<compile_context>
chip_gen: v6e
topology: v6e:2x2x1
jax: 0.10.0
libtpu: 0.0.40
codegen_flags: <defaults>
</compile_context>

<pallas_src>
import functools

import jax
import jax.numpy as jnp
from jax.experimental import pallas as pl
from jax.experimental.pallas import tpu as pltpu

_BN_EPS = 1e-5


# ----------------------------------------------------------------------------
# In-kernel math helpers
# ----------------------------------------------------------------------------
def _elu(x):
    # nn.ELU(alpha=1).  exp() rides the EUP slot; the clamp keeps the
    # discarded positive branch finite.  (PyTorch uses expm1; the difference
    # is a few f32 ulps for tiny negative x.)
    return jnp.where(x > 0, x, jnp.exp(jnp.minimum(x, 0.0)) - 1.0)


def _sigmoid(x):
    # Exact sigmoid; only used on the final [1, N] output so cost is nil.
    return 1.0 / (1.0 + jnp.exp(-x))


# ----------------------------------------------------------------------------
# Pallas kernels
# ----------------------------------------------------------------------------
def _gemm_act_kernel(w_ref, p_ref, o_ref, *, act):
    # [Cout, K] @ [K, TM] -> [Cout, TM] on the MXU, f32 accumulation.
    y = jnp.dot(w_ref[...], p_ref[...], preferred_element_type=jnp.float32)
    if act == "elu":
        y = _elu(y)
    elif act == "sigmoid":
        y = _sigmoid(y)
    o_ref[...] = y.astype(o_ref.dtype)


def _gemm_stats_kernel(w_ref, p_ref, y_ref, s_ref, q_ref):
    # GEMM + per-channel partial statistics for training-mode BatchNorm.
    y = jnp.dot(w_ref[...], p_ref[...], preferred_element_type=jnp.float32)
    y_ref[...] = y
    s_ref[...] = jnp.sum(y, axis=1, keepdims=True)[None]        # (1, Cout, 1)
    q_ref[...] = jnp.sum(y * y, axis=1, keepdims=True)[None]    # (1, Cout, 1)


def _bn_elu_kernel(y_ref, scale_ref, shift_ref, o_ref):
    # Fused (folded) BatchNorm affine + ELU, lane-dense over M.
    x = y_ref[...] * scale_ref[...] + shift_ref[...]
    o_ref[...] = _elu(x).astype(o_ref.dtype)


# ----------------------------------------------------------------------------
# pallas_call wrappers
# ----------------------------------------------------------------------------
def _choose_tm(m, cap):
    """Largest multiple of 128 <= cap that divides m, else m (single block)."""
    if m <= cap:
        return m
    tm = cap - (cap % 128)
    while tm >= 128:
        if m % tm == 0:
            return tm
        tm -= 128
    return m


def _conv_act(patches, w2d, act, out_dtype):
    K, M = patches.shape
    Cout = w2d.shape[0]
    tm = _choose_tm(M, 512)
    grid = (M // tm,)
    kern = functools.partial(_gemm_act_kernel, act=act)
    return pl.pallas_call(
        kern,
        out_shape=jax.ShapeDtypeStruct((Cout, M), out_dtype),
        grid=grid,
        in_specs=[
            pl.BlockSpec((Cout, K), lambda i: (0, 0)),   # weight resident
            pl.BlockSpec((K, tm), lambda i: (0, i)),     # patch tile
        ],
        out_specs=pl.BlockSpec((Cout, tm), lambda i: (0, i)),
        compiler_params=pltpu.CompilerParams(dimension_semantics=("parallel",)),
        cost_estimate=pl.CostEstimate(
            flops=2 * M * K * Cout,
            transcendentals=M * Cout,
            bytes_accessed=patches.size * 2 + w2d.size * 2
            + M * Cout * jnp.dtype(out_dtype).itemsize,
        ),
    )(w2d, patches)


def _conv_stats(patches, w2d):
    K, M = patches.shape
    Cout = w2d.shape[0]
    tm = _choose_tm(M, 256)
    g = M // tm
    return pl.pallas_call(
        _gemm_stats_kernel,
        out_shape=(
            jax.ShapeDtypeStruct((Cout, M), jnp.float32),
            jax.ShapeDtypeStruct((g, Cout, 1), jnp.float32),
            jax.ShapeDtypeStruct((g, Cout, 1), jnp.float32),
        ),
        grid=(g,),
        in_specs=[
            pl.BlockSpec((Cout, K), lambda i: (0, 0)),
            pl.BlockSpec((K, tm), lambda i: (0, i)),
        ],
        out_specs=(
            pl.BlockSpec((Cout, tm), lambda i: (0, i)),
            pl.BlockSpec((1, Cout, 1), lambda i: (i, 0, 0)),
            pl.BlockSpec((1, Cout, 1), lambda i: (i, 0, 0)),
        ),
        compiler_params=pltpu.CompilerParams(dimension_semantics=("parallel",)),
        cost_estimate=pl.CostEstimate(
            flops=2 * M * K * Cout,
            transcendentals=0,
            bytes_accessed=patches.size * 2 + w2d.size * 2 + M * Cout * 4,
        ),
    )(w2d, patches)


def _bn_elu(y, scale, shift, out_dtype):
    Cout, M = y.shape
    tm = _choose_tm(M, 512)
    g = M // tm
    return pl.pallas_call(
        _bn_elu_kernel,
        out_shape=jax.ShapeDtypeStruct((Cout, M), out_dtype),
        grid=(g,),
        in_specs=[
            pl.BlockSpec((Cout, tm), lambda i: (0, i)),
            pl.BlockSpec((Cout, 1), lambda i: (0, 0)),
            pl.BlockSpec((Cout, 1), lambda i: (0, 0)),
        ],
        out_specs=pl.BlockSpec((Cout, tm), lambda i: (0, i)),
        compiler_params=pltpu.CompilerParams(dimension_semantics=("parallel",)),
    )(y, scale, shift)


# ----------------------------------------------------------------------------
# Glue: channels-first im2col + layer stacking (no transposes between layers)
# ----------------------------------------------------------------------------
def _im2col_cf(x_cnhw, kh, kw, stride, pad):
    """x [C, N, H, W] -> patches [K = kh*kw*C, M = N*OH*OW] (bf16)."""
    if pad:
        x_cnhw = jnp.pad(x_cnhw, ((0, 0), (0, 0), (pad, pad), (pad, pad)))
    C, N, H, W = x_cnhw.shape
    OH = (H - kh) // stride + 1
    OW = (W - kw) // stride + 1
    cols = []
    for i in range(kh):
        for j in range(kw):
            cols.append(
                x_cnhw[:, :, i:i + stride * OH:stride, j:j + stride * OW:stride]
            )
    p = jnp.stack(cols, axis=0)                      # [kh*kw, C, N, OH, OW]
    return p.reshape(kh * kw * C, N * OH * OW), (N, OH, OW)


def _conv_block(x_cf, w_oihw, gamma, beta, *, stride, pad, use_bn, act, out_dtype):
    Cout, Cin, KH, KW = w_oihw.shape
    patches, (N, OH, OW) = _im2col_cf(
        x_cf.astype(jnp.bfloat16), KH, KW, stride, pad)
    # [Cout, Cin, KH, KW] -> [Cout, KH*KW*Cin] matching the patch K ordering.
    w2d = jnp.transpose(w_oihw, (0, 2, 3, 1)).reshape(Cout, KH * KW * Cin)
    w2d = w2d.astype(jnp.bfloat16)
    M = N * OH * OW

    if not use_bn:
        out = _conv_act(patches, w2d, act, out_dtype)
    else:
        y, ps, pq = _conv_stats(patches, w2d)
        # Tiny per-channel reduction + fold of gamma/beta into scale/shift.
        s = jnp.sum(ps, axis=0)                      # (Cout, 1)
        q = jnp.sum(pq, axis=0)                      # (Cout, 1)
        mean = s / M
        var = jnp.maximum(q / M - mean * mean, 0.0)  # biased var (training BN)
        scale = gamma.reshape(Cout, 1) * jax.lax.rsqrt(var + _BN_EPS)
        shift = beta.reshape(Cout, 1) - mean * scale
        out = _bn_elu(y, scale, shift, out_dtype)

    return out.reshape(Cout, N, OH, OW)


def init_params(key, features, channels):
    f = features
    layer_io = [(f, channels), (2 * f, f), (4 * f, 2 * f), (8 * f, 4 * f), (1, 8 * f)]
    params = []
    for co, ci in layer_io:
        key, sub = jax.random.split(key)
        w = jax.random.normal(sub, (co, ci, 4, 4), jnp.float32) * 0.05
        gamma = jnp.ones((co,), jnp.float32)   # nn.BatchNorm2d weight init
        beta = jnp.zeros((co,), jnp.float32)   # nn.BatchNorm2d bias init
        params.append((w, gamma, beta))
    return params


def discriminator_forward(x_nchw, params):
    # NCHW -> channels-first [C, N, H, W]; activations stay channels-first so
    # every Pallas GEMM is lane-dense (M on the 128-lane axis).
    x = jnp.transpose(x_nchw, (1, 0, 2, 3)).astype(jnp.float32)
    cfg = [
        dict(stride=2, pad=1, use_bn=False, act="elu",     out_dtype=jnp.bfloat16),
        dict(stride=2, pad=1, use_bn=True,  act="elu",     out_dtype=jnp.bfloat16),
        dict(stride=2, pad=1, use_bn=True,  act="elu",     out_dtype=jnp.bfloat16),
        dict(stride=2, pad=1, use_bn=True,  act="elu",     out_dtype=jnp.bfloat16),
        dict(stride=1, pad=0, use_bn=False, act="sigmoid", out_dtype=jnp.float32),
    ]
    for (w, g, b), c in zip(params, cfg):
        x = _conv_block(x, w, g, b, **c)
    # [1, N, 1, 1] -> [N, 1, 1, 1]
    return jnp.transpose(x, (1, 0, 2, 3))


if __name__ == "__main__":
    channels = 1
    features = 32    # matches the reference module's `features`
    batch = 2
    spatial = 64     # DCGAN geometry: 64 -> 32 -> 16 -> 8 -> 4 -> 1

    key = jax.random.PRNGKey(0)
    kx, kp = jax.random.split(key)
    x = jax.random.normal(kx, (batch, channels, spatial, spatial), jnp.float32)
    params = init_params(kp, features, channels)

    out = jax.jit(discriminator_forward)(x, params)
    out = jax.block_until_ready(out)

    assert out.shape == (batch, 1, 1, 1), out.shape
    assert bool(jnp.all((out >= 0.0) & (out <= 1.0)))  # sigmoid range
    print("KERNEL_OK")
</pallas_src>

<mosaic_0001>
module attributes {stable_mosaic.version = 11 : i64} {
  func.func @_gemm_act_kernel(%arg0: i32, %arg1: memref<32x16xbf16, #tpu.memory_space<vmem>>, %arg2: memref<16x512xbf16, #tpu.memory_space<vmem>>, %arg3: memref<32x512xbf16, #tpu.memory_space<vmem>>) attributes {dimension_semantics = [#tpu.dimension_semantics<parallel>], iteration_bounds = array<i64: 4>, scalar_prefetch = 0 : i64, scratch_operands = 0 : i64, tpu.core_type = #tpu.core_type<tc>, window_params = [{pipeline_mode = #tpu.pipeline_mode<synchronous>, transform_indices = @transform_0, window_bounds = array<i64: 32, 16>}, {transform_indices = @transform_1, window_bounds = array<i64: 16, 512>}, {transform_indices = @transform_2, window_bounds = array<i64: 32, 512>}]} {
    %c0 = arith.constant 0 : index
    %c0_0 = arith.constant 0 : index
    %0 = vector.load %arg1[%c0, %c0_0] : memref<32x16xbf16, #tpu.memory_space<vmem>>, vector<32x16xbf16>
    %c0_1 = arith.constant 0 : index
    %c0_2 = arith.constant 0 : index
    %1 = vector.load %arg2[%c0_1, %c0_2] : memref<16x512xbf16, #tpu.memory_space<vmem>>, vector<16x512xbf16>
    %cst = arith.constant dense<0.000000e+00> : vector<32x512xf32>
    %2 = tpu.matmul %0, %1, %cst {dimension_numbers = #tpu.dot_dimension_numbers<[1], [0], [0], [1], [0, 0, 1, 1], [], []>} : vector<32x16xbf16>, vector<16x512xbf16>, vector<32x512xf32> -> vector<32x512xf32>
    %cst_3 = arith.constant 0.000000e+00 : f32
    %3 = vector.broadcast %cst_3 : f32 to vector<32x512xf32>
    %4 = arith.cmpf ogt, %2, %3 : vector<32x512xf32>
    %cst_4 = arith.constant 0.000000e+00 : f32
    %5 = vector.broadcast %cst_4 : f32 to vector<32x512xf32>
    %6 = arith.minimumf %2, %5 : vector<32x512xf32>
    %7 = math.exp %6 : vector<32x512xf32>
    %cst_5 = arith.constant 1.000000e+00 : f32
    %8 = vector.broadcast %cst_5 : f32 to vector<32x512xf32>
    %9 = arith.subf %7, %8 : vector<32x512xf32>
    %10 = arith.select %4, %2, %9 : vector<32x512xi1>, vector<32x512xf32>
    %11 = arith.truncf %10 : vector<32x512xf32> to vector<32x512xbf16>
    %c0_6 = arith.constant 0 : index
    %c0_7 = arith.constant 0 : index
    %12 = vector.load %arg3[%c0_6, %c0_7] : memref<32x512xbf16, #tpu.memory_space<vmem>>, vector<32x512xbf16>
    tpu.vector_store %arg3[%c0_6, %c0_7], %11 {strides = array<i32>} : memref<32x512xbf16, #tpu.memory_space<vmem>>, vector<32x512xbf16>,
    return
  }
  func.func @transform_0(%arg0: i32) -> (i32, i32) {
    %c0_i32 = arith.constant 0 : i32
    %c0_i32_0 = arith.constant 0 : i32
    %c0_i32_1 = arith.constant 0 : i32
    return %c0_i32, %c0_i32_0 : i32, i32
  }
  func.func @transform_1(%arg0: i32) -> (i32, i32) {
    %c0_i32 = arith.constant 0 : i32
    %c0_i32_0 = arith.constant 0 : i32
    return %c0_i32, %arg0 : i32, i32
  }
  func.func @transform_2(%arg0: i32) -> (i32, i32) {
    %c0_i32 = arith.constant 0 : i32
    %c0_i32_0 = arith.constant 0 : i32
    return %c0_i32, %arg0 : i32, i32
  }
}

module attributes {stable_mosaic.version = 11 : i64} {
  func.func @_gemm_stats_kernel(%arg0: i32, %arg1: memref<64x512xbf16, #tpu.memory_space<vmem>>, %arg2: memref<512x256xbf16, #tpu.memory_space<vmem>>, %arg3: memref<64x256xf32, #tpu.memory_space<vmem>>, %arg4: memref<1x64x1xf32, #tpu.memory_space<vmem>>, %arg5: memref<1x64x1xf32, #tpu.memory_space<vmem>>) attributes {dimension_semantics = [#tpu.dimension_semantics<parallel>], iteration_bounds = array<i64: 2>, scalar_prefetch = 0 : i64, scratch_operands = 0 : i64, tpu.core_type = #tpu.core_type<tc>, window_params = [{pipeline_mode = #tpu.pipeline_mode<synchronous>, transform_indices = @transform_0, window_bounds = array<i64: 64, 512>}, {transform_indices = @transform_1, window_bounds = array<i64: 512, 256>}, {transform_indices = @transform_2, window_bounds = array<i64: 64, 256>}, {transform_indices = @transform_3, window_bounds = array<i64: 1, 64, 1>}, {transform_indices = @transform_4, window_bounds = array<i64: 1, 64, 1>}]} {
    %c0 = arith.constant 0 : index
    %c0_0 = arith.constant 0 : index
    %0 = vector.load %arg1[%c0, %c0_0] : memref<64x512xbf16, #tpu.memory_space<vmem>>, vector<64x512xbf16>
    %c0_1 = arith.constant 0 : index
    %c0_2 = arith.constant 0 : index
    %1 = vector.load %arg2[%c0_1, %c0_2] : memref<512x256xbf16, #tpu.memory_space<vmem>>, vector<512x256xbf16>
    %cst = arith.constant dense<0.000000e+00> : vector<64x256xf32>
    %2 = tpu.matmul %0, %1, %cst {dimension_numbers = #tpu.dot_dimension_numbers<[1], [0], [0], [1], [0, 0, 1, 1], [], []>} : vector<64x512xbf16>, vector<512x256xbf16>, vector<64x256xf32> -> vector<64x256xf32>
    %c0_3 = arith.constant 0 : index
    %c0_4 = arith.constant 0 : index
    %3 = vector.load %arg3[%c0_3, %c0_4] : memref<64x256xf32, #tpu.memory_space<vmem>>, vector<64x256xf32>
    tpu.vector_store %arg3[%c0_3, %c0_4], %2 {strides = array<i32>} : memref<64x256xf32, #tpu.memory_space<vmem>>, vector<64x256xf32>,
    %cst_5 = arith.constant dense<0.000000e+00> : vector<64xf32>
    %4 = vector.multi_reduction <add>, %2, %cst_5 [1] : vector<64x256xf32> to vector<64xf32>
    %5 = vector.shape_cast %4 : vector<64xf32> to vector<64x1xf32>
    %6 = vector.shape_cast %5 : vector<64x1xf32> to vector<1x64x1xf32>
    %c0_6 = arith.constant 0 : index
    %c0_7 = arith.constant 0 : index
    %c0_8 = arith.constant 0 : index
    %7 = vector.load %arg4[%c0_6, %c0_7, %c0_8] : memref<1x64x1xf32, #tpu.memory_space<vmem>>, vector<1x64x1xf32>
    tpu.vector_store %arg4[%c0_6, %c0_7, %c0_8], %6 {strides = array<i32>} : memref<1x64x1xf32, #tpu.memory_space<vmem>>, vector<1x64x1xf32>,
    %8 = arith.mulf %2, %2 : vector<64x256xf32>
    %cst_9 = arith.constant dense<0.000000e+00> : vector<64xf32>
    %9 = vector.multi_reduction <add>, %8, %cst_9 [1] : vector<64x256xf32> to vector<64xf32>
    %10 = vector.shape_cast %9 : vector<64xf32> to vector<64x1xf32>
    %11 = vector.shape_cast %10 : vector<64x1xf32> to vector<1x64x1xf32>
    %c0_10 = arith.constant 0 : index
    %c0_11 = arith.constant 0 : index
    %c0_12 = arith.constant 0 : index
    %12 = vector.load %arg5[%c0_10, %c0_11, %c0_12] : memref<1x64x1xf32, #tpu.memory_space<vmem>>, vector<1x64x1xf32>
    tpu.vector_store %arg5[%c0_10, %c0_11, %c0_12], %11 {strides = array<i32>} : memref<1x64x1xf32, #tpu.memory_space<vmem>>, vector<1x64x1xf32>,
    return
  }
  func.func @transform_0(%arg0: i32) -> (i32, i32) {
    %c0_i32 = arith.constant 0 : i32
    %c0_i32_0 = arith.constant 0 : i32
    %c0_i32_1 = arith.constant 0 : i32
    return %c0_i32, %c0_i32_0 : i32, i32
  }
  func.func @transform_1(%arg0: i32) -> (i32, i32) {
    %c0_i32 = arith.constant 0 : i32
    %c0_i32_0 = arith.constant 0 : i32
    return %c0_i32, %arg0 : i32, i32
  }
  func.func @transform_2(%arg0: i32) -> (i32, i32) {
    %c0_i32 = arith.constant 0 : i32
    %c0_i32_0 = arith.constant 0 : i32
    return %c0_i32, %arg0 : i32, i32
  }
  func.func @transform_3(%arg0: i32) -> (i32, i32, i32) {
    %c0_i32 = arith.constant 0 : i32
    %c0_i32_0 = arith.constant 0 : i32
    %c0_i32_1 = arith.constant 0 : i32
    return %arg0, %c0_i32, %c0_i32_0 : i32, i32, i32
  }
  func.func @transform_4(%arg0: i32) -> (i32, i32, i32) {
    %c0_i32 = arith.constant 0 : i32
    %c0_i32_0 = arith.constant 0 : i32
    %c0_i32_1 = arith.constant 0 : i32
    return %arg0, %c0_i32, %c0_i32_0 : i32, i32, i32
  }
}

module attributes {stable_mosaic.version = 11 : i64} {
  func.func @_bn_elu_kernel(%arg0: i32, %arg1: memref<64x512xf32, #tpu.memory_space<vmem>>, %arg2: memref<64x1xf32, #tpu.memory_space<vmem>>, %arg3: memref<64x1xf32, #tpu.memory_space<vmem>>, %arg4: memref<64x512xbf16, #tpu.memory_space<vmem>>) attributes {dimension_semantics = [#tpu.dimension_semantics<parallel>], iteration_bounds = array<i64: 1>, scalar_prefetch = 0 : i64, scratch_operands = 0 : i64, tpu.core_type = #tpu.core_type<tc>, window_params = [{transform_indices = @transform_0, window_bounds = array<i64: 64, 512>}, {pipeline_mode = #tpu.pipeline_mode<synchronous>, transform_indices = @transform_1, window_bounds = array<i64: 64, 1>}, {pipeline_mode = #tpu.pipeline_mode<synchronous>, transform_indices = @transform_2, window_bounds = array<i64: 64, 1>}, {transform_indices = @transform_3, window_bounds = array<i64: 64, 512>}]} {
    %c0 = arith.constant 0 : index
    %c0_0 = arith.constant 0 : index
    %0 = vector.load %arg1[%c0, %c0_0] : memref<64x512xf32, #tpu.memory_space<vmem>>, vector<64x512xf32>
    %c0_1 = arith.constant 0 : index
    %c0_2 = arith.constant 0 : index
    %1 = vector.load %arg2[%c0_1, %c0_2] : memref<64x1xf32, #tpu.memory_space<vmem>>, vector<64x1xf32>
    %2 = vector.broadcast %1 : vector<64x1xf32> to vector<64x512xf32>
    %3 = arith.mulf %0, %2 : vector<64x512xf32>
    %c0_3 = arith.constant 0 : index
    %c0_4 = arith.constant 0 : index
    %4 = vector.load %arg3[%c0_3, %c0_4] : memref<64x1xf32, #tpu.memory_space<vmem>>, vector<64x1xf32>
    %5 = vector.broadcast %4 : vector<64x1xf32> to vector<64x512xf32>
    %6 = arith.addf %3, %5 : vector<64x512xf32>
    %cst = arith.constant 0.000000e+00 : f32
    %7 = vector.broadcast %cst : f32 to vector<64x512xf32>
    %8 = arith.cmpf ogt, %6, %7 : vector<64x512xf32>
    %cst_5 = arith.constant 0.000000e+00 : f32
    %9 = vector.broadcast %cst_5 : f32 to vector<64x512xf32>
    %10 = arith.minimumf %6, %9 : vector<64x512xf32>
    %11 = math.exp %10 : vector<64x512xf32>
    %cst_6 = arith.constant 1.000000e+00 : f32
    %12 = vector.broadcast %cst_6 : f32 to vector<64x512xf32>
    %13 = arith.subf %11, %12 : vector<64x512xf32>
    %14 = arith.select %8, %6, %13 : vector<64x512xi1>, vector<64x512xf32>
    %15 = arith.truncf %14 : vector<64x512xf32> to vector<64x512xbf16>
    %c0_7 = arith.constant 0 : index
    %c0_8 = arith.constant 0 : index
    %16 = vector.load %arg4[%c0_7, %c0_8] : memref<64x512xbf16, #tpu.memory_space<vmem>>, vector<64x512xbf16>
    tpu.vector_store %arg4[%c0_7, %c0_8], %15 {strides = array<i32>} : memref<64x512xbf16, #tpu.memory_space<vmem>>, vector<64x512xbf16>,
    return
  }
  func.func @transform_0(%arg0: i32) -> (i32, i32) {
    %c0_i32 = arith.constant 0 : i32
    %c0_i32_0 = arith.constant 0 : i32
    return %c0_i32, %arg0 : i32, i32
  }
  func.func @transform_1(%arg0: i32) -> (i32, i32) {
    %c0_i32 = arith.constant 0 : i32
    %c0_i32_0 = arith.constant 0 : i32
    %c0_i32_1 = arith.constant 0 : i32
    return %c0_i32, %c0_i32_0 : i32, i32
  }
  func.func @transform_2(%arg0: i32) -> (i32, i32) {
    %c0_i32 = arith.constant 0 : i32
    %c0_i32_0 = arith.constant 0 : i32
    %c0_i32_1 = arith.constant 0 : i32
    return %c0_i32, %c0_i32_0 : i32, i32
  }
  func.func @transform_3(%arg0: i32) -> (i32, i32) {
    %c0_i32 = arith.constant 0 : i32
    %c0_i32_0 = arith.constant 0 : i32
    return %c0_i32, %arg0 : i32, i32
  }
}

module attributes {stable_mosaic.version = 11 : i64} {
  func.func @_gemm_stats_kernel(%arg0: i32, %arg1: memref<128x1024xbf16, #tpu.memory_space<vmem>>, %arg2: memref<1024x128xbf16, #tpu.memory_space<vmem>>, %arg3: memref<128x128xf32, #tpu.memory_space<vmem>>, %arg4: memref<1x128x1xf32, #tpu.memory_space<vmem>>, %arg5: memref<1x128x1xf32, #tpu.memory_space<vmem>>) attributes {dimension_semantics = [#tpu.dimension_semantics<parallel>], iteration_bounds = array<i64: 1>, scalar_prefetch = 0 : i64, scratch_operands = 0 : i64, tpu.core_type = #tpu.core_type<tc>, window_params = [{pipeline_mode = #tpu.pipeline_mode<synchronous>, transform_indices = @transform_0, window_bounds = array<i64: 128, 1024>}, {transform_indices = @transform_1, window_bounds = array<i64: 1024, 128>}, {transform_indices = @transform_2, window_bounds = array<i64: 128, 128>}, {transform_indices = @transform_3, window_bounds = array<i64: 1, 128, 1>}, {transform_indices = @transform_4, window_bounds = array<i64: 1, 128, 1>}]} {
    %c0 = arith.constant 0 : index
    %c0_0 = arith.constant 0 : index
    %0 = vector.load %arg1[%c0, %c0_0] : memref<128x1024xbf16, #tpu.memory_space<vmem>>, vector<128x1024xbf16>
    %c0_1 = arith.constant 0 : index
    %c0_2 = arith.constant 0 : index
    %1 = vector.load %arg2[%c0_1, %c0_2] : memref<1024x128xbf16, #tpu.memory_space<vmem>>, vector<1024x128xbf16>
    %cst = arith.constant dense<0.000000e+00> : vector<128x128xf32>
    %2 = tpu.matmul %0, %1, %cst {dimension_numbers = #tpu.dot_dimension_numbers<[1], [0], [0], [1], [0, 0, 1, 1], [], []>} : vector<128x1024xbf16>, vector<1024x128xbf16>, vector<128x128xf32> -> vector<128x128xf32>
    %c0_3 = arith.constant 0 : index
    %c0_4 = arith.constant 0 : index
    %3 = vector.load %arg3[%c0_3, %c0_4] : memref<128x128xf32, #tpu.memory_space<vmem>>, vector<128x128xf32>
    tpu.vector_store %arg3[%c0_3, %c0_4], %2 {strides = array<i32>} : memref<128x128xf32, #tpu.memory_space<vmem>>, vector<128x128xf32>,
    %cst_5 = arith.constant dense<0.000000e+00> : vector<128xf32>
    %4 = vector.multi_reduction <add>, %2, %cst_5 [1] : vector<128x128xf32> to vector<128xf32>
    %5 = vector.shape_cast %4 : vector<128xf32> to vector<128x1xf32>
    %6 = vector.shape_cast %5 : vector<128x1xf32> to vector<1x128x1xf32>
    %c0_6 = arith.constant 0 : index
    %c0_7 = arith.constant 0 : index
    %c0_8 = arith.constant 0 : index
    %7 = vector.load %arg4[%c0_6, %c0_7, %c0_8] : memref<1x128x1xf32, #tpu.memory_space<vmem>>, vector<1x128x1xf32>
    tpu.vector_store %arg4[%c0_6, %c0_7, %c0_8], %6 {strides = array<i32>} : memref<1x128x1xf32, #tpu.memory_space<vmem>>, vector<1x128x1xf32>,
    %8 = arith.mulf %2, %2 : vector<128x128xf32>
    %cst_9 = arith.constant dense<0.000000e+00> : vector<128xf32>
    %9 = vector.multi_reduction <add>, %8, %cst_9 [1] : vector<128x128xf32> to vector<128xf32>
    %10 = vector.shape_cast %9 : vector<128xf32> to vector<128x1xf32>
    %11 = vector.shape_cast %10 : vector<128x1xf32> to vector<1x128x1xf32>
    %c0_10 = arith.constant 0 : index
    %c0_11 = arith.constant 0 : index
    %c0_12 = arith.constant 0 : index
    %12 = vector.load %arg5[%c0_10, %c0_11, %c0_12] : memref<1x128x1xf32, #tpu.memory_space<vmem>>, vector<1x128x1xf32>
    tpu.vector_store %arg5[%c0_10, %c0_11, %c0_12], %11 {strides = array<i32>} : memref<1x128x1xf32, #tpu.memory_space<vmem>>, vector<1x128x1xf32>,
    return
  }
  func.func @transform_0(%arg0: i32) -> (i32, i32) {
    %c0_i32 = arith.constant 0 : i32
    %c0_i32_0 = arith.constant 0 : i32
    %c0_i32_1 = arith.constant 0 : i32
    return %c0_i32, %c0_i32_0 : i32, i32
  }
  func.func @transform_1(%arg0: i32) -> (i32, i32) {
    %c0_i32 = arith.constant 0 : i32
    %c0_i32_0 = arith.constant 0 : i32
    return %c0_i32, %arg0 : i32, i32
  }
  func.func @transform_2(%arg0: i32) -> (i32, i32) {
    %c0_i32 = arith.constant 0 : i32
    %c0_i32_0 = arith.constant 0 : i32
    return %c0_i32, %arg0 : i32, i32
  }
  func.func @transform_3(%arg0: i32) -> (i32, i32, i32) {
    %c0_i32 = arith.constant 0 : i32
    %c0_i32_0 = arith.constant 0 : i32
    %c0_i32_1 = arith.constant 0 : i32
    return %arg0, %c0_i32, %c0_i32_0 : i32, i32, i32
  }
  func.func @transform_4(%arg0: i32) -> (i32, i32, i32) {
    %c0_i32 = arith.constant 0 : i32
    %c0_i32_0 = arith.constant 0 : i32
    %c0_i32_1 = arith.constant 0 : i32
    return %arg0, %c0_i32, %c0_i32_0 : i32, i32, i32
  }
}

module attributes {stable_mosaic.version = 11 : i64} {
  func.func @_bn_elu_kernel(%arg0: i32, %arg1: memref<128x128xf32, #tpu.memory_space<vmem>>, %arg2: memref<128x1xf32, #tpu.memory_space<vmem>>, %arg3: memref<128x1xf32, #tpu.memory_space<vmem>>, %arg4: memref<128x128xbf16, #tpu.memory_space<vmem>>) attributes {dimension_semantics = [#tpu.dimension_semantics<parallel>], iteration_bounds = array<i64: 1>, scalar_prefetch = 0 : i64, scratch_operands = 0 : i64, tpu.core_type = #tpu.core_type<tc>, window_params = [{transform_indices = @transform_0, window_bounds = array<i64: 128, 128>}, {pipeline_mode = #tpu.pipeline_mode<synchronous>, transform_indices = @transform_1, window_bounds = array<i64: 128, 1>}, {pipeline_mode = #tpu.pipeline_mode<synchronous>, transform_indices = @transform_2, window_bounds = array<i64: 128, 1>}, {transform_indices = @transform_3, window_bounds = array<i64: 128, 128>}]} {
    %c0 = arith.constant 0 : index
    %c0_0 = arith.constant 0 : index
    %0 = vector.load %arg1[%c0, %c0_0] : memref<128x128xf32, #tpu.memory_space<vmem>>, vector<128x128xf32>
    %c0_1 = arith.constant 0 : index
    %c0_2 = arith.constant 0 : index
    %1 = vector.load %arg2[%c0_1, %c0_2] : memref<128x1xf32, #tpu.memory_space<vmem>>, vector<128x1xf32>
    %2 = vector.broadcast %1 : vector<128x1xf32> to vector<128x128xf32>
    %3 = arith.mulf %0, %2 : vector<128x128xf32>
    %c0_3 = arith.constant 0 : index
    %c0_4 = arith.constant 0 : index
    %4 = vector.load %arg3[%c0_3, %c0_4] : memref<128x1xf32, #tpu.memory_space<vmem>>, vector<128x1xf32>
    %5 = vector.broadcast %4 : vector<128x1xf32> to vector<128x128xf32>
    %6 = arith.addf %3, %5 : vector<128x128xf32>
    %cst = arith.constant 0.000000e+00 : f32
    %7 = vector.broadcast %cst : f32 to vector<128x128xf32>
    %8 = arith.cmpf ogt, %6, %7 : vector<128x128xf32>
    %cst_5 = arith.constant 0.000000e+00 : f32
    %9 = vector.broadcast %cst_5 : f32 to vector<128x128xf32>
    %10 = arith.minimumf %6, %9 : vector<128x128xf32>
    %11 = math.exp %10 : vector<128x128xf32>
    %cst_6 = arith.constant 1.000000e+00 : f32
    %12 = vector.broadcast %cst_6 : f32 to vector<128x128xf32>
    %13 = arith.subf %11, %12 : vector<128x128xf32>
    %14 = arith.select %8, %6, %13 : vector<128x128xi1>, vector<128x128xf32>
    %15 = arith.truncf %14 : vector<128x128xf32> to vector<128x128xbf16>
    %c0_7 = arith.constant 0 : index
    %c0_8 = arith.constant 0 : index
    %16 = vector.load %arg4[%c0_7, %c0_8] : memref<128x128xbf16, #tpu.memory_space<vmem>>, vector<128x128xbf16>
    tpu.vector_store %arg4[%c0_7, %c0_8], %15 {strides = array<i32>} : memref<128x128xbf16, #tpu.memory_space<vmem>>, vector<128x128xbf16>,
    return
  }
  func.func @transform_0(%arg0: i32) -> (i32, i32) {
    %c0_i32 = arith.constant 0 : i32
    %c0_i32_0 = arith.constant 0 : i32
    return %c0_i32, %arg0 : i32, i32
  }
  func.func @transform_1(%arg0: i32) -> (i32, i32) {
    %c0_i32 = arith.constant 0 : i32
    %c0_i32_0 = arith.constant 0 : i32
    %c0_i32_1 = arith.constant 0 : i32
    return %c0_i32, %c0_i32_0 : i32, i32
  }
  func.func @transform_2(%arg0: i32) -> (i32, i32) {
    %c0_i32 = arith.constant 0 : i32
    %c0_i32_0 = arith.constant 0 : i32
    %c0_i32_1 = arith.constant 0 : i32
    return %c0_i32, %c0_i32_0 : i32, i32
  }
  func.func @transform_3(%arg0: i32) -> (i32, i32) {
    %c0_i32 = arith.constant 0 : i32
    %c0_i32_0 = arith.constant 0 : i32
    return %c0_i32, %arg0 : i32, i32
  }
}

module attributes {stable_mosaic.version = 11 : i64} {
  func.func @_gemm_stats_kernel(%arg0: i32, %arg1: memref<256x2048xbf16, #tpu.memory_space<vmem>>, %arg2: memref<2048x32xbf16, #tpu.memory_space<vmem>>, %arg3: memref<256x32xf32, #tpu.memory_space<vmem>>, %arg4: memref<1x256x1xf32, #tpu.memory_space<vmem>>, %arg5: memref<1x256x1xf32, #tpu.memory_space<vmem>>) attributes {dimension_semantics = [#tpu.dimension_semantics<parallel>], iteration_bounds = array<i64: 1>, scalar_prefetch = 0 : i64, scratch_operands = 0 : i64, tpu.core_type = #tpu.core_type<tc>, window_params = [{pipeline_mode = #tpu.pipeline_mode<synchronous>, transform_indices = @transform_0, window_bounds = array<i64: 256, 2048>}, {transform_indices = @transform_1, window_bounds = array<i64: 2048, 32>}, {transform_indices = @transform_2, window_bounds = array<i64: 256, 32>}, {transform_indices = @transform_3, window_bounds = array<i64: 1, 256, 1>}, {transform_indices = @transform_4, window_bounds = array<i64: 1, 256, 1>}]} {
    %c0 = arith.constant 0 : index
    %c0_0 = arith.constant 0 : index
    %0 = vector.load %arg1[%c0, %c0_0] : memref<256x2048xbf16, #tpu.memory_space<vmem>>, vector<256x2048xbf16>
    %c0_1 = arith.constant 0 : index
    %c0_2 = arith.constant 0 : index
    %1 = vector.load %arg2[%c0_1, %c0_2] : memref<2048x32xbf16, #tpu.memory_space<vmem>>, vector<2048x32xbf16>
    %cst = arith.constant dense<0.000000e+00> : vector<256x32xf32>
    %2 = tpu.matmul %0, %1, %cst {dimension_numbers = #tpu.dot_dimension_numbers<[1], [0], [0], [1], [0, 0, 1, 1], [], []>} : vector<256x2048xbf16>, vector<2048x32xbf16>, vector<256x32xf32> -> vector<256x32xf32>
    %c0_3 = arith.constant 0 : index
    %c0_4 = arith.constant 0 : index
    %3 = vector.load %arg3[%c0_3, %c0_4] : memref<256x32xf32, #tpu.memory_space<vmem>>, vector<256x32xf32>
    tpu.vector_store %arg3[%c0_3, %c0_4], %2 {strides = array<i32>} : memref<256x32xf32, #tpu.memory_space<vmem>>, vector<256x32xf32>,
    %cst_5 = arith.constant dense<0.000000e+00> : vector<256xf32>
    %4 = vector.multi_reduction <add>, %2, %cst_5 [1] : vector<256x32xf32> to vector<256xf32>
    %5 = vector.shape_cast %4 : vector<256xf32> to vector<256x1xf32>
    %6 = vector.shape_cast %5 : vector<256x1xf32> to vector<1x256x1xf32>
    %c0_6 = arith.constant 0 : index
    %c0_7 = arith.constant 0 : index
    %c0_8 = arith.constant 0 : index
    %7 = vector.load %arg4[%c0_6, %c0_7, %c0_8] : memref<1x256x1xf32, #tpu.memory_space<vmem>>, vector<1x256x1xf32>
    tpu.vector_store %arg4[%c0_6, %c0_7, %c0_8], %6 {strides = array<i32>} : memref<1x256x1xf32, #tpu.memory_space<vmem>>, vector<1x256x1xf32>,
    %8 = arith.mulf %2, %2 : vector<256x32xf32>
    %cst_9 = arith.constant dense<0.000000e+00> : vector<256xf32>
    %9 = vector.multi_reduction <add>, %8, %cst_9 [1] : vector<256x32xf32> to vector<256xf32>
    %10 = vector.shape_cast %9 : vector<256xf32> to vector<256x1xf32>
    %11 = vector.shape_cast %10 : vector<256x1xf32> to vector<1x256x1xf32>
    %c0_10 = arith.constant 0 : index
    %c0_11 = arith.constant 0 : index
    %c0_12 = arith.constant 0 : index
    %12 = vector.load %arg5[%c0_10, %c0_11, %c0_12] : memref<1x256x1xf32, #tpu.memory_space<vmem>>, vector<1x256x1xf32>
    tpu.vector_store %arg5[%c0_10, %c0_11, %c0_12], %11 {strides = array<i32>} : memref<1x256x1xf32, #tpu.memory_space<vmem>>, vector<1x256x1xf32>,
    return
  }
  func.func @transform_0(%arg0: i32) -> (i32, i32) {
    %c0_i32 = arith.constant 0 : i32
    %c0_i32_0 = arith.constant 0 : i32
    %c0_i32_1 = arith.constant 0 : i32
    return %c0_i32, %c0_i32_0 : i32, i32
  }
  func.func @transform_1(%arg0: i32) -> (i32, i32) {
    %c0_i32 = arith.constant 0 : i32
    %c0_i32_0 = arith.constant 0 : i32
    return %c0_i32, %arg0 : i32, i32
  }
  func.func @transform_2(%arg0: i32) -> (i32, i32) {
    %c0_i32 = arith.constant 0 : i32
    %c0_i32_0 = arith.constant 0 : i32
    return %c0_i32, %arg0 : i32, i32
  }
  func.func @transform_3(%arg0: i32) -> (i32, i32, i32) {
    %c0_i32 = arith.constant 0 : i32
    %c0_i32_0 = arith.constant 0 : i32
    %c0_i32_1 = arith.constant 0 : i32
    return %arg0, %c0_i32, %c0_i32_0 : i32, i32, i32
  }
  func.func @transform_4(%arg0: i32) -> (i32, i32, i32) {
    %c0_i32 = arith.constant 0 : i32
    %c0_i32_0 = arith.constant 0 : i32
    %c0_i32_1 = arith.constant 0 : i32
    return %arg0, %c0_i32, %c0_i32_0 : i32, i32, i32
  }
}

module attributes {stable_mosaic.version = 11 : i64} {
  func.func @_bn_elu_kernel(%arg0: i32, %arg1: memref<256x32xf32, #tpu.memory_space<vmem>>, %arg2: memref<256x1xf32, #tpu.memory_space<vmem>>, %arg3: memref<256x1xf32, #tpu.memory_space<vmem>>, %arg4: memref<256x32xbf16, #tpu.memory_space<vmem>>) attributes {dimension_semantics = [#tpu.dimension_semantics<parallel>], iteration_bounds = array<i64: 1>, scalar_prefetch = 0 : i64, scratch_operands = 0 : i64, tpu.core_type = #tpu.core_type<tc>, window_params = [{transform_indices = @transform_0, window_bounds = array<i64: 256, 32>}, {pipeline_mode = #tpu.pipeline_mode<synchronous>, transform_indices = @transform_1, window_bounds = array<i64: 256, 1>}, {pipeline_mode = #tpu.pipeline_mode<synchronous>, transform_indices = @transform_2, window_bounds = array<i64: 256, 1>}, {transform_indices = @transform_3, window_bounds = array<i64: 256, 32>}]} {
    %c0 = arith.constant 0 : index
    %c0_0 = arith.constant 0 : index
    %0 = vector.load %arg1[%c0, %c0_0] : memref<256x32xf32, #tpu.memory_space<vmem>>, vector<256x32xf32>
    %c0_1 = arith.constant 0 : index
    %c0_2 = arith.constant 0 : index
    %1 = vector.load %arg2[%c0_1, %c0_2] : memref<256x1xf32, #tpu.memory_space<vmem>>, vector<256x1xf32>
    %2 = vector.broadcast %1 : vector<256x1xf32> to vector<256x32xf32>
    %3 = arith.mulf %0, %2 : vector<256x32xf32>
    %c0_3 = arith.constant 0 : index
    %c0_4 = arith.constant 0 : index
    %4 = vector.load %arg3[%c0_3, %c0_4] : memref<256x1xf32, #tpu.memory_space<vmem>>, vector<256x1xf32>
    %5 = vector.broadcast %4 : vector<256x1xf32> to vector<256x32xf32>
    %6 = arith.addf %3, %5 : vector<256x32xf32>
    %cst = arith.constant 0.000000e+00 : f32
    %7 = vector.broadcast %cst : f32 to vector<256x32xf32>
    %8 = arith.cmpf ogt, %6, %7 : vector<256x32xf32>
    %cst_5 = arith.constant 0.000000e+00 : f32
    %9 = vector.broadcast %cst_5 : f32 to vector<256x32xf32>
    %10 = arith.minimumf %6, %9 : vector<256x32xf32>
    %11 = math.exp %10 : vector<256x32xf32>
    %cst_6 = arith.constant 1.000000e+00 : f32
    %12 = vector.broadcast %cst_6 : f32 to vector<256x32xf32>
    %13 = arith.subf %11, %12 : vector<256x32xf32>
    %14 = arith.select %8, %6, %13 : vector<256x32xi1>, vector<256x32xf32>
    %15 = arith.truncf %14 : vector<256x32xf32> to vector<256x32xbf16>
    %c0_7 = arith.constant 0 : index
    %c0_8 = arith.constant 0 : index
    %16 = vector.load %arg4[%c0_7, %c0_8] : memref<256x32xbf16, #tpu.memory_space<vmem>>, vector<256x32xbf16>
    tpu.vector_store %arg4[%c0_7, %c0_8], %15 {strides = array<i32>} : memref<256x32xbf16, #tpu.memory_space<vmem>>, vector<256x32xbf16>,
    return
  }
  func.func @transform_0(%arg0: i32) -> (i32, i32) {
    %c0_i32 = arith.constant 0 : i32
    %c0_i32_0 = arith.constant 0 : i32
    return %c0_i32, %arg0 : i32, i32
  }
  func.func @transform_1(%arg0: i32) -> (i32, i32) {
    %c0_i32 = arith.constant 0 : i32
    %c0_i32_0 = arith.constant 0 : i32
    %c0_i32_1 = arith.constant 0 : i32
    return %c0_i32, %c0_i32_0 : i32, i32
  }
  func.func @transform_2(%arg0: i32) -> (i32, i32) {
    %c0_i32 = arith.constant 0 : i32
    %c0_i32_0 = arith.constant 0 : i32
    %c0_i32_1 = arith.constant 0 : i32
    return %c0_i32, %c0_i32_0 : i32, i32
  }
  func.func @transform_3(%arg0: i32) -> (i32, i32) {
    %c0_i32 = arith.constant 0 : i32
    %c0_i32_0 = arith.constant 0 : i32
    return %c0_i32, %arg0 : i32, i32
  }
}

module attributes {stable_mosaic.version = 11 : i64} {
  func.func @_gemm_act_kernel(%arg0: i32, %arg1: memref<1x4096xbf16, #tpu.memory_space<vmem>>, %arg2: memref<4096x2xbf16, #tpu.memory_space<vmem>>, %arg3: memref<1x2xf32, #tpu.memory_space<vmem>>) attributes {dimension_semantics = [#tpu.dimension_semantics<parallel>], iteration_bounds = array<i64: 1>, scalar_prefetch = 0 : i64, scratch_operands = 0 : i64, tpu.core_type = #tpu.core_type<tc>, window_params = [{pipeline_mode = #tpu.pipeline_mode<synchronous>, transform_indices = @transform_0, window_bounds = array<i64: 1, 4096>}, {transform_indices = @transform_1, window_bounds = array<i64: 4096, 2>}, {transform_indices = @transform_2, window_bounds = array<i64: 1, 2>}]} {
    %c0 = arith.constant 0 : index
    %c0_0 = arith.constant 0 : index
    %0 = vector.load %arg1[%c0, %c0_0] : memref<1x4096xbf16, #tpu.memory_space<vmem>>, vector<1x4096xbf16>
    %c0_1 = arith.constant 0 : index
    %c0_2 = arith.constant 0 : index
    %1 = vector.load %arg2[%c0_1, %c0_2] : memref<4096x2xbf16, #tpu.memory_space<vmem>>, vector<4096x2xbf16>
    %cst = arith.constant dense<0.000000e+00> : vector<1x2xf32>
    %2 = tpu.matmul %0, %1, %cst {dimension_numbers = #tpu.dot_dimension_numbers<[1], [0], [0], [1], [0, 0, 1, 1], [], []>} : vector<1x4096xbf16>, vector<4096x2xbf16>, vector<1x2xf32> -> vector<1x2xf32>
    %cst_3 = arith.constant 0.000000e+00 : f32
    %3 = vector.broadcast %cst_3 : f32 to vector<1x2xf32>
    %4 = arith.subf %3, %2 : vector<1x2xf32>
    %5 = math.exp %4 : vector<1x2xf32>
    %cst_4 = arith.constant 1.000000e+00 : f32
    %6 = vector.broadcast %cst_4 : f32 to vector<1x2xf32>
    %7 = arith.addf %6, %5 : vector<1x2xf32>
    %cst_5 = arith.constant 1.000000e+00 : f32
    %8 = vector.broadcast %cst_5 : f32 to vector<1x2xf32>
    %9 = arith.divf %8, %7 : vector<1x2xf32>
    %c0_6 = arith.constant 0 : index
    %c0_7 = arith.constant 0 : index
    %10 = vector.load %arg3[%c0_6, %c0_7] : memref<1x2xf32, #tpu.memory_space<vmem>>, vector<1x2xf32>
    tpu.vector_store %arg3[%c0_6, %c0_7], %9 {strides = array<i32>} : memref<1x2xf32, #tpu.memory_space<vmem>>, vector<1x2xf32>,
    return
  }
  func.func @transform_0(%arg0: i32) -> (i32, i32) {
    %c0_i32 = arith.constant 0 : i32
    %c0_i32_0 = arith.constant 0 : i32
    %c0_i32_1 = arith.constant 0 : i32
    return %c0_i32, %c0_i32_0 : i32, i32
  }
  func.func @transform_1(%arg0: i32) -> (i32, i32) {
    %c0_i32 = arith.constant 0 : i32
    %c0_i32_0 = arith.constant 0 : i32
    return %c0_i32, %arg0 : i32, i32
  }
  func.func @transform_2(%arg0: i32) -> (i32, i32) {
    %c0_i32 = arith.constant 0 : i32
    %c0_i32_0 = arith.constant 0 : i32
    return %c0_i32, %arg0 : i32, i32
  }
}

</mosaic_0001>

<bundles_post_ra>
// kernel: discriminator_forward.8
= control target key start
LH: loop header
LB: loop body
LE: loop exit
PB: predicated region body
PF: predicated region fallthrough
CT: control target
= control target key end

     0   :  { %s731_s9 = smov 0   ;;  %s733_s10 = smov 0   ;;  %s899_s0 = inlined_call_operand.vmem [shape: bf16[32,16], index: 0, kind: input, shape index: {}]   ;;  %s900_s1 = inlined_call_operand.vmem [shape: bf16[16,2048], index: 1, kind: input, shape index: {}]   ;;  %s901_s2 = inlined_call_operand.vmem [shape: bf16[32,2048], index: 2, kind: output, shape index: {}]  }
   0x1   :  { %s735_s11 = smov 0  }
   0x2 LB: > { %s567_s12 = sadd.s32 4294967295, %s713_s11   ;;  %s748_s13 = sadd.s32 1, %s713_s11   ;;  %s713_s11 = sphi %s735_s11, %s905_s11   ;;  %s709_s10 = sphi %s733_s10, %s904_s10   ;;  %s705_s9 = sphi %s731_s9, %s903_s9  }
   0x3   : > { %s37_s14 = ssub.s32 %s713_s11, %s748_s13  ;;  %s40_s15 = sadd.s32 1, %s709_s10 }
   0x4   : > { %p38_p0 = scmp.eq.s32.totalorder %s37_s14, 0  ;;  %p47_p1 = scmp.ne.s32.totalorder %s709_s10, %s705_s9 }
   0x5   : > { %p48_p2 = scmp.eq.s32.totalorder %s713_s11, 0  ;;  %p77_p3 = scmp.eq.s32.totalorder %s567_s12, 3 }
   0x6   : > { %s759_s16 = scalar_select %p38_p0, %s709_s10, %s40_s15  }
   0x7   : > { %p49_p4 = por %p48_p2, %p47_p1  ;;  %p761_p5 = por %p77_p3, %p47_p1 }
   0x8   : > { %p570_p6 = scmp.ge.s32.totalorder %s713_s11, 4 }
   0xa   : > { %102 = sbr.rel (%p570_p6) target bundleno = 21 (0x15), region = 20 }
   0xf   : > { %105 = sbr.rel (!%p49_p4) target bundleno = 21 (0x15), region = 24  ;;  %s107_s18 = sand.u32 (%p49_p4), 1, %s709_s10  }
  0x10   : > { %s616_s19 = sshll.u32 (%p49_p4), %s713_s11, 4  ;;  %s571_s20 = sshll.u32 (%p49_p4), %s107_s18, 5 }
  0x11   : > { %s112_s23 = scalar_lea.vmem (%p49_p4), %s900_s1, %s616_s19  ;;  %s109_s24 = scalar_lea.vmem (%p49_p4), [#allocation2], %s571_s20 }
  0x12   : > { %v125_v0 = vld [vmem:[%s112_s23] sm:$0xff] (%p49_p4)  ;;  %v127_v1 = vld [vmem:[%s112_s23 + $0x8] sm:$0xff] (%p49_p4) }
  0x13   : > { %v129_v2 = vld [vmem:[%s112_s23 + $0x40] sm:$0xff] (%p49_p4)  ;;  %126 = vst [vmem:[%s109_s24] sm:$0xff] (%p49_p4), %v125_v0  ;;  %128 = vst [vmem:[%s109_s24 + $0x8] sm:$0xff] (%p49_p4), %v127_v1  ;;  %v131_v3 = vld [vmem:[%s112_s23 + $0x48] sm:$0xff] (%p49_p4) }
  0x14   : > { %130 = vst [vmem:[%s109_s24 + $0x10] sm:$0xff] %v129_v2  ;;  %132 = vst [vmem:[%s109_s24 + $0x18] sm:$0xff] %v131_v3 }
  0x15 PF: > { %p574_p7 = scmp.ge.s32.totalorder %s713_s11, 1  ;;  %p137_p8 = scmp.lt.s32.totalorder %s713_s11, 5 }
  0x17   : > { %p138_p9 = pnand %p574_p7, %p137_p8 }
  0x18   : > { %s144_s25 = sand.u32 (!%p138_p9), 1, %s705_s9  }
  0x19   : > { %141 = sbr.rel (%p138_p9) target bundleno = 276 (0x114), region = 47  ;;  %s575_s26 = sshll.u32 (!%p138_p9), %s144_s25, 5 }
  0x1a   : > { %s146_s27 = scalar_lea.vmem (!%p138_p9), [#allocation2], %s575_s26  ;;  %s576_s4 = sshll.u32 (!%p138_p9), %s144_s25, 6 }
  0x1b   : > { %s840_s5 = scalar_lea.vmem (!%p138_p9), [#allocation3], %s576_s4 }
  0x1e   : > { %v715_v4 = vmov 0   ;;  %v651_v5 = vld [vmem:[%s146_s27 + $0x4] ss:$16 sps:$4 sm:$0xff]   ;;  %v653_v6 = vld [vmem:[%s146_s27 + $0xc] ss:$16 sps:$4 sm:$0xff]   ;;  %vm205_vm0 = vcmask 130048  }
  0x1f   : > { %244 = vmatprep.mubr.bf16.mxu0 %v715_v4  ;;  %297 = vmatprep.mubr.bf16.mxu1 %v715_v4  ;;  %v655_v7 = vld [vmem:[%s146_s27] ss:$16 sps:$4 sm:$0xff]   ;;  %v656_v8 = vld [vmem:[%s146_s27 + $0x8] ss:$16 sps:$4 sm:$0xff]   ;;  %s625_s6 = sshll.u32 (%p761_p5), %s567_s12, 4 }
  0x20   : > { %226 = vmatprep.subr.bf16.mxu0 %v651_v5  ;;  %279 = vmatprep.subr.bf16.mxu1 %v653_v6  ;;  %v657_v9 = vld [vmem:[%s899_s0] sm:$0xff]   ;;  %v658_v10 = vld [vmem:[%s899_s0 + $0x8] sm:$0xff]   ;;  %s479_s9 = scalar_lea.vmem (%p761_p5), %s901_s2, %s625_s6 }
  0x21   : > { %227 = vmatpush1.bf16.msra.mxu0 %v655_v7  ;;  %280 = vmatpush1.bf16.msra.mxu1 %v656_v8 }
  0x24   : > { %583 = vmatmul.mubr.msk.bf16.vlgmr.msra.gmra.mxu0 %vm205_vm0, %v657_v9  ;;  %585 = vmatmul.mubr.msk.bf16.vlgmr.msra.gmra.mxu1 %vm205_vm0, %v657_v9 }
  0x25   : > { %254 = vmatprep.mubr.bf16.mxu0 %v715_v4  ;;  %307 = vmatprep.mubr.bf16.mxu1 %v715_v4 }
  0x2c   : > { %584 = vmatmul.mubr.msk.bf16.gmra.mxu0 %vm205_vm0, %v658_v10  ;;  %586 = vmatmul.mubr.msk.bf16.gmra.mxu1 %vm205_vm0, %v658_v10 }
  0xe4   : > { %v782_v11 = vpop.f32.mrf.mxu0  ;;  %v784_v12 = vpop.f32.mrf.mxu1 }
  0xe5   : > { %v334_v13 = vmin.f32 %v782_v11, 0.0  ;;  %v336_v14 = vmin.f32 %v784_v12, 0.0  ;;  %vm318_vm1 = vcmp.gt.f32.partialorder %v782_v11, 0.0  ;;  %vm320_vm2 = vcmp.gt.f32.partialorder %v784_v12, 0.0 }
  0xe6   : > { %v788_v15 = vpop.f32.mrf.mxu0  ;;  %v790_v16 = vpop.f32.mrf.mxu1 }
  0xe7   : > { %v350_v17 = vmul.f32 1.442695, %v334_v13  ;;  %v354_v18 = vmul.f32 1.442695, %v336_v14  ;;  %v335_v19 = vmin.f32 %v788_v15, 0.0  ;;  %v337_v20 = vmin.f32 %v790_v16, 0.0 }
  0xe8   : > { %v794_v21 = vpop.f32.mrf.mxu0  ;;  %v796_v22 = vpop.f32.mrf.mxu1  ;;  %vm319_vm3 = vcmp.gt.f32.partialorder %v788_v15, 0.0  ;;  %vm321_vm4 = vcmp.gt.f32.partialorder %v790_v16, 0.0 }
  0xe9   : > { %659 = vpow2.f32 %v350_v17  ;;  %v352_v23 = vmul.f32 1.442695, %v335_v19  ;;  %v338_v24 = vmin.f32 %v794_v21, 0.0  ;;  %v356_v25 = vmul.f32 1.442695, %v337_v20 }
  0xea   : > { %661 = vpow2.f32 %v354_v18  ;;  %v340_v26 = vmin.f32 %v796_v22, 0.0  ;;  %v800_v27 = vpop.f32.mrf.mxu0  ;;  %v802_v28 = vpop.f32.mrf.mxu1  ;;  %vm322_vm5 = vcmp.gt.f32.partialorder %v794_v21, 0.0  ;;  %vm324_vm6 = vcmp.gt.f32.partialorder %v796_v22, 0.0 }
  0xeb   : > { %663 = vpow2.f32 %v352_v23  ;;  %v358_v29 = vmul.f32 1.442695, %v338_v24  ;;  %v339_v30 = vmin.f32 %v800_v27, 0.0  ;;  %v341_v32 = vmin.f32 %v802_v28, 0.0 }
  0xec   : > { %665 = vpow2.f32 %v356_v25  ;;  %v362_v31 = vmul.f32 1.442695, %v340_v26  ;;  %v806_v33 = vpop.f32.mrf.mxu0  ;;  %v808_v34 = vpop.f32.mrf.mxu1  ;;  %vm323_vm7 = vcmp.gt.f32.partialorder %v800_v27, 0.0  ;;  %vm325_vm8 = vcmp.gt.f32.partialorder %v802_v28, 0.0 }
  0xed   : > { %667 = vpow2.f32 %v358_v29  ;;  %v360_v35 = vmul.f32 1.442695, %v339_v30  ;;  %v342_v36 = vmin.f32 %v806_v33, 0.0  ;;  %v364_v37 = vmul.f32 1.442695, %v341_v32 }
  0xee   : > { %669 = vpow2.f32 %v362_v31  ;;  %v344_v38 = vmin.f32 %v808_v34, 0.0  ;;  %v812_v39 = vpop.f32.mrf.mxu0  ;;  %v814_v40 = vpop.f32.mrf.mxu1  ;;  %vm326_vm9 = vcmp.gt.f32.partialorder %v806_v33, 0.0  ;;  %vm328_vm10 = vcmp.gt.f32.partialorder %v808_v34, 0.0 }
  0xef   : > { %671 = vpow2.f32 %v360_v35  ;;  %v366_v41 = vmul.f32 1.442695, %v342_v36  ;;  %v343_v42 = vmin.f32 %v812_v39, 0.0  ;;  %v345_v44 = vmin.f32 %v814_v40, 0.0 }
  0xf0   : > { %673 = vpow2.f32 %v364_v37  ;;  %v370_v43 = vmul.f32 1.442695, %v344_v38  ;;  %v818_v45 = vpop.f32.mrf.mxu0  ;;  %v820_v46 = vpop.f32.mrf.mxu1  ;;  %vm327_vm11 = vcmp.gt.f32.partialorder %v812_v39, 0.0  ;;  %vm329_vm12 = vcmp.gt.f32.partialorder %v814_v40, 0.0 }
  0xf1   : > { %675 = vpow2.f32 %v366_v41  ;;  %v368_v47 = vmul.f32 1.442695, %v343_v42  ;;  %v346_v48 = vmin.f32 %v818_v45, 0.0  ;;  %v372_v49 = vmul.f32 1.442695, %v345_v44 }
  0xf2   : > { %677 = vpow2.f32 %v370_v43  ;;  %v348_v50 = vmin.f32 %v820_v46, 0.0  ;;  %v824_v51 = vpop.f32.mrf.mxu0  ;;  %v826_v52 = vpop.f32.mrf.mxu1  ;;  %vm330_vm13 = vcmp.gt.f32.partialorder %v818_v45, 0.0  ;;  %vm332_vm15 = vcmp.gt.f32.partialorder %v820_v46, 0.0 }
  0xf3   : > { %679 = vpow2.f32 %v368_v47  ;;  %v374_v53 = vmul.f32 1.442695, %v346_v48  ;;  %v347_v54 = vmin.f32 %v824_v51, 0.0  ;;  %v349_v56 = vmin.f32 %v826_v52, 0.0 }
  0xf4   : > { %681 = vpow2.f32 %v372_v49  ;;  %v378_v55 = vmul.f32 1.442695, %v348_v50  ;;  %vm331_vm14 = vcmp.gt.f32.partialorder %v824_v51, 0.0  ;;  %vm333_vm0 = vcmp.gt.f32.partialorder %v826_v52, 0.0 }
  0xf5   : > { %683 = vpow2.f32 %v374_v53  ;;  %v376_v57 = vmul.f32 1.442695, %v347_v54  ;;  %v380_v59 = vmul.f32 1.442695, %v349_v56 }
  0xf6   : > { %v660_v58 = vpop.eup %659  ;;  %685 = vpow2.f32 %v378_v55 }
  0xf7   : > { %v662_v60 = vpop.eup %661  ;;  %v587_v61 = vadd.f32 -1.0, %v660_v58  ;;  %687 = vpow2.f32 %v376_v57 }
  0xf8   : > { %v664_v62 = vpop.eup %663  ;;  %v589_v63 = vadd.f32 -1.0, %v662_v60  ;;  %689 = vpow2.f32 %v380_v59 }
  0xf9   : > { %v666_v0 = vpop.eup %665  ;;  %v588_v1 = vadd.f32 -1.0, %v664_v62  ;;  %v398_v5 = vsel %vm318_vm1, %v782_v11, %v587_v61 }
  0xfa   : > { %v668_v2 = vpop.eup %667  ;;  %v590_v3 = vadd.f32 -1.0, %v666_v0  ;;  %v400_v9 = vsel %vm320_vm2, %v784_v12, %v589_v63 }
  0xfb   : > { %v670_v4 = vpop.eup %669  ;;  %v399_v6 = vsel %vm319_vm3, %v788_v15, %v588_v1  ;;  %v591_v7 = vadd.f32 -1.0, %v668_v2 }
  0xfc   : > { %v672_v8 = vpop.eup %671  ;;  %v617_v10 = vpack.c.bf16 %v399_v6, %v398_v5  ;;  %v401_v13 = vsel %vm321_vm4, %v790_v16, %v590_v3  ;;  %v593_v14 = vadd.f32 -1.0, %v670_v4 }
  0xfd   : > { %v674_v17 = vpop.eup %673  ;;  %v618_v18 = vpack.c.bf16 %v401_v13, %v400_v9  ;;  %v592_v19 = vadd.f32 -1.0, %v672_v8  ;;  %v402_v15 = vsel %vm322_vm5, %v794_v21, %v591_v7 }
  0xfe   : > { %v676_v20 = vpop.eup %675  ;;  %462 = vst [vmem:[%s840_s5] sm:$0xff] %v617_v10  ;;  %v594_v11 = vadd.f32 -1.0, %v674_v17  ;;  %v404_v25 = vsel %vm324_vm6, %v796_v22, %v593_v14 }
  0xff   : > { %v678_v12 = vpop.eup %677  ;;  %463 = vst [vmem:[%s840_s5 + $0x8] sm:$0xff] %v618_v18  ;;  %v403_v16 = vsel %vm323_vm7, %v800_v27, %v592_v19  ;;  %v595_v23 = vadd.f32 -1.0, %v676_v20 }
 0x100   : > { %v680_v24 = vpop.eup %679  ;;  %v619_v26 = vpack.c.bf16 %v403_v16, %v402_v15  ;;  %v405_v29 = vsel %vm325_vm8, %v802_v28, %v594_v11  ;;  %v597_v30 = vadd.f32 -1.0, %v678_v12 }
 0x101   : > { %v682_v31 = vpop.eup %681  ;;  %v620_v32 = vpack.c.bf16 %v405_v29, %v404_v25  ;;  %v596_v35 = vadd.f32 -1.0, %v680_v24  ;;  %v406_v22 = vsel %vm326_vm9, %v806_v33, %v595_v23 }
 0x102   : > { %v684_v36 = vpop.eup %683  ;;  %464 = vst [vmem:[%s840_s5 + $0x10] sm:$0xff] %v619_v26  ;;  %v598_v21 = vadd.f32 -1.0, %v682_v31  ;;  %v408_v41 = vsel %vm328_vm10, %v808_v34, %v597_v30 }
 0x103   : > { %v686_v27 = vpop.eup %685  ;;  %465 = vst [vmem:[%s840_s5 + $0x18] sm:$0xff] %v620_v32  ;;  %v407_v28 = vsel %vm327_vm11, %v812_v39, %v596_v35  ;;  %v599_v37 = vadd.f32 -1.0, %v684_v36 }
 0x104   : > { %v688_v38 = vpop.eup %687  ;;  %v621_v42 = vpack.c.bf16 %v407_v28, %v406_v22  ;;  %v409_v43 = vsel %vm329_vm12, %v814_v40, %v598_v21  ;;  %v601_v44 = vadd.f32 -1.0, %v686_v27 }
 0x105   : > { %v690_v47 = vpop.eup %689  ;;  %v622_v48 = vpack.c.bf16 %v409_v43, %v408_v41  ;;  %v600_v49 = vadd.f32 -1.0, %v688_v38  ;;  %v410_v39 = vsel %vm330_vm13, %v818_v45, %v599_v37  ;;  %v492_v45 = vld [vmem:[%s840_s5] sm:$0xff] (%p761_p5) }
 0x106   : > { %466 = vst [vmem:[%s840_s5 + $0x20] sm:$0xff] %v621_v42  ;;  %v602_v33 = vadd.f32 -1.0, %v690_v47  ;;  %v412_v40 = vsel %vm332_vm15, %v820_v46, %v601_v44  ;;  %v494_v46 = vld [vmem:[%s840_s5 + $0x8] sm:$0xff] (%p761_p5)  ;;  %493 = vst [vmem:[%s479_s9] sm:$0xff] (%p761_p5), %v492_v45 }
 0x107   : > { %467 = vst [vmem:[%s840_s5 + $0x28] sm:$0xff] %v622_v48  ;;  %v411_v34 = vsel %vm331_vm14, %v824_v51, %v600_v49  ;;  %476 = sbr.rel (!%p761_p5) target bundleno = 276 (0x114), region = 55  ;;  %495 = vst [vmem:[%s479_s9 + $0x8] sm:$0xff] (%p761_p5), %v494_v46 }
 0x108   : > { %v623_v50 = vpack.c.bf16 %v411_v34, %v410_v39  ;;  %v413_v53 = vsel %vm333_vm0, %v826_v52, %v602_v33 }
 0x109   : > { %v624_v54 = vpack.c.bf16 %v413_v53, %v412_v40  ;;  %v496_v51 = vld [vmem:[%s840_s5 + $0x10] sm:$0xff] (%p761_p5) }
 0x10a   : > { %468 = vst [vmem:[%s840_s5 + $0x30] sm:$0xff] %v623_v50  ;;  %v498_v52 = vld [vmem:[%s840_s5 + $0x18] sm:$0xff] (%p761_p5)  ;;  %497 = vst [vmem:[%s479_s9 + $0x40] sm:$0xff] (%p761_p5), %v496_v51 }
 0x10b   : > { %469 = vst [vmem:[%s840_s5 + $0x38] sm:$0xff] %v624_v54  ;;  %499 = vst [vmem:[%s479_s9 + $0x48] sm:$0xff] (%p761_p5), %v498_v52 }
 0x10d   : > { %v500_v55 = vld [vmem:[%s840_s5 + $0x20] sm:$0xff] }
 0x10e   : > { %v502_v56 = vld [vmem:[%s840_s5 + $0x28] sm:$0xff]  ;;  %501 = vst [vmem:[%s479_s9 + $0x80] sm:$0xff] %v500_v55 }
 0x10f   : > { %503 = vst [vmem:[%s479_s9 + $0x88] sm:$0xff] %v502_v56 }
 0x111   : > { %v504_v57 = vld [vmem:[%s840_s5 + $0x30] sm:$0xff] }
 0x112   : > { %v506_v58 = vld [vmem:[%s840_s5 + $0x38] sm:$0xff]  ;;  %505 = vst [vmem:[%s479_s9 + $0xc0] sm:$0xff] %v504_v57 }
 0x113   : > { %507 = vst [vmem:[%s479_s9 + $0xc8] sm:$0xff] %v506_v58 }
 0x114 PF: > { %p9_p10 = scmp.ge.s32.totalorder %s748_s13, 6   ;;  %s903_s9 = smov %s709_s10 }
 0x115   : > { %s904_s10 = smov %s759_s16  ;;  %s905_s11 = smov %s748_s13 }
 0x116   :  { %11 = sbr.rel (!%p9_p10) target bundleno = 2 (0x2), region = 109 }

// kernel: discriminator_forward.9
= control target key start
LH: loop header
LB: loop body
LE: loop exit
PB: predicated region body
PF: predicated region fallthrough
CT: control target
= control target key end

     0   :  { %s1705_s15 = smov 0   ;;  %s1707_s16 = smov 0   ;;  %s2083_s0 = inlined_call_operand.vmem [shape: bf16[64,512], index: 0, kind: input, shape index: {}]   ;;  %s2084_s1 = inlined_call_operand.vmem [shape: bf16[512,512], index: 1, kind: input, shape index: {}]   ;;  %s2085_s2 = inlined_call_operand.vmem [shape: f32[64,512], index: 2, kind: output, shape index: {0}]   ;;  %s2086_s3 = inlined_call_operand.vmem [shape: f32[2,64,1], index: 3, kind: output, shape index: {1}]   ;;  %s2087_s4 = inlined_call_operand.vmem [shape: f32[2,64,1], index: 4, kind: output, shape index: {2}]  }
   0x1   :  { %s1709_s17 = smov 0  }
   0x2 LB: > { %s1721_s18 = sadd.s32 4294967295, %s1678_s17   ;;  %s1724_s19 = sadd.s32 1, %s1678_s17   ;;  %s1678_s17 = sphi %s1709_s17, %s2091_s17   ;;  %s1674_s16 = sphi %s1707_s16, %s2090_s16   ;;  %s1670_s15 = sphi %s1705_s15, %s2089_s15  }
   0x3   : > { %s40_s20 = ssub.s32 %s1678_s17, %s1724_s19  ;;  %s43_s21 = sadd.s32 1, %s1674_s16 }
   0x4   : > { %p41_p0 = scmp.eq.s32.totalorder %s40_s20, 0  ;;  %p50_p1 = scmp.ne.s32.totalorder %s1674_s16, %s1670_s15 }
   0x5   : > { %p51_p2 = scmp.eq.s32.totalorder %s1678_s17, 0  ;;  %p80_p3 = scmp.eq.s32.totalorder %s1721_s18, 1 }
   0x6   : > { %s1734_s22 = scalar_select %p41_p0, %s1674_s16, %s43_s21  }
   0x7   : > { %p52_p4 = por %p51_p2, %p50_p1  ;;  %p1736_p5 = por %p80_p3, %p50_p1 }
   0x8   : > { %p1412_p6 = scmp.ge.s32.totalorder %s1678_s17, 2 }
   0xa   : > { %157 = sbr.rel (%p1412_p6) target bundleno = 51 (0x33), region = 20 }
   0xf   : > { %160 = sbr.rel (!%p52_p4) target bundleno = 51 (0x33), region = 24  ;;  %s162_s24 = sand.u32 (%p52_p4), 1, %s1674_s16  }
  0x10   : > { %s1508_s25 = sshll.u32 (%p52_p4), %s1678_s17, 3  ;;  %s1413_s26 = sshll.u32 (%p52_p4), %s162_s24, 9 }
  0x11   : > { %s1746_s29 = scalar_lea.vmem (%p52_p4), %s2084_s1, %s1508_s25  ;;  %s1751_s30 = scalar_lea.vmem (%p52_p4), [#allocation2], %s1413_s26 }
  0x12   : > { %v322_v0 = vld [vmem:[%s1746_s29] sm:$0xff] (%p52_p4)  ;;  %v324_v1 = vld [vmem:[%s1746_s29 + $0x10] sm:$0xff] (%p52_p4) }
  0x13   : > { %v326_v2 = vld [vmem:[%s1746_s29 + $0x20] sm:$0xff] (%p52_p4)  ;;  %323 = vst [vmem:[%s1751_s30] sm:$0xff] (%p52_p4), %v322_v0  ;;  %325 = vst [vmem:[%s1751_s30 + $0x8] sm:$0xff] (%p52_p4), %v324_v1  ;;  %v328_v3 = vld [vmem:[%s1746_s29 + $0x30] sm:$0xff] (%p52_p4) }
  0x14   : > { %327 = vst [vmem:[%s1751_s30 + $0x10] sm:$0xff] %v326_v2  ;;  %v330_v4 = vld [vmem:[%s1746_s29 + $0x40] sm:$0xff]  ;;  %v332_v5 = vld [vmem:[%s1746_s29 + $0x50] sm:$0xff]  ;;  %329 = vst [vmem:[%s1751_s30 + $0x18] sm:$0xff] %v328_v3 }
  0x15   : > { %331 = vst [vmem:[%s1751_s30 + $0x20] sm:$0xff] %v330_v4  ;;  %333 = vst [vmem:[%s1751_s30 + $0x28] sm:$0xff] %v332_v5  ;;  %v334_v6 = vld [vmem:[%s1746_s29 + $0x60] sm:$0xff]  ;;  %v336_v7 = vld [vmem:[%s1746_s29 + $0x70] sm:$0xff] }
  0x16   : > { %v338_v8 = vld [vmem:[%s1746_s29 + $0x80] sm:$0xff]  ;;  %335 = vst [vmem:[%s1751_s30 + $0x30] sm:$0xff] %v334_v6  ;;  %337 = vst [vmem:[%s1751_s30 + $0x38] sm:$0xff] %v336_v7  ;;  %v340_v9 = vld [vmem:[%s1746_s29 + $0x90] sm:$0xff] }
  0x17   : > { %339 = vst [vmem:[%s1751_s30 + $0x40] sm:$0xff] %v338_v8  ;;  %v342_v10 = vld [vmem:[%s1746_s29 + $0xa0] sm:$0xff]  ;;  %v344_v11 = vld [vmem:[%s1746_s29 + $0xb0] sm:$0xff]  ;;  %341 = vst [vmem:[%s1751_s30 + $0x48] sm:$0xff] %v340_v9 }
  0x18   : > { %343 = vst [vmem:[%s1751_s30 + $0x50] sm:$0xff] %v342_v10  ;;  %345 = vst [vmem:[%s1751_s30 + $0x58] sm:$0xff] %v344_v11  ;;  %v346_v12 = vld [vmem:[%s1746_s29 + $0xc0] sm:$0xff]  ;;  %v348_v13 = vld [vmem:[%s1746_s29 + $0xd0] sm:$0xff] }
  0x19   : > { %v350_v14 = vld [vmem:[%s1746_s29 + $0xe0] sm:$0xff]  ;;  %347 = vst [vmem:[%s1751_s30 + $0x60] sm:$0xff] %v346_v12  ;;  %349 = vst [vmem:[%s1751_s30 + $0x68] sm:$0xff] %v348_v13  ;;  %v352_v15 = vld [vmem:[%s1746_s29 + $0xf0] sm:$0xff] }
  0x1a   : > { %351 = vst [vmem:[%s1751_s30 + $0x70] sm:$0xff] %v350_v14  ;;  %v354_v16 = vld [vmem:[%s1746_s29 + $0x100] sm:$0xff]  ;;  %v356_v17 = vld [vmem:[%s1746_s29 + $0x110] sm:$0xff]  ;;  %353 = vst [vmem:[%s1751_s30 + $0x78] sm:$0xff] %v352_v15 }
  0x1b   : > { %355 = vst [vmem:[%s1751_s30 + $0x80] sm:$0xff] %v354_v16  ;;  %357 = vst [vmem:[%s1751_s30 + $0x88] sm:$0xff] %v356_v17  ;;  %v358_v18 = vld [vmem:[%s1746_s29 + $0x120] sm:$0xff]  ;;  %v360_v19 = vld [vmem:[%s1746_s29 + $0x130] sm:$0xff] }
  0x1c   : > { %v362_v20 = vld [vmem:[%s1746_s29 + $0x140] sm:$0xff]  ;;  %359 = vst [vmem:[%s1751_s30 + $0x90] sm:$0xff] %v358_v18  ;;  %361 = vst [vmem:[%s1751_s30 + $0x98] sm:$0xff] %v360_v19  ;;  %v364_v21 = vld [vmem:[%s1746_s29 + $0x150] sm:$0xff] }
  0x1d   : > { %363 = vst [vmem:[%s1751_s30 + $0xa0] sm:$0xff] %v362_v20  ;;  %v366_v22 = vld [vmem:[%s1746_s29 + $0x160] sm:$0xff]  ;;  %v368_v23 = vld [vmem:[%s1746_s29 + $0x170] sm:$0xff]  ;;  %365 = vst [vmem:[%s1751_s30 + $0xa8] sm:$0xff] %v364_v21 }
  0x1e   : > { %367 = vst [vmem:[%s1751_s30 + $0xb0] sm:$0xff] %v366_v22  ;;  %369 = vst [vmem:[%s1751_s30 + $0xb8] sm:$0xff] %v368_v23  ;;  %v370_v24 = vld [vmem:[%s1746_s29 + $0x180] sm:$0xff]  ;;  %v372_v25 = vld [vmem:[%s1746_s29 + $0x190] sm:$0xff] }
  0x1f   : > { %v374_v26 = vld [vmem:[%s1746_s29 + $0x1a0] sm:$0xff]  ;;  %371 = vst [vmem:[%s1751_s30 + $0xc0] sm:$0xff] %v370_v24  ;;  %373 = vst [vmem:[%s1751_s30 + $0xc8] sm:$0xff] %v372_v25  ;;  %v376_v27 = vld [vmem:[%s1746_s29 + $0x1b0] sm:$0xff] }
  0x20   : > { %375 = vst [vmem:[%s1751_s30 + $0xd0] sm:$0xff] %v374_v26  ;;  %v378_v28 = vld [vmem:[%s1746_s29 + $0x1c0] sm:$0xff]  ;;  %v380_v29 = vld [vmem:[%s1746_s29 + $0x1d0] sm:$0xff]  ;;  %377 = vst [vmem:[%s1751_s30 + $0xd8] sm:$0xff] %v376_v27 }
  0x21   : > { %379 = vst [vmem:[%s1751_s30 + $0xe0] sm:$0xff] %v378_v28  ;;  %381 = vst [vmem:[%s1751_s30 + $0xe8] sm:$0xff] %v380_v29  ;;  %v382_v30 = vld [vmem:[%s1746_s29 + $0x1e0] sm:$0xff]  ;;  %v384_v31 = vld [vmem:[%s1746_s29 + $0x1f0] sm:$0xff] }
  0x22   : > { %v386_v32 = vld [vmem:[%s1746_s29 + $0x200] sm:$0xff]  ;;  %383 = vst [vmem:[%s1751_s30 + $0xf0] sm:$0xff] %v382_v30  ;;  %385 = vst [vmem:[%s1751_s30 + $0xf8] sm:$0xff] %v384_v31  ;;  %v388_v33 = vld [vmem:[%s1746_s29 + $0x210] sm:$0xff] }
  0x23   : > { %387 = vst [vmem:[%s1751_s30 + $0x100] sm:$0xff] %v386_v32  ;;  %v390_v34 = vld [vmem:[%s1746_s29 + $0x220] sm:$0xff]  ;;  %v392_v35 = vld [vmem:[%s1746_s29 + $0x230] sm:$0xff]  ;;  %389 = vst [vmem:[%s1751_s30 + $0x108] sm:$0xff] %v388_v33 }
  0x24   : > { %391 = vst [vmem:[%s1751_s30 + $0x110] sm:$0xff] %v390_v34  ;;  %393 = vst [vmem:[%s1751_s30 + $0x118] sm:$0xff] %v392_v35  ;;  %v394_v36 = vld [vmem:[%s1746_s29 + $0x240] sm:$0xff]  ;;  %v396_v37 = vld [vmem:[%s1746_s29 + $0x250] sm:$0xff] }
  0x25   : > { %v398_v38 = vld [vmem:[%s1746_s29 + $0x260] sm:$0xff]  ;;  %395 = vst [vmem:[%s1751_s30 + $0x120] sm:$0xff] %v394_v36  ;;  %397 = vst [vmem:[%s1751_s30 + $0x128] sm:$0xff] %v396_v37  ;;  %v400_v39 = vld [vmem:[%s1746_s29 + $0x270] sm:$0xff] }
  0x26   : > { %399 = vst [vmem:[%s1751_s30 + $0x130] sm:$0xff] %v398_v38  ;;  %v402_v40 = vld [vmem:[%s1746_s29 + $0x280] sm:$0xff]  ;;  %v404_v41 = vld [vmem:[%s1746_s29 + $0x290] sm:$0xff]  ;;  %401 = vst [vmem:[%s1751_s30 + $0x138] sm:$0xff] %v400_v39 }
  0x27   : > { %403 = vst [vmem:[%s1751_s30 + $0x140] sm:$0xff] %v402_v40  ;;  %405 = vst [vmem:[%s1751_s30 + $0x148] sm:$0xff] %v404_v41  ;;  %v406_v42 = vld [vmem:[%s1746_s29 + $0x2a0] sm:$0xff]  ;;  %v408_v43 = vld [vmem:[%s1746_s29 + $0x2b0] sm:$0xff] }
  0x28   : > { %v410_v44 = vld [vmem:[%s1746_s29 + $0x2c0] sm:$0xff]  ;;  %407 = vst [vmem:[%s1751_s30 + $0x150] sm:$0xff] %v406_v42  ;;  %409 = vst [vmem:[%s1751_s30 + $0x158] sm:$0xff] %v408_v43  ;;  %v412_v45 = vld [vmem:[%s1746_s29 + $0x2d0] sm:$0xff] }
  0x29   : > { %411 = vst [vmem:[%s1751_s30 + $0x160] sm:$0xff] %v410_v44  ;;  %v414_v46 = vld [vmem:[%s1746_s29 + $0x2e0] sm:$0xff]  ;;  %v416_v47 = vld [vmem:[%s1746_s29 + $0x2f0] sm:$0xff]  ;;  %413 = vst [vmem:[%s1751_s30 + $0x168] sm:$0xff] %v412_v45 }
  0x2a   : > { %415 = vst [vmem:[%s1751_s30 + $0x170] sm:$0xff] %v414_v46  ;;  %417 = vst [vmem:[%s1751_s30 + $0x178] sm:$0xff] %v416_v47  ;;  %v418_v48 = vld [vmem:[%s1746_s29 + $0x300] sm:$0xff]  ;;  %v420_v49 = vld [vmem:[%s1746_s29 + $0x310] sm:$0xff] }
  0x2b   : > { %v422_v50 = vld [vmem:[%s1746_s29 + $0x320] sm:$0xff]  ;;  %419 = vst [vmem:[%s1751_s30 + $0x180] sm:$0xff] %v418_v48  ;;  %421 = vst [vmem:[%s1751_s30 + $0x188] sm:$0xff] %v420_v49  ;;  %v424_v51 = vld [vmem:[%s1746_s29 + $0x330] sm:$0xff] }
  0x2c   : > { %423 = vst [vmem:[%s1751_s30 + $0x190] sm:$0xff] %v422_v50  ;;  %v426_v52 = vld [vmem:[%s1746_s29 + $0x340] sm:$0xff]  ;;  %v428_v53 = vld [vmem:[%s1746_s29 + $0x350] sm:$0xff]  ;;  %425 = vst [vmem:[%s1751_s30 + $0x198] sm:$0xff] %v424_v51 }
  0x2d   : > { %427 = vst [vmem:[%s1751_s30 + $0x1a0] sm:$0xff] %v426_v52  ;;  %429 = vst [vmem:[%s1751_s30 + $0x1a8] sm:$0xff] %v428_v53  ;;  %v430_v54 = vld [vmem:[%s1746_s29 + $0x360] sm:$0xff]  ;;  %v432_v55 = vld [vmem:[%s1746_s29 + $0x370] sm:$0xff] }
  0x2e   : > { %v434_v56 = vld [vmem:[%s1746_s29 + $0x380] sm:$0xff]  ;;  %431 = vst [vmem:[%s1751_s30 + $0x1b0] sm:$0xff] %v430_v54  ;;  %433 = vst [vmem:[%s1751_s30 + $0x1b8] sm:$0xff] %v432_v55  ;;  %v436_v57 = vld [vmem:[%s1746_s29 + $0x390] sm:$0xff] }
  0x2f   : > { %435 = vst [vmem:[%s1751_s30 + $0x1c0] sm:$0xff] %v434_v56  ;;  %v438_v58 = vld [vmem:[%s1746_s29 + $0x3a0] sm:$0xff]  ;;  %v440_v59 = vld [vmem:[%s1746_s29 + $0x3b0] sm:$0xff]  ;;  %437 = vst [vmem:[%s1751_s30 + $0x1c8] sm:$0xff] %v436_v57 }
  0x30   : > { %439 = vst [vmem:[%s1751_s30 + $0x1d0] sm:$0xff] %v438_v58  ;;  %441 = vst [vmem:[%s1751_s30 + $0x1d8] sm:$0xff] %v440_v59  ;;  %v442_v60 = vld [vmem:[%s1746_s29 + $0x3c0] sm:$0xff]  ;;  %v444_v61 = vld [vmem:[%s1746_s29 + $0x3d0] sm:$0xff] }
  0x31   : > { %v446_v62 = vld [vmem:[%s1746_s29 + $0x3e0] sm:$0xff]  ;;  %443 = vst [vmem:[%s1751_s30 + $0x1e0] sm:$0xff] %v442_v60  ;;  %445 = vst [vmem:[%s1751_s30 + $0x1e8] sm:$0xff] %v444_v61  ;;  %v448_v63 = vld [vmem:[%s1746_s29 + $0x3f0] sm:$0xff] }
  0x32   : > { %447 = vst [vmem:[%s1751_s30 + $0x1f0] sm:$0xff] %v446_v62  ;;  %449 = vst [vmem:[%s1751_s30 + $0x1f8] sm:$0xff] %v448_v63 }
  0x33 PF: > { %p1416_p7 = scmp.ge.s32.totalorder %s1678_s17, 1  ;;  %p454_p8 = scmp.lt.s32.totalorder %s1678_s17, 3 }
  0x35   : > { %p455_p9 = pnand %p1416_p7, %p454_p8 }
  0x36   : > { %s461_s5 = sand.u32 (!%p455_p9), 1, %s1670_s15   ;;  %p497_p10 = scmp.lt.s32.totalorder (!%p455_p9), %s1721_s18, 1 }
  0x37   : > { %458 = sbr.rel (%p455_p9) target bundleno = 499 (0x1f3), region = 62  ;;  %s1417_s6 = sshll.u32 (!%p455_p9), %s461_s5, 9 }
  0x38   : > { %s1889_s11 = scalar_lea.vmem (!%p455_p9), [#allocation2], %s1417_s6  ;;  %s1418_s27 = sshll.u32 (!%p455_p9), %s461_s5, 7 }
  0x39   : > { %s1999_s28 = scalar_lea.vmem (!%p455_p9), [#allocation3], %s1418_s27 }
  0x3c   : > { %v1634_v0 = vld [vmem:[%s2083_s0 + $0x4] ss:$16 sps:$4 sm:$0xff]   ;;  %v1637_v1 = vld [vmem:[%s2083_s0 + $0xc] ss:$16 sps:$4 sm:$0xff]   ;;  %v1540_v4 = vld [vmem:[%s1889_s11 + $0x70] ss:$8 sps:$4 sm:$0xff]  }
  0x3d   : > { %v1536_v2 = vld [vmem:[%s1889_s11 + $0x74] ss:$8 sps:$4 sm:$0xff]   ;;  %1019 = vmatprep.mubr.bf16.mxu0 %v1634_v0  ;;  %1092 = vmatprep.mubr.bf16.mxu1 %v1637_v1  ;;  %v1541_v5 = vld [vmem:[%s1889_s11 + $0x170] ss:$8 sps:$4 sm:$0xff]   ;;  %v1542_v6 = vld [vmem:[%s1889_s11 + $0x64] ss:$8 sps:$4 sm:$0xff]  }
  0x3e   : > { %v1538_v3 = vld [vmem:[%s1889_s11 + $0x174] ss:$8 sps:$4 sm:$0xff]   ;;  %987 = vmatprep.subr.bf16.mxu0 %v1536_v2  ;;  %v1544_v7 = vld [vmem:[%s1889_s11 + $0x164] ss:$8 sps:$4 sm:$0xff]   ;;  %v1546_v8 = vld [vmem:[%s1889_s11 + $0x60] ss:$8 sps:$4 sm:$0xff]  }
  0x3f   : > { %1060 = vmatprep.subr.bf16.mxu1 %v1538_v3  ;;  %988 = vmatpush1.bf16.msra.mxu0 %v1540_v4  ;;  %v1547_v9 = vld [vmem:[%s1889_s11 + $0x160] ss:$8 sps:$4 sm:$0xff]   ;;  %v1548_v10 = vld [vmem:[%s1889_s11 + $0x54] ss:$8 sps:$4 sm:$0xff]   ;;  %v1552_v12 = vld [vmem:[%s1889_s11 + $0x50] ss:$8 sps:$4 sm:$0xff]  }
  0x40   : > { %1061 = vmatpush1.bf16.msra.mxu1 %v1541_v5  ;;  %989 = vmatprep.subr.bf16.mxu0 %v1542_v6  ;;  %v1550_v11 = vld [vmem:[%s1889_s11 + $0x154] ss:$8 sps:$4 sm:$0xff]   ;;  %v1553_v13 = vld [vmem:[%s1889_s11 + $0x150] ss:$8 sps:$4 sm:$0xff]   ;;  %v1554_v14 = vld [vmem:[%s1889_s11 + $0x44] ss:$8 sps:$4 sm:$0xff]  }
  0x41   : > { %1062 = vmatprep.subr.bf16.mxu1 %v1544_v7  ;;  %v1556_v15 = vld [vmem:[%s1889_s11 + $0x144] ss:$8 sps:$4 sm:$0xff]   ;;  %v1558_v16 = vld [vmem:[%s1889_s11 + $0x40] ss:$8 sps:$4 sm:$0xff]   ;;  %v1560_v18 = vld [vmem:[%s1889_s11 + $0x34] ss:$8 sps:$4 sm:$0xff]  }
  0x42   : > { %v1559_v17 = vld [vmem:[%s1889_s11 + $0x140] ss:$8 sps:$4 sm:$0xff]   ;;  %v1562_v19 = vld [vmem:[%s1889_s11 + $0x134] ss:$8 sps:$4 sm:$0xff]   ;;  %v1564_v20 = vld [vmem:[%s1889_s11 + $0x30] ss:$8 sps:$4 sm:$0xff]  }
  0x43   : > { %990 = vmatpush1.bf16.msra.mxu0 %v1546_v8  ;;  %v1565_v21 = vld [vmem:[%s1889_s11 + $0x130] ss:$8 sps:$4 sm:$0xff]   ;;  %v1566_v22 = vld [vmem:[%s1889_s11 + $0x24] ss:$8 sps:$4 sm:$0xff]   ;;  %v1570_v24 = vld [vmem:[%s1889_s11 + $0x20] ss:$8 sps:$4 sm:$0xff]  }
  0x44   : > { %1063 = vmatpush1.bf16.msra.mxu1 %v1547_v9  ;;  %991 = vmatprep.subr.bf16.mxu0 %v1548_v10  ;;  %v1568_v23 = vld [vmem:[%s1889_s11 + $0x124] ss:$8 sps:$4 sm:$0xff]   ;;  %v1571_v25 = vld [vmem:[%s1889_s11 + $0x120] ss:$8 sps:$4 sm:$0xff]   ;;  %v1572_v26 = vld [vmem:[%s1889_s11 + $0x14] ss:$8 sps:$4 sm:$0xff]  }
  0x45   : > { %1064 = vmatprep.subr.bf16.mxu1 %v1550_v11  ;;  %v1574_v27 = vld [vmem:[%s1889_s11 + $0x114] ss:$8 sps:$4 sm:$0xff]   ;;  %v1576_v28 = vld [vmem:[%s1889_s11 + $0x10] ss:$8 sps:$4 sm:$0xff]   ;;  %v1578_v30 = vld [vmem:[%s1889_s11 + $0x4] ss:$8 sps:$4 sm:$0xff]  }
  0x46   : > { %v1577_v29 = vld [vmem:[%s1889_s11 + $0x110] ss:$8 sps:$4 sm:$0xff]   ;;  %v1580_v31 = vld [vmem:[%s1889_s11 + $0x104] ss:$8 sps:$4 sm:$0xff]   ;;  %v1582_v32 = vld [vmem:[%s1889_s11] ss:$8 sps:$4 sm:$0xff]  }
  0x47   : > { %992 = vmatpush1.bf16.msra.mxu0 %v1552_v12  ;;  %v1583_v33 = vld [vmem:[%s1889_s11 + $0x100] ss:$8 sps:$4 sm:$0xff]   ;;  %v1584_v34 = vld [vmem:[%s1889_s11 + $0xf4] ss:$8 sps:$4 sm:$0xff]   ;;  %v1588_v36 = vld [vmem:[%s1889_s11 + $0xf0] ss:$8 sps:$4 sm:$0xff]  }
  0x48   : > { %1065 = vmatpush1.bf16.msra.mxu1 %v1553_v13  ;;  %993 = vmatprep.subr.bf16.mxu0 %v1554_v14  ;;  %v1586_v35 = vld [vmem:[%s1889_s11 + $0x1f4] ss:$8 sps:$4 sm:$0xff]   ;;  %v1589_v37 = vld [vmem:[%s1889_s11 + $0x1f0] ss:$8 sps:$4 sm:$0xff]   ;;  %v1590_v38 = vld [vmem:[%s1889_s11 + $0xe4] ss:$8 sps:$4 sm:$0xff]  }
  0x49   : > { %1066 = vmatprep.subr.bf16.mxu1 %v1556_v15  ;;  %v1592_v39 = vld [vmem:[%s1889_s11 + $0x1e4] ss:$8 sps:$4 sm:$0xff]   ;;  %v1594_v40 = vld [vmem:[%s1889_s11 + $0xe0] ss:$8 sps:$4 sm:$0xff]   ;;  %v1596_v42 = vld [vmem:[%s1889_s11 + $0xd4] ss:$8 sps:$4 sm:$0xff]  }
  0x4a   : > { %v1595_v41 = vld [vmem:[%s1889_s11 + $0x1e0] ss:$8 sps:$4 sm:$0xff]   ;;  %v1598_v43 = vld [vmem:[%s1889_s11 + $0x1d4] ss:$8 sps:$4 sm:$0xff]   ;;  %v1600_v44 = vld [vmem:[%s1889_s11 + $0xd0] ss:$8 sps:$4 sm:$0xff]  }
  0x4b   : > { %994 = vmatpush1.bf16.msra.mxu0 %v1558_v16  ;;  %v1601_v45 = vld [vmem:[%s1889_s11 + $0x1d0] ss:$8 sps:$4 sm:$0xff]   ;;  %v1602_v46 = vld [vmem:[%s1889_s11 + $0xc4] ss:$8 sps:$4 sm:$0xff]   ;;  %v1606_v48 = vld [vmem:[%s1889_s11 + $0xc0] ss:$8 sps:$4 sm:$0xff]  }
  0x4c   : > { %1067 = vmatpush1.bf16.msra.mxu1 %v1559_v17  ;;  %995 = vmatprep.subr.bf16.mxu0 %v1560_v18  ;;  %v1604_v47 = vld [vmem:[%s1889_s11 + $0x1c4] ss:$8 sps:$4 sm:$0xff]   ;;  %v1607_v49 = vld [vmem:[%s1889_s11 + $0x1c0] ss:$8 sps:$4 sm:$0xff]   ;;  %v1608_v50 = vld [vmem:[%s1889_s11 + $0xb4] ss:$8 sps:$4 sm:$0xff]  }
  0x4d   : > { %1068 = vmatprep.subr.bf16.mxu1 %v1562_v19  ;;  %v1610_v51 = vld [vmem:[%s1889_s11 + $0x1b4] ss:$8 sps:$4 sm:$0xff]   ;;  %v1612_v52 = vld [vmem:[%s1889_s11 + $0xb0] ss:$8 sps:$4 sm:$0xff]   ;;  %v1614_v54 = vld [vmem:[%s1889_s11 + $0xa4] ss:$8 sps:$4 sm:$0xff]  }
  0x4e   : > { %v1613_v53 = vld [vmem:[%s1889_s11 + $0x1b0] ss:$8 sps:$4 sm:$0xff]   ;;  %v1616_v55 = vld [vmem:[%s1889_s11 + $0x1a4] ss:$8 sps:$4 sm:$0xff]   ;;  %v1618_v56 = vld [vmem:[%s1889_s11 + $0xa0] ss:$8 sps:$4 sm:$0xff]  }
  0x4f   : > { %996 = vmatpush1.bf16.msra.mxu0 %v1564_v20  ;;  %v1619_v57 = vld [vmem:[%s1889_s11 + $0x1a0] ss:$8 sps:$4 sm:$0xff]   ;;  %v1620_v58 = vld [vmem:[%s1889_s11 + $0x94] ss:$8 sps:$4 sm:$0xff]   ;;  %v1624_v60 = vld [vmem:[%s1889_s11 + $0x90] ss:$8 sps:$4 sm:$0xff]  }
  0x50   : > { %1069 = vmatpush1.bf16.msra.mxu1 %v1565_v21  ;;  %997 = vmatprep.subr.bf16.mxu0 %v1566_v22  ;;  %v1622_v59 = vld [vmem:[%s1889_s11 + $0x194] ss:$8 sps:$4 sm:$0xff]   ;;  %v1625_v61 = vld [vmem:[%s1889_s11 + $0x190] ss:$8 sps:$4 sm:$0xff]   ;;  %v1626_v62 = vld [vmem:[%s1889_s11 + $0x84] ss:$8 sps:$4 sm:$0xff]  }
  0x51   : > { %1070 = vmatprep.subr.bf16.mxu1 %v1568_v23  ;;  %v1628_v63 = vld [vmem:[%s1889_s11 + $0x184] ss:$8 sps:$4 sm:$0xff]   ;;  %v1630_v0 = vld [vmem:[%s1889_s11 + $0x80] ss:$8 sps:$4 sm:$0xff]   ;;  %s498_s15 = scalar_select %p497_p10, %s1721_s18, 1  ;;  %vm1173_vm0 = vcmask 7168  }
  0x52   : > { %v1631_v1 = vld [vmem:[%s1889_s11 + $0x180] ss:$8 sps:$4 sm:$0xff]   ;;  %v1638_v4 = vld [vmem:[%s2083_s0 + $0x24] ss:$16 sps:$4 sm:$0xff]   ;;  %v1640_v5 = vld [vmem:[%s2083_s0 + $0x2c] ss:$16 sps:$4 sm:$0xff]  }
  0x53   : > { %998 = vmatpush1.bf16.msra.mxu0 %v1570_v24  ;;  %v1632_v2 = vld [vmem:[%s2083_s0] ss:$16 sps:$4 sm:$0xff]   ;;  %v1635_v3 = vld [vmem:[%s2083_s0 + $0x8] ss:$16 sps:$4 sm:$0xff]   ;;  %v1644_v8 = vld [vmem:[%s2083_s0 + $0x44] ss:$16 sps:$4 sm:$0xff]  }
  0x54   : > { %1071 = vmatpush1.bf16.msra.mxu1 %v1571_v25  ;;  %999 = vmatprep.subr.bf16.mxu0 %v1572_v26  ;;  %v1642_v6 = vld [vmem:[%s2083_s0 + $0x20] ss:$16 sps:$4 sm:$0xff]   ;;  %v1643_v7 = vld [vmem:[%s2083_s0 + $0x28] ss:$16 sps:$4 sm:$0xff]   ;;  %v1646_v9 = vld [vmem:[%s2083_s0 + $0x4c] ss:$16 sps:$4 sm:$0xff]  }
  0x55   : > { %1072 = vmatprep.subr.bf16.mxu1 %v1574_v27  ;;  %v1648_v10 = vld [vmem:[%s2083_s0 + $0x40] ss:$16 sps:$4 sm:$0xff]   ;;  %v1649_v11 = vld [vmem:[%s2083_s0 + $0x48] ss:$16 sps:$4 sm:$0xff]   ;;  %v1650_v12 = vld [vmem:[%s2083_s0 + $0x64] ss:$16 sps:$4 sm:$0xff]  }
  0x56   : > { %v1652_v13 = vld [vmem:[%s2083_s0 + $0x6c] ss:$16 sps:$4 sm:$0xff]   ;;  %v1654_v14 = vld [vmem:[%s2083_s0 + $0x60] ss:$16 sps:$4 sm:$0xff]   ;;  %v1655_v15 = vld [vmem:[%s2083_s0 + $0x68] ss:$16 sps:$4 sm:$0xff]  }
  0x57   : > { %1000 = vmatpush1.bf16.msra.mxu0 %v1576_v28  ;;  %s1509_s5 = sshll.u32 %s498_s15, 6  ;;  %s1511_s10 = sshll.u32 (%p1736_p5), %s1721_s18, 4 }
  0x58   : > { %1073 = vmatpush1.bf16.msra.mxu1 %v1577_v29  ;;  %1001 = vmatprep.subr.bf16.mxu0 %v1578_v30  ;;  %s2022_s6 = scalar_lea.vmem %s2086_s3, %s1509_s5  ;;  %s506_s9 = scalar_lea.vmem %s2087_s4, %s1509_s5 }
  0x59   : > { %1074 = vmatprep.subr.bf16.mxu1 %v1580_v31  ;;  %s1249_s13 = scalar_lea.vmem (%p1736_p5), %s2085_s2, %s1511_s10 }
  0x5b   : > { %1002 = vmatpush1.bf16.msra.mxu0 %v1582_v32 }
  0x5c   : > { %1075 = vmatpush1.bf16.msra.mxu1 %v1583_v33  ;;  %1003 = vmatprep.subr.bf16.mxu0 %v1584_v34 }
  0x5d   : > { %1076 = vmatprep.subr.bf16.mxu1 %v1586_v35 }
  0x5f   : > { %1004 = vmatpush2.bf16.msra.mxu0 %v1588_v36 }
  0x60   : > { %1077 = vmatpush2.bf16.msra.mxu1 %v1589_v37  ;;  %1005 = vmatprep.subr.bf16.mxu0 %v1590_v38 }
  0x61   : > { %1078 = vmatprep.subr.bf16.mxu1 %v1592_v39 }
  0x63   : > { %1006 = vmatpush2.bf16.msra.mxu0 %v1594_v40 }
  0x64   : > { %1079 = vmatpush2.bf16.msra.mxu1 %v1595_v41  ;;  %1007 = vmatprep.subr.bf16.mxu0 %v1596_v42 }
  0x65   : > { %1080 = vmatprep.subr.bf16.mxu1 %v1598_v43 }
  0x67   : > { %1008 = vmatpush2.bf16.msra.mxu0 %v1600_v44 }
  0x68   : > { %1081 = vmatpush2.bf16.msra.mxu1 %v1601_v45  ;;  %1009 = vmatprep.subr.bf16.mxu0 %v1602_v46 }
  0x69   : > { %1082 = vmatprep.subr.bf16.mxu1 %v1604_v47 }
  0x6b   : > { %1010 = vmatpush2.bf16.msra.mxu0 %v1606_v48 }
  0x6c   : > { %1083 = vmatpush2.bf16.msra.mxu1 %v1607_v49  ;;  %1011 = vmatprep.subr.bf16.mxu0 %v1608_v50 }
  0x6d   : > { %1084 = vmatprep.subr.bf16.mxu1 %v1610_v51 }
  0x6f   : > { %1012 = vmatpush2.bf16.msra.mxu0 %v1612_v52 }
  0x70   : > { %1085 = vmatpush2.bf16.msra.mxu1 %v1613_v53  ;;  %1013 = vmatprep.subr.bf16.mxu0 %v1614_v54 }
  0x71   : > { %1086 = vmatprep.subr.bf16.mxu1 %v1616_v55 }
  0x73   : > { %1014 = vmatpush2.bf16.msra.mxu0 %v1618_v56 }
  0x74   : > { %1087 = vmatpush2.bf16.msra.mxu1 %v1619_v57  ;;  %1015 = vmatprep.subr.bf16.mxu0 %v1620_v58 }
  0x75   : > { %1088 = vmatprep.subr.bf16.mxu1 %v1622_v59 }
  0x77   : > { %1016 = vmatpush2.bf16.msra.mxu0 %v1624_v60 }
  0x78   : > { %1089 = vmatpush2.bf16.msra.mxu1 %v1625_v61  ;;  %1017 = vmatprep.subr.bf16.mxu0 %v1626_v62 }
  0x79   : > { %1090 = vmatprep.subr.bf16.mxu1 %v1628_v63 }
  0x7b   : > { %1018 = vmatpush2.bf16.msra.mxu0 %v1630_v0 }
  0x7c   : > { %1091 = vmatpush2.bf16.msra.mxu1 %v1631_v1 }
  0x7e   : > { %1020 = vmatmul.mubr.bf16.vlgmr.msra.gmra.mxu0 %v1632_v2 }
  0x7f   : > { %1093 = vmatmul.mubr.bf16.vlgmr.msra.gmra.mxu1 %v1635_v3  ;;  %1029 = vmatprep.mubr.bf16.mxu0 %v1638_v4 }
  0x80   : > { %1102 = vmatprep.mubr.bf16.mxu1 %v1640_v5 }
  0x86   : > { %1030 = vmatmul.mubr.bf16.gmra.mxu0 %v1642_v6 }
  0x87   : > { %1103 = vmatmul.mubr.bf16.gmra.mxu1 %v1643_v7  ;;  %1039 = vmatprep.mubr.bf16.mxu0 %v1644_v8 }
  0x88   : > { %1112 = vmatprep.mubr.bf16.mxu1 %v1646_v9 }
  0x8e   : > { %1040 = vmatmul.mubr.bf16.gmra.mxu0 %v1648_v10 }
  0x8f   : > { %1113 = vmatmul.mubr.bf16.gmra.mxu1 %v1649_v11  ;;  %1049 = vmatprep.mubr.bf16.mxu0 %v1650_v12 }
  0x90   : > { %1122 = vmatprep.mubr.bf16.mxu1 %v1652_v13 }
  0x96   : > { %1050 = vmatmul.mubr.bf16.gmra.mxu0 %v1654_v14 }
  0x97   : > { %1123 = vmatmul.mubr.bf16.gmra.mxu1 %v1655_v15 }
 0x13e   : > { %v1021_v16 = vpop.f32.mrf.mxu0 }
 0x13f   : > { %v1094_v17 = vpop.f32.mrf.mxu1 }
 0x140   : > { %v1095_v18 = vadd.f32 %v1094_v17, %v1021_v16  ;;  %v1023_v19 = vpop.f32.mrf.mxu0 }
 0x141   : > { %v1096_v20 = vpop.f32.mrf.mxu1 }
 0x142   : > { %1133 = vst [vmem:[%s1999_s28] sm:$0xff] %v1095_v18  ;;  %v1097_v21 = vadd.f32 %v1096_v20, %v1023_v19  ;;  %v1025_v22 = vpop.f32.mrf.mxu0  ;;  %v1182_v30 = vmul.f32 %v1095_v18, %v1095_v18 }
 0x143   : > { %v1098_v23 = vpop.f32.mrf.mxu1 }
 0x144   : > { %1134 = vst [vmem:[%s1999_s28 + $0x8] sm:$0xff] %v1097_v21  ;;  %v1099_v24 = vadd.f32 %v1098_v23, %v1025_v22  ;;  %v1149_v25 = vadd.f32 %v1097_v21, %v1095_v18  ;;  %v1183_v26 = vmul.f32 %v1097_v21, %v1097_v21  ;;  %v1027_v27 = vpop.f32.mrf.mxu0 }
 0x145   : > { %v1100_v28 = vpop.f32.mrf.mxu1 }
 0x146   : > { %1135 = vst [vmem:[%s1999_s28 + $0x10] sm:$0xff] %v1099_v24  ;;  %v1101_v29 = vadd.f32 %v1100_v28, %v1027_v27  ;;  %1150 = vadd.xlane.f32.xlu0 %v1149_v25  ;;  %v1031_v31 = vpop.f32.mrf.mxu0  ;;  %v1198_v34 = vadd.f32 %v1183_v26, %v1182_v30  ;;  %v1184_v35 = vmul.f32 %v1099_v24, %v1099_v24 }
 0x147   : > { %v1104_v32 = vpop.f32.mrf.mxu1 }
 0x148   : > { %1136 = vst [vmem:[%s1999_s28 + $0x18] sm:$0xff] %v1101_v29  ;;  %v1105_v33 = vadd.f32 %v1104_v32, %v1031_v31  ;;  %v1185_v36 = vmul.f32 %v1101_v29, %v1101_v29  ;;  %v1033_v37 = vpop.f32.mrf.mxu0  ;;  %v1152_v44 = vadd.f32 %v1101_v29, %v1099_v24 }
 0x149   : > { %v1106_v38 = vpop.f32.mrf.mxu1 }
 0x14a   : > { %1137 = vst [vmem:[%s1999_s28 + $0x20] sm:$0xff] %v1105_v33  ;;  %v1107_v39 = vadd.f32 %v1106_v38, %v1033_v37  ;;  %1199 = vadd.xlane.f32.xlu0 %v1198_v34  ;;  %v1201_v40 = vadd.f32 %v1185_v36, %v1184_v35  ;;  %v1035_v41 = vpop.f32.mrf.mxu0  ;;  %v1186_v45 = vmul.f32 %v1105_v33, %v1105_v33 }
 0x14b   : > { %v1108_v42 = vpop.f32.mrf.mxu1 }
 0x14c   : > { %1138 = vst [vmem:[%s1999_s28 + $0x28] sm:$0xff] %v1107_v39  ;;  %v1109_v43 = vadd.f32 %v1108_v42, %v1035_v41  ;;  %1202 = vadd.xlane.f32.xlu1 %v1201_v40  ;;  %v1187_v46 = vmul.f32 %v1107_v39, %v1107_v39  ;;  %v1037_v47 = vpop.f32.mrf.mxu0  ;;  %v1155_v50 = vadd.f32 %v1107_v39, %v1105_v33 }
 0x14d   : > { %v1110_v48 = vpop.f32.mrf.mxu1 }
 0x14e   : > { %1139 = vst [vmem:[%s1999_s28 + $0x30] sm:$0xff] %v1109_v43  ;;  %v1111_v49 = vadd.f32 %v1110_v48, %v1037_v47  ;;  %1153 = vadd.xlane.f32.xlu0 %v1152_v44  ;;  %v1041_v51 = vpop.f32.mrf.mxu0  ;;  %v1204_v54 = vadd.f32 %v1187_v46, %v1186_v45  ;;  %v1188_v62 = vmul.f32 %v1109_v43, %v1109_v43  ;;  %v1262_v48 = vld [vmem:[%s1999_s28] sm:$0xff] (%p1736_p5) }
 0x14f   : > { %v1114_v52 = vpop.f32.mrf.mxu1  ;;  %1263 = vst [vmem:[%s1249_s13] sm:$0xff] (%p1736_p5), %v1262_v48 }
 0x150   : > { %1140 = vst [vmem:[%s1999_s28 + $0x38] sm:$0xff] %v1111_v49  ;;  %v1115_v53 = vadd.f32 %v1114_v52, %v1041_v51  ;;  %1156 = vadd.xlane.f32.xlu1 %v1155_v50  ;;  %v1043_v55 = vpop.f32.mrf.mxu0  ;;  %v1158_v58 = vadd.f32 %v1111_v49, %v1109_v43  ;;  %v1189_v59 = vmul.f32 %v1111_v49, %v1111_v49  ;;  %v1264_v49 = vld [vmem:[%s1999_s28 + $0x8] sm:$0xff] (%p1736_p5)  ;;  %v1266_v50 = vld [vmem:[%s1999_s28 + $0x10] sm:$0xff] (%p1736_p5)  ;;  %v1268_v51 = vld [vmem:[%s1999_s28 + $0x18] sm:$0xff] (%p1736_p5) }
 0x151   : > { %v1116_v56 = vpop.f32.mrf.mxu1  ;;  %v1270_v52 = vld [vmem:[%s1999_s28 + $0x20] sm:$0xff] (%p1736_p5)  ;;  %1265 = vst [vmem:[%s1249_s13 + $0x8] sm:$0xff] (%p1736_p5), %v1264_v49  ;;  %1267 = vst [vmem:[%s1249_s13 + $0x20] sm:$0xff] (%p1736_p5), %v1266_v50 }
 0x152   : > { %1141 = vst [vmem:[%s1999_s28 + $0x40] sm:$0xff] %v1115_v53  ;;  %v1117_v57 = vadd.f32 %v1116_v56, %v1043_v55  ;;  %1205 = vadd.xlane.f32.xlu0 %v1204_v54  ;;  %v1045_v60 = vpop.f32.mrf.mxu0  ;;  %v1190_v1 = vmul.f32 %v1115_v53, %v1115_v53  ;;  %v1207_v6 = vadd.f32 %v1189_v59, %v1188_v62  ;;  %1269 = vst [vmem:[%s1249_s13 + $0x28] sm:$0xff] (%p1736_p5), %v1268_v51 }
 0x153   : > { %v1118_v61 = vpop.f32.mrf.mxu1  ;;  %1271 = vst [vmem:[%s1249_s13 + $0x40] sm:$0xff] (%p1736_p5), %v1270_v52 }
 0x154   : > { %1142 = vst [vmem:[%s1999_s28 + $0x48] sm:$0xff] %v1117_v57  ;;  %v1119_v63 = vadd.f32 %v1118_v61, %v1045_v60  ;;  %1159 = vadd.xlane.f32.xlu1 %v1158_v58  ;;  %v1161_v0 = vadd.f32 %v1117_v57, %v1115_v53  ;;  %v1191_v2 = vmul.f32 %v1117_v57, %v1117_v57  ;;  %v1047_v3 = vpop.f32.mrf.mxu0  ;;  %v1272_v53 = vld [vmem:[%s1999_s28 + $0x28] sm:$0xff] (%p1736_p5) }
 0x155   : > { %v1120_v4 = vpop.f32.mrf.mxu1  ;;  %1273 = vst [vmem:[%s1249_s13 + $0x48] sm:$0xff] (%p1736_p5), %v1272_v53  ;;  %v1274_v54 = vld [vmem:[%s1999_s28 + $0x30] sm:$0xff] (%p1736_p5) }
 0x156   : > { %1143 = vst [vmem:[%s1999_s28 + $0x50] sm:$0xff] %v1119_v63  ;;  %v1121_v5 = vadd.f32 %v1120_v4, %v1047_v3  ;;  %1162 = vadd.xlane.f32.xlu0 %v1161_v0  ;;  %v1051_v7 = vpop.f32.mrf.mxu0  ;;  %v1210_v10 = vadd.f32 %v1191_v2, %v1190_v1  ;;  %v1192_v18 = vmul.f32 %v1119_v63, %v1119_v63  ;;  %1275 = vst [vmem:[%s1249_s13 + $0x60] sm:$0xff] (%p1736_p5), %v1274_v54 }
 0x157   : > { %v1124_v8 = vpop.f32.mrf.mxu1  ;;  %v1276_v55 = vld [vmem:[%s1999_s28 + $0x38] sm:$0xff] (%p1736_p5) }
 0x158   : > { %1144 = vst [vmem:[%s1999_s28 + $0x58] sm:$0xff] %v1121_v5  ;;  %v1125_v9 = vadd.f32 %v1124_v8, %v1051_v7  ;;  %1208 = vadd.xlane.f32.xlu1 %v1207_v6  ;;  %v1053_v11 = vpop.f32.mrf.mxu0  ;;  %v1164_v14 = vadd.f32 %v1121_v5, %v1119_v63  ;;  %v1193_v15 = vmul.f32 %v1121_v5, %v1121_v5  ;;  %1277 = vst [vmem:[%s1249_s13 + $0x68] sm:$0xff] (%p1736_p5), %v1276_v55 }
 0x159   : > { %v1126_v12 = vpop.f32.mrf.mxu1  ;;  %v1278_v56 = vld [vmem:[%s1999_s28 + $0x40] sm:$0xff] (%p1736_p5) }
 0x15a   : > { %1145 = vst [vmem:[%s1999_s28 + $0x60] sm:$0xff] %v1125_v9  ;;  %v1127_v13 = vadd.f32 %v1126_v12, %v1053_v11  ;;  %1211 = vadd.xlane.f32.xlu0 %v1210_v10  ;;  %v1055_v16 = vpop.f32.mrf.mxu0  ;;  %v1194_v21 = vmul.f32 %v1125_v9, %v1125_v9  ;;  %v1213_v26 = vadd.f32 %v1193_v15, %v1192_v18  ;;  %1279 = vst [vmem:[%s1249_s13 + $0x80] sm:$0xff] (%p1736_p5), %v1278_v56 }
 0x15b   : > { %v1128_v17 = vpop.f32.mrf.mxu1  ;;  %v1280_v57 = vld [vmem:[%s1999_s28 + $0x48] sm:$0xff] (%p1736_p5) }
 0x15c   : > { %1146 = vst [vmem:[%s1999_s28 + $0x68] sm:$0xff] %v1127_v13  ;;  %v1129_v19 = vadd.f32 %v1128_v17, %v1055_v16  ;;  %1165 = vadd.xlane.f32.xlu1 %v1164_v14  ;;  %v1167_v20 = vadd.f32 %v1127_v13, %v1125_v9  ;;  %v1195_v22 = vmul.f32 %v1127_v13, %v1127_v13  ;;  %v1057_v23 = vpop.f32.mrf.mxu0  ;;  %1281 = vst [vmem:[%s1249_s13 + $0x88] sm:$0xff] (%p1736_p5), %v1280_v57 }
 0x15d   : > { %v1130_v24 = vpop.f32.mrf.mxu1  ;;  %v1282_v58 = vld [vmem:[%s1999_s28 + $0x50] sm:$0xff] (%p1736_p5) }
 0x15e   : > { %1147 = vst [vmem:[%s1999_s28 + $0x70] sm:$0xff] %v1129_v19  ;;  %v1131_v25 = vadd.f32 %v1130_v24, %v1057_v23  ;;  %1168 = vadd.xlane.f32.xlu0 %v1167_v20  ;;  %v1216_v27 = vadd.f32 %v1195_v22, %v1194_v21  ;;  %v1196_v30 = vmul.f32 %v1129_v19, %v1129_v19  ;;  %1283 = vst [vmem:[%s1249_s13 + $0xa0] sm:$0xff] (%p1736_p5), %v1282_v58 }
 0x15f   : > { %v1284_v59 = vld [vmem:[%s1999_s28 + $0x58] sm:$0xff] (%p1736_p5) }
 0x160   : > { %1148 = vst [vmem:[%s1999_s28 + $0x78] sm:$0xff] %v1131_v25  ;;  %1214 = vadd.xlane.f32.xlu1 %v1213_v26  ;;  %v1170_v28 = vadd.f32 %v1131_v25, %v1129_v19  ;;  %v1197_v29 = vmul.f32 %v1131_v25, %v1131_v25  ;;  %1285 = vst [vmem:[%s1249_s13 + $0xa8] sm:$0xff] (%p1736_p5), %v1284_v59 }
 0x161   : > { %v1286_v60 = vld [vmem:[%s1999_s28 + $0x60] sm:$0xff] (%p1736_p5) }
 0x162   : > { %1217 = vadd.xlane.f32.xlu0 %v1216_v27  ;;  %v1219_v31 = vadd.f32 %v1197_v29, %v1196_v30  ;;  %1287 = vst [vmem:[%s1249_s13 + $0xc0] sm:$0xff] (%p1736_p5), %v1286_v60 }
 0x163   : > { %v1288_v61 = vld [vmem:[%s1999_s28 + $0x68] sm:$0xff] (%p1736_p5) }
 0x164   : > { %1171 = vadd.xlane.f32.xlu1 %v1170_v28  ;;  %1289 = vst [vmem:[%s1249_s13 + $0xc8] sm:$0xff] (%p1736_p5), %v1288_v61 }
 0x165   : > { %v1290_v62 = vld [vmem:[%s1999_s28 + $0x70] sm:$0xff] (%p1736_p5) }
 0x166   : > { %1291 = vst [vmem:[%s1249_s13 + $0xe0] sm:$0xff] (%p1736_p5), %v1290_v62 }
 0x167   : > { %v1292_v63 = vld [vmem:[%s1999_s28 + $0x78] sm:$0xff] (%p1736_p5) }
 0x168   : > { %1220 = vadd.xlane.f32.xlu1 %v1219_v31  ;;  %1293 = vst [vmem:[%s1249_s13 + $0xe8] sm:$0xff] (%p1736_p5), %v1292_v63 }
 0x1cf   : > { %v1151_v32 = vpop.xlane.xlu0 %1150 }
 0x1d0   : > { %1174 = vst.msk [vmem:[%s2022_s6] sm:$0xff] %vm1173_vm0, %v1151_v32 }
 0x1d3   : > { %v1200_v33 = vpop.xlane.xlu0 %1199 }
 0x1d4   : > { %1222 = vst.msk [vmem:[%s506_s9] sm:$0xff] %vm1173_vm0, %v1200_v33 }
 0x1d5   : > { %v1203_v34 = vpop.xlane.xlu1 %1202 }
 0x1d6   : > { %1223 = vst.msk [vmem:[%s506_s9 + $0x8] sm:$0xff] %vm1173_vm0, %v1203_v34 }
 0x1d7   : > { %v1154_v35 = vpop.xlane.xlu0 %1153 }
 0x1d8   : > { %1175 = vst.msk [vmem:[%s2022_s6 + $0x8] sm:$0xff] %vm1173_vm0, %v1154_v35 }
 0x1d9   : > { %v1157_v36 = vpop.xlane.xlu1 %1156 }
 0x1da   : > { %1176 = vst.msk [vmem:[%s2022_s6 + $0x10] sm:$0xff] %vm1173_vm0, %v1157_v36 }
 0x1db   : > { %v1206_v37 = vpop.xlane.xlu0 %1205 }
 0x1dc   : > { %1224 = vst.msk [vmem:[%s506_s9 + $0x10] sm:$0xff] %vm1173_vm0, %v1206_v37 }
 0x1dd   : > { %v1160_v38 = vpop.xlane.xlu1 %1159 }
 0x1de   : > { %1177 = vst.msk [vmem:[%s2022_s6 + $0x18] sm:$0xff] %vm1173_vm0, %v1160_v38 }
 0x1df   : > { %v1163_v39 = vpop.xlane.xlu0 %1162 }
 0x1e0   : > { %1178 = vst.msk [vmem:[%s2022_s6 + $0x20] sm:$0xff] %vm1173_vm0, %v1163_v39 }
 0x1e1   : > { %v1209_v40 = vpop.xlane.xlu1 %1208 }
 0x1e2   : > { %1225 = vst.msk [vmem:[%s506_s9 + $0x18] sm:$0xff] %vm1173_vm0, %v1209_v40 }
 0x1e3   : > { %v1212_v41 = vpop.xlane.xlu0 %1211 }
 0x1e4   : > { %1226 = vst.msk [vmem:[%s506_s9 + $0x20] sm:$0xff] %vm1173_vm0, %v1212_v41 }
 0x1e5   : > { %v1166_v42 = vpop.xlane.xlu1 %1165 }
 0x1e6   : > { %1179 = vst.msk [vmem:[%s2022_s6 + $0x28] sm:$0xff] %vm1173_vm0, %v1166_v42 }
 0x1e7   : > { %v1169_v43 = vpop.xlane.xlu0 %1168 }
 0x1e8   : > { %1180 = vst.msk [vmem:[%s2022_s6 + $0x30] sm:$0xff] %vm1173_vm0, %v1169_v43 }
 0x1e9   : > { %v1215_v44 = vpop.xlane.xlu1 %1214 }
 0x1ea   : > { %1227 = vst.msk [vmem:[%s506_s9 + $0x28] sm:$0xff] %vm1173_vm0, %v1215_v44 }
 0x1eb   : > { %v1218_v45 = vpop.xlane.xlu0 %1217 }
 0x1ec   : > { %1228 = vst.msk [vmem:[%s506_s9 + $0x30] sm:$0xff] %vm1173_vm0, %v1218_v45 }
 0x1ed   : > { %v1172_v46 = vpop.xlane.xlu1 %1171 }
 0x1ee   : > { %1181 = vst.msk [vmem:[%s2022_s6 + $0x38] sm:$0xff] %vm1173_vm0, %v1172_v46  ;;  %1246 = sbr.rel (!%p1736_p5) target bundleno = 499 (0x1f3), region = 70 }
 0x1f1   : > { %v1221_v47 = vpop.xlane.xlu1 %1220 }
 0x1f2   : > { %1229 = vst.msk [vmem:[%s506_s9 + $0x38] sm:$0xff] %vm1173_vm0, %v1221_v47 }
 0x1f3 PF: > { %p12_p11 = scmp.ge.s32.totalorder %s1724_s19, 4   ;;  %s2089_s15 = smov %s1674_s16 }
 0x1f4   : > { %s2090_s16 = smov %s1734_s22  ;;  %s2091_s17 = smov %s1724_s19 }
 0x1f5   :  { %14 = sbr.rel (!%p12_p11) target bundleno = 2 (0x2), region = 148 }

// kernel: discriminator_forward.10
= control target key start
LH: loop header
LB: loop body
LE: loop exit
PB: predicated region body
PF: predicated region fallthrough
CT: control target
= control target key end

     0   :  { %v645_v0 = vmov 0   ;;  %s1130_s1 = inlined_call_operand.vmem [shape: f32[64,1], index: 1, kind: input, shape index: {}]   ;;  %s1131_s2 = inlined_call_operand.vmem [shape: f32[64,1], index: 2, kind: input, shape index: {}]   ;;  %s1132_s0 = inlined_call_operand.vmem [shape: f32[64,512], index: 0, kind: input, shape index: {}]   ;;  %s1133_s3 = inlined_call_operand.vmem [shape: bf16[64,512], index: 3, kind: output, shape index: {}]  }
   0x1   :  { %580 = vset.pattern.permute.xlu1 %v645_v0  ;;  %579 = vset.pattern.permute.xlu0 %v645_v0  ;;  %v48_v1 = vld [vmem:[%s1130_s1 + $0x10] sm:$0xff]  ;;  %v46_v2 = vld [vmem:[%s1130_s1] sm:$0xff]  ;;  %v49_v3 = vld [vmem:[%s1130_s1 + $0x18] sm:$0xff] }
   0x2   :  { %66 = vperm.xlu1 %580, %v48_v1   ;;  %56 = vperm.xlu0 %579, %v46_v2   ;;  %v47_v4 = vld [vmem:[%s1130_s1 + $0x8] sm:$0xff]  ;;  %v50_v6 = vld [vmem:[%s1130_s1 + $0x20] sm:$0xff]  ;;  %v53_v7 = vld [vmem:[%s1130_s1 + $0x38] sm:$0xff] }
   0x3   :  { %v51_v5 = vld [vmem:[%s1130_s1 + $0x28] sm:$0xff]  ;;  %v52_v8 = vld [vmem:[%s1130_s1 + $0x30] sm:$0xff]  ;;  %v126_v10 = vld [vmem:[%s1131_s2] sm:$0xff] }
   0x4   :  { %v127_v9 = vld [vmem:[%s1131_s2 + $0x8] sm:$0xff]  ;;  %v129_v11 = vld [vmem:[%s1131_s2 + $0x18] sm:$0xff]  ;;  %v128_v12 = vld [vmem:[%s1131_s2 + $0x10] sm:$0xff] }
   0x5   :  { %v131_v13 = vld [vmem:[%s1131_s2 + $0x28] sm:$0xff]  ;;  %v130_v14 = vld [vmem:[%s1131_s2 + $0x20] sm:$0xff]  ;;  %v133_v15 = vld [vmem:[%s1131_s2 + $0x38] sm:$0xff] }
   0x6   :  { %71 = vperm.xlu1 %580, %v49_v3   ;;  %61 = vperm.xlu0 %579, %v47_v4   ;;  %v132_v16 = vld [vmem:[%s1131_s2 + $0x30] sm:$0xff]  ;;  %v22_v21 = vld [vmem:[%s1132_s0 + $0x40] sm:$0xff]  ;;  %v23_v22 = vld [vmem:[%s1132_s0 + $0x48] sm:$0xff] }
   0x7   :  { %v24_v23 = vld [vmem:[%s1132_s0 + $0x50] sm:$0xff]  ;;  %v25_v24 = vld [vmem:[%s1132_s0 + $0x58] sm:$0xff]  ;;  %v14_v27 = vld [vmem:[%s1132_s0] sm:$0xff] }
   0x8   :  { %v15_v28 = vld [vmem:[%s1132_s0 + $0x8] sm:$0xff]  ;;  %v16_v29 = vld [vmem:[%s1132_s0 + $0x10] sm:$0xff]  ;;  %v17_v30 = vld [vmem:[%s1132_s0 + $0x18] sm:$0xff] }
   0x9   :  { %v26_v31 = vld [vmem:[%s1132_s0 + $0x60] sm:$0xff]  ;;  %v27_v32 = vld [vmem:[%s1132_s0 + $0x68] sm:$0xff]  ;;  %v28_v33 = vld [vmem:[%s1132_s0 + $0x70] sm:$0xff] }
   0xa   :  { %81 = vperm.xlu1 %580, %v51_v5   ;;  %76 = vperm.xlu0 %579, %v50_v6   ;;  %v29_v34 = vld [vmem:[%s1132_s0 + $0x78] sm:$0xff]  ;;  %v18_v35 = vld [vmem:[%s1132_s0 + $0x20] sm:$0xff]  ;;  %v19_v39 = vld [vmem:[%s1132_s0 + $0x28] sm:$0xff] }
   0xb   :  { %v20_v40 = vld [vmem:[%s1132_s0 + $0x30] sm:$0xff]  ;;  %v21_v41 = vld [vmem:[%s1132_s0 + $0x38] sm:$0xff]  ;;  %v34_v48 = vld [vmem:[%s1132_s0 + $0xa0] sm:$0xff] }
   0xc   :  { %v35_v49 = vld [vmem:[%s1132_s0 + $0xa8] sm:$0xff]  ;;  %v36_v50 = vld [vmem:[%s1132_s0 + $0xb0] sm:$0xff]  ;;  %v37_v55 = vld [vmem:[%s1132_s0 + $0xb8] sm:$0xff] }
   0xd   :  { %v30_v60 = vld [vmem:[%s1132_s0 + $0x80] sm:$0xff]  ;;  %v31_v61 = vld [vmem:[%s1132_s0 + $0x88] sm:$0xff]  ;;  %v32_v62 = vld [vmem:[%s1132_s0 + $0x90] sm:$0xff] }
   0xe   :  { %91 = vperm.xlu1 %580, %v53_v7   ;;  %86 = vperm.xlu0 %579, %v52_v8   ;;  %v33_v5 = vld [vmem:[%s1132_s0 + $0x98] sm:$0xff] }
  0x12   :  { %141 = vperm.xlu1 %580, %v127_v9   ;;  %136 = vperm.xlu0 %579, %v126_v10  }
  0x16   :  { %151 = vperm.xlu1 %580, %v129_v11   ;;  %146 = vperm.xlu0 %579, %v128_v12  }
  0x1a   :  { %161 = vperm.xlu1 %580, %v131_v13   ;;  %156 = vperm.xlu0 %579, %v130_v14   ;;  %v42_v14 = vld [vmem:[%s1132_s0 + $0xe0] sm:$0xff] }
  0x1e   :  { %171 = vperm.xlu1 %580, %v133_v15   ;;  %166 = vperm.xlu0 %579, %v132_v16   ;;  %v43_v15 = vld [vmem:[%s1132_s0 + $0xe8] sm:$0xff]  ;;  %v44_v16 = vld [vmem:[%s1132_s0 + $0xf0] sm:$0xff] }
  0x7d   :  { %v67_v17 = vpop.permute.xlu1 %66  ;;  %v57_v18 = vpop.permute.xlu0 %56 }
  0x7e   :  { %v755_v36 = vmul.f32 %v67_v17, %v22_v21  ;;  %v757_v37 = vmul.f32 %v67_v17, %v23_v22  ;;  %v759_v38 = vmul.f32 %v67_v17, %v24_v23  ;;  %v774_v44 = vmul.f32 %v67_v17, %v25_v24 }
  0x7f   :  { %v94_v45 = vmul.f32 %v57_v18, %v14_v27  ;;  %v95_v46 = vmul.f32 %v57_v18, %v15_v28  ;;  %v96_v47 = vmul.f32 %v57_v18, %v16_v29  ;;  %v97_v51 = vmul.f32 %v57_v18, %v17_v30  ;;  %v45_v28 = vld [vmem:[%s1132_s0 + $0xf8] sm:$0xff] }
  0x81   :  { %v72_v19 = vpop.permute.xlu1 %71  ;;  %v62_v20 = vpop.permute.xlu0 %61 }
  0x82   :  { %v106_v52 = vmul.f32 %v72_v19, %v26_v31  ;;  %v107_v53 = vmul.f32 %v72_v19, %v27_v32  ;;  %v108_v54 = vmul.f32 %v72_v19, %v28_v33  ;;  %v98_v56 = vmul.f32 %v62_v20, %v18_v35 }
  0x83   :  { %v99_v57 = vmul.f32 %v62_v20, %v19_v39  ;;  %v100_v58 = vmul.f32 %v62_v20, %v20_v40  ;;  %v101_v59 = vmul.f32 %v62_v20, %v21_v41  ;;  %v109_v63 = vmul.f32 %v72_v19, %v29_v34 }
  0x85   :  { %v82_v25 = vpop.permute.xlu1 %81  ;;  %v726_v26 = vpop.permute.xlu0 %76 }
  0x86   :  { %v797_v0 = vmul.f32 %v82_v25, %v34_v48  ;;  %v799_v1 = vmul.f32 %v82_v25, %v35_v49  ;;  %v801_v2 = vmul.f32 %v82_v25, %v36_v50  ;;  %v814_v10 = vmul.f32 %v82_v25, %v37_v55  ;;  %v39_v49 = vld [vmem:[%s1132_s0 + $0xc8] sm:$0xff]  ;;  %v40_v55 = vld [vmem:[%s1132_s0 + $0xd0] sm:$0xff] }
  0x87   :  { %v817_v11 = vmul.f32 %v726_v26, %v30_v60  ;;  %v820_v12 = vmul.f32 %v726_v26, %v31_v61  ;;  %v823_v13 = vmul.f32 %v726_v26, %v32_v62  ;;  %v847_v27 = vmul.f32 %v726_v26, %v33_v5  ;;  %v41_v5 = vld [vmem:[%s1132_s0 + $0xd8] sm:$0xff] }
  0x89   :  { %v770_v42 = vpop.permute.xlu1 %91  ;;  %v772_v43 = vpop.permute.xlu0 %86 }
  0x8a   :  { %v853_v29 = vmul.f32 %v770_v42, %v42_v14  ;;  %v856_v30 = vmul.f32 %v770_v42, %v43_v15  ;;  %v859_v31 = vmul.f32 %v770_v42, %v44_v16  ;;  %v890_v60 = vmul.f32 %v772_v43, %v39_v49 }
  0x8b   :  { %v895_v62 = vmul.f32 %v772_v43, %v40_v55 }
  0x8d   :  { %v142_v3 = vpop.permute.xlu1 %141  ;;  %v137_v4 = vpop.permute.xlu0 %136 }
  0x8e   :  { %v806_v6 = vadd.f32 %v142_v3, %v98_v56  ;;  %v808_v7 = vadd.f32 %v142_v3, %v99_v57  ;;  %v810_v8 = vadd.f32 %v142_v3, %v100_v58  ;;  %v812_v9 = vadd.f32 %v142_v3, %v101_v59 }
  0x8f   :  { %v834_v17 = vadd.f32 %v137_v4, %v94_v45  ;;  %v836_v18 = vadd.f32 %v137_v4, %v95_v46  ;;  %v838_v19 = vadd.f32 %v137_v4, %v96_v47  ;;  %v840_v20 = vadd.f32 %v137_v4, %v97_v51  ;;  %v38_v45 = vld [vmem:[%s1132_s0 + $0xc0] sm:$0xff] }
  0x90   :  { %v242_v21 = vmin.f32 %v806_v6, 0.0  ;;  %v243_v22 = vmin.f32 %v808_v7, 0.0  ;;  %v244_v23 = vmin.f32 %v810_v8, 0.0  ;;  %v245_v24 = vmin.f32 %v812_v9, 0.0 }
  0x91   :  { %v152_v25 = vpop.permute.xlu1 %151  ;;  %v238_v39 = vmin.f32 %v834_v17, 0.0  ;;  %v239_v40 = vmin.f32 %v836_v18, 0.0  ;;  %v240_v41 = vmin.f32 %v838_v19, 0.0  ;;  %v241_v46 = vmin.f32 %v840_v20, 0.0 }
  0x92   :  { %v278_v32 = vmul.f32 1.442695, %v242_v21  ;;  %v280_v33 = vmul.f32 1.442695, %v243_v22  ;;  %v282_v34 = vmul.f32 1.442695, %v244_v23  ;;  %v861_v35 = vadd.f32 %v152_v25, %v106_v52 }
  0x93   :  { %v284_v26 = vmul.f32 1.442695, %v245_v24  ;;  %v870_v47 = vadd.f32 %v152_v25, %v107_v53  ;;  %v872_v48 = vadd.f32 %v152_v25, %v108_v54  ;;  %v270_v50 = vmul.f32 1.442695, %v238_v39  ;;  %v147_v54 = vpop.permute.xlu0 %146 }
  0x94   :  { %581 = vpow2.f32 %v278_v32  ;;  %v272_v51 = vmul.f32 1.442695, %v239_v40  ;;  %v878_v52 = vmul.f32 %v770_v42, %v45_v28  ;;  %v274_v56 = vmul.f32 1.442695, %v240_v41 }
  0x95   :  { %583 = vpow2.f32 %v280_v33  ;;  %v883_v53 = vadd.f32 %v152_v25, %v109_v63  ;;  %v886_v57 = vmul.f32 %v772_v43, %v38_v45  ;;  %v276_v58 = vmul.f32 1.442695, %v241_v46  ;;  %v162_v24 = vpop.permute.xlu1 %161 }
  0x96   :  { %585 = vpow2.f32 %v282_v34  ;;  %v250_v59 = vmin.f32 %v861_v35, 0.0  ;;  %v251_v42 = vmin.f32 %v870_v47, 0.0  ;;  %v252_v61 = vmin.f32 %v872_v48, 0.0 }
  0x97   :  { %587 = vpow2.f32 %v284_v26  ;;  %v253_v63 = vmin.f32 %v883_v53, 0.0  ;;  %v899_v4 = vadd.f32 %v147_v54, %v755_v36  ;;  %v905_v16 = vadd.f32 %v147_v54, %v757_v37 }
  0x98   :  { %589 = vpow2.f32 %v270_v50  ;;  %v294_v3 = vmul.f32 1.442695, %v250_v59  ;;  %v296_v14 = vmul.f32 1.442695, %v251_v42  ;;  %v298_v15 = vmul.f32 1.442695, %v252_v61 }
  0x99   :  { %591 = vpow2.f32 %v272_v51  ;;  %v300_v21 = vmul.f32 1.442695, %v253_v63  ;;  %v908_v22 = vadd.f32 %v147_v54, %v759_v38  ;;  %v911_v23 = vadd.f32 %v147_v54, %v774_v44 }
  0x9a   :  { %593 = vpow2.f32 %v274_v56  ;;  %vm210_vm0 = vcmp.gt.f32.partialorder %v806_v6, 0.0  ;;  %v246_v36 = vmin.f32 %v899_v4, 0.0  ;;  %v916_v25 = vmul.f32 %v772_v43, %v41_v5 }
  0x9b   :  { %595 = vpow2.f32 %v276_v58  ;;  %vm211_vm1 = vcmp.gt.f32.partialorder %v808_v7, 0.0  ;;  %vm212_vm2 = vcmp.gt.f32.partialorder %v810_v8, 0.0  ;;  %v247_v37 = vmin.f32 %v905_v16, 0.0 }
  0x9c   :  { %597 = vpow2.f32 %v294_v3  ;;  %vm213_vm3 = vcmp.gt.f32.partialorder %v812_v9, 0.0  ;;  %v248_v38 = vmin.f32 %v908_v22, 0.0  ;;  %v249_v44 = vmin.f32 %v911_v23, 0.0 }
  0x9d   :  { %599 = vpow2.f32 %v296_v14  ;;  %v286_v28 = vmul.f32 1.442695, %v246_v36  ;;  %vm206_vm4 = vcmp.gt.f32.partialorder %v834_v17, 0.0  ;;  %v288_v43 = vmul.f32 1.442695, %v247_v37 }
  0x9e   :  { %601 = vpow2.f32 %v298_v15  ;;  %v926_v32 = vadd.f32 %v162_v24, %v797_v0  ;;  %v929_v33 = vadd.f32 %v162_v24, %v799_v1  ;;  %v290_v34 = vmul.f32 1.442695, %v248_v38 }
  0x9f   :  { %603 = vpow2.f32 %v300_v21  ;;  %v292_v26 = vmul.f32 1.442695, %v249_v44  ;;  %v932_v39 = vadd.f32 %v162_v24, %v801_v2  ;;  %vm207_vm5 = vcmp.gt.f32.partialorder %v836_v18, 0.0  ;;  %v157_v44 = vpop.permute.xlu0 %156 }
  0xa0   :  { %605 = vpow2.f32 %v286_v28  ;;  %vm208_vm6 = vcmp.gt.f32.partialorder %v838_v19, 0.0  ;;  %v937_v41 = vadd.f32 %v162_v24, %v814_v10  ;;  %vm209_vm7 = vcmp.gt.f32.partialorder %v840_v20, 0.0 }
  0xa1   :  { %v582_v40 = vpop.eup %581  ;;  %607 = vpow2.f32 %v288_v43  ;;  %v258_v1 = vmin.f32 %v926_v32, 0.0  ;;  %vm218_vm8 = vcmp.gt.f32.partialorder %v861_v35, 0.0  ;;  %v259_v2 = vmin.f32 %v929_v33, 0.0 }
  0xa2   :  { %v584_v0 = vpop.eup %583  ;;  %v518_v45 = vadd.f32 -1.0, %v582_v40  ;;  %609 = vpow2.f32 %v290_v34  ;;  %vm219_vm9 = vcmp.gt.f32.partialorder %v870_v47, 0.0  ;;  %v260_v55 = vmin.f32 %v932_v39, 0.0 }
  0xa3   :  { %v586_v46 = vpop.eup %585  ;;  %v519_v49 = vadd.f32 -1.0, %v584_v0  ;;  %611 = vpow2.f32 %v292_v26  ;;  %v261_v56 = vmin.f32 %v937_v41, 0.0  ;;  %vm220_vm10 = vcmp.gt.f32.partialorder %v872_v48, 0.0 }
  0xa4   :  { %v588_v50 = vpop.eup %587  ;;  %v520_v51 = vadd.f32 -1.0, %v586_v46  ;;  %v370_v10 = vsel %vm210_vm0, %v806_v6, %v518_v45  ;;  %v310_v42 = vmul.f32 1.442695, %v258_v1  ;;  %v312_v61 = vmul.f32 1.442695, %v259_v2 }
  0xa5   :  { %v590_v54 = vpop.eup %589  ;;  %v521_v58 = vadd.f32 -1.0, %v588_v50  ;;  %v371_v59 = vsel %vm211_vm1, %v808_v7, %v519_v49  ;;  %vm221_vm11 = vcmp.gt.f32.partialorder %v883_v53, 0.0  ;;  %v314_v14 = vmul.f32 1.442695, %v260_v55 }
  0xa6   :  { %v592_v63 = vpop.eup %591  ;;  %v372_v6 = vsel %vm212_vm2, %v810_v8, %v520_v51  ;;  %v564_v3 = vpack.c.bf16 %v371_v59, %v370_v10  ;;  %v514_v5 = vadd.f32 -1.0, %v590_v54  ;;  %613 = vpow2.f32 %v310_v42 }
  0xa7   :  { %v594_v15 = vpop.eup %593  ;;  %v373_v21 = vsel %vm213_vm3, %v812_v9, %v521_v58  ;;  %v515_v7 = vadd.f32 -1.0, %v592_v63  ;;  %v316_v36 = vmul.f32 1.442695, %v261_v56  ;;  %615 = vpow2.f32 %v312_v61 }
  0xa8   :  { %v596_v24 = vpop.eup %595  ;;  %v565_v37 = vpack.c.bf16 %v373_v21, %v372_v6  ;;  %496 = vst [vmem:[%s1133_s3 + $0x10] sm:$0xff] %v564_v3  ;;  %v516_v8 = vadd.f32 -1.0, %v594_v15  ;;  %v366_v38 = vsel %vm206_vm4, %v834_v17, %v514_v5  ;;  %vm214_vm12 = vcmp.gt.f32.partialorder %v899_v4, 0.0 }
  0xa9   :  { %v598_v28 = vpop.eup %597  ;;  %v517_v43 = vadd.f32 -1.0, %v596_v24  ;;  %v367_v9 = vsel %vm207_vm5, %v836_v18, %v515_v7  ;;  %617 = vpow2.f32 %v314_v14  ;;  %vm215_vm13 = vcmp.gt.f32.partialorder %v905_v16, 0.0  ;;  %v172_v14 = vpop.permute.xlu1 %171 }
  0xaa   :  { %v600_v34 = vpop.eup %599  ;;  %497 = vst [vmem:[%s1133_s3 + $0x18] sm:$0xff] %v565_v37  ;;  %v368_v17 = vsel %vm208_vm6, %v838_v19, %v516_v8  ;;  %v562_v26 = vpack.c.bf16 %v367_v9, %v366_v38  ;;  %v526_v40 = vadd.f32 -1.0, %v598_v28  ;;  %619 = vpow2.f32 %v316_v36 }
  0xab   :  { %v602_v0 = vpop.eup %601  ;;  %v369_v18 = vsel %vm209_vm7, %v840_v20, %v517_v43  ;;  %v527_v45 = vadd.f32 -1.0, %v600_v34  ;;  %v981_v1 = vadd.f32 %v157_v44, %v817_v11  ;;  %v990_v50 = vadd.f32 %v157_v44, %v820_v12 }
  0xac   :  { %v604_v46 = vpop.eup %603  ;;  %v563_v49 = vpack.c.bf16 %v369_v18, %v368_v17  ;;  %494 = vst [vmem:[%s1133_s3] sm:$0xff] %v562_v26  ;;  %v528_v19 = vadd.f32 -1.0, %v602_v0  ;;  %v378_v2 = vsel %vm218_vm8, %v861_v35, %v526_v40  ;;  %v996_v10 = vadd.f32 %v157_v44, %v823_v13 }
  0xad   :  { %v606_v20 = vpop.eup %605  ;;  %v529_v51 = vadd.f32 -1.0, %v604_v46  ;;  %v379_v11 = vsel %vm219_vm9, %v870_v47, %v527_v45  ;;  %v999_v55 = vadd.f32 %v157_v44, %v847_v27  ;;  %vm216_vm14 = vcmp.gt.f32.partialorder %v908_v22, 0.0 }
  0xae   :  { %v608_v56 = vpop.eup %607  ;;  %495 = vst [vmem:[%s1133_s3 + $0x8] sm:$0xff] %v563_v49  ;;  %v380_v12 = vsel %vm220_vm10, %v872_v48, %v528_v19  ;;  %v568_v35 = vpack.c.bf16 %v379_v11, %v378_v2  ;;  %v522_v54 = vadd.f32 -1.0, %v606_v20  ;;  %vm217_vm15 = vcmp.gt.f32.partialorder %v911_v23, 0.0 }
  0xaf   :  { %v610_v47 = vpop.eup %609  ;;  %v381_v13 = vsel %vm221_vm11, %v883_v53, %v529_v51  ;;  %v523_v27 = vadd.f32 -1.0, %v608_v56  ;;  %v254_v58 = vmin.f32 %v981_v1, 0.0  ;;  %v255_v63 = vmin.f32 %v990_v50, 0.0 }
  0xb0   :  { %v612_v59 = vpop.eup %611  ;;  %v569_v42 = vpack.c.bf16 %v381_v13, %v380_v12  ;;  %500 = vst [vmem:[%s1133_s3 + $0x30] sm:$0xff] %v568_v35  ;;  %v524_v48 = vadd.f32 -1.0, %v610_v47  ;;  %v374_v61 = vsel %vm214_vm12, %v899_v4, %v522_v54  ;;  %v256_v3 = vmin.f32 %v996_v10, 0.0 }
  0xb1   :  { %v525_v6 = vadd.f32 -1.0, %v612_v59  ;;  %v375_v53 = vsel %vm215_vm13, %v905_v16, %v523_v27  ;;  %v257_v5 = vmin.f32 %v999_v55, 0.0  ;;  %v302_v21 = vmul.f32 1.442695, %v254_v58 }
  0xb2   :  { %501 = vst [vmem:[%s1133_s3 + $0x38] sm:$0xff] %v569_v42  ;;  %v376_v4 = vsel %vm216_vm14, %v908_v22, %v524_v48  ;;  %v566_v15 = vpack.c.bf16 %v375_v53, %v374_v61  ;;  %v304_v7 = vmul.f32 1.442695, %v255_v63  ;;  %vm226_vm0 = vcmp.gt.f32.partialorder %v926_v32, 0.0 }
  0xb3   :  { %v377_v16 = vsel %vm217_vm15, %v911_v23, %v525_v6  ;;  %v306_v36 = vmul.f32 1.442695, %v256_v3  ;;  %v308_v24 = vmul.f32 1.442695, %v257_v5  ;;  %v614_v37 = vpop.eup %613  ;;  %621 = vpow2.f32 %v302_v21 }
  0xb4   :  { %v567_v8 = vpack.c.bf16 %v377_v16, %v376_v4  ;;  %498 = vst [vmem:[%s1133_s3 + $0x20] sm:$0xff] %v566_v15  ;;  %v1039_v22 = vadd.f32 %v172_v14, %v853_v29  ;;  %v1042_v38 = vadd.f32 %v172_v14, %v856_v30  ;;  %v616_v44 = vpop.eup %615  ;;  %v534_v28 = vadd.f32 -1.0, %v614_v37 }
  0xb5   :  { %623 = vpow2.f32 %v304_v7  ;;  %v1045_v23 = vadd.f32 %v172_v14, %v859_v31  ;;  %v1048_v43 = vadd.f32 %v172_v14, %v878_v52  ;;  %vm227_vm1 = vcmp.gt.f32.partialorder %v929_v33, 0.0  ;;  %v167_v52 = vpop.permute.xlu0 %166 }
  0xb6   :  { %v618_v9 = vpop.eup %617  ;;  %499 = vst [vmem:[%s1133_s3 + $0x28] sm:$0xff] %v567_v8  ;;  %vm228_vm2 = vcmp.gt.f32.partialorder %v932_v39, 0.0  ;;  %v535_v29 = vadd.f32 -1.0, %v616_v44  ;;  %625 = vpow2.f32 %v306_v36  ;;  %vm229_vm3 = vcmp.gt.f32.partialorder %v937_v41, 0.0 }
  0xb7   :  { %v620_v30 = vpop.eup %619  ;;  %v536_v34 = vadd.f32 -1.0, %v618_v9  ;;  %v386_v31 = vsel %vm226_vm0, %v926_v32, %v534_v28  ;;  %627 = vpow2.f32 %v308_v24  ;;  %v266_v40 = vmin.f32 %v1039_v22, 0.0 }
  0xb8   :  { %v537_v17 = vadd.f32 -1.0, %v620_v30  ;;  %v387_v26 = vsel %vm227_vm1, %v929_v33, %v535_v29  ;;  %v267_v0 = vmin.f32 %v1042_v38, 0.0  ;;  %v268_v46 = vmin.f32 %v1045_v23, 0.0 }
  0xb9   :  { %v388_v18 = vsel %vm228_vm2, %v932_v39, %v536_v34  ;;  %v572_v45 = vpack.c.bf16 %v387_v26, %v386_v31  ;;  %v269_v49 = vmin.f32 %v1048_v43, 0.0  ;;  %v326_v2 = vmul.f32 1.442695, %v266_v40 }
  0xba   :  { %v389_v19 = vsel %vm229_vm3, %v937_v41, %v537_v17  ;;  %v328_v32 = vmul.f32 1.442695, %v267_v0  ;;  %v1067_v20 = vadd.f32 %v167_v52, %v886_v57  ;;  %v330_v33 = vmul.f32 1.442695, %v268_v46 }
  0xbb   :  { %v573_v51 = vpack.c.bf16 %v389_v19, %v388_v18  ;;  %504 = vst [vmem:[%s1133_s3 + $0x50] sm:$0xff] %v572_v45  ;;  %v332_v11 = vmul.f32 1.442695, %v269_v49  ;;  %v1073_v39 = vadd.f32 %v167_v52, %v890_v60  ;;  %629 = vpow2.f32 %v326_v2 }
  0xbc   :  { %v1076_v56 = vadd.f32 %v167_v52, %v895_v62  ;;  %v1079_v41 = vadd.f32 %v167_v52, %v916_v25  ;;  %631 = vpow2.f32 %v328_v32  ;;  %v262_v57 = vmin.f32 %v1067_v20, 0.0 }
  0xbd   :  { %505 = vst [vmem:[%s1133_s3 + $0x58] sm:$0xff] %v573_v51  ;;  %v263_v12 = vmin.f32 %v1073_v39, 0.0  ;;  %633 = vpow2.f32 %v330_v33  ;;  %vm222_vm4 = vcmp.gt.f32.partialorder %v981_v1, 0.0  ;;  %vm223_vm5 = vcmp.gt.f32.partialorder %v990_v50, 0.0 }
  0xbe   :  { %v264_v60 = vmin.f32 %v1076_v56, 0.0  ;;  %635 = vpow2.f32 %v332_v11  ;;  %v265_v35 = vmin.f32 %v1079_v41, 0.0  ;;  %v318_v62 = vmul.f32 1.442695, %v262_v57 }
  0xbf   :  { %v320_v54 = vmul.f32 1.442695, %v263_v12  ;;  %vm224_vm6 = vcmp.gt.f32.partialorder %v996_v10, 0.0  ;;  %vm225_vm7 = vcmp.gt.f32.partialorder %v999_v55, 0.0  ;;  %vm234_vm8 = vcmp.gt.f32.partialorder %v1039_v22, 0.0 }
  0xc0   :  { %v322_v47 = vmul.f32 1.442695, %v264_v60  ;;  %v622_v25 = vpop.eup %621  ;;  %637 = vpow2.f32 %v318_v62  ;;  %v324_v13 = vmul.f32 1.442695, %v265_v35  ;;  %vm235_vm9 = vcmp.gt.f32.partialorder %v1042_v38, 0.0 }
  0xc1   :  { %v530_v58 = vadd.f32 -1.0, %v622_v25  ;;  %639 = vpow2.f32 %v320_v54  ;;  %vm236_vm10 = vcmp.gt.f32.partialorder %v1045_v23, 0.0  ;;  %vm237_vm11 = vcmp.gt.f32.partialorder %v1048_v43, 0.0 }
  0xc2   :  { %v624_v27 = vpop.eup %623  ;;  %641 = vpow2.f32 %v322_v47  ;;  %vm230_vm12 = vcmp.gt.f32.partialorder %v1067_v20, 0.0  ;;  %vm231_vm13 = vcmp.gt.f32.partialorder %v1073_v39, 0.0  ;;  %vm232_vm14 = vcmp.gt.f32.partialorder %v1076_v56, 0.0 }
  0xc3   :  { %v626_v59 = vpop.eup %625  ;;  %v531_v42 = vadd.f32 -1.0, %v624_v27  ;;  %v382_v63 = vsel %vm222_vm4, %v981_v1, %v530_v58  ;;  %643 = vpow2.f32 %v324_v13  ;;  %vm233_vm15 = vcmp.gt.f32.partialorder %v1079_v41, 0.0 }
  0xc4   :  { %v628_v48 = vpop.eup %627  ;;  %v532_v61 = vadd.f32 -1.0, %v626_v59 }
  0xc5   :  { %v533_v6 = vadd.f32 -1.0, %v628_v48  ;;  %v383_v53 = vsel %vm223_vm5, %v990_v50, %v531_v42 }
  0xc6   :  { %v384_v3 = vsel %vm224_vm6, %v996_v10, %v532_v61  ;;  %v570_v5 = vpack.c.bf16 %v383_v53, %v382_v63 }
  0xc7   :  { %v385_v14 = vsel %vm225_vm7, %v999_v55, %v533_v6 }
  0xc8   :  { %v571_v4 = vpack.c.bf16 %v385_v14, %v384_v3  ;;  %502 = vst [vmem:[%s1133_s3 + $0x40] sm:$0xff] %v570_v5  ;;  %v630_v15 = vpop.eup %629 }
  0xc9   :  { %v632_v1 = vpop.eup %631  ;;  %v542_v21 = vadd.f32 -1.0, %v630_v15 }
  0xca   :  { %503 = vst [vmem:[%s1133_s3 + $0x48] sm:$0xff] %v571_v4  ;;  %v634_v50 = vpop.eup %633  ;;  %v543_v7 = vadd.f32 -1.0, %v632_v1 }
  0xcb   :  { %v636_v10 = vpop.eup %635  ;;  %v544_v55 = vadd.f32 -1.0, %v634_v50  ;;  %v394_v16 = vsel %vm234_vm8, %v1039_v22, %v542_v21 }
  0xcc   :  { %v545_v36 = vadd.f32 -1.0, %v636_v10  ;;  %v395_v24 = vsel %vm235_vm9, %v1042_v38, %v543_v7 }
  0xcd   :  { %v638_v37 = vpop.eup %637  ;;  %v396_v8 = vsel %vm236_vm10, %v1045_v23, %v544_v55  ;;  %v576_v44 = vpack.c.bf16 %v395_v24, %v394_v16 }
  0xce   :  { %v640_v28 = vpop.eup %639  ;;  %v397_v9 = vsel %vm237_vm11, %v1048_v43, %v545_v36  ;;  %v538_v29 = vadd.f32 -1.0, %v638_v37 }
  0xcf   :  { %v642_v30 = vpop.eup %641  ;;  %v577_v34 = vpack.c.bf16 %v397_v9, %v396_v8  ;;  %508 = vst [vmem:[%s1133_s3 + $0x70] sm:$0xff] %v576_v44  ;;  %v539_v22 = vadd.f32 -1.0, %v640_v28 }
  0xd0   :  { %v644_v38 = vpop.eup %643  ;;  %v540_v31 = vadd.f32 -1.0, %v642_v30  ;;  %v390_v23 = vsel %vm230_vm12, %v1067_v20, %v538_v29 }
  0xd1   :  { %509 = vst [vmem:[%s1133_s3 + $0x78] sm:$0xff] %v577_v34  ;;  %v541_v43 = vadd.f32 -1.0, %v644_v38  ;;  %v391_v52 = vsel %vm231_vm13, %v1073_v39, %v539_v22 }
  0xd2   :  { %v392_v17 = vsel %vm232_vm14, %v1076_v56, %v540_v31  ;;  %v574_v26 = vpack.c.bf16 %v391_v52, %v390_v23 }
  0xd3   :  { %v393_v40 = vsel %vm233_vm15, %v1079_v41, %v541_v43 }
  0xd4   :  { %v575_v0 = vpack.c.bf16 %v393_v40, %v392_v17  ;;  %506 = vst [vmem:[%s1133_s3 + $0x60] sm:$0xff] %v574_v26 }
  0xd6   :  { %507 = vst [vmem:[%s1133_s3 + $0x68] sm:$0xff] %v575_v0 }

// kernel: discriminator_forward.11
= control target key start
LH: loop header
LB: loop body
LE: loop exit
PB: predicated region body
PF: predicated region fallthrough
CT: control target
= control target key end

     0   :  { %vm1347_vm0 = vcmask 7168   ;;  %s2659_s1 = inlined_call_operand.vmem [shape: bf16[1024,128], index: 1, kind: input, shape index: {}]   ;;  %s2660_s0 = inlined_call_operand.vmem [shape: bf16[128,1024], index: 0, kind: input, shape index: {}]   ;;  %s2661_s2 = inlined_call_operand.vmem [shape: f32[128,128], index: 2, kind: output, shape index: {0}]   ;;  %s2662_s3 = inlined_call_operand.vmem [shape: f32[1,128,1], index: 3, kind: output, shape index: {1}]   ;;  %s2663_s4 = inlined_call_operand.vmem [shape: f32[1,128,1], index: 4, kind: output, shape index: {2}]  }
   0x1   :  { %v1824_v0 = vld [vmem:[%s2659_s1 + $0x78] sm:$0xff]   ;;  %v1828_v4 = vld [vmem:[%s2659_s1 + $0x70] sm:$0xff]   ;;  %v1832_v8 = vld [vmem:[%s2659_s1 + $0x68] sm:$0xff]  }
   0x2   :  { %v1825_v1 = vld [vmem:[%s2659_s1 + $0xf8] sm:$0xff]   ;;  %1568 = vmatprep.subr.bf16.mxu0 %v1824_v0  ;;  %v1829_v5 = vld [vmem:[%s2659_s1 + $0xf0] sm:$0xff]   ;;  %v1833_v9 = vld [vmem:[%s2659_s1 + $0xe8] sm:$0xff]  }
   0x3   :  { %v1826_v2 = vld [vmem:[%s2659_s1 + $0x38] sm:$0xff]   ;;  %1632 = vmatprep.subr.bf16.mxu1 %v1825_v1  ;;  %v1830_v6 = vld [vmem:[%s2659_s1 + $0x30] sm:$0xff]   ;;  %v1834_v10 = vld [vmem:[%s2659_s1 + $0x28] sm:$0xff]  }
   0x4   :  { %v1827_v3 = vld [vmem:[%s2659_s1 + $0xb8] sm:$0xff]   ;;  %1569 = vmatpush3.bf16.msra.mxu0 %v1826_v2  ;;  %v1831_v7 = vld [vmem:[%s2659_s1 + $0xb0] sm:$0xff]   ;;  %v1835_v11 = vld [vmem:[%s2659_s1 + $0xa8] sm:$0xff]  }
   0x5   :  { %1633 = vmatpush3.bf16.msra.mxu1 %v1827_v3  ;;  %1570 = vmatprep.subr.bf16.mxu0 %v1828_v4  ;;  %v1836_v12 = vld [vmem:[%s2659_s1 + $0x60] sm:$0xff]   ;;  %v1840_v16 = vld [vmem:[%s2659_s1 + $0x58] sm:$0xff]   ;;  %v1844_v20 = vld [vmem:[%s2659_s1 + $0x50] sm:$0xff]  }
   0x6   :  { %1634 = vmatprep.subr.bf16.mxu1 %v1829_v5  ;;  %v1837_v13 = vld [vmem:[%s2659_s1 + $0xe0] sm:$0xff]   ;;  %v1841_v17 = vld [vmem:[%s2659_s1 + $0xd8] sm:$0xff]   ;;  %v1845_v21 = vld [vmem:[%s2659_s1 + $0xd0] sm:$0xff]  }
   0x7   :  { %v1838_v14 = vld [vmem:[%s2659_s1 + $0x20] sm:$0xff]   ;;  %v1842_v18 = vld [vmem:[%s2659_s1 + $0x18] sm:$0xff]   ;;  %v1846_v22 = vld [vmem:[%s2659_s1 + $0x10] sm:$0xff]  }
   0x8   :  { %1571 = vmatpush3.bf16.msra.mxu0 %v1830_v6  ;;  %v1839_v15 = vld [vmem:[%s2659_s1 + $0xa0] sm:$0xff]   ;;  %v1843_v19 = vld [vmem:[%s2659_s1 + $0x98] sm:$0xff]   ;;  %v1847_v23 = vld [vmem:[%s2659_s1 + $0x90] sm:$0xff]  }
   0x9   :  { %1635 = vmatpush3.bf16.msra.mxu1 %v1831_v7  ;;  %1572 = vmatprep.subr.bf16.mxu0 %v1832_v8  ;;  %v1848_v24 = vld [vmem:[%s2659_s1 + $0x48] sm:$0xff]   ;;  %v1852_v28 = vld [vmem:[%s2659_s1 + $0x40] sm:$0xff]   ;;  %v1856_v40 = vld [vmem:[%s2659_s1 + $0x178] sm:$0xff]  }
   0xa   :  { %1636 = vmatprep.subr.bf16.mxu1 %v1833_v9  ;;  %v1849_v25 = vld [vmem:[%s2659_s1 + $0xc8] sm:$0xff]   ;;  %v1853_v29 = vld [vmem:[%s2659_s1 + $0xc0] sm:$0xff]   ;;  %v1857_v41 = vld [vmem:[%s2659_s1 + $0x138] sm:$0xff]  }
   0xb   :  { %v1850_v26 = vld [vmem:[%s2659_s1 + $0x8] sm:$0xff]   ;;  %v1854_v30 = vld [vmem:[%s2659_s1] sm:$0xff]   ;;  %v1858_v42 = vld [vmem:[%s2659_s1 + $0x1f8] sm:$0xff]  }
   0xc   :  { %1573 = vmatpush3.bf16.msra.mxu0 %v1834_v10  ;;  %v1851_v27 = vld [vmem:[%s2659_s1 + $0x88] sm:$0xff]   ;;  %v1855_v31 = vld [vmem:[%s2659_s1 + $0x80] sm:$0xff]   ;;  %v1859_v43 = vld [vmem:[%s2659_s1 + $0x1b8] sm:$0xff]  }
   0xd   :  { %1637 = vmatpush3.bf16.msra.mxu1 %v1835_v11  ;;  %1574 = vmatprep.subr.bf16.mxu0 %v1836_v12  ;;  %v15_v32 = vld [vmem:[%s2660_s0] sm:$0xff]  ;;  %v16_v34 = vld [vmem:[%s2660_s0 + $0x8] sm:$0xff]  ;;  %v1860_v50 = vld [vmem:[%s2659_s1 + $0x170] sm:$0xff]  }
   0xe   :  { %1638 = vmatprep.subr.bf16.mxu1 %v1837_v13  ;;  %v19_v33 = vld [vmem:[%s2660_s0 + $0x20] sm:$0xff]  ;;  %v20_v37 = vld [vmem:[%s2660_s0 + $0x28] sm:$0xff]  ;;  %v1861_v52 = vld [vmem:[%s2659_s1 + $0x130] sm:$0xff]  }
   0xf   :  { %v1440_v35 = vcombine.low %v15_v32, %v19_v33  ;;  %v1441_v36 = vcombine.high %v15_v32, %v19_v33  ;;  %v1442_v38 = vcombine.low %v16_v34, %v20_v37  ;;  %v1443_v39 = vcombine.high %v16_v34, %v20_v37  ;;  %v23_v44 = vld [vmem:[%s2660_s0 + $0x40] sm:$0xff]  ;;  %v24_v47 = vld [vmem:[%s2660_s0 + $0x48] sm:$0xff]  ;;  %v1862_v54 = vld [vmem:[%s2659_s1 + $0x1f0] sm:$0xff]  }
  0x10   :  { %1575 = vmatpush3.bf16.msra.mxu0 %v1838_v14  ;;  %v27_v45 = vld [vmem:[%s2660_s0 + $0x60] sm:$0xff]  ;;  %v28_v48 = vld [vmem:[%s2660_s0 + $0x68] sm:$0xff]  ;;  %v1863_v55 = vld [vmem:[%s2659_s1 + $0x1b0] sm:$0xff]  }
  0x11   :  { %1639 = vmatpush3.bf16.msra.mxu1 %v1839_v15  ;;  %1576 = vmatprep.subr.bf16.mxu0 %v1840_v16  ;;  %v1449_v46 = vcombine.high %v23_v44, %v27_v45  ;;  %v1451_v49 = vcombine.high %v24_v47, %v28_v48  ;;  %v1448_v51 = vcombine.low %v23_v44, %v27_v45  ;;  %v31_v56 = vld [vmem:[%s2660_s0 + $0x80] sm:$0xff]  ;;  %v32_v58 = vld [vmem:[%s2660_s0 + $0x88] sm:$0xff]  ;;  %v1878_v32 = vld [vmem:[%s2659_s1 + $0x1d0] sm:$0xff]  }
  0x12   :  { %1640 = vmatprep.subr.bf16.mxu1 %v1841_v17  ;;  %943 = vmatprep.mubr.bf16.mxu0 %v1441_v36  ;;  %v1450_v53 = vcombine.low %v24_v47, %v28_v48  ;;  %v35_v57 = vld [vmem:[%s2660_s0 + $0xa0] sm:$0xff]  ;;  %v36_v59 = vld [vmem:[%s2660_s0 + $0xa8] sm:$0xff]  ;;  %v1879_v33 = vld [vmem:[%s2659_s1 + $0x190] sm:$0xff]  }
  0x13   :  { %1040 = vmatprep.mubr.bf16.mxu1 %v1443_v39  ;;  %v1457_v60 = vcombine.high %v31_v56, %v35_v57  ;;  %v1459_v61 = vcombine.high %v32_v58, %v36_v59  ;;  %v1864_v62 = vld [vmem:[%s2659_s1 + $0x168] sm:$0xff]   ;;  %v1456_v2 = vcombine.low %v31_v56, %v35_v57  ;;  %v39_v3 = vld [vmem:[%s2660_s0 + $0xc0] sm:$0xff]  ;;  %v1458_v6 = vcombine.low %v32_v58, %v36_v59 }
  0x14   :  { %1577 = vmatpush3.bf16.msra.mxu0 %v1842_v18  ;;  %v1865_v63 = vld [vmem:[%s2659_s1 + $0x128] sm:$0xff]   ;;  %v43_v4 = vld [vmem:[%s2660_s0 + $0xe0] sm:$0xff]  ;;  %v1872_v18 = vld [vmem:[%s2659_s1 + $0x158] sm:$0xff]  }
  0x15   :  { %1641 = vmatpush3.bf16.msra.mxu1 %v1843_v19  ;;  %1578 = vmatprep.subr.bf16.mxu0 %v1844_v20  ;;  %v1866_v0 = vld [vmem:[%s2659_s1 + $0x1e8] sm:$0xff]   ;;  %v1465_v7 = vcombine.high %v39_v3, %v43_v4  ;;  %v1868_v10 = vld [vmem:[%s2659_s1 + $0x160] sm:$0xff]   ;;  %v1464_v19 = vcombine.low %v39_v3, %v43_v4  ;;  %v1873_v20 = vld [vmem:[%s2659_s1 + $0x118] sm:$0xff]  }
  0x16   :  { %1642 = vmatprep.subr.bf16.mxu1 %v1845_v21  ;;  %v1867_v1 = vld [vmem:[%s2659_s1 + $0x1a8] sm:$0xff]   ;;  %v1869_v11 = vld [vmem:[%s2659_s1 + $0x120] sm:$0xff]  }
  0x17   :  { %v40_v5 = vld [vmem:[%s2660_s0 + $0xc8] sm:$0xff]  ;;  %v1870_v12 = vld [vmem:[%s2659_s1 + $0x1e0] sm:$0xff]  }
  0x18   :  { %1579 = vmatpush3.bf16.msra.mxu0 %v1846_v22  ;;  %v44_v8 = vld [vmem:[%s2660_s0 + $0xe8] sm:$0xff]  ;;  %v1871_v13 = vld [vmem:[%s2659_s1 + $0x1a0] sm:$0xff]  }
  0x19   :  { %1643 = vmatpush3.bf16.msra.mxu1 %v1847_v23  ;;  %1580 = vmatprep.subr.bf16.mxu0 %v1848_v24  ;;  %v1467_v9 = vcombine.high %v40_v5, %v44_v8  ;;  %v47_v14 = vld [vmem:[%s2660_s0 + $0x100] sm:$0xff]  ;;  %v48_v16 = vld [vmem:[%s2660_s0 + $0x108] sm:$0xff]  ;;  %v1466_v21 = vcombine.low %v40_v5, %v44_v8  ;;  %v1874_v23 = vld [vmem:[%s2659_s1 + $0x1d8] sm:$0xff]  }
  0x1a   :  { %1644 = vmatprep.subr.bf16.mxu1 %v1849_v25  ;;  %v51_v15 = vld [vmem:[%s2660_s0 + $0x120] sm:$0xff]  ;;  %v52_v17 = vld [vmem:[%s2660_s0 + $0x128] sm:$0xff]  ;;  %v1875_v25 = vld [vmem:[%s2659_s1 + $0x198] sm:$0xff]  }
  0x1b   :  { %v1473_v22 = vcombine.high %v47_v14, %v51_v15  ;;  %v1475_v24 = vcombine.high %v48_v16, %v52_v17  ;;  %v1472_v34 = vcombine.low %v47_v14, %v51_v15  ;;  %v1881_v39 = vld [vmem:[%s2659_s1 + $0x108] sm:$0xff]   ;;  %v1885_v48 = vld [vmem:[%s2659_s1 + $0x100] sm:$0xff]   ;;  %v26_v8 = vld [vmem:[%s2660_s0 + $0x58] sm:$0xff] }
  0x1c   :  { %1581 = vmatpush3.bf16.msra.mxu0 %v1850_v26  ;;  %v55_v26 = vld [vmem:[%s2660_s0 + $0x140] sm:$0xff]  ;;  %v64_v44 = vld [vmem:[%s2660_s0 + $0x188] sm:$0xff]  ;;  %v33_v14 = vld [vmem:[%s2660_s0 + $0x90] sm:$0xff] }
  0x1d   :  { %1645 = vmatpush3.bf16.msra.mxu1 %v1851_v27  ;;  %1582 = vmatprep.subr.bf16.mxu0 %v1852_v28  ;;  %v59_v27 = vld [vmem:[%s2660_s0 + $0x160] sm:$0xff]  ;;  %v1876_v28 = vld [vmem:[%s2659_s1 + $0x150] sm:$0xff]   ;;  %v68_v45 = vld [vmem:[%s2660_s0 + $0x1a8] sm:$0xff] }
  0x1e   :  { %1646 = vmatprep.subr.bf16.mxu1 %v1853_v29  ;;  %v56_v29 = vld [vmem:[%s2660_s0 + $0x148] sm:$0xff]  ;;  %v1481_v36 = vcombine.high %v55_v26, %v59_v27  ;;  %v1480_v47 = vcombine.low %v55_v26, %v59_v27  ;;  %v1490_v59 = vcombine.low %v64_v44, %v68_v45  ;;  %v37_v15 = vld [vmem:[%s2660_s0 + $0xb0] sm:$0xff] }
  0x1f   :  { %v72_v56 = vld [vmem:[%s2660_s0 + $0x1c8] sm:$0xff]  ;;  %v1460_v26 = vcombine.low %v33_v14, %v37_v15 }
  0x20   :  { %1583 = vmatpush3.bf16.msra.mxu0 %v1854_v30  ;;  %v60_v30 = vld [vmem:[%s2660_s0 + $0x168] sm:$0xff] }
  0x21   :  { %1647 = vmatpush3.bf16.msra.mxu1 %v1855_v31  ;;  %1696 = vmatprep.subr.bf16.mxu0 %v1856_v40  ;;  %v1877_v31 = vld [vmem:[%s2659_s1 + $0x110] sm:$0xff]   ;;  %v1483_v37 = vcombine.high %v56_v29, %v60_v30  ;;  %v1882_v40 = vld [vmem:[%s2659_s1 + $0x1c8] sm:$0xff]  }
  0x22   :  { %1760 = vmatprep.subr.bf16.mxu1 %v1858_v42  ;;  %v67_v42 = vld [vmem:[%s2660_s0 + $0x1a0] sm:$0xff]  ;;  %v76_v57 = vld [vmem:[%s2660_s0 + $0x1e8] sm:$0xff] }
  0x23   :  { %944 = vmatmul.mubr.bf16.vlgmr.msra.gmra.mxu0 %v1440_v35  ;;  %v1474_v35 = vcombine.low %v48_v16, %v52_v17  ;;  %v1498_v3 = vcombine.low %v72_v56, %v76_v57  ;;  %v34_v16 = vld [vmem:[%s2660_s0 + $0x98] sm:$0xff] }
  0x24   :  { %1041 = vmatmul.mubr.bf16.vlgmr.msra.gmra.mxu1 %v1442_v38  ;;  %1697 = vmatpush3.bf16.msra.mxu0 %v1857_v41  ;;  %v1880_v38 = vld [vmem:[%s2659_s1 + $0x148] sm:$0xff]   ;;  %v63_v41 = vld [vmem:[%s2660_s0 + $0x180] sm:$0xff]  ;;  %v38_v17 = vld [vmem:[%s2660_s0 + $0xb8] sm:$0xff] }
  0x25   :  { %1761 = vmatpush3.bf16.msra.mxu1 %v1859_v43  ;;  %951 = vmatprep.mubr.bf16.mxu0 %v1449_v46  ;;  %v1883_v43 = vld [vmem:[%s2659_s1 + $0x188] sm:$0xff]   ;;  %v1884_v46 = vld [vmem:[%s2659_s1 + $0x140] sm:$0xff]   ;;  %v1488_v58 = vcombine.low %v63_v41, %v67_v42  ;;  %v1462_v27 = vcombine.low %v34_v16, %v38_v17 }
  0x26   :  { %1048 = vmatprep.mubr.bf16.mxu1 %v1451_v49  ;;  %1698 = vmatprep.subr.bf16.mxu0 %v1860_v50  ;;  %v1482_v49 = vcombine.low %v56_v29, %v60_v30  ;;  %v1489_v50 = vcombine.high %v63_v41, %v67_v42  ;;  %v49_v30 = vld [vmem:[%s2660_s0 + $0x110] sm:$0xff]  ;;  %v62_v41 = vld [vmem:[%s2660_s0 + $0x178] sm:$0xff] }
  0x27   :  { %1762 = vmatprep.subr.bf16.mxu1 %v1862_v54  ;;  %v71_v54 = vld [vmem:[%s2660_s0 + $0x1c0] sm:$0xff] }
  0x28   :  { %1699 = vmatpush3.bf16.msra.mxu0 %v1861_v52  ;;  %v1491_v52 = vcombine.high %v64_v44, %v68_v45 }
  0x29   :  { %1763 = vmatpush3.bf16.msra.mxu1 %v1863_v55  ;;  %1700 = vmatprep.subr.bf16.mxu0 %v1864_v62  ;;  %v75_v55 = vld [vmem:[%s2660_s0 + $0x1e0] sm:$0xff]  ;;  %v17_v62 = vld [vmem:[%s2660_s0 + $0x10] sm:$0xff] }
  0x2a   :  { %1764 = vmatprep.subr.bf16.mxu1 %v1866_v0  ;;  %v18_v0 = vld [vmem:[%s2660_s0 + $0x18] sm:$0xff] }
  0x2b   :  { %952 = vmatmul.mubr.bf16.gmra.mxu0 %v1448_v51  ;;  %v1886_v51 = vld [vmem:[%s2659_s1 + $0x1c0] sm:$0xff]  }
  0x2c   :  { %1049 = vmatmul.mubr.bf16.gmra.mxu1 %v1450_v53  ;;  %959 = vmatprep.mubr.bf16.mxu0 %v1457_v60  ;;  %v1887_v53 = vld [vmem:[%s2659_s1 + $0x180] sm:$0xff]   ;;  %v1497_v60 = vcombine.high %v71_v54, %v75_v55 }
  0x2d   :  { %1056 = vmatprep.mubr.bf16.mxu1 %v1459_v61  ;;  %1701 = vmatpush3.bf16.msra.mxu0 %v1865_v63  ;;  %v1499_v61 = vcombine.high %v72_v56, %v76_v57  ;;  %v21_v63 = vld [vmem:[%s2660_s0 + $0x30] sm:$0xff]  ;;  %v74_v56 = vld [vmem:[%s2660_s0 + $0x1d8] sm:$0xff] }
  0x2e   :  { %1765 = vmatpush3.bf16.msra.mxu1 %v1867_v1  ;;  %1702 = vmatprep.subr.bf16.mxu0 %v1868_v10  ;;  %v22_v1 = vld [vmem:[%s2660_s0 + $0x38] sm:$0xff]  ;;  %v1445_v4 = vcombine.high %v17_v62, %v21_v63  ;;  %v1444_v10 = vcombine.low %v17_v62, %v21_v63 }
  0x2f   :  { %1766 = vmatprep.subr.bf16.mxu1 %v1870_v12  ;;  %v1447_v5 = vcombine.high %v18_v0, %v22_v1  ;;  %v78_v57 = vld [vmem:[%s2660_s0 + $0x1f8] sm:$0xff] }
  0x30   :  { %v1502_v63 = vcombine.low %v74_v56, %v78_v57 }
  0x31   :  { %1703 = vmatpush3.bf16.msra.mxu0 %v1869_v11  ;;  %v1446_v11 = vcombine.low %v18_v0, %v22_v1 }
  0x32   :  { %1767 = vmatpush3.bf16.msra.mxu1 %v1871_v13  ;;  %1704 = vmatprep.subr.bf16.mxu0 %v1872_v18 }
  0x33   :  { %960 = vmatmul.mubr.bf16.gmra.mxu0 %v1456_v2  ;;  %1768 = vmatprep.subr.bf16.mxu1 %v1874_v23  ;;  %v1496_v2 = vcombine.low %v71_v54, %v75_v55  ;;  %v45_v23 = vld [vmem:[%s2660_s0 + $0xf0] sm:$0xff] }
  0x34   :  { %1057 = vmatmul.mubr.bf16.gmra.mxu1 %v1458_v6  ;;  %967 = vmatprep.mubr.bf16.mxu0 %v1465_v7  ;;  %v25_v6 = vld [vmem:[%s2660_s0 + $0x50] sm:$0xff] }
  0x35   :  { %1064 = vmatprep.mubr.bf16.mxu1 %v1467_v9  ;;  %1705 = vmatpush3.bf16.msra.mxu0 %v1873_v20  ;;  %v29_v7 = vld [vmem:[%s2660_s0 + $0x70] sm:$0xff]  ;;  %v30_v9 = vld [vmem:[%s2660_s0 + $0x78] sm:$0xff]  ;;  %v1461_v20 = vcombine.high %v33_v14, %v37_v15 }
  0x36   :  { %1769 = vmatpush3.bf16.msra.mxu1 %v1875_v25  ;;  %1706 = vmatprep.subr.bf16.mxu0 %v1876_v28  ;;  %v1453_v12 = vcombine.high %v25_v6, %v29_v7  ;;  %v1455_v13 = vcombine.high %v26_v8, %v30_v9  ;;  %v1452_v18 = vcombine.low %v25_v6, %v29_v7  ;;  %v46_v25 = vld [vmem:[%s2660_s0 + $0xf8] sm:$0xff]  ;;  %v73_v54 = vld [vmem:[%s2660_s0 + $0x1d0] sm:$0xff] }
  0x37   :  { %1770 = vmatprep.subr.bf16.mxu1 %v1878_v32  ;;  %v50_v32 = vld [vmem:[%s2660_s0 + $0x118] sm:$0xff]  ;;  %v77_v55 = vld [vmem:[%s2660_s0 + $0x1f0] sm:$0xff] }
  0x38   :  { %v1500_v62 = vcombine.low %v73_v54, %v77_v55 }
  0x39   :  { %1707 = vmatpush3.bf16.msra.mxu0 %v1877_v31  ;;  %v53_v31 = vld [vmem:[%s2660_s0 + $0x130] sm:$0xff] }
  0x3a   :  { %1771 = vmatpush3.bf16.msra.mxu1 %v1879_v33  ;;  %1708 = vmatprep.subr.bf16.mxu0 %v1880_v38  ;;  %v54_v33 = vld [vmem:[%s2660_s0 + $0x138] sm:$0xff]  ;;  %v57_v38 = vld [vmem:[%s2660_s0 + $0x150] sm:$0xff]  ;;  %v1476_v42 = vcombine.low %v49_v30, %v53_v31 }
  0x3b   :  { %968 = vmatmul.mubr.bf16.gmra.mxu0 %v1464_v19  ;;  %1772 = vmatprep.subr.bf16.mxu1 %v1882_v40  ;;  %v1454_v19 = vcombine.low %v26_v8, %v30_v9  ;;  %v58_v40 = vld [vmem:[%s2660_s0 + $0x158] sm:$0xff] }
  0x3c   :  { %1065 = vmatmul.mubr.bf16.gmra.mxu1 %v1466_v21  ;;  %975 = vmatprep.mubr.bf16.mxu0 %v1473_v22  ;;  %v1463_v21 = vcombine.high %v34_v16, %v38_v17  ;;  %v41_v22 = vld [vmem:[%s2660_s0 + $0xd0] sm:$0xff]  ;;  %v1487_v45 = vcombine.high %v58_v40, %v62_v41 }
  0x3d   :  { %1072 = vmatprep.mubr.bf16.mxu1 %v1475_v24  ;;  %1709 = vmatpush3.bf16.msra.mxu0 %v1881_v39  ;;  %v42_v24 = vld [vmem:[%s2660_s0 + $0xd8] sm:$0xff]  ;;  %v1469_v28 = vcombine.high %v41_v22, %v45_v23  ;;  %v61_v39 = vld [vmem:[%s2660_s0 + $0x170] sm:$0xff] }
  0x3e   :  { %1773 = vmatpush3.bf16.msra.mxu1 %v1883_v43  ;;  %1710 = vmatprep.subr.bf16.mxu0 %v1884_v46  ;;  %v1471_v29 = vcombine.high %v42_v24, %v46_v25  ;;  %v1478_v43 = vcombine.low %v50_v32, %v54_v33  ;;  %v1485_v44 = vcombine.high %v57_v38, %v61_v39  ;;  %v65_v46 = vld [vmem:[%s2660_s0 + $0x190] sm:$0xff] }
  0x3f   :  { %1774 = vmatprep.subr.bf16.mxu1 %v1886_v51  ;;  %v1486_v51 = vcombine.low %v58_v40, %v62_v41 }
  0x41   :  { %1711 = vmatpush3.bf16.msra.mxu0 %v1885_v48  ;;  %v66_v48 = vld [vmem:[%s2660_s0 + $0x198] sm:$0xff] }
  0x42   :  { %1775 = vmatpush3.bf16.msra.mxu1 %v1887_v53 }
  0x43   :  { %976 = vmatmul.mubr.bf16.gmra.mxu0 %v1472_v34  ;;  %v1468_v34 = vcombine.low %v41_v22, %v45_v23 }
  0x44   :  { %1073 = vmatmul.mubr.bf16.gmra.mxu1 %v1474_v35  ;;  %983 = vmatprep.mubr.bf16.mxu0 %v1481_v36  ;;  %v1470_v35 = vcombine.low %v42_v24, %v46_v25  ;;  %v1477_v36 = vcombine.high %v49_v30, %v53_v31 }
  0x45   :  { %1080 = vmatprep.mubr.bf16.mxu1 %v1483_v37  ;;  %v1479_v37 = vcombine.high %v50_v32, %v54_v33 }
  0x4b   :  { %984 = vmatmul.mubr.bf16.gmra.mxu0 %v1480_v47  ;;  %v69_v47 = vld [vmem:[%s2660_s0 + $0x1b0] sm:$0xff] }
  0x4c   :  { %1081 = vmatmul.mubr.bf16.gmra.mxu1 %v1482_v49  ;;  %991 = vmatprep.mubr.bf16.mxu0 %v1489_v50  ;;  %v70_v49 = vld [vmem:[%s2660_s0 + $0x1b8] sm:$0xff]  ;;  %v1484_v50 = vcombine.low %v57_v38, %v61_v39 }
  0x4d   :  { %1088 = vmatprep.mubr.bf16.mxu1 %v1491_v52  ;;  %v1493_v52 = vcombine.high %v65_v46, %v69_v47  ;;  %v1495_v53 = vcombine.high %v66_v48, %v70_v49 }
  0x53   :  { %992 = vmatmul.mubr.bf16.gmra.mxu0 %v1488_v58  ;;  %v1492_v58 = vcombine.low %v65_v46, %v69_v47 }
  0x54   :  { %1089 = vmatmul.mubr.bf16.gmra.mxu1 %v1490_v59  ;;  %999 = vmatprep.mubr.bf16.mxu0 %v1497_v60  ;;  %v1494_v59 = vcombine.low %v66_v48, %v70_v49  ;;  %v1501_v60 = vcombine.high %v73_v54, %v77_v55 }
  0x55   :  { %1096 = vmatprep.mubr.bf16.mxu1 %v1499_v61  ;;  %v1503_v61 = vcombine.high %v74_v56, %v78_v57 }
  0x5b   :  { %1000 = vmatmul.mubr.bf16.gmra.mxu0 %v1496_v2 }
  0x5c   :  { %1097 = vmatmul.mubr.bf16.gmra.mxu1 %v1498_v3  ;;  %1137 = vmatprep.mubr.bf16.mxu0 %v1445_v4 }
  0x5d   :  { %1234 = vmatprep.mubr.bf16.mxu1 %v1447_v5 }
  0x63   :  { %1138 = vmatmul.mubr.bf16.vlgmr.msra.gmra.mxu0 %v1444_v10 }
  0x64   :  { %1235 = vmatmul.mubr.bf16.vlgmr.msra.gmra.mxu1 %v1446_v11  ;;  %1145 = vmatprep.mubr.bf16.mxu0 %v1453_v12 }
  0x65   :  { %1242 = vmatprep.mubr.bf16.mxu1 %v1455_v13 }
  0x6b   :  { %1146 = vmatmul.mubr.bf16.gmra.mxu0 %v1452_v18 }
  0x6c   :  { %1243 = vmatmul.mubr.bf16.gmra.mxu1 %v1454_v19  ;;  %1153 = vmatprep.mubr.bf16.mxu0 %v1461_v20 }
  0x6d   :  { %1250 = vmatprep.mubr.bf16.mxu1 %v1463_v21 }
  0x73   :  { %1154 = vmatmul.mubr.bf16.gmra.mxu0 %v1460_v26 }
  0x74   :  { %1251 = vmatmul.mubr.bf16.gmra.mxu1 %v1462_v27  ;;  %1161 = vmatprep.mubr.bf16.mxu0 %v1469_v28 }
  0x75   :  { %1258 = vmatprep.mubr.bf16.mxu1 %v1471_v29 }
  0x7b   :  { %1162 = vmatmul.mubr.bf16.gmra.mxu0 %v1468_v34 }
  0x7c   :  { %1259 = vmatmul.mubr.bf16.gmra.mxu1 %v1470_v35  ;;  %1169 = vmatprep.mubr.bf16.mxu0 %v1477_v36 }
  0x7d   :  { %1266 = vmatprep.mubr.bf16.mxu1 %v1479_v37 }
  0x83   :  { %1170 = vmatmul.mubr.bf16.gmra.mxu0 %v1476_v42 }
  0x84   :  { %1267 = vmatmul.mubr.bf16.gmra.mxu1 %v1478_v43  ;;  %1177 = vmatprep.mubr.bf16.mxu0 %v1485_v44 }
  0x85   :  { %1274 = vmatprep.mubr.bf16.mxu1 %v1487_v45 }
  0x8b   :  { %1178 = vmatmul.mubr.bf16.gmra.mxu0 %v1484_v50 }
  0x8c   :  { %1275 = vmatmul.mubr.bf16.gmra.mxu1 %v1486_v51  ;;  %1185 = vmatprep.mubr.bf16.mxu0 %v1493_v52 }
  0x8d   :  { %1282 = vmatprep.mubr.bf16.mxu1 %v1495_v53 }
  0x93   :  { %1186 = vmatmul.mubr.bf16.gmra.mxu0 %v1492_v58 }
  0x94   :  { %1283 = vmatmul.mubr.bf16.gmra.mxu1 %v1494_v59  ;;  %1193 = vmatprep.mubr.bf16.mxu0 %v1501_v60 }
  0x95   :  { %1290 = vmatprep.mubr.bf16.mxu1 %v1503_v61 }
  0x9b   :  { %1194 = vmatmul.mubr.bf16.gmra.mxu0 %v1500_v62 }
  0x9c   :  { %1291 = vmatmul.mubr.bf16.gmra.mxu1 %v1502_v63 }
  0xe3   :  { %v2297_v0 = vpop.f32.mrf.mxu0 }
  0xe4   :  { %v2299_v1 = vpop.f32.mrf.mxu1 }
  0xe5   :  { %v1585_v2 = vpop.f32.mrf.mxu0 }
  0xe6   :  { %v1649_v3 = vpop.f32.mrf.mxu1  ;;  %v1586_v63 = vadd.f32 %v1585_v2, %v2297_v0 }
  0xe7   :  { %v2301_v4 = vpop.f32.mrf.mxu0 }
  0xe8   :  { %v2303_v5 = vpop.f32.mrf.mxu1 }
  0xe9   :  { %v2305_v6 = vpop.f32.mrf.mxu0 }
  0xea   :  { %v2307_v7 = vpop.f32.mrf.mxu1 }
  0xeb   :  { %v2309_v8 = vpop.f32.mrf.mxu0 }
  0xec   :  { %v2311_v9 = vpop.f32.mrf.mxu1 }
  0xed   :  { %v2313_v10 = vpop.f32.mrf.mxu0 }
  0xee   :  { %v2315_v11 = vpop.f32.mrf.mxu1 }
  0xef   :  { %v2317_v12 = vpop.f32.mrf.mxu0  ;;  %v1656_v2 = vadd.f32 %v2315_v11, %v2311_v9 }
  0xf0   :  { %v2319_v13 = vpop.f32.mrf.mxu1 }
  0xf1   :  { %v2321_v14 = vpop.f32.mrf.mxu0 }
  0xf2   :  { %v2323_v15 = vpop.f32.mrf.mxu1 }
  0xf3   :  { %v2325_v16 = vpop.f32.mrf.mxu0  ;;  %v1659_v9 = vadd.f32 %v2323_v15, %v2319_v13 }
  0xf4   :  { %v2327_v17 = vpop.f32.mrf.mxu1 }
  0xf5   :  { %v2329_v18 = vpop.f32.mrf.mxu0 }
  0xf6   :  { %v2331_v19 = vpop.f32.mrf.mxu1 }
  0xf7   :  { %v2333_v20 = vpop.f32.mrf.mxu0  ;;  %v1662_v13 = vadd.f32 %v2331_v19, %v2327_v17 }
  0xf8   :  { %v2335_v21 = vpop.f32.mrf.mxu1 }
  0xf9   :  { %v2337_v22 = vpop.f32.mrf.mxu0 }
  0xfa   :  { %v2339_v23 = vpop.f32.mrf.mxu1 }
  0xfb   :  { %v2341_v24 = vpop.f32.mrf.mxu0 }
  0xfc   :  { %v2343_v25 = vpop.f32.mrf.mxu1 }
  0xfd   :  { %v2345_v26 = vpop.f32.mrf.mxu0 }
  0xfe   :  { %v2347_v27 = vpop.f32.mrf.mxu1 }
  0xff   :  { %v2349_v28 = vpop.f32.mrf.mxu0 }
 0x100   :  { %v2351_v29 = vpop.f32.mrf.mxu1 }
 0x101   :  { %v2353_v30 = vpop.f32.mrf.mxu0 }
 0x102   :  { %v2355_v31 = vpop.f32.mrf.mxu1 }
 0x103   :  { %v2357_v32 = vpop.f32.mrf.mxu0 }
 0x104   :  { %v2359_v33 = vpop.f32.mrf.mxu1 }
 0x105   :  { %v2361_v34 = vpop.f32.mrf.mxu0 }
 0x106   :  { %v2363_v35 = vpop.f32.mrf.mxu1 }
 0x107   :  { %v2365_v36 = vpop.f32.mrf.mxu0 }
 0x108   :  { %v2367_v37 = vpop.f32.mrf.mxu1 }
 0x109   :  { %v2369_v38 = vpop.f32.mrf.mxu0 }
 0x10a   :  { %v2371_v39 = vpop.f32.mrf.mxu1 }
 0x10b   :  { %v2373_v40 = vpop.f32.mrf.mxu0 }
 0x10c   :  { %v2375_v41 = vpop.f32.mrf.mxu1 }
 0x10d   :  { %v2377_v42 = vpop.f32.mrf.mxu0 }
 0x10e   :  { %v2379_v43 = vpop.f32.mrf.mxu1 }
 0x10f   :  { %v2381_v44 = vpop.f32.mrf.mxu0 }
 0x110   :  { %v2383_v45 = vpop.f32.mrf.mxu1 }
 0x111   :  { %v2385_v46 = vpop.f32.mrf.mxu0 }
 0x112   :  { %v2387_v47 = vpop.f32.mrf.mxu1 }
 0x113   :  { %v2389_v48 = vpop.f32.mrf.mxu0 }
 0x114   :  { %v2391_v49 = vpop.f32.mrf.mxu1 }
 0x115   :  { %2664 = vst [vmem:[#allocation2_spill] sm:$0xff] %v2391_v49  ;;  %v2393_v50 = vpop.f32.mrf.mxu0 }
 0x116   :  { %v2395_v51 = vpop.f32.mrf.mxu1 }
 0x117   :  { %2665 = vst [vmem:[#allocation3_spill] sm:$0xff] %v2395_v51  ;;  %v2397_v52 = vpop.f32.mrf.mxu0 }
 0x118   :  { %2666 = vst [vmem:[#allocation4_spill] sm:$0xff] %v2397_v52  ;;  %v2399_v53 = vpop.f32.mrf.mxu1 }
 0x119   :  { %2667 = vst [vmem:[#allocation5_spill] sm:$0xff] %v2399_v53  ;;  %v2401_v54 = vpop.f32.mrf.mxu0  ;;  %v1650_v53 = vadd.f32 %v1649_v3, %v2299_v1  ;;  %v1592_v1 = vadd.f32 %v2313_v10, %v2309_v8  ;;  %v1595_v8 = vadd.f32 %v2321_v14, %v2317_v12  ;;  %v1598_v12 = vadd.f32 %v2329_v18, %v2325_v16 }
 0x11a   :  { %2668 = vst [vmem:[#allocation6_spill] sm:$0xff] %v2401_v54  ;;  %v2403_v55 = vpop.f32.mrf.mxu1  ;;  %v1601_v16 = vadd.f32 %v2337_v22, %v2333_v20  ;;  %v1665_v18 = vadd.f32 %v2339_v23, %v2335_v21  ;;  %v1604_v20 = vadd.f32 %v2345_v26, %v2341_v24  ;;  %v1668_v21 = vadd.f32 %v2347_v27, %v2343_v25 }
 0x11b   :  { %2669 = vst [vmem:[#allocation7_spill] sm:$0xff] %v2403_v55  ;;  %v2405_v56 = vpop.f32.mrf.mxu0  ;;  %v1054_v15 = vadd.f32 %v1659_v9, %v1595_v8  ;;  %v1607_v25 = vadd.f32 %v2353_v30, %v2349_v28  ;;  %v1671_v27 = vadd.f32 %v2355_v31, %v2351_v29  ;;  %v1610_v28 = vadd.f32 %v2361_v34, %v2357_v32 }
 0x11c   :  { %2670 = vst [vmem:[#allocation8_spill] sm:$0xff] %v2405_v56  ;;  %v2407_v57 = vpop.f32.mrf.mxu1  ;;  %v1062_v23 = vadd.f32 %v1665_v18, %v1601_v16  ;;  %v1067_v24 = vadd.f32 %v1668_v21, %v1604_v20  ;;  %v1674_v29 = vadd.f32 %v2363_v35, %v2359_v33  ;;  %v1613_v33 = vadd.f32 %v2369_v38, %v2365_v36 }
 0x11d   :  { %2671 = vst [vmem:[#allocation9_spill] sm:$0xff] %v2407_v57  ;;  %v2409_v58 = vpop.f32.mrf.mxu0  ;;  %v1043_v57 = vadd.f32 %v1650_v53, %v1586_v63  ;;  %v1070_v31 = vadd.f32 %v1671_v27, %v1607_v25  ;;  %v1677_v35 = vadd.f32 %v2371_v39, %v2367_v37  ;;  %v1616_v36 = vadd.f32 %v2377_v42, %v2373_v40 }
 0x11e   :  { %2672 = vst [vmem:[#allocation10_spill] sm:$0xff] %v2409_v58  ;;  %v2411_v59 = vpop.f32.mrf.mxu1  ;;  %v1589_v58 = vadd.f32 %v2305_v6, %v2301_v4  ;;  %v1075_v32 = vadd.f32 %v1674_v29, %v1610_v28  ;;  %v1680_v37 = vadd.f32 %v2379_v43, %v2375_v41  ;;  %v1619_v41 = vadd.f32 %v2385_v46, %v2381_v44  ;;  %v2678_v46 = vld [vmem:[#allocation2_spill] sm:$0xff] }
 0x11f   :  { %2673 = vst [vmem:[#allocation11_spill] sm:$0xff] %v2411_v59  ;;  %v2413_v60 = vpop.f32.mrf.mxu0  ;;  %v1078_v39 = vadd.f32 %v1677_v35, %v1613_v33  ;;  %v1683_v43 = vadd.f32 %v2387_v47, %v2383_v45  ;;  %v1622_v44 = vadd.f32 %v2393_v50, %v2389_v48  ;;  %v2680_v50 = vld [vmem:[#allocation4_spill] sm:$0xff] }
 0x120   :  { %2674 = vst [vmem:[#allocation12_spill] sm:$0xff] %v2413_v60  ;;  %v2415_v61 = vpop.f32.mrf.mxu1  ;;  %v1653_v60 = vadd.f32 %v2307_v7, %v2303_v5  ;;  %v1083_v40 = vadd.f32 %v1680_v37, %v1616_v36 }
 0x121   :  { %2675 = vst [vmem:[#allocation13_spill] sm:$0xff] %v2415_v61  ;;  %v2417_v62 = vpop.f32.mrf.mxu0  ;;  %v1086_v27 = vadd.f32 %v1683_v43, %v1619_v41  ;;  %v2681_v28 = vld [vmem:[#allocation6_spill] sm:$0xff] }
 0x122   :  { %2676 = vst [vmem:[#allocation14_spill] sm:$0xff] %v2417_v62  ;;  %v2421_v54 = vpop.f32.mrf.mxu1  ;;  %v1046_v53 = vadd.f32 %v1653_v60, %v1589_v58  ;;  %v1625_v29 = vadd.f32 %v2681_v28, %v2680_v50 }
 0x123   :  { %2677 = vst [vmem:[#allocation15_spill] sm:$0xff] %v2421_v54  ;;  %v1712_v55 = vpop.f32.mrf.mxu0 }
 0x124   :  { %v1776_v56 = vpop.f32.mrf.mxu1 }
 0x125   :  { %v1713_v52 = vpop.f32.mrf.mxu0  ;;  %v2685_v35 = vld [vmem:[#allocation10_spill] sm:$0xff] }
 0x126   :  { %v1714_v59 = vadd.f32 %v1713_v52, %v1712_v55  ;;  %v1777_v61 = vpop.f32.mrf.mxu1  ;;  %v1051_v55 = vadd.f32 %v1656_v2, %v1592_v1 }
 0x127   :  { %v1715_v51 = vpop.f32.mrf.mxu0  ;;  %v1778_v49 = vadd.f32 %v1777_v61, %v1776_v56 }
 0x128   :  { %v1140_v62 = vadd.f32 %v1714_v59, %v1043_v57  ;;  %v1779_v0 = vpop.f32.mrf.mxu1 }
 0x129   :  { %v1716_v3 = vpop.f32.mrf.mxu0 }
 0x12a   :  { %v1237_v63 = vadd.f32 %v1778_v49, %v1140_v62  ;;  %v1717_v54 = vadd.f32 %v1716_v3, %v1715_v51  ;;  %v1780_v4 = vpop.f32.mrf.mxu1 }
 0x12b   :  { %v1718_v6 = vpop.f32.mrf.mxu0  ;;  %v1781_v7 = vadd.f32 %v1780_v4, %v1779_v0 }
 0x12c   :  { %1299 = vst [vmem:[%s2661_s2] sm:$0xff] %v1237_v63  ;;  %v1143_v5 = vadd.f32 %v1717_v54, %v1046_v53  ;;  %v1782_v52 = vpop.f32.mrf.mxu1  ;;  %1315 = vadd.xlane.f32.xlu0 %v1237_v63  ;;  %v1364_v56 = vmul.f32 %v1237_v63, %v1237_v63  ;;  %v1059_v63 = vadd.f32 %v1662_v13, %v1598_v12 }
 0x12d   :  { %v1719_v10 = vpop.f32.mrf.mxu0 }
 0x12e   :  { %v1240_v11 = vadd.f32 %v1781_v7, %v1143_v5  ;;  %v1720_v49 = vadd.f32 %v1719_v10, %v1718_v6  ;;  %v1783_v51 = vpop.f32.mrf.mxu1 }
 0x12f   :  { %v1784_v57 = vadd.f32 %v1783_v51, %v1782_v52  ;;  %v1721_v58 = vpop.f32.mrf.mxu0 }
 0x130   :  { %1300 = vst [vmem:[%s2661_s2 + $0x8] sm:$0xff] %v1240_v11  ;;  %v1148_v54 = vadd.f32 %v1720_v49, %v1051_v55  ;;  %v1785_v59 = vpop.f32.mrf.mxu1  ;;  %1380 = vadd.xlane.f32.xlu0 %v1364_v56  ;;  %v1365_v60 = vmul.f32 %v1240_v11, %v1240_v11 }
 0x131   :  { %v1722_v14 = vpop.f32.mrf.mxu0 }
 0x132   :  { %v1245_v61 = vadd.f32 %v1784_v57, %v1148_v54  ;;  %v1723_v62 = vadd.f32 %v1722_v14, %v1721_v58  ;;  %v1786_v0 = vpop.f32.mrf.mxu1  ;;  %1382 = vadd.xlane.f32.xlu1 %v1365_v60 }
 0x133   :  { %v1724_v1 = vpop.f32.mrf.mxu0  ;;  %v1787_v3 = vadd.f32 %v1786_v0, %v1785_v59 }
 0x134   :  { %1301 = vst [vmem:[%s2661_s2 + $0x10] sm:$0xff] %v1245_v61  ;;  %v1151_v2 = vadd.f32 %v1723_v62, %v1054_v15  ;;  %v1788_v53 = vpop.f32.mrf.mxu1  ;;  %1317 = vadd.xlane.f32.xlu0 %v1240_v11  ;;  %v1366_v5 = vmul.f32 %v1245_v61, %v1245_v61 }
 0x135   :  { %v1725_v17 = vpop.f32.mrf.mxu0 }
 0x136   :  { %v1248_v19 = vadd.f32 %v1787_v3, %v1151_v2  ;;  %v1726_v4 = vadd.f32 %v1725_v17, %v1724_v1  ;;  %v1789_v6 = vpop.f32.mrf.mxu1  ;;  %1319 = vadd.xlane.f32.xlu1 %v1245_v61 }
 0x137   :  { %v1790_v7 = vadd.f32 %v1789_v6, %v1788_v53  ;;  %v1727_v52 = vpop.f32.mrf.mxu0 }
 0x138   :  { %1302 = vst [vmem:[%s2661_s2 + $0x18] sm:$0xff] %v1248_v19  ;;  %v1156_v55 = vadd.f32 %v1726_v4, %v1059_v63  ;;  %v1791_v8 = vpop.f32.mrf.mxu1  ;;  %1384 = vadd.xlane.f32.xlu0 %v1366_v5  ;;  %v1367_v58 = vmul.f32 %v1248_v19, %v1248_v19 }
 0x139   :  { %v1728_v22 = vpop.f32.mrf.mxu0 }
 0x13a   :  { %v1253_v10 = vadd.f32 %v1790_v7, %v1156_v55  ;;  %v1729_v9 = vadd.f32 %v1728_v22, %v1727_v52  ;;  %v1792_v11 = vpop.f32.mrf.mxu1  ;;  %1321 = vadd.xlane.f32.xlu1 %v1248_v19 }
 0x13b   :  { %v1730_v49 = vpop.f32.mrf.mxu0  ;;  %v1793_v56 = vadd.f32 %v1792_v11, %v1791_v8 }
 0x13c   :  { %1303 = vst [vmem:[%s2661_s2 + $0x20] sm:$0xff] %v1253_v10  ;;  %v1159_v51 = vadd.f32 %v1729_v9, %v1062_v23  ;;  %v1794_v57 = vpop.f32.mrf.mxu1  ;;  %1323 = vadd.xlane.f32.xlu0 %v1253_v10  ;;  %v1368_v12 = vmul.f32 %v1253_v10, %v1253_v10 }
 0x13d   :  { %v1731_v26 = vpop.f32.mrf.mxu0 }
 0x13e   :  { %v1256_v54 = vadd.f32 %v1793_v56, %v1159_v51  ;;  %v1732_v59 = vadd.f32 %v1731_v26, %v1730_v49  ;;  %v1795_v60 = vpop.f32.mrf.mxu1  ;;  %1386 = vadd.xlane.f32.xlu1 %v1367_v58  ;;  %v2679_v26 = vld [vmem:[#allocation3_spill] sm:$0xff] }
 0x13f   :  { %v1796_v13 = vadd.f32 %v1795_v60, %v1794_v57  ;;  %v1733_v14 = vpop.f32.mrf.mxu0  ;;  %v1686_v45 = vadd.f32 %v2679_v26, %v2678_v46 }
 0x140   :  { %1304 = vst [vmem:[%s2661_s2 + $0x28] sm:$0xff] %v1256_v54  ;;  %v1164_v15 = vadd.f32 %v1732_v59, %v1067_v24  ;;  %v1797_v61 = vpop.f32.mrf.mxu1  ;;  %1388 = vadd.xlane.f32.xlu0 %v1368_v12  ;;  %v1369_v16 = vmul.f32 %v1256_v54, %v1256_v54 }
 0x141   :  { %v1734_v30 = vpop.f32.mrf.mxu0  ;;  %v1091_v48 = vadd.f32 %v1686_v45, %v1622_v44 }
 0x142   :  { %v1261_v62 = vadd.f32 %v1796_v13, %v1164_v15  ;;  %v1735_v0 = vadd.f32 %v1734_v30, %v1733_v14  ;;  %v1798_v1 = vpop.f32.mrf.mxu1  ;;  %1325 = vadd.xlane.f32.xlu1 %v1256_v54 }
 0x143   :  { %v1736_v2 = vpop.f32.mrf.mxu0  ;;  %v1799_v53 = vadd.f32 %v1798_v1, %v1797_v61 }
 0x144   :  { %1305 = vst [vmem:[%s2661_s2 + $0x30] sm:$0xff] %v1261_v62  ;;  %v1167_v3 = vadd.f32 %v1735_v0, %v1070_v31  ;;  %v1800_v63 = vpop.f32.mrf.mxu1  ;;  %1327 = vadd.xlane.f32.xlu0 %v1261_v62  ;;  %v1370_v4 = vmul.f32 %v1261_v62, %v1261_v62  ;;  %v2682_v31 = vld [vmem:[#allocation5_spill] sm:$0xff]  ;;  %v2683_v62 = vld [vmem:[#allocation7_spill] sm:$0xff] }
 0x145   :  { %v1737_v34 = vpop.f32.mrf.mxu0  ;;  %v1689_v0 = vadd.f32 %v2683_v62, %v2682_v31 }
 0x146   :  { %v1264_v17 = vadd.f32 %v1799_v53, %v1167_v3  ;;  %v1738_v18 = vadd.f32 %v1737_v34, %v1736_v2  ;;  %v1801_v19 = vpop.f32.mrf.mxu1  ;;  %1390 = vadd.xlane.f32.xlu1 %v1369_v16  ;;  %v2684_v34 = vld [vmem:[#allocation8_spill] sm:$0xff] }
 0x147   :  { %v1802_v6 = vadd.f32 %v1801_v19, %v1800_v63  ;;  %v1739_v5 = vpop.f32.mrf.mxu0  ;;  %v2687_v19 = vld [vmem:[#allocation11_spill] sm:$0xff] }
 0x148   :  { %1306 = vst [vmem:[%s2661_s2 + $0x38] sm:$0xff] %v1264_v17  ;;  %v1172_v7 = vadd.f32 %v1738_v18, %v1075_v32  ;;  %v1803_v52 = vpop.f32.mrf.mxu1  ;;  %1392 = vadd.xlane.f32.xlu0 %v1370_v4  ;;  %v1371_v9 = vmul.f32 %v1264_v17, %v1264_v17  ;;  %v2686_v18 = vld [vmem:[#allocation9_spill] sm:$0xff] }
 0x149   :  { %v1740_v38 = vpop.f32.mrf.mxu0  ;;  %v1692_v4 = vadd.f32 %v2687_v19, %v2686_v18 }
 0x14a   :  { %v1269_v55 = vadd.f32 %v1802_v6, %v1172_v7  ;;  %v1741_v8 = vadd.f32 %v1740_v38, %v1739_v5  ;;  %v1804_v20 = vpop.f32.mrf.mxu1  ;;  %1329 = vadd.xlane.f32.xlu1 %v1264_v17  ;;  %v1628_v17 = vadd.f32 %v2685_v35, %v2684_v34  ;;  %v1094_v5 = vadd.f32 %v1689_v0, %v1625_v29 }
 0x14b   :  { %v1742_v21 = vpop.f32.mrf.mxu0  ;;  %v1805_v23 = vadd.f32 %v1804_v20, %v1803_v52 }
 0x14c   :  { %1307 = vst [vmem:[%s2661_s2 + $0x40] sm:$0xff] %v1269_v55  ;;  %v1175_v22 = vadd.f32 %v1741_v8, %v1078_v39  ;;  %v1806_v10 = vpop.f32.mrf.mxu1  ;;  %1331 = vadd.xlane.f32.xlu0 %v1269_v55  ;;  %v1372_v56 = vmul.f32 %v1269_v55, %v1269_v55  ;;  %v1099_v20 = vadd.f32 %v1692_v4, %v1628_v17 }
 0x14d   :  { %v1743_v42 = vpop.f32.mrf.mxu0 }
 0x14e   :  { %v1272_v11 = vadd.f32 %v1805_v23, %v1175_v22  ;;  %v1744_v49 = vadd.f32 %v1743_v42, %v1742_v21  ;;  %v1807_v51 = vpop.f32.mrf.mxu1  ;;  %1394 = vadd.xlane.f32.xlu1 %v1371_v9  ;;  %v2688_v21 = vld [vmem:[#allocation12_spill] sm:$0xff]  ;;  %v2689_v22 = vld [vmem:[#allocation14_spill] sm:$0xff]  ;;  %v2690_v9 = vld [vmem:[#allocation13_spill] sm:$0xff] }
 0x14f   :  { %v1808_v57 = vadd.f32 %v1807_v51, %v1806_v10  ;;  %v1745_v58 = vpop.f32.mrf.mxu0  ;;  %v1631_v23 = vadd.f32 %v2689_v22, %v2688_v21 }
 0x150   :  { %1308 = vst [vmem:[%s2661_s2 + $0x48] sm:$0xff] %v1272_v11  ;;  %v1180_v24 = vadd.f32 %v1744_v49, %v1083_v40  ;;  %v1809_v25 = vpop.f32.mrf.mxu1  ;;  %1396 = vadd.xlane.f32.xlu0 %v1372_v56  ;;  %v1373_v61 = vmul.f32 %v1272_v11, %v1272_v11  ;;  %v2691_v40 = vld [vmem:[#allocation15_spill] sm:$0xff] }
 0x151   :  { %v1746_v47 = vpop.f32.mrf.mxu0  ;;  %v1695_v41 = vadd.f32 %v2691_v40, %v2690_v9 }
 0x152   :  { %v1277_v54 = vadd.f32 %v1808_v57, %v1180_v24  ;;  %v1747_v59 = vadd.f32 %v1746_v47, %v1745_v58  ;;  %v1810_v60 = vpop.f32.mrf.mxu1  ;;  %1333 = vadd.xlane.f32.xlu1 %v1272_v11 }
 0x153   :  { %v1748_v12 = vpop.f32.mrf.mxu0  ;;  %v1811_v14 = vadd.f32 %v1810_v60, %v1809_v25  ;;  %v1102_v25 = vadd.f32 %v1695_v41, %v1631_v23 }
 0x154   :  { %1309 = vst [vmem:[%s2661_s2 + $0x50] sm:$0xff] %v1277_v54  ;;  %v1183_v13 = vadd.f32 %v1747_v59, %v1086_v27  ;;  %v1812_v15 = vpop.f32.mrf.mxu1  ;;  %1335 = vadd.xlane.f32.xlu0 %v1277_v54  ;;  %v1374_v53 = vmul.f32 %v1277_v54, %v1277_v54 }
 0x155   :  { %v1749_v30 = vpop.f32.mrf.mxu0 }
 0x156   :  { %v1280_v1 = vadd.f32 %v1811_v14, %v1183_v13  ;;  %v1750_v2 = vadd.f32 %v1749_v30, %v1748_v12  ;;  %v1813_v3 = vpop.f32.mrf.mxu1  ;;  %1398 = vadd.xlane.f32.xlu1 %v1373_v61 }
 0x157   :  { %v1814_v63 = vadd.f32 %v1813_v3, %v1812_v15  ;;  %v1751_v16 = vpop.f32.mrf.mxu0 }
 0x158   :  { %1310 = vst [vmem:[%s2661_s2 + $0x58] sm:$0xff] %v1280_v1  ;;  %v1188_v32 = vadd.f32 %v1750_v2, %v1091_v48  ;;  %v1815_v33 = vpop.f32.mrf.mxu1  ;;  %1400 = vadd.xlane.f32.xlu0 %v1374_v53  ;;  %v1375_v8 = vmul.f32 %v1280_v1, %v1280_v1 }
 0x159   :  { %v1752_v6 = vpop.f32.mrf.mxu0 }
 0x15a   :  { %v1285_v7 = vadd.f32 %v1814_v63, %v1188_v32  ;;  %v1753_v52 = vadd.f32 %v1752_v6, %v1751_v16  ;;  %v1816_v36 = vpop.f32.mrf.mxu1  ;;  %1337 = vadd.xlane.f32.xlu1 %v1280_v1 }
 0x15b   :  { %v1754_v37 = vpop.f32.mrf.mxu0  ;;  %v1817_v39 = vadd.f32 %v1816_v36, %v1815_v33 }
 0x15c   :  { %1311 = vst [vmem:[%s2661_s2 + $0x60] sm:$0xff] %v1285_v7  ;;  %v1191_v38 = vadd.f32 %v1753_v52, %v1094_v5  ;;  %v1818_v55 = vpop.f32.mrf.mxu1  ;;  %1339 = vadd.xlane.f32.xlu0 %v1285_v7  ;;  %v1376_v49 = vmul.f32 %v1285_v7, %v1285_v7 }
 0x15d   :  { %v1755_v10 = vpop.f32.mrf.mxu0 }
 0x15e   :  { %v1288_v42 = vadd.f32 %v1817_v39, %v1191_v38  ;;  %v1756_v43 = vadd.f32 %v1755_v10, %v1754_v37  ;;  %v1819_v11 = vpop.f32.mrf.mxu1  ;;  %1402 = vadd.xlane.f32.xlu1 %v1375_v8 }
 0x15f   :  { %v1820_v51 = vadd.f32 %v1819_v11, %v1818_v55  ;;  %v1757_v56 = vpop.f32.mrf.mxu0 }
 0x160   :  { %1312 = vst [vmem:[%s2661_s2 + $0x68] sm:$0xff] %v1288_v42  ;;  %v1196_v57 = vadd.f32 %v1756_v43, %v1099_v20  ;;  %v1821_v58 = vpop.f32.mrf.mxu1  ;;  %1404 = vadd.xlane.f32.xlu0 %v1376_v49  ;;  %v1377_v27 = vmul.f32 %v1288_v42, %v1288_v42 }
 0x161   :  { %v1758_v24 = vpop.f32.mrf.mxu0 }
 0x162   :  { %v1293_v44 = vadd.f32 %v1820_v51, %v1196_v57  ;;  %v1759_v46 = vadd.f32 %v1758_v24, %v1757_v56  ;;  %v1822_v26 = vpop.f32.mrf.mxu1  ;;  %1341 = vadd.xlane.f32.xlu1 %v1288_v42 }
 0x163   :  { %v1823_v47 = vadd.f32 %v1822_v26, %v1821_v58 }
 0x164   :  { %1313 = vst [vmem:[%s2661_s2 + $0x70] sm:$0xff] %v1293_v44  ;;  %v1199_v45 = vadd.f32 %v1759_v46, %v1102_v25  ;;  %1343 = vadd.xlane.f32.xlu0 %v1293_v44  ;;  %v1378_v59 = vmul.f32 %v1293_v44, %v1293_v44 }
 0x166   :  { %v1296_v54 = vadd.f32 %v1823_v47, %v1199_v45  ;;  %1406 = vadd.xlane.f32.xlu1 %v1377_v27 }
 0x168   :  { %1314 = vst [vmem:[%s2661_s2 + $0x78] sm:$0xff] %v1296_v54  ;;  %1408 = vadd.xlane.f32.xlu0 %v1378_v59  ;;  %v1379_v60 = vmul.f32 %v1296_v54, %v1296_v54 }
 0x16a   :  { %1345 = vadd.xlane.f32.xlu1 %v1296_v54 }
 0x16e   :  { %1410 = vadd.xlane.f32.xlu1 %v1379_v60 }
 0x1b5   :  { %v1316_v12 = vpop.xlane.xlu0 %1315 }
 0x1b6   :  { %1348 = vst.msk [vmem:[%s2662_s3] sm:$0xff] %vm1347_vm0, %v1316_v12 }
 0x1b9   :  { %v1381_v13 = vpop.xlane.xlu0 %1380 }
 0x1ba   :  { %1412 = vst.msk [vmem:[%s2663_s4] sm:$0xff] %vm1347_vm0, %v1381_v13 }
 0x1bb   :  { %v1383_v14 = vpop.xlane.xlu1 %1382 }
 0x1bc   :  { %1413 = vst.msk [vmem:[%s2663_s4 + $0x8] sm:$0xff] %vm1347_vm0, %v1383_v14 }
 0x1bd   :  { %v1318_v15 = vpop.xlane.xlu0 %1317 }
 0x1be   :  { %1349 = vst.msk [vmem:[%s2662_s3 + $0x8] sm:$0xff] %vm1347_vm0, %v1318_v15 }
 0x1bf   :  { %v1320_v61 = vpop.xlane.xlu1 %1319 }
 0x1c0   :  { %1350 = vst.msk [vmem:[%s2662_s3 + $0x10] sm:$0xff] %vm1347_vm0, %v1320_v61 }
 0x1c1   :  { %v1385_v48 = vpop.xlane.xlu0 %1384 }
 0x1c2   :  { %1414 = vst.msk [vmem:[%s2663_s4 + $0x10] sm:$0xff] %vm1347_vm0, %v1385_v48 }
 0x1c3   :  { %v1322_v50 = vpop.xlane.xlu1 %1321 }
 0x1c4   :  { %1351 = vst.msk [vmem:[%s2662_s3 + $0x18] sm:$0xff] %vm1347_vm0, %v1322_v50 }
 0x1c5   :  { %v1324_v28 = vpop.xlane.xlu0 %1323 }
 0x1c6   :  { %1352 = vst.msk [vmem:[%s2662_s3 + $0x20] sm:$0xff] %vm1347_vm0, %v1324_v28 }
 0x1c7   :  { %v1387_v29 = vpop.xlane.xlu1 %1386 }
 0x1c8   :  { %1415 = vst.msk [vmem:[%s2663_s4 + $0x18] sm:$0xff] %vm1347_vm0, %v1387_v29 }
 0x1c9   :  { %v1389_v30 = vpop.xlane.xlu0 %1388 }
 0x1ca   :  { %1416 = vst.msk [vmem:[%s2663_s4 + $0x20] sm:$0xff] %vm1347_vm0, %v1389_v30 }
 0x1cb   :  { %v1326_v31 = vpop.xlane.xlu1 %1325 }
 0x1cc   :  { %1353 = vst.msk [vmem:[%s2662_s3 + $0x28] sm:$0xff] %vm1347_vm0, %v1326_v31 }
 0x1cd   :  { %v1328_v62 = vpop.xlane.xlu0 %1327 }
 0x1ce   :  { %1354 = vst.msk [vmem:[%s2662_s3 + $0x30] sm:$0xff] %vm1347_vm0, %v1328_v62 }
 0x1cf   :  { %v1391_v0 = vpop.xlane.xlu1 %1390 }
 0x1d0   :  { %1417 = vst.msk [vmem:[%s2663_s4 + $0x28] sm:$0xff] %vm1347_vm0, %v1391_v0 }
 0x1d1   :  { %v1393_v1 = vpop.xlane.xlu0 %1392 }
 0x1d2   :  { %1418 = vst.msk [vmem:[%s2663_s4 + $0x30] sm:$0xff] %vm1347_vm0, %v1393_v1 }
 0x1d3   :  { %v1330_v2 = vpop.xlane.xlu1 %1329 }
 0x1d4   :  { %1355 = vst.msk [vmem:[%s2662_s3 + $0x38] sm:$0xff] %vm1347_vm0, %v1330_v2 }
 0x1d5   :  { %v1332_v3 = vpop.xlane.xlu0 %1331 }
 0x1d6   :  { %1356 = vst.msk [vmem:[%s2662_s3 + $0x40] sm:$0xff] %vm1347_vm0, %v1332_v3 }
 0x1d7   :  { %v1395_v53 = vpop.xlane.xlu1 %1394 }
 0x1d8   :  { %1419 = vst.msk [vmem:[%s2663_s4 + $0x38] sm:$0xff] %vm1347_vm0, %v1395_v53 }
 0x1d9   :  { %v1397_v63 = vpop.xlane.xlu0 %1396 }
 0x1da   :  { %1420 = vst.msk [vmem:[%s2663_s4 + $0x40] sm:$0xff] %vm1347_vm0, %v1397_v63 }
 0x1db   :  { %v1334_v16 = vpop.xlane.xlu1 %1333 }
 0x1dc   :  { %1357 = vst.msk [vmem:[%s2662_s3 + $0x48] sm:$0xff] %vm1347_vm0, %v1334_v16 }
 0x1dd   :  { %v1336_v32 = vpop.xlane.xlu0 %1335 }
 0x1de   :  { %1358 = vst.msk [vmem:[%s2662_s3 + $0x50] sm:$0xff] %vm1347_vm0, %v1336_v32 }
 0x1df   :  { %v1399_v33 = vpop.xlane.xlu1 %1398 }
 0x1e0   :  { %1421 = vst.msk [vmem:[%s2663_s4 + $0x48] sm:$0xff] %vm1347_vm0, %v1399_v33 }
 0x1e1   :  { %v1401_v34 = vpop.xlane.xlu0 %1400 }
 0x1e2   :  { %1422 = vst.msk [vmem:[%s2663_s4 + $0x50] sm:$0xff] %vm1347_vm0, %v1401_v34 }
 0x1e3   :  { %v1338_v35 = vpop.xlane.xlu1 %1337 }
 0x1e4   :  { %1359 = vst.msk [vmem:[%s2662_s3 + $0x58] sm:$0xff] %vm1347_vm0, %v1338_v35 }
 0x1e5   :  { %v1340_v17 = vpop.xlane.xlu0 %1339 }
 0x1e6   :  { %1360 = vst.msk [vmem:[%s2662_s3 + $0x60] sm:$0xff] %vm1347_vm0, %v1340_v17 }
 0x1e7   :  { %v1403_v18 = vpop.xlane.xlu1 %1402 }
 0x1e8   :  { %1423 = vst.msk [vmem:[%s2663_s4 + $0x58] sm:$0xff] %vm1347_vm0, %v1403_v18 }
 0x1e9   :  { %v1405_v19 = vpop.xlane.xlu0 %1404 }
 0x1ea   :  { %1424 = vst.msk [vmem:[%s2663_s4 + $0x60] sm:$0xff] %vm1347_vm0, %v1405_v19 }
 0x1eb   :  { %v1342_v4 = vpop.xlane.xlu1 %1341 }
 0x1ec   :  { %1361 = vst.msk [vmem:[%s2662_s3 + $0x68] sm:$0xff] %vm1347_vm0, %v1342_v4 }
 0x1ed   :  { %v1344_v6 = vpop.xlane.xlu0 %1343 }
 0x1ee   :  { %1362 = vst.msk [vmem:[%s2662_s3 + $0x70] sm:$0xff] %vm1347_vm0, %v1344_v6 }
 0x1ef   :  { %v1407_v5 = vpop.xlane.xlu1 %1406 }
 0x1f0   :  { %1425 = vst.msk [vmem:[%s2663_s4 + $0x68] sm:$0xff] %vm1347_vm0, %v1407_v5 }
 0x1f1   :  { %v1409_v7 = vpop.xlane.xlu0 %1408 }
 0x1f2   :  { %1426 = vst.msk [vmem:[%s2663_s4 + $0x70] sm:$0xff] %vm1347_vm0, %v1409_v7 }
 0x1f3   :  { %v1346_v52 = vpop.xlane.xlu1 %1345 }
 0x1f4   :  { %1363 = vst.msk [vmem:[%s2662_s3 + $0x78] sm:$0xff] %vm1347_vm0, %v1346_v52 }
 0x1f7   :  { %v1411_v36 = vpop.xlane.xlu1 %1410 }
 0x1f8   :  { %1427 = vst.msk [vmem:[%s2663_s4 + $0x78] sm:$0xff] %vm1347_vm0, %v1411_v36 }

// kernel: discriminator_forward.12
= control target key start
LH: loop header
LB: loop body
LE: loop exit
PB: predicated region body
PF: predicated region fallthrough
CT: control target
= control target key end

     0   :  { %v564_v0 = vmov 0   ;;  %s851_s1 = inlined_call_operand.vmem [shape: f32[128,1], index: 1, kind: input, shape index: {}]   ;;  %s852_s2 = inlined_call_operand.vmem [shape: f32[128,1], index: 2, kind: input, shape index: {}]   ;;  %s853_s0 = inlined_call_operand.vmem [shape: f32[128,128], index: 0, kind: input, shape index: {}]   ;;  %s854_s3 = inlined_call_operand.vmem [shape: bf16[128,128], index: 3, kind: output, shape index: {}]  }
   0x1   :  { %531 = vset.pattern.permute.xlu1 %v564_v0  ;;  %530 = vset.pattern.permute.xlu0 %v564_v0  ;;  %v32_v1 = vld [vmem:[%s851_s1 + $0x10] sm:$0xff]  ;;  %v30_v2 = vld [vmem:[%s851_s1] sm:$0xff]  ;;  %v33_v3 = vld [vmem:[%s851_s1 + $0x18] sm:$0xff] }
   0x2   :  { %58 = vperm.xlu1 %531, %v32_v1   ;;  %48 = vperm.xlu0 %530, %v30_v2   ;;  %v31_v4 = vld [vmem:[%s851_s1 + $0x8] sm:$0xff]  ;;  %v34_v6 = vld [vmem:[%s851_s1 + $0x20] sm:$0xff]  ;;  %v37_v7 = vld [vmem:[%s851_s1 + $0x38] sm:$0xff] }
   0x3   :  { %v35_v5 = vld [vmem:[%s851_s1 + $0x28] sm:$0xff]  ;;  %v36_v8 = vld [vmem:[%s851_s1 + $0x30] sm:$0xff]  ;;  %v38_v10 = vld [vmem:[%s851_s1 + $0x40] sm:$0xff] }
   0x4   :  { %v39_v9 = vld [vmem:[%s851_s1 + $0x48] sm:$0xff]  ;;  %v41_v11 = vld [vmem:[%s851_s1 + $0x58] sm:$0xff]  ;;  %v40_v12 = vld [vmem:[%s851_s1 + $0x50] sm:$0xff] }
   0x5   :  { %v43_v13 = vld [vmem:[%s851_s1 + $0x68] sm:$0xff]  ;;  %v42_v14 = vld [vmem:[%s851_s1 + $0x60] sm:$0xff]  ;;  %v45_v15 = vld [vmem:[%s851_s1 + $0x78] sm:$0xff] }
   0x6   :  { %63 = vperm.xlu1 %531, %v33_v3   ;;  %53 = vperm.xlu0 %530, %v31_v4   ;;  %v44_v16 = vld [vmem:[%s851_s1 + $0x70] sm:$0xff]  ;;  %v143_v17 = vld [vmem:[%s852_s2 + $0x8] sm:$0xff]  ;;  %v142_v18 = vld [vmem:[%s852_s2] sm:$0xff] }
   0x7   :  { %v145_v19 = vld [vmem:[%s852_s2 + $0x18] sm:$0xff]  ;;  %v144_v20 = vld [vmem:[%s852_s2 + $0x10] sm:$0xff]  ;;  %v147_v21 = vld [vmem:[%s852_s2 + $0x28] sm:$0xff] }
   0x8   :  { %v146_v22 = vld [vmem:[%s852_s2 + $0x20] sm:$0xff]  ;;  %v149_v23 = vld [vmem:[%s852_s2 + $0x38] sm:$0xff]  ;;  %v148_v24 = vld [vmem:[%s852_s2 + $0x30] sm:$0xff] }
   0x9   :  { %v151_v25 = vld [vmem:[%s852_s2 + $0x48] sm:$0xff]  ;;  %v150_v26 = vld [vmem:[%s852_s2 + $0x40] sm:$0xff]  ;;  %v153_v27 = vld [vmem:[%s852_s2 + $0x58] sm:$0xff] }
   0xa   :  { %73 = vperm.xlu1 %531, %v35_v5   ;;  %68 = vperm.xlu0 %530, %v34_v6   ;;  %v152_v28 = vld [vmem:[%s852_s2 + $0x50] sm:$0xff]  ;;  %v155_v29 = vld [vmem:[%s852_s2 + $0x68] sm:$0xff]  ;;  %v154_v30 = vld [vmem:[%s852_s2 + $0x60] sm:$0xff] }
   0xb   :  { %v157_v31 = vld [vmem:[%s852_s2 + $0x78] sm:$0xff]  ;;  %v156_v32 = vld [vmem:[%s852_s2 + $0x70] sm:$0xff]  ;;  %v14_v47 = vld [vmem:[%s853_s0] sm:$0xff] }
   0xc   :  { %v15_v48 = vld [vmem:[%s853_s0 + $0x8] sm:$0xff]  ;;  %v16_v53 = vld [vmem:[%s853_s0 + $0x10] sm:$0xff]  ;;  %v17_v54 = vld [vmem:[%s853_s0 + $0x18] sm:$0xff] }
   0xd   :  { %v19_v63 = vld [vmem:[%s853_s0 + $0x28] sm:$0xff]  ;;  %v18_v0 = vld [vmem:[%s853_s0 + $0x20] sm:$0xff] }
   0xe   :  { %83 = vperm.xlu1 %531, %v37_v7   ;;  %78 = vperm.xlu0 %530, %v36_v8  }
  0x12   :  { %93 = vperm.xlu1 %531, %v39_v9   ;;  %88 = vperm.xlu0 %530, %v38_v10   ;;  %v21_v10 = vld [vmem:[%s853_s0 + $0x38] sm:$0xff] }
  0x16   :  { %103 = vperm.xlu1 %531, %v41_v11   ;;  %98 = vperm.xlu0 %530, %v40_v12   ;;  %v20_v11 = vld [vmem:[%s853_s0 + $0x30] sm:$0xff] }
  0x1a   :  { %113 = vperm.xlu1 %531, %v43_v13   ;;  %108 = vperm.xlu0 %530, %v42_v14  }
  0x1e   :  { %123 = vperm.xlu1 %531, %v45_v15   ;;  %118 = vperm.xlu0 %530, %v44_v16  }
  0x22   :  { %165 = vperm.xlu1 %531, %v143_v17   ;;  %160 = vperm.xlu0 %530, %v142_v18  }
  0x26   :  { %175 = vperm.xlu1 %531, %v145_v19   ;;  %170 = vperm.xlu0 %530, %v144_v20  }
  0x2a   :  { %185 = vperm.xlu1 %531, %v147_v21   ;;  %180 = vperm.xlu0 %530, %v146_v22   ;;  %v23_v22 = vld [vmem:[%s853_s0 + $0x48] sm:$0xff] }
  0x2e   :  { %195 = vperm.xlu1 %531, %v149_v23   ;;  %190 = vperm.xlu0 %530, %v148_v24   ;;  %v22_v23 = vld [vmem:[%s853_s0 + $0x40] sm:$0xff] }
  0x32   :  { %205 = vperm.xlu1 %531, %v151_v25   ;;  %200 = vperm.xlu0 %530, %v150_v26  }
  0x36   :  { %215 = vperm.xlu1 %531, %v153_v27   ;;  %210 = vperm.xlu0 %530, %v152_v28  }
  0x3a   :  { %225 = vperm.xlu1 %531, %v155_v29   ;;  %220 = vperm.xlu0 %530, %v154_v30  }
  0x3e   :  { %235 = vperm.xlu1 %531, %v157_v31   ;;  %230 = vperm.xlu0 %530, %v156_v32  }
  0x7d   :  { %v59_v33 = vpop.permute.xlu1 %58  ;;  %v49_v34 = vpop.permute.xlu0 %48 }
  0x7e   :  { %v126_v51 = vmul.f32 %v49_v34, %v14_v47  ;;  %v128_v59 = vmul.f32 %v59_v33, %v16_v53  ;;  %v25_v34 = vld [vmem:[%s853_s0 + $0x58] sm:$0xff] }
  0x81   :  { %v64_v35 = vpop.permute.xlu1 %63  ;;  %v54_v36 = vpop.permute.xlu0 %53 }
  0x82   :  { %v127_v52 = vmul.f32 %v54_v36, %v15_v48  ;;  %v129_v60 = vmul.f32 %v64_v35, %v17_v54  ;;  %v24_v35 = vld [vmem:[%s853_s0 + $0x50] sm:$0xff] }
  0x85   :  { %v74_v37 = vpop.permute.xlu1 %73  ;;  %v69_v38 = vpop.permute.xlu0 %68 }
  0x86   :  { %v131_v7 = vmul.f32 %v74_v37, %v19_v63  ;;  %v130_v8 = vmul.f32 %v69_v38, %v18_v0 }
  0x89   :  { %v84_v39 = vpop.permute.xlu1 %83  ;;  %v79_v40 = vpop.permute.xlu0 %78 }
  0x8a   :  { %v133_v19 = vmul.f32 %v84_v39, %v21_v10  ;;  %v132_v20 = vmul.f32 %v79_v40, %v20_v11  ;;  %v27_v39 = vld [vmem:[%s853_s0 + $0x68] sm:$0xff] }
  0x8d   :  { %v94_v41 = vpop.permute.xlu1 %93  ;;  %v89_v42 = vpop.permute.xlu0 %88 }
  0x8e   :  { %v135_v31 = vmul.f32 %v94_v41, %v23_v22  ;;  %v134_v32 = vmul.f32 %v89_v42, %v22_v23 }
  0x91   :  { %v681_v43 = vpop.permute.xlu1 %103  ;;  %v683_v44 = vpop.permute.xlu0 %98 }
  0x92   :  { %v137_v48 = vmul.f32 %v681_v43, %v25_v34  ;;  %v29_v43 = vld [vmem:[%s853_s0 + $0x78] sm:$0xff] }
  0x95   :  { %v685_v45 = vpop.permute.xlu1 %113  ;;  %v687_v46 = vpop.permute.xlu0 %108 }
  0x99   :  { %v695_v49 = vpop.permute.xlu1 %123  ;;  %v697_v50 = vpop.permute.xlu0 %118 }
  0x9d   :  { %v166_v55 = vpop.permute.xlu1 %165  ;;  %v161_v56 = vpop.permute.xlu0 %160 }
  0x9e   :  { %v705_v57 = vadd.f32 %v166_v55, %v127_v52  ;;  %v707_v58 = vadd.f32 %v161_v56, %v126_v51  ;;  %v136_v51 = vmul.f32 %v683_v44, %v24_v35  ;;  %v26_v52 = vld [vmem:[%s853_s0 + $0x60] sm:$0xff]  ;;  %v139_v55 = vmul.f32 %v685_v45, %v27_v39 }
  0xa0   :  { %v271_v61 = vmin.f32 %v705_v57, 0.0  ;;  %v270_v62 = vmin.f32 %v707_v58, 0.0  ;;  %vm255_vm0 = vcmp.gt.f32.partialorder %v705_v57, 0.0  ;;  %vm254_vm1 = vcmp.gt.f32.partialorder %v707_v58, 0.0 }
  0xa1   :  { %v176_v1 = vpop.permute.xlu1 %175  ;;  %v171_v2 = vpop.permute.xlu0 %170 }
  0xa2   :  { %v288_v3 = vmul.f32 1.442695, %v271_v61  ;;  %v286_v4 = vmul.f32 1.442695, %v270_v62  ;;  %v717_v5 = vadd.f32 %v176_v1, %v129_v60  ;;  %v719_v6 = vadd.f32 %v171_v2, %v128_v59 }
  0xa3   :  { %v138_v1 = vmul.f32 %v687_v46, %v26_v52 }
  0xa4   :  { %532 = vpow2.f32 %v288_v3  ;;  %v273_v9 = vmin.f32 %v717_v5, 0.0  ;;  %v272_v12 = vmin.f32 %v719_v6, 0.0  ;;  %vm257_vm2 = vcmp.gt.f32.partialorder %v717_v5, 0.0 }
  0xa5   :  { %534 = vpow2.f32 %v286_v4  ;;  %v186_v13 = vpop.permute.xlu1 %185  ;;  %v181_v14 = vpop.permute.xlu0 %180  ;;  %vm256_vm3 = vcmp.gt.f32.partialorder %v719_v6, 0.0 }
  0xa6   :  { %v292_v15 = vmul.f32 1.442695, %v273_v9  ;;  %v729_v16 = vadd.f32 %v186_v13, %v131_v7  ;;  %v731_v17 = vadd.f32 %v181_v14, %v130_v8  ;;  %v290_v18 = vmul.f32 1.442695, %v272_v12 }
  0xa7   :  { %v141_v8 = vmul.f32 %v695_v49, %v29_v43 }
  0xa8   :  { %536 = vpow2.f32 %v292_v15  ;;  %v275_v21 = vmin.f32 %v729_v16, 0.0  ;;  %v274_v24 = vmin.f32 %v731_v17, 0.0  ;;  %vm259_vm4 = vcmp.gt.f32.partialorder %v729_v16, 0.0 }
  0xa9   :  { %538 = vpow2.f32 %v290_v18  ;;  %v196_v25 = vpop.permute.xlu1 %195  ;;  %v191_v26 = vpop.permute.xlu0 %190  ;;  %vm258_vm5 = vcmp.gt.f32.partialorder %v731_v17, 0.0 }
  0xaa   :  { %v296_v27 = vmul.f32 1.442695, %v275_v21  ;;  %v741_v28 = vadd.f32 %v196_v25, %v133_v19  ;;  %v743_v29 = vadd.f32 %v191_v26, %v132_v20  ;;  %v294_v30 = vmul.f32 1.442695, %v274_v24 }
  0xac   :  { %540 = vpow2.f32 %v296_v27  ;;  %v277_v33 = vmin.f32 %v741_v28, 0.0  ;;  %v276_v36 = vmin.f32 %v743_v29, 0.0  ;;  %vm261_vm6 = vcmp.gt.f32.partialorder %v741_v28, 0.0 }
  0xad   :  { %542 = vpow2.f32 %v294_v30  ;;  %v206_v37 = vpop.permute.xlu1 %205  ;;  %v201_v38 = vpop.permute.xlu0 %200  ;;  %vm260_vm7 = vcmp.gt.f32.partialorder %v743_v29, 0.0 }
  0xae   :  { %v300_v40 = vmul.f32 1.442695, %v277_v33  ;;  %v756_v41 = vadd.f32 %v206_v37, %v135_v31  ;;  %v758_v42 = vadd.f32 %v201_v38, %v134_v32  ;;  %v298_v47 = vmul.f32 1.442695, %v276_v36 }
  0xb0   :  { %544 = vpow2.f32 %v300_v40  ;;  %v279_v53 = vmin.f32 %v756_v41, 0.0  ;;  %v278_v56 = vmin.f32 %v758_v42, 0.0  ;;  %vm263_vm8 = vcmp.gt.f32.partialorder %v756_v41, 0.0 }
  0xb1   :  { %v533_v54 = vpop.eup %532  ;;  %546 = vpow2.f32 %v298_v47  ;;  %v216_v59 = vpop.permute.xlu1 %215  ;;  %vm262_vm9 = vcmp.gt.f32.partialorder %v758_v42, 0.0 }
  0xb2   :  { %v211_v60 = vpop.permute.xlu0 %210  ;;  %v535_v61 = vpop.eup %534  ;;  %v435_v44 = vadd.f32 -1.0, %v533_v54  ;;  %v304_v62 = vmul.f32 1.442695, %v279_v53  ;;  %v771_v63 = vadd.f32 %v216_v59, %v137_v48  ;;  %v302_v2 = vmul.f32 1.442695, %v278_v56 }
  0xb3   :  { %v773_v0 = vadd.f32 %v211_v60, %v136_v51  ;;  %v434_v45 = vadd.f32 -1.0, %v535_v61 }
  0xb4   :  { %v335_v3 = vsel %vm255_vm0, %v705_v57, %v435_v44  ;;  %548 = vpow2.f32 %v304_v62  ;;  %v281_v4 = vmin.f32 %v771_v63, 0.0  ;;  %v28_v57 = vld [vmem:[%s853_s0 + $0x70] sm:$0xff]  ;;  %vm265_vm10 = vcmp.gt.f32.partialorder %v771_v63, 0.0 }
  0xb5   :  { %v537_v7 = vpop.eup %536  ;;  %v334_v9 = vsel %vm254_vm1, %v707_v58, %v434_v45  ;;  %550 = vpow2.f32 %v302_v2  ;;  %v280_v10 = vmin.f32 %v773_v0, 0.0  ;;  %v226_v46 = vpop.permute.xlu1 %225  ;;  %v140_v23 = vmul.f32 %v697_v50, %v28_v57 }
  0xb6   :  { %v221_v11 = vpop.permute.xlu0 %220  ;;  %v539_v12 = vpop.eup %538  ;;  %v485_v13 = vpack.c.bf16 %v335_v3, %v334_v9  ;;  %v437_v14 = vadd.f32 -1.0, %v537_v7  ;;  %v308_v15 = vmul.f32 1.442695, %v281_v4  ;;  %v786_v18 = vadd.f32 %v226_v46, %v139_v55 }
  0xb7   :  { %v436_v49 = vadd.f32 -1.0, %v539_v12  ;;  %v306_v19 = vmul.f32 1.442695, %v280_v10  ;;  %v789_v58 = vadd.f32 %v221_v11, %v138_v1  ;;  %vm264_vm11 = vcmp.gt.f32.partialorder %v773_v0, 0.0 }
  0xb8   :  { %486 = vst [vmem:[%s854_s3] sm:$0xff] %v485_v13   ;;  %v337_v20 = vsel %vm257_vm2, %v717_v5, %v437_v14  ;;  %552 = vpow2.f32 %v308_v15  ;;  %v283_v21 = vmin.f32 %v786_v18, 0.0  ;;  %vm267_vm12 = vcmp.gt.f32.partialorder %v786_v18, 0.0 }
  0xb9   :  { %v541_v22 = vpop.eup %540  ;;  %v336_v24 = vsel %vm256_vm3, %v719_v6, %v436_v49  ;;  %554 = vpow2.f32 %v306_v19  ;;  %v282_v25 = vmin.f32 %v789_v58, 0.0  ;;  %v236_v26 = vpop.permute.xlu1 %235  ;;  %vm266_vm13 = vcmp.gt.f32.partialorder %v789_v58, 0.0 }
  0xba   :  { %v231_v27 = vpop.permute.xlu0 %230  ;;  %v543_v30 = vpop.eup %542  ;;  %v490_v31 = vpack.c.bf16 %v337_v20, %v336_v24  ;;  %v439_v32 = vadd.f32 -1.0, %v541_v22  ;;  %v312_v33 = vmul.f32 1.442695, %v283_v21  ;;  %v800_v5 = vadd.f32 %v236_v26, %v141_v8 }
  0xbb   :  { %v438_v34 = vadd.f32 -1.0, %v543_v30  ;;  %v310_v35 = vmul.f32 1.442695, %v282_v25  ;;  %v803_v36 = vadd.f32 %v231_v27, %v140_v23 }
  0xbc   :  { %522 = vst [vmem:[%s854_s3 + $0x8] sm:$0xff] %v490_v31   ;;  %v339_v50 = vsel %vm259_vm4, %v729_v16, %v439_v32  ;;  %556 = vpow2.f32 %v312_v33  ;;  %v285_v6 = vmin.f32 %v800_v5, 0.0  ;;  %vm269_vm14 = vcmp.gt.f32.partialorder %v800_v5, 0.0 }
  0xbd   :  { %v545_v37 = vpop.eup %544  ;;  %v338_v38 = vsel %vm258_vm5, %v731_v17, %v438_v34  ;;  %558 = vpow2.f32 %v310_v35  ;;  %v284_v39 = vmin.f32 %v803_v36, 0.0  ;;  %vm268_vm15 = vcmp.gt.f32.partialorder %v803_v36, 0.0 }
  0xbe   :  { %v547_v40 = vpop.eup %546  ;;  %v495_v47 = vpack.c.bf16 %v339_v50, %v338_v38  ;;  %v441_v48 = vadd.f32 -1.0, %v545_v37  ;;  %v316_v51 = vmul.f32 1.442695, %v285_v6 }
  0xbf   :  { %v440_v52 = vadd.f32 -1.0, %v547_v40  ;;  %v314_v53 = vmul.f32 1.442695, %v284_v39 }
  0xc0   :  { %523 = vst [vmem:[%s854_s3 + $0x10] sm:$0xff] %v495_v47   ;;  %v341_v16 = vsel %vm261_vm6, %v741_v28, %v441_v48  ;;  %560 = vpow2.f32 %v316_v51 }
  0xc1   :  { %v549_v17 = vpop.eup %548  ;;  %v340_v54 = vsel %vm260_vm7, %v743_v29, %v440_v52  ;;  %562 = vpow2.f32 %v314_v53 }
  0xc2   :  { %v551_v55 = vpop.eup %550  ;;  %v500_v56 = vpack.c.bf16 %v341_v16, %v340_v54  ;;  %v443_v59 = vadd.f32 -1.0, %v549_v17 }
  0xc3   :  { %v442_v60 = vadd.f32 -1.0, %v551_v55 }
  0xc4   :  { %524 = vst [vmem:[%s854_s3 + $0x18] sm:$0xff] %v500_v56   ;;  %v343_v61 = vsel %vm263_vm8, %v756_v41, %v443_v59 }
  0xc5   :  { %v553_v28 = vpop.eup %552  ;;  %v342_v43 = vsel %vm262_vm9, %v758_v42, %v442_v60 }
  0xc6   :  { %v555_v44 = vpop.eup %554  ;;  %v505_v29 = vpack.c.bf16 %v343_v61, %v342_v43  ;;  %v445_v62 = vadd.f32 -1.0, %v553_v28 }
  0xc7   :  { %v444_v1 = vadd.f32 -1.0, %v555_v44 }
  0xc8   :  { %525 = vst [vmem:[%s854_s3 + $0x20] sm:$0xff] %v505_v29   ;;  %v345_v45 = vsel %vm265_vm10, %v771_v63, %v445_v62 }
  0xc9   :  { %v557_v41 = vpop.eup %556  ;;  %v344_v2 = vsel %vm264_vm11, %v773_v0, %v444_v1 }
  0xca   :  { %v559_v3 = vpop.eup %558  ;;  %v510_v4 = vpack.c.bf16 %v345_v45, %v344_v2  ;;  %v447_v42 = vadd.f32 -1.0, %v557_v41 }
  0xcb   :  { %v446_v7 = vadd.f32 -1.0, %v559_v3 }
  0xcc   :  { %526 = vst [vmem:[%s854_s3 + $0x28] sm:$0xff] %v510_v4   ;;  %v347_v8 = vsel %vm267_vm12, %v786_v18, %v447_v42 }
  0xcd   :  { %v561_v63 = vpop.eup %560  ;;  %v346_v9 = vsel %vm266_vm13, %v789_v58, %v446_v7 }
  0xce   :  { %v563_v10 = vpop.eup %562  ;;  %v515_v46 = vpack.c.bf16 %v347_v8, %v346_v9  ;;  %v449_v0 = vadd.f32 -1.0, %v561_v63 }
  0xcf   :  { %v448_v11 = vadd.f32 -1.0, %v563_v10 }
  0xd0   :  { %527 = vst [vmem:[%s854_s3 + $0x30] sm:$0xff] %v515_v46   ;;  %v349_v12 = vsel %vm269_vm14, %v800_v5, %v449_v0 }
  0xd1   :  { %v348_v57 = vsel %vm268_vm15, %v803_v36, %v448_v11 }
  0xd2   :  { %v520_v13 = vpack.c.bf16 %v349_v12, %v348_v57 }
  0xd4   :  { %528 = vst [vmem:[%s854_s3 + $0x38] sm:$0xff] %v520_v13  }

// kernel: discriminator_forward.14
= control target key start
LH: loop header
LB: loop body
LE: loop exit
PB: predicated region body
PF: predicated region fallthrough
CT: control target
= control target key end

     0   :  { %v1014_v0 = vmov 0   ;;  %vm814_vm0 = vcmask 257024   ;;  %s1742_s1 = inlined_call_operand.vmem [shape: f32[256,1], index: 1, kind: input, shape index: {}]   ;;  %s1743_s2 = inlined_call_operand.vmem [shape: f32[256,1], index: 2, kind: input, shape index: {}]   ;;  %s1744_s0 = inlined_call_operand.vmem [shape: f32[256,32], index: 0, kind: input, shape index: {}]   ;;  %s1745_s3 = inlined_call_operand.vmem [shape: bf16[256,32], index: 3, kind: output, shape index: {}]  }
   0x1   :  { %949 = vset.pattern.permute.xlu1 %v1014_v0  ;;  %948 = vset.pattern.permute.xlu0 %v1014_v0  ;;  %v48_v1 = vld [vmem:[%s1742_s1 + $0x10] sm:$0xff]  ;;  %v46_v2 = vld [vmem:[%s1742_s1] sm:$0xff]  ;;  %v49_v3 = vld [vmem:[%s1742_s1 + $0x18] sm:$0xff] }
   0x2   :  { %90 = vperm.xlu1 %949, %v48_v1   ;;  %80 = vperm.xlu0 %948, %v46_v2   ;;  %v47_v4 = vld [vmem:[%s1742_s1 + $0x8] sm:$0xff]  ;;  %v50_v6 = vld [vmem:[%s1742_s1 + $0x20] sm:$0xff]  ;;  %v53_v7 = vld [vmem:[%s1742_s1 + $0x38] sm:$0xff] }
   0x3   :  { %v51_v5 = vld [vmem:[%s1742_s1 + $0x28] sm:$0xff]  ;;  %v52_v8 = vld [vmem:[%s1742_s1 + $0x30] sm:$0xff]  ;;  %v54_v10 = vld [vmem:[%s1742_s1 + $0x40] sm:$0xff] }
   0x4   :  { %v55_v9 = vld [vmem:[%s1742_s1 + $0x48] sm:$0xff]  ;;  %v57_v11 = vld [vmem:[%s1742_s1 + $0x58] sm:$0xff]  ;;  %v56_v12 = vld [vmem:[%s1742_s1 + $0x50] sm:$0xff] }
   0x5   :  { %v59_v13 = vld [vmem:[%s1742_s1 + $0x68] sm:$0xff]  ;;  %v58_v14 = vld [vmem:[%s1742_s1 + $0x60] sm:$0xff]  ;;  %v61_v15 = vld [vmem:[%s1742_s1 + $0x78] sm:$0xff] }
   0x6   :  { %95 = vperm.xlu1 %949, %v49_v3   ;;  %85 = vperm.xlu0 %948, %v47_v4   ;;  %v60_v16 = vld [vmem:[%s1742_s1 + $0x70] sm:$0xff]  ;;  %v63_v17 = vld [vmem:[%s1742_s1 + $0x88] sm:$0xff]  ;;  %v62_v18 = vld [vmem:[%s1742_s1 + $0x80] sm:$0xff] }
   0x7   :  { %v65_v19 = vld [vmem:[%s1742_s1 + $0x98] sm:$0xff]  ;;  %v64_v20 = vld [vmem:[%s1742_s1 + $0x90] sm:$0xff]  ;;  %v67_v21 = vld [vmem:[%s1742_s1 + $0xa8] sm:$0xff] }
   0x8   :  { %v66_v22 = vld [vmem:[%s1742_s1 + $0xa0] sm:$0xff]  ;;  %v69_v23 = vld [vmem:[%s1742_s1 + $0xb8] sm:$0xff]  ;;  %v68_v24 = vld [vmem:[%s1742_s1 + $0xb0] sm:$0xff] }
   0x9   :  { %v71_v25 = vld [vmem:[%s1742_s1 + $0xc8] sm:$0xff]  ;;  %v70_v26 = vld [vmem:[%s1742_s1 + $0xc0] sm:$0xff]  ;;  %v73_v27 = vld [vmem:[%s1742_s1 + $0xd8] sm:$0xff] }
   0xa   :  { %105 = vperm.xlu1 %949, %v51_v5   ;;  %100 = vperm.xlu0 %948, %v50_v6   ;;  %v72_v28 = vld [vmem:[%s1742_s1 + $0xd0] sm:$0xff]  ;;  %v75_v29 = vld [vmem:[%s1742_s1 + $0xe8] sm:$0xff]  ;;  %v74_v30 = vld [vmem:[%s1742_s1 + $0xe0] sm:$0xff] }
   0xb   :  { %v77_v31 = vld [vmem:[%s1742_s1 + $0xf8] sm:$0xff]  ;;  %v76_v32 = vld [vmem:[%s1742_s1 + $0xf0] sm:$0xff]  ;;  %v271_v33 = vld [vmem:[%s1743_s2 + $0x8] sm:$0xff] }
   0xc   :  { %v270_v34 = vld [vmem:[%s1743_s2] sm:$0xff]  ;;  %v273_v35 = vld [vmem:[%s1743_s2 + $0x18] sm:$0xff]  ;;  %v272_v36 = vld [vmem:[%s1743_s2 + $0x10] sm:$0xff] }
   0xd   :  { %v275_v37 = vld [vmem:[%s1743_s2 + $0x28] sm:$0xff]  ;;  %v274_v38 = vld [vmem:[%s1743_s2 + $0x20] sm:$0xff]  ;;  %v277_v39 = vld [vmem:[%s1743_s2 + $0x38] sm:$0xff] }
   0xe   :  { %115 = vperm.xlu1 %949, %v53_v7   ;;  %110 = vperm.xlu0 %948, %v52_v8   ;;  %v276_v40 = vld [vmem:[%s1743_s2 + $0x30] sm:$0xff]  ;;  %v279_v41 = vld [vmem:[%s1743_s2 + $0x48] sm:$0xff]  ;;  %v278_v42 = vld [vmem:[%s1743_s2 + $0x40] sm:$0xff] }
   0xf   :  { %v281_v43 = vld [vmem:[%s1743_s2 + $0x58] sm:$0xff]  ;;  %v280_v44 = vld [vmem:[%s1743_s2 + $0x50] sm:$0xff]  ;;  %v283_v45 = vld [vmem:[%s1743_s2 + $0x68] sm:$0xff] }
  0x10   :  { %v282_v46 = vld [vmem:[%s1743_s2 + $0x60] sm:$0xff]  ;;  %v285_v47 = vld [vmem:[%s1743_s2 + $0x78] sm:$0xff]  ;;  %v284_v48 = vld [vmem:[%s1743_s2 + $0x70] sm:$0xff] }
  0x11   :  { %v287_v49 = vld [vmem:[%s1743_s2 + $0x88] sm:$0xff]  ;;  %v286_v50 = vld [vmem:[%s1743_s2 + $0x80] sm:$0xff]  ;;  %v289_v51 = vld [vmem:[%s1743_s2 + $0x98] sm:$0xff] }
  0x12   :  { %125 = vperm.xlu1 %949, %v55_v9   ;;  %120 = vperm.xlu0 %948, %v54_v10   ;;  %v288_v52 = vld [vmem:[%s1743_s2 + $0x90] sm:$0xff]  ;;  %v291_v53 = vld [vmem:[%s1743_s2 + $0xa8] sm:$0xff]  ;;  %v290_v54 = vld [vmem:[%s1743_s2 + $0xa0] sm:$0xff] }
  0x13   :  { %v293_v55 = vld [vmem:[%s1743_s2 + $0xb8] sm:$0xff]  ;;  %v292_v56 = vld [vmem:[%s1743_s2 + $0xb0] sm:$0xff]  ;;  %v295_v57 = vld [vmem:[%s1743_s2 + $0xc8] sm:$0xff] }
  0x14   :  { %v294_v58 = vld [vmem:[%s1743_s2 + $0xc0] sm:$0xff]  ;;  %v297_v59 = vld [vmem:[%s1743_s2 + $0xd8] sm:$0xff]  ;;  %v296_v60 = vld [vmem:[%s1743_s2 + $0xd0] sm:$0xff] }
  0x15   :  { %v299_v61 = vld [vmem:[%s1743_s2 + $0xe8] sm:$0xff]  ;;  %v298_v62 = vld [vmem:[%s1743_s2 + $0xe0] sm:$0xff]  ;;  %v301_v63 = vld [vmem:[%s1743_s2 + $0xf8] sm:$0xff] }
  0x16   :  { %135 = vperm.xlu1 %949, %v57_v11   ;;  %130 = vperm.xlu0 %948, %v56_v12   ;;  %v300_v0 = vld [vmem:[%s1743_s2 + $0xf0] sm:$0xff] }
  0x1a   :  { %145 = vperm.xlu1 %949, %v59_v13   ;;  %140 = vperm.xlu0 %948, %v58_v14  }
  0x1e   :  { %155 = vperm.xlu1 %949, %v61_v15   ;;  %150 = vperm.xlu0 %948, %v60_v16  }
  0x22   :  { %165 = vperm.xlu1 %949, %v63_v17   ;;  %160 = vperm.xlu0 %948, %v62_v18  }
  0x26   :  { %175 = vperm.xlu1 %949, %v65_v19   ;;  %170 = vperm.xlu0 %948, %v64_v20  }
  0x2a   :  { %185 = vperm.xlu1 %949, %v67_v21   ;;  %180 = vperm.xlu0 %948, %v66_v22  }
  0x2e   :  { %195 = vperm.xlu1 %949, %v69_v23   ;;  %190 = vperm.xlu0 %948, %v68_v24  }
  0x32   :  { %205 = vperm.xlu1 %949, %v71_v25   ;;  %200 = vperm.xlu0 %948, %v70_v26  }
  0x36   :  { %215 = vperm.xlu1 %949, %v73_v27   ;;  %210 = vperm.xlu0 %948, %v72_v28  }
  0x3a   :  { %225 = vperm.xlu1 %949, %v75_v29   ;;  %220 = vperm.xlu0 %948, %v74_v30  }
  0x3e   :  { %235 = vperm.xlu1 %949, %v77_v31   ;;  %230 = vperm.xlu0 %948, %v76_v32   ;;  %v44_v31 = vld [vmem:[%s1744_s0 + $0xf0] sm:$0xff]  ;;  %v14_v32 = vld [vmem:[%s1744_s0] sm:$0xff] }
  0x42   :  { %309 = vperm.xlu1 %949, %v271_v33   ;;  %304 = vperm.xlu0 %948, %v270_v34   ;;  %v15_v33 = vld [vmem:[%s1744_s0 + $0x8] sm:$0xff] }
  0x46   :  { %319 = vperm.xlu1 %949, %v273_v35   ;;  %314 = vperm.xlu0 %948, %v272_v36  }
  0x4a   :  { %329 = vperm.xlu1 %949, %v275_v37   ;;  %324 = vperm.xlu0 %948, %v274_v38  }
  0x4e   :  { %339 = vperm.xlu1 %949, %v277_v39   ;;  %334 = vperm.xlu0 %948, %v276_v40   ;;  %v16_v39 = vld [vmem:[%s1744_s0 + $0x10] sm:$0xff]  ;;  %v17_v40 = vld [vmem:[%s1744_s0 + $0x18] sm:$0xff] }
  0x52   :  { %349 = vperm.xlu1 %949, %v279_v41   ;;  %344 = vperm.xlu0 %948, %v278_v42  }
  0x56   :  { %359 = vperm.xlu1 %949, %v281_v43   ;;  %354 = vperm.xlu0 %948, %v280_v44  }
  0x5a   :  { %369 = vperm.xlu1 %949, %v283_v45   ;;  %364 = vperm.xlu0 %948, %v282_v46  }
  0x5e   :  { %379 = vperm.xlu1 %949, %v285_v47   ;;  %374 = vperm.xlu0 %948, %v284_v48  }
  0x62   :  { %389 = vperm.xlu1 %949, %v287_v49   ;;  %384 = vperm.xlu0 %948, %v286_v50   ;;  %v19_v49 = vld [vmem:[%s1744_s0 + $0x28] sm:$0xff]  ;;  %v18_v50 = vld [vmem:[%s1744_s0 + $0x20] sm:$0xff] }
  0x66   :  { %399 = vperm.xlu1 %949, %v289_v51   ;;  %394 = vperm.xlu0 %948, %v288_v52  }
  0x6a   :  { %409 = vperm.xlu1 %949, %v291_v53   ;;  %404 = vperm.xlu0 %948, %v290_v54  }
  0x6e   :  { %419 = vperm.xlu1 %949, %v293_v55   ;;  %414 = vperm.xlu0 %948, %v292_v56  }
  0x72   :  { %429 = vperm.xlu1 %949, %v295_v57   ;;  %424 = vperm.xlu0 %948, %v294_v58  }
  0x76   :  { %439 = vperm.xlu1 %949, %v297_v59   ;;  %434 = vperm.xlu0 %948, %v296_v60   ;;  %v21_v60 = vld [vmem:[%s1744_s0 + $0x38] sm:$0xff] }
  0x7a   :  { %449 = vperm.xlu1 %949, %v299_v61   ;;  %444 = vperm.xlu0 %948, %v298_v62   ;;  %v20_v61 = vld [vmem:[%s1744_s0 + $0x30] sm:$0xff] }
  0x7d   :  { %v91_v1 = vpop.permute.xlu1 %90  ;;  %v81_v2 = vpop.permute.xlu0 %80 }
  0x7e   :  { %459 = vperm.xlu1 %949, %v301_v63   ;;  %454 = vperm.xlu0 %948, %v300_v0   ;;  %v238_v37 = vmul.f32 %v81_v2, %v14_v32  ;;  %v240_v45 = vmul.f32 %v91_v1, %v16_v39  ;;  %v22_v32 = vld [vmem:[%s1744_s0 + $0x40] sm:$0xff]  ;;  %v27_v39 = vld [vmem:[%s1744_s0 + $0x68] sm:$0xff] }
  0x81   :  { %v96_v3 = vpop.permute.xlu1 %95  ;;  %v86_v4 = vpop.permute.xlu0 %85 }
  0x82   :  { %v239_v38 = vmul.f32 %v86_v4, %v15_v33  ;;  %v241_v46 = vmul.f32 %v96_v3, %v17_v40  ;;  %v26_v40 = vld [vmem:[%s1744_s0 + $0x60] sm:$0xff] }
  0x85   :  { %v106_v5 = vpop.permute.xlu1 %105  ;;  %v101_v6 = vpop.permute.xlu0 %100 }
  0x86   :  { %v243_v57 = vmul.f32 %v106_v5, %v19_v49  ;;  %v242_v58 = vmul.f32 %v101_v6, %v18_v50 }
  0x89   :  { %v1227_v7 = vpop.permute.xlu1 %115  ;;  %v1229_v8 = vpop.permute.xlu0 %110 }
  0x8a   :  { %v245_v5 = vmul.f32 %v1227_v7, %v21_v60  ;;  %v244_v6 = vmul.f32 %v1229_v8, %v20_v61  ;;  %v24_v7 = vld [vmem:[%s1744_s0 + $0x50] sm:$0xff] }
  0x8d   :  { %v1231_v9 = vpop.permute.xlu1 %125  ;;  %v1233_v10 = vpop.permute.xlu0 %120 }
  0x91   :  { %v1235_v11 = vpop.permute.xlu1 %135  ;;  %v1237_v12 = vpop.permute.xlu0 %130 }
  0x95   :  { %v1239_v13 = vpop.permute.xlu1 %145  ;;  %v1241_v14 = vpop.permute.xlu0 %140 }
  0x99   :  { %v1243_v15 = vpop.permute.xlu1 %155  ;;  %v1245_v16 = vpop.permute.xlu0 %150 }
  0x9d   :  { %v1247_v17 = vpop.permute.xlu1 %165  ;;  %v1249_v18 = vpop.permute.xlu0 %160 }
  0xa1   :  { %v1251_v19 = vpop.permute.xlu1 %175  ;;  %v1253_v20 = vpop.permute.xlu0 %170 }
  0xa5   :  { %v1255_v21 = vpop.permute.xlu1 %185  ;;  %v1257_v22 = vpop.permute.xlu0 %180 }
  0xa9   :  { %v1259_v23 = vpop.permute.xlu1 %195  ;;  %v1261_v24 = vpop.permute.xlu0 %190 }
  0xad   :  { %v1263_v25 = vpop.permute.xlu1 %205  ;;  %v1265_v26 = vpop.permute.xlu0 %200 }
  0xb1   :  { %v1267_v27 = vpop.permute.xlu1 %215  ;;  %v1269_v28 = vpop.permute.xlu0 %210 }
  0xb5   :  { %v1271_v29 = vpop.permute.xlu1 %225  ;;  %v1273_v30 = vpop.permute.xlu0 %220 }
  0xb9   :  { %v1284_v34 = vpop.permute.xlu1 %235  ;;  %v231_v35 = vpop.permute.xlu0 %230 }
  0xba   :  { %v1286_v36 = vmul.f32 %v231_v35, %v44_v31  ;;  %v23_v31 = vld [vmem:[%s1744_s0 + $0x48] sm:$0xff]  ;;  %v25_v35 = vld [vmem:[%s1744_s0 + $0x58] sm:$0xff] }
  0xbb   :  { %v249_v50 = vmul.f32 %v1235_v11, %v25_v35  ;;  %v251_v11 = vmul.f32 %v1239_v13, %v27_v39  ;;  %v35_v13 = vld [vmem:[%s1744_s0 + $0xa8] sm:$0xff] }
  0xbd   :  { %v310_v41 = vpop.permute.xlu1 %309  ;;  %v305_v42 = vpop.permute.xlu0 %304 }
  0xbe   :  { %v1294_v43 = vadd.f32 %v310_v41, %v239_v38  ;;  %v1296_v44 = vadd.f32 %v305_v42, %v238_v37 }
  0xc0   :  { %v527_v47 = vmin.f32 %v1294_v43, 0.0  ;;  %v526_v48 = vmin.f32 %v1296_v44, 0.0  ;;  %vm495_vm1 = vcmp.gt.f32.partialorder %v1294_v43, 0.0  ;;  %vm494_vm2 = vcmp.gt.f32.partialorder %v1296_v44, 0.0 }
  0xc1   :  { %v320_v51 = vpop.permute.xlu1 %319  ;;  %v315_v52 = vpop.permute.xlu0 %314 }
  0xc2   :  { %v560_v53 = vmul.f32 1.442695, %v527_v47  ;;  %v558_v54 = vmul.f32 1.442695, %v526_v48  ;;  %v1306_v55 = vadd.f32 %v320_v51, %v241_v46  ;;  %v1308_v56 = vadd.f32 %v315_v52, %v240_v45  ;;  %v29_v48 = vld [vmem:[%s1744_s0 + $0x78] sm:$0xff]  ;;  %v28_v52 = vld [vmem:[%s1744_s0 + $0x70] sm:$0xff] }
  0xc3   :  { %v247_v46 = vmul.f32 %v1231_v9, %v23_v31  ;;  %v246_v47 = vmul.f32 %v1233_v10, %v22_v32  ;;  %v248_v51 = vmul.f32 %v1237_v12, %v24_v7  ;;  %v30_v9 = vld [vmem:[%s1744_s0 + $0x80] sm:$0xff]  ;;  %v250_v12 = vmul.f32 %v1241_v14, %v26_v40  ;;  %v37_v32 = vld [vmem:[%s1744_s0 + $0xb8] sm:$0xff] }
  0xc4   :  { %950 = vpow2.f32 %v560_v53  ;;  %v529_v59 = vmin.f32 %v1306_v55, 0.0  ;;  %v528_v62 = vmin.f32 %v1308_v56, 0.0  ;;  %v31_v53 = vld [vmem:[%s1744_s0 + $0x88] sm:$0xff]  ;;  %v1375_v61 = vmul.f32 %v1243_v15, %v29_v48  ;;  %v34_v14 = vld [vmem:[%s1744_s0 + $0xa0] sm:$0xff] }
  0xc5   :  { %952 = vpow2.f32 %v558_v54  ;;  %v330_v63 = vpop.permute.xlu1 %329  ;;  %v325_v0 = vpop.permute.xlu0 %324  ;;  %v33_v54 = vld [vmem:[%s1744_s0 + $0x98] sm:$0xff]  ;;  %v1394_v15 = vmul.f32 %v1249_v18, %v30_v9  ;;  %v1410_v18 = vmul.f32 %v1257_v22, %v34_v14  ;;  %vm497_vm3 = vcmp.gt.f32.partialorder %v1306_v55, 0.0 }
  0xc6   :  { %v564_v1 = vmul.f32 1.442695, %v529_v59  ;;  %v1318_v2 = vadd.f32 %v330_v63, %v243_v57  ;;  %v1320_v3 = vadd.f32 %v325_v0, %v242_v58  ;;  %v562_v4 = vmul.f32 1.442695, %v528_v62  ;;  %v32_v57 = vld [vmem:[%s1744_s0 + $0x90] sm:$0xff] }
  0xc7   :  { %v1400_v31 = vmul.f32 %v1253_v20, %v32_v57  ;;  %vm496_vm4 = vcmp.gt.f32.partialorder %v1308_v56, 0.0 }
  0xc8   :  { %954 = vpow2.f32 %v564_v1  ;;  %v531_v33 = vmin.f32 %v1318_v2, 0.0  ;;  %v530_v8 = vmin.f32 %v1320_v3, 0.0  ;;  %v1388_v1 = vmul.f32 %v1245_v16, %v28_v52 }
  0xc9   :  { %956 = vpow2.f32 %v562_v4  ;;  %v340_v37 = vpop.permute.xlu1 %339  ;;  %v335_v38 = vpop.permute.xlu0 %334  ;;  %v1391_v4 = vmul.f32 %v1247_v17, %v31_v53  ;;  %v1407_v17 = vmul.f32 %v1255_v21, %v35_v13  ;;  %v1421_v21 = vmul.f32 %v1259_v23, %v37_v32 }
  0xca   :  { %v568_v41 = vmul.f32 1.442695, %v531_v33  ;;  %v1344_v42 = vadd.f32 %v340_v37, %v245_v5  ;;  %v1346_v45 = vadd.f32 %v335_v38, %v244_v6  ;;  %v566_v49 = vmul.f32 1.442695, %v530_v8  ;;  %v36_v8 = vld [vmem:[%s1744_s0 + $0xb0] sm:$0xff] }
  0xcb   :  { %v1397_v6 = vmul.f32 %v1251_v19, %v33_v54  ;;  %vm499_vm5 = vcmp.gt.f32.partialorder %v1318_v2, 0.0  ;;  %vm498_vm6 = vcmp.gt.f32.partialorder %v1320_v3, 0.0 }
  0xcc   :  { %958 = vpow2.f32 %v568_v41  ;;  %v533_v10 = vmin.f32 %v1344_v42, 0.0  ;;  %v532_v58 = vmin.f32 %v1346_v45, 0.0  ;;  %vm501_vm7 = vcmp.gt.f32.partialorder %v1344_v42, 0.0 }
  0xcd   :  { %960 = vpow2.f32 %v566_v49  ;;  %v350_v59 = vpop.permute.xlu1 %349  ;;  %v345_v60 = vpop.permute.xlu0 %344  ;;  %v1428_v49 = vmul.f32 %v1261_v24, %v36_v8  ;;  %vm500_vm8 = vcmp.gt.f32.partialorder %v1346_v45, 0.0 }
  0xce   :  { %v572_v62 = vmul.f32 1.442695, %v533_v10  ;;  %v1383_v63 = vadd.f32 %v350_v59, %v247_v46  ;;  %v1385_v0 = vadd.f32 %v345_v60, %v246_v47  ;;  %v570_v5 = vmul.f32 1.442695, %v532_v58 }
  0xd0   :  { %962 = vpow2.f32 %v572_v62  ;;  %v535_v16 = vmin.f32 %v1383_v63, 0.0  ;;  %v534_v19 = vmin.f32 %v1385_v0, 0.0  ;;  %vm503_vm9 = vcmp.gt.f32.partialorder %v1383_v63, 0.0 }
  0xd1   :  { %v951_v33 = vpop.eup %950  ;;  %964 = vpow2.f32 %v570_v5  ;;  %v360_v35 = vpop.permute.xlu1 %359  ;;  %vm502_vm10 = vcmp.gt.f32.partialorder %v1385_v0, 0.0 }
  0xd2   :  { %v355_v20 = vpop.permute.xlu0 %354  ;;  %v953_v7 = vpop.eup %952  ;;  %v852_v37 = vadd.f32 -1.0, %v951_v33  ;;  %v576_v38 = vmul.f32 1.442695, %v535_v16  ;;  %v1416_v39 = vadd.f32 %v360_v35, %v249_v50  ;;  %v574_v41 = vmul.f32 1.442695, %v534_v19 }
  0xd3   :  { %v1418_v40 = vadd.f32 %v355_v20, %v248_v51  ;;  %v851_v22 = vadd.f32 -1.0, %v953_v7 }
  0xd4   :  { %v655_v46 = vsel %vm495_vm1, %v1294_v43, %v852_v37  ;;  %966 = vpow2.f32 %v576_v38  ;;  %v537_v47 = vmin.f32 %v1416_v39, 0.0  ;;  %v39_v43 = vld [vmem:[%s1744_s0 + $0xc8] sm:$0xff]  ;;  %vm505_vm11 = vcmp.gt.f32.partialorder %v1416_v39, 0.0 }
  0xd5   :  { %v955_v48 = vpop.eup %954  ;;  %v916_v50 = vpack.c.bf16 %v655_v46, %v655_v46  ;;  %v654_v51 = vsel %vm494_vm2, %v1296_v44, %v851_v22  ;;  %968 = vpow2.f32 %v574_v41  ;;  %v370_v23 = vpop.permute.xlu1 %369  ;;  %v536_v57 = vmin.f32 %v1418_v40, 0.0 }
  0xd6   :  { %v365_v52 = vpop.permute.xlu0 %364  ;;  %v957_v53 = vpop.eup %956  ;;  %v915_v9 = vpack.c.bf16 %v654_v51, %v654_v51  ;;  %v854_v10 = vadd.f32 -1.0, %v955_v48  ;;  %v580_v54 = vmul.f32 1.442695, %v537_v47  ;;  %v1440_v44 = vadd.f32 %v370_v23, %v251_v11  ;;  %v38_v11 = vld [vmem:[%s1744_s0 + $0xc0] sm:$0xff]  ;;  %v41_v48 = vld [vmem:[%s1744_s0 + $0xd8] sm:$0xff] }
  0xd7   :  { %816 = vst.msk [vmem:[%s1745_s3 + $0x4] sm:$0xf] %vm814_vm0, %v916_v50  ;;  %v853_v24 = vadd.f32 -1.0, %v957_v53  ;;  %v1442_v58 = vadd.f32 %v365_v52, %v250_v12  ;;  %v578_v60 = vmul.f32 1.442695, %v536_v57  ;;  %v1451_v14 = vmul.f32 %v1263_v25, %v39_v43 }
  0xd8   :  { %815 = vst.msk [vmem:[%s1745_s3] sm:$0xf] %vm814_vm0, %v915_v9  ;;  %v657_v59 = vsel %vm497_vm3, %v1306_v55, %v854_v10  ;;  %970 = vpow2.f32 %v580_v54  ;;  %v539_v5 = vmin.f32 %v1440_v44, 0.0  ;;  %v1468_v7 = vmul.f32 %v1265_v26, %v38_v11 }
  0xd9   :  { %v959_v13 = vpop.eup %958  ;;  %v918_v12 = vpack.c.bf16 %v657_v59, %v657_v59  ;;  %v656_v62 = vsel %vm496_vm4, %v1308_v56, %v853_v24  ;;  %v380_v32 = vpop.permute.xlu1 %379  ;;  %972 = vpow2.f32 %v578_v60  ;;  %v538_v20 = vmin.f32 %v1442_v58, 0.0 }
  0xda   :  { %v375_v16 = vpop.permute.xlu0 %374  ;;  %v961_v55 = vpop.eup %960  ;;  %v917_v33 = vpack.c.bf16 %v656_v62, %v656_v62  ;;  %v856_v19 = vadd.f32 -1.0, %v959_v13  ;;  %v584_v35 = vmul.f32 1.442695, %v539_v5  ;;  %v1465_v56 = vadd.f32 %v380_v32, %v1375_v61 }
  0xdb   :  { %818 = vst.msk [vmem:[%s1745_s3 + $0xc] sm:$0xf] %vm814_vm0, %v918_v12  ;;  %v855_v25 = vadd.f32 -1.0, %v961_v55  ;;  %v1477_v37 = vadd.f32 %v375_v16, %v1388_v1  ;;  %v582_v41 = vmul.f32 1.442695, %v538_v20  ;;  %v1503_v10 = vmul.f32 %v1267_v27, %v41_v48 }
  0xdc   :  { %817 = vst.msk [vmem:[%s1745_s3 + $0x8] sm:$0xf] %vm814_vm0, %v917_v33  ;;  %v659_v8 = vsel %vm499_vm5, %v1318_v2, %v856_v19  ;;  %974 = vpow2.f32 %v584_v35  ;;  %v541_v1 = vmin.f32 %v1465_v56, 0.0  ;;  %vm504_vm12 = vcmp.gt.f32.partialorder %v1418_v40, 0.0 }
  0xdd   :  { %v963_v38 = vpop.eup %962  ;;  %v920_v22 = vpack.c.bf16 %v659_v8, %v659_v8  ;;  %v658_v61 = vsel %vm498_vm6, %v1320_v3, %v855_v25  ;;  %v390_v26 = vpop.permute.xlu1 %389  ;;  %976 = vpow2.f32 %v582_v41  ;;  %v540_v51 = vmin.f32 %v1477_v37, 0.0 }
  0xde   :  { %v385_v46 = vpop.permute.xlu0 %384  ;;  %v965_v47 = vpop.eup %964  ;;  %v919_v50 = vpack.c.bf16 %v658_v61, %v658_v61  ;;  %v858_v2 = vadd.f32 -1.0, %v963_v38  ;;  %v588_v52 = vmul.f32 1.442695, %v541_v1  ;;  %v1497_v53 = vadd.f32 %v390_v26, %v1391_v4 }
  0xdf   :  { %820 = vst.msk [vmem:[%s1745_s3 + $0x14] sm:$0xf] %vm814_vm0, %v920_v22  ;;  %v857_v3 = vadd.f32 -1.0, %v965_v47  ;;  %v1500_v43 = vadd.f32 %v385_v46, %v1394_v15  ;;  %v586_v24 = vmul.f32 1.442695, %v540_v51  ;;  %vm507_vm13 = vcmp.gt.f32.partialorder %v1440_v44, 0.0 }
  0xe0   :  { %819 = vst.msk [vmem:[%s1745_s3 + $0x10] sm:$0xf] %vm814_vm0, %v919_v50  ;;  %v661_v23 = vsel %vm501_vm7, %v1344_v42, %v858_v2  ;;  %v40_v42 = vld [vmem:[%s1744_s0 + $0xd0] sm:$0xff]  ;;  %978 = vpow2.f32 %v588_v52  ;;  %vm506_vm14 = vcmp.gt.f32.partialorder %v1442_v58, 0.0  ;;  %vm509_vm15 = vcmp.gt.f32.partialorder %v1465_v56, 0.0 }
  0xe1   :  { %v967_v9 = vpop.eup %966  ;;  %v922_v54 = vpack.c.bf16 %v661_v23, %v661_v23  ;;  %v660_v57 = vsel %vm500_vm8, %v1346_v45, %v857_v3  ;;  %v400_v59 = vpop.permute.xlu1 %399  ;;  %980 = vpow2.f32 %v586_v24  ;;  %v543_v45 = vmin.f32 %v1497_v53, 0.0 }
  0xe2   :  { %v395_v60 = vpop.permute.xlu0 %394  ;;  %v969_v13 = vpop.eup %968  ;;  %v921_v4 = vpack.c.bf16 %v660_v57, %v660_v57  ;;  %v860_v15 = vadd.f32 -1.0, %v967_v9  ;;  %v542_v12 = vmin.f32 %v1500_v43, 0.0  ;;  %v1523_v62 = vadd.f32 %v400_v59, %v1397_v6 }
  0xe3   :  { %822 = vst.msk [vmem:[%s1745_s3 + $0x1c] sm:$0xf] %vm814_vm0, %v922_v54  ;;  %v859_v27 = vadd.f32 -1.0, %v969_v13  ;;  %v1526_v5 = vadd.f32 %v395_v60, %v1400_v31  ;;  %v1529_v16 = vmul.f32 %v1269_v28, %v40_v42  ;;  %v592_v19 = vmul.f32 1.442695, %v543_v45  ;;  %v43_v31 = vld [vmem:[%s1744_s0 + $0xe8] sm:$0xff] }
  0xe4   :  { %821 = vst.msk [vmem:[%s1745_s3 + $0x18] sm:$0xf] %vm814_vm0, %v921_v4  ;;  %v663_v11 = vsel %vm503_vm9, %v1383_v63, %v860_v15  ;;  %v590_v8 = vmul.f32 1.442695, %v542_v12  ;;  %v545_v28 = vmin.f32 %v1523_v62, 0.0  ;;  %v1555_v1 = vmul.f32 %v1271_v29, %v43_v31 }
  0xe5   :  { %v971_v32 = vpop.eup %970  ;;  %v924_v55 = vpack.c.bf16 %v663_v11, %v663_v11  ;;  %v662_v33 = vsel %vm502_vm10, %v1385_v0, %v859_v27  ;;  %v410_v25 = vpop.permute.xlu1 %409  ;;  %982 = vpow2.f32 %v592_v19  ;;  %v544_v0 = vmin.f32 %v1526_v5, 0.0 }
  0xe6   :  { %v405_v35 = vpop.permute.xlu0 %404  ;;  %v923_v20 = vpack.c.bf16 %v662_v33, %v662_v33  ;;  %v862_v63 = vadd.f32 -1.0, %v971_v32  ;;  %v973_v6 = vpop.eup %972  ;;  %984 = vpow2.f32 %v590_v8  ;;  %v1549_v61 = vadd.f32 %v410_v25, %v1407_v17 }
  0xe7   :  { %824 = vst.msk [vmem:[%s1745_s3 + $0x24] sm:$0xf] %vm814_vm0, %v924_v55  ;;  %v861_v22 = vadd.f32 -1.0, %v973_v6  ;;  %v596_v26 = vmul.f32 1.442695, %v545_v28  ;;  %v1552_v47 = vadd.f32 %v405_v35, %v1410_v18  ;;  %vm508_vm1 = vcmp.gt.f32.partialorder %v1477_v37, 0.0 }
  0xe8   :  { %823 = vst.msk [vmem:[%s1745_s3 + $0x20] sm:$0xf] %vm814_vm0, %v923_v20  ;;  %v665_v38 = vsel %vm505_vm11, %v1416_v39, %v862_v63  ;;  %v594_v46 = vmul.f32 1.442695, %v544_v0  ;;  %v547_v3 = vmin.f32 %v1549_v61, 0.0  ;;  %vm511_vm2 = vcmp.gt.f32.partialorder %v1497_v53, 0.0 }
  0xe9   :  { %v926_v41 = vpack.c.bf16 %v665_v38, %v665_v38  ;;  %v420_v48 = vpop.permute.xlu1 %419  ;;  %v975_v2 = vpop.eup %974  ;;  %v664_v39 = vsel %vm504_vm12, %v1418_v40, %v861_v22  ;;  %986 = vpow2.f32 %v596_v26  ;;  %v546_v23 = vmin.f32 %v1552_v47, 0.0 }
  0xea   :  { %v415_v50 = vpop.permute.xlu0 %414  ;;  %v1562_v17 = vadd.f32 %v420_v48, %v1421_v21  ;;  %v925_v18 = vpack.c.bf16 %v664_v39, %v664_v39  ;;  %v864_v51 = vadd.f32 -1.0, %v975_v2  ;;  %v977_v29 = vpop.eup %976  ;;  %988 = vpow2.f32 %v594_v46 }
  0xeb   :  { %826 = vst.msk [vmem:[%s1745_s3 + $0x2c] sm:$0xf] %vm814_vm0, %v926_v41  ;;  %v600_v40 = vmul.f32 1.442695, %v547_v3  ;;  %v863_v52 = vadd.f32 -1.0, %v977_v29  ;;  %v1578_v54 = vadd.f32 %v415_v50, %v1428_v49  ;;  %vm510_vm3 = vcmp.gt.f32.partialorder %v1500_v43, 0.0 }
  0xec   :  { %825 = vst.msk [vmem:[%s1745_s3 + $0x28] sm:$0xf] %vm814_vm0, %v925_v18  ;;  %v667_v21 = vsel %vm507_vm13, %v1440_v44, %v864_v51  ;;  %v549_v9 = vmin.f32 %v1562_v17, 0.0  ;;  %v598_v60 = vmul.f32 1.442695, %v546_v23  ;;  %vm513_vm4 = vcmp.gt.f32.partialorder %v1523_v62, 0.0 }
  0xed   :  { %v430_v57 = vpop.permute.xlu1 %429  ;;  %v928_v59 = vpack.c.bf16 %v667_v21, %v667_v21  ;;  %990 = vpow2.f32 %v600_v40  ;;  %v979_v42 = vpop.eup %978  ;;  %v666_v4 = vsel %vm506_vm14, %v1442_v58, %v863_v52  ;;  %v548_v15 = vmin.f32 %v1578_v54, 0.0  ;;  %v42_v58 = vld [vmem:[%s1744_s0 + $0xe0] sm:$0xff] }
  0xee   :  { %v425_v24 = vpop.permute.xlu0 %424  ;;  %v1581_v13 = vadd.f32 %v430_v57, %v1451_v14  ;;  %v604_v44 = vmul.f32 1.442695, %v549_v9  ;;  %v981_v49 = vpop.eup %980  ;;  %v927_v27 = vpack.c.bf16 %v666_v4, %v666_v4  ;;  %v866_v45 = vadd.f32 -1.0, %v979_v42  ;;  %v45_v14 = vld [vmem:[%s1744_s0 + $0xf8] sm:$0xff] }
  0xef   :  { %828 = vst.msk [vmem:[%s1745_s3 + $0x34] sm:$0xf] %vm814_vm0, %v928_v59  ;;  %992 = vpow2.f32 %v598_v60  ;;  %v865_v11 = vadd.f32 -1.0, %v981_v49  ;;  %v602_v12 = vmul.f32 1.442695, %v548_v15  ;;  %v1608_v25 = vadd.f32 %v425_v24, %v1468_v7 }
  0xf0   :  { %994 = vpow2.f32 %v604_v44  ;;  %v551_v32 = vmin.f32 %v1581_v13, 0.0  ;;  %827 = vst.msk [vmem:[%s1745_s3 + $0x30] sm:$0xf] %vm814_vm0, %v927_v27  ;;  %v669_v19 = vsel %vm509_vm15, %v1465_v56, %v866_v45  ;;  %v266_v28 = vmul.f32 %v1273_v30, %v42_v58 }
  0xf1   :  { %v440_v55 = vpop.permute.xlu1 %439  ;;  %v930_v63 = vpack.c.bf16 %v669_v19, %v669_v19  ;;  %v668_v8 = vsel %vm508_vm1, %v1477_v37, %v865_v11  ;;  %996 = vpow2.f32 %v602_v12  ;;  %v269_v56 = vmul.f32 %v1284_v34, %v45_v14 }
  0xf2   :  { %v435_v33 = vpop.permute.xlu0 %434  ;;  %v1611_v35 = vadd.f32 %v440_v55, %v1503_v10  ;;  %v608_v6 = vmul.f32 1.442695, %v551_v32  ;;  %v983_v31 = vpop.eup %982  ;;  %v929_v7 = vpack.c.bf16 %v668_v8, %v668_v8  ;;  %v550_v0 = vmin.f32 %v1608_v25, 0.0 }
  0xf3   :  { %v1614_v20 = vadd.f32 %v435_v33, %v1529_v16  ;;  %v985_v10 = vpop.eup %984  ;;  %830 = vst.msk [vmem:[%s1745_s3 + $0x3c] sm:$0xf] %vm814_vm0, %v930_v63  ;;  %v868_v16 = vadd.f32 -1.0, %v983_v31  ;;  %vm512_vm5 = vcmp.gt.f32.partialorder %v1526_v5, 0.0  ;;  %vm515_vm6 = vcmp.gt.f32.partialorder %v1549_v61, 0.0 }
  0xf4   :  { %998 = vpow2.f32 %v608_v6  ;;  %v553_v37 = vmin.f32 %v1611_v35, 0.0  ;;  %829 = vst.msk [vmem:[%s1745_s3 + $0x38] sm:$0xf] %vm814_vm0, %v929_v7  ;;  %v867_v30 = vadd.f32 -1.0, %v985_v10  ;;  %v606_v34 = vmul.f32 1.442695, %v550_v0 }
  0xf5   :  { %v450_v38 = vpop.permute.xlu1 %449  ;;  %v552_v41 = vmin.f32 %v1614_v20, 0.0  ;;  %v671_v46 = vsel %vm511_vm2, %v1497_v53, %v868_v16  ;;  %vm514_vm7 = vcmp.gt.f32.partialorder %v1552_v47, 0.0  ;;  %vm517_vm8 = vcmp.gt.f32.partialorder %v1562_v17, 0.0 }
  0xf6   :  { %v445_v22 = vpop.permute.xlu0 %444  ;;  %v1634_v26 = vadd.f32 %v450_v38, %v1555_v1  ;;  %v612_v48 = vmul.f32 1.442695, %v553_v37  ;;  %v987_v2 = vpop.eup %986  ;;  %v932_v39 = vpack.c.bf16 %v671_v46, %v671_v46  ;;  %v670_v3 = vsel %vm510_vm3, %v1500_v43, %v867_v30 }
  0xf7   :  { %v1638_v50 = vadd.f32 %v445_v22, %v266_v28  ;;  %1000 = vpow2.f32 %v606_v34  ;;  %v610_v18 = vmul.f32 1.442695, %v552_v41  ;;  %v989_v51 = vpop.eup %988  ;;  %v931_v29 = vpack.c.bf16 %v670_v3, %v670_v3 }
  0xf8   :  { %v870_v40 = vadd.f32 -1.0, %v987_v2  ;;  %1002 = vpow2.f32 %v612_v48  ;;  %832 = vst.msk [vmem:[%s1745_s3 + $0x44] sm:$0xf] %vm814_vm0, %v932_v39  ;;  %v869_v53 = vadd.f32 -1.0, %v989_v51  ;;  %v555_v43 = vmin.f32 %v1634_v26, 0.0 }
  0xf9   :  { %v460_v1 = vpop.permute.xlu1 %459  ;;  %1004 = vpow2.f32 %v610_v18  ;;  %831 = vst.msk [vmem:[%s1745_s3 + $0x40] sm:$0xf] %vm814_vm0, %v931_v29  ;;  %v554_v9 = vmin.f32 %v1638_v50, 0.0  ;;  %vm516_vm9 = vcmp.gt.f32.partialorder %v1578_v54, 0.0  ;;  %vm519_vm10 = vcmp.gt.f32.partialorder %v1581_v13, 0.0 }
  0xfa   :  { %v455_v23 = vpop.permute.xlu0 %454  ;;  %v991_v21 = vpop.eup %990  ;;  %v673_v52 = vsel %vm513_vm4, %v1523_v62, %v870_v40  ;;  %v1654_v57 = vadd.f32 %v460_v1, %v269_v56  ;;  %v672_v60 = vsel %vm512_vm5, %v1526_v5, %v869_v53  ;;  %v616_v4 = vmul.f32 1.442695, %v555_v43 }
  0xfb   :  { %v1657_v24 = vadd.f32 %v455_v23, %v1286_v36  ;;  %v934_v59 = vpack.c.bf16 %v673_v52, %v673_v52  ;;  %v872_v42 = vadd.f32 -1.0, %v991_v21  ;;  %v933_v15 = vpack.c.bf16 %v672_v60, %v672_v60 }
  0xfc   :  { %v993_v44 = vpop.eup %992  ;;  %v614_v49 = vmul.f32 1.442695, %v554_v9  ;;  %v557_v27 = vmin.f32 %v1654_v57, 0.0  ;;  %1006 = vpow2.f32 %v616_v4  ;;  %vm518_vm11 = vcmp.gt.f32.partialorder %v1608_v25, 0.0 }
  0xfd   :  { %v995_v62 = vpop.eup %994  ;;  %834 = vst.msk [vmem:[%s1745_s3 + $0x4c] sm:$0xf] %vm814_vm0, %v934_v59  ;;  %v675_v36 = vsel %vm515_vm6, %v1549_v61, %v872_v42  ;;  %v871_v5 = vadd.f32 -1.0, %v993_v44  ;;  %833 = vst.msk [vmem:[%s1745_s3 + $0x48] sm:$0xf] %vm814_vm0, %v933_v15  ;;  %v556_v61 = vmin.f32 %v1657_v24, 0.0 }
  0xfe   :  { %v936_v45 = vpack.c.bf16 %v675_v36, %v675_v36  ;;  %v874_v58 = vadd.f32 -1.0, %v995_v62  ;;  %1008 = vpow2.f32 %v614_v49  ;;  %v620_v14 = vmul.f32 1.442695, %v557_v27  ;;  %v997_v11 = vpop.eup %996 }
  0xff   :  { %v674_v12 = vsel %vm514_vm7, %v1552_v47, %v871_v5  ;;  %v873_v33 = vadd.f32 -1.0, %v997_v11  ;;  %v618_v8 = vmul.f32 1.442695, %v556_v61  ;;  %vm521_vm12 = vcmp.gt.f32.partialorder %v1611_v35, 0.0 }
 0x100   :  { %836 = vst.msk [vmem:[%s1745_s3 + $0x54] sm:$0xf] %vm814_vm0, %v936_v45  ;;  %v935_v32 = vpack.c.bf16 %v674_v12, %v674_v12  ;;  %v677_v55 = vsel %vm517_vm8, %v1562_v17, %v874_v58  ;;  %1010 = vpow2.f32 %v620_v14  ;;  %vm520_vm13 = vcmp.gt.f32.partialorder %v1614_v20, 0.0 }
 0x101   :  { %v999_v19 = vpop.eup %998  ;;  %v938_v63 = vpack.c.bf16 %v677_v55, %v677_v55  ;;  %v676_v47 = vsel %vm516_vm9, %v1578_v54, %v873_v33  ;;  %1012 = vpow2.f32 %v618_v8  ;;  %vm523_vm14 = vcmp.gt.f32.partialorder %v1634_v26, 0.0 }
 0x102   :  { %835 = vst.msk [vmem:[%s1745_s3 + $0x50] sm:$0xf] %vm814_vm0, %v935_v32  ;;  %v876_v6 = vadd.f32 -1.0, %v999_v19  ;;  %v937_v17 = vpack.c.bf16 %v676_v47, %v676_v47  ;;  %vm522_vm15 = vcmp.gt.f32.partialorder %v1638_v50, 0.0  ;;  %vm525_vm1 = vcmp.gt.f32.partialorder %v1654_v57, 0.0 }
 0x103   :  { %838 = vst.msk [vmem:[%s1745_s3 + $0x5c] sm:$0xf] %vm814_vm0, %v938_v63  ;;  %vm524_vm2 = vcmp.gt.f32.partialorder %v1657_v24, 0.0 }
 0x104   :  { %v1001_v31 = vpop.eup %1000  ;;  %v679_v28 = vsel %vm519_vm10, %v1581_v13, %v876_v6  ;;  %837 = vst.msk [vmem:[%s1745_s3 + $0x58] sm:$0xf] %vm814_vm0, %v937_v17 }
 0x105   :  { %v1003_v56 = vpop.eup %1002  ;;  %v940_v54 = vpack.c.bf16 %v679_v28, %v679_v28  ;;  %v875_v7 = vadd.f32 -1.0, %v1001_v31 }
 0x106   :  { %v1005_v0 = vpop.eup %1004  ;;  %v878_v10 = vadd.f32 -1.0, %v1003_v56 }
 0x107   :  { %840 = vst.msk [vmem:[%s1745_s3 + $0x64] sm:$0xf] %vm814_vm0, %v940_v54  ;;  %v678_v16 = vsel %vm518_vm11, %v1608_v25, %v875_v7  ;;  %v877_v13 = vadd.f32 -1.0, %v1005_v0 }
 0x108   :  { %v939_v37 = vpack.c.bf16 %v678_v16, %v678_v16  ;;  %v681_v38 = vsel %vm521_vm12, %v1611_v35, %v878_v10 }
 0x109   :  { %v942_v22 = vpack.c.bf16 %v681_v38, %v681_v38  ;;  %v680_v30 = vsel %vm520_vm13, %v1614_v20, %v877_v13  ;;  %v1007_v34 = vpop.eup %1006 }
 0x10a   :  { %839 = vst.msk [vmem:[%s1745_s3 + $0x60] sm:$0xf] %vm814_vm0, %v939_v37  ;;  %v941_v41 = vpack.c.bf16 %v680_v30, %v680_v30  ;;  %v880_v25 = vadd.f32 -1.0, %v1007_v34 }
 0x10b   :  { %v1009_v46 = vpop.eup %1008  ;;  %842 = vst.msk [vmem:[%s1745_s3 + $0x6c] sm:$0xf] %vm814_vm0, %v942_v22 }
 0x10c   :  { %841 = vst.msk [vmem:[%s1745_s3 + $0x68] sm:$0xf] %vm814_vm0, %v941_v41  ;;  %v879_v35 = vadd.f32 -1.0, %v1009_v46  ;;  %v683_v48 = vsel %vm523_vm14, %v1634_v26, %v880_v25 }
 0x10d   :  { %v1011_v20 = vpop.eup %1010  ;;  %v944_v2 = vpack.c.bf16 %v683_v48, %v683_v48 }
 0x10e   :  { %v682_v39 = vsel %vm522_vm15, %v1638_v50, %v879_v35  ;;  %v882_v3 = vadd.f32 -1.0, %v1011_v20  ;;  %v1013_v51 = vpop.eup %1012 }
 0x10f   :  { %v943_v18 = vpack.c.bf16 %v682_v39, %v682_v39  ;;  %844 = vst.msk [vmem:[%s1745_s3 + $0x74] sm:$0xf] %vm814_vm0, %v944_v2  ;;  %v881_v40 = vadd.f32 -1.0, %v1013_v51 }
 0x110   :  { %v685_v29 = vsel %vm525_vm1, %v1654_v57, %v882_v3 }
 0x111   :  { %843 = vst.msk [vmem:[%s1745_s3 + $0x70] sm:$0xf] %vm814_vm0, %v943_v18  ;;  %v946_v26 = vpack.c.bf16 %v685_v29, %v685_v29  ;;  %v684_v50 = vsel %vm524_vm2, %v1657_v24, %v881_v40 }
 0x112   :  { %v945_v1 = vpack.c.bf16 %v684_v50, %v684_v50 }
 0x113   :  { %846 = vst.msk [vmem:[%s1745_s3 + $0x7c] sm:$0xf] %vm814_vm0, %v946_v26 }
 0x114   :  { %845 = vst.msk [vmem:[%s1745_s3 + $0x78] sm:$0xf] %vm814_vm0, %v945_v1 }

// kernel: discriminator_forward.13
= control target key start
LH: loop header
LB: loop body
LE: loop exit
PB: predicated region body
PF: predicated region fallthrough
CT: control target
= control target key end

     0   :  { %vm3863_vm0 = vcmask 261120   ;;  %vm3992_vm1 = vcmask 7168   ;;  %s7566_s1 = inlined_call_operand.vmem [shape: bf16[2048,32], index: 1, kind: input, shape index: {}]   ;;  %s7567_s0 = inlined_call_operand.vmem [shape: bf16[256,2048], index: 0, kind: input, shape index: {}]   ;;  %s7568_s2 = inlined_call_operand.vmem [shape: f32[256,32], index: 2, kind: output, shape index: {0}]   ;;  %s7569_s3 = inlined_call_operand.vmem [shape: f32[1,256,1], index: 3, kind: output, shape index: {1}]   ;;  %s7570_s4 = inlined_call_operand.vmem [shape: f32[1,256,1], index: 4, kind: output, shape index: {2}]  }
   0x1   :  { %v5477_v0 = vld [vmem:[%s7566_s1 + $0x78] sm:$0xff]   ;;  %v5481_v4 = vld [vmem:[%s7566_s1 + $0x70] sm:$0xff]   ;;  %v5485_v8 = vld [vmem:[%s7566_s1 + $0x68] sm:$0xff]  }
   0x2   :  { %v5478_v1 = vld [vmem:[%s7566_s1 + $0xf8] sm:$0xff]   ;;  %4581 = vmatprep.subr.bf16.mxu0 %v5477_v0  ;;  %v5482_v5 = vld [vmem:[%s7566_s1 + $0xf0] sm:$0xff]   ;;  %v5486_v9 = vld [vmem:[%s7566_s1 + $0xe8] sm:$0xff]  }
   0x3   :  { %v5479_v2 = vld [vmem:[%s7566_s1 + $0x38] sm:$0xff]   ;;  %4693 = vmatprep.subr.bf16.mxu1 %v5478_v1  ;;  %v5483_v6 = vld [vmem:[%s7566_s1 + $0x30] sm:$0xff]   ;;  %v5487_v10 = vld [vmem:[%s7566_s1 + $0x28] sm:$0xff]  }
   0x4   :  { %v5480_v3 = vld [vmem:[%s7566_s1 + $0xb8] sm:$0xff]   ;;  %4582 = vmatpush3.bf16.msra.mxu0 %v5479_v2  ;;  %v5484_v7 = vld [vmem:[%s7566_s1 + $0xb0] sm:$0xff]   ;;  %v5488_v11 = vld [vmem:[%s7566_s1 + $0xa8] sm:$0xff]  }
   0x5   :  { %4694 = vmatpush3.bf16.msra.mxu1 %v5480_v3  ;;  %4583 = vmatprep.subr.bf16.mxu0 %v5481_v4  ;;  %v5489_v12 = vld [vmem:[%s7566_s1 + $0x60] sm:$0xff]   ;;  %v5493_v16 = vld [vmem:[%s7566_s1 + $0x58] sm:$0xff]   ;;  %v5497_v20 = vld [vmem:[%s7566_s1 + $0x50] sm:$0xff]  }
   0x6   :  { %4695 = vmatprep.subr.bf16.mxu1 %v5482_v5  ;;  %v5490_v13 = vld [vmem:[%s7566_s1 + $0xe0] sm:$0xff]   ;;  %v5494_v17 = vld [vmem:[%s7566_s1 + $0xd8] sm:$0xff]   ;;  %v5498_v21 = vld [vmem:[%s7566_s1 + $0xd0] sm:$0xff]  }
   0x7   :  { %v5491_v14 = vld [vmem:[%s7566_s1 + $0x20] sm:$0xff]   ;;  %v5495_v18 = vld [vmem:[%s7566_s1 + $0x18] sm:$0xff]   ;;  %v5499_v22 = vld [vmem:[%s7566_s1 + $0x10] sm:$0xff]  }
   0x8   :  { %4584 = vmatpush3.bf16.msra.mxu0 %v5483_v6  ;;  %v5492_v15 = vld [vmem:[%s7566_s1 + $0xa0] sm:$0xff]   ;;  %v5496_v19 = vld [vmem:[%s7566_s1 + $0x98] sm:$0xff]   ;;  %v5500_v23 = vld [vmem:[%s7566_s1 + $0x90] sm:$0xff]  }
   0x9   :  { %4696 = vmatpush3.bf16.msra.mxu1 %v5484_v7  ;;  %4585 = vmatprep.subr.bf16.mxu0 %v5485_v8  ;;  %v5501_v24 = vld [vmem:[%s7566_s1 + $0x48] sm:$0xff]   ;;  %v5505_v28 = vld [vmem:[%s7566_s1 + $0x40] sm:$0xff]   ;;  %v5509_v40 = vld [vmem:[%s7566_s1 + $0x178] sm:$0xff]  }
   0xa   :  { %4697 = vmatprep.subr.bf16.mxu1 %v5486_v9  ;;  %v5502_v25 = vld [vmem:[%s7566_s1 + $0xc8] sm:$0xff]   ;;  %v5506_v29 = vld [vmem:[%s7566_s1 + $0xc0] sm:$0xff]   ;;  %v5510_v41 = vld [vmem:[%s7566_s1 + $0x138] sm:$0xff]  }
   0xb   :  { %v5503_v26 = vld [vmem:[%s7566_s1 + $0x8] sm:$0xff]   ;;  %v5507_v30 = vld [vmem:[%s7566_s1] sm:$0xff]   ;;  %v5511_v42 = vld [vmem:[%s7566_s1 + $0x1f8] sm:$0xff]  }
   0xc   :  { %4586 = vmatpush3.bf16.msra.mxu0 %v5487_v10  ;;  %v5504_v27 = vld [vmem:[%s7566_s1 + $0x88] sm:$0xff]   ;;  %v5508_v31 = vld [vmem:[%s7566_s1 + $0x80] sm:$0xff]   ;;  %v5512_v43 = vld [vmem:[%s7566_s1 + $0x1b8] sm:$0xff]  }
   0xd   :  { %4698 = vmatpush3.bf16.msra.mxu1 %v5488_v11  ;;  %4587 = vmatprep.subr.bf16.mxu0 %v5489_v12  ;;  %v15_v32 = vld [vmem:[%s7567_s0] sm:$0xff]  ;;  %v16_v34 = vld [vmem:[%s7567_s0 + $0x8] sm:$0xff]  ;;  %v5513_v55 = vld [vmem:[%s7566_s1 + $0x170] sm:$0xff]  }
   0xe   :  { %4699 = vmatprep.subr.bf16.mxu1 %v5490_v13  ;;  %v23_v33 = vld [vmem:[%s7567_s0 + $0x40] sm:$0xff]  ;;  %v24_v37 = vld [vmem:[%s7567_s0 + $0x48] sm:$0xff]  ;;  %v5514_v58 = vld [vmem:[%s7566_s1 + $0x130] sm:$0xff]  }
   0xf   :  { %v4197_v35 = vcombine.low %v15_v32, %v23_v33  ;;  %v4198_v36 = vcombine.high %v15_v32, %v23_v33  ;;  %v4199_v38 = vcombine.low %v16_v34, %v24_v37  ;;  %v4200_v39 = vcombine.high %v16_v34, %v24_v37  ;;  %v31_v44 = vld [vmem:[%s7567_s0 + $0x80] sm:$0xff]  ;;  %v32_v47 = vld [vmem:[%s7567_s0 + $0x88] sm:$0xff]  ;;  %v5515_v60 = vld [vmem:[%s7566_s1 + $0x1f0] sm:$0xff]  }
  0x10   :  { %4588 = vmatpush3.bf16.msra.mxu0 %v5491_v14  ;;  %v39_v45 = vld [vmem:[%s7567_s0 + $0xc0] sm:$0xff]  ;;  %v40_v48 = vld [vmem:[%s7567_s0 + $0xc8] sm:$0xff]  ;;  %v5516_v61 = vld [vmem:[%s7566_s1 + $0x1b0] sm:$0xff]  }
  0x11   :  { %4700 = vmatpush3.bf16.msra.mxu1 %v5492_v15  ;;  %4589 = vmatprep.subr.bf16.mxu0 %v5493_v16  ;;  %v4214_v46 = vcombine.high %v31_v44, %v39_v45  ;;  %v47_v49 = vld [vmem:[%s7567_s0 + $0x100] sm:$0xff]  ;;  %v4216_v50 = vcombine.high %v32_v47, %v40_v48  ;;  %v48_v52 = vld [vmem:[%s7567_s0 + $0x108] sm:$0xff]  ;;  %v4213_v54 = vcombine.low %v31_v44, %v39_v45  ;;  %v5529_v34 = vld [vmem:[%s7566_s1 + $0x150] sm:$0xff]  }
  0x12   :  { %4701 = vmatprep.subr.bf16.mxu1 %v5494_v17  ;;  %2607 = vmatprep.mubr.bf16.mxu0 %v4198_v36  ;;  %v55_v51 = vld [vmem:[%s7567_s0 + $0x140] sm:$0xff]  ;;  %v56_v53 = vld [vmem:[%s7567_s0 + $0x148] sm:$0xff]  ;;  %v4215_v56 = vcombine.low %v32_v47, %v40_v48  ;;  %v5530_v36 = vld [vmem:[%s7566_s1 + $0x110] sm:$0xff]  }
  0x13   :  { %2768 = vmatprep.mubr.bf16.mxu1 %v4200_v39  ;;  %v4230_v57 = vcombine.high %v47_v49, %v55_v51  ;;  %v4232_v59 = vcombine.high %v48_v52, %v56_v53  ;;  %v63_v62 = vld [vmem:[%s7567_s0 + $0x180] sm:$0xff]  ;;  %v64_v0 = vld [vmem:[%s7567_s0 + $0x188] sm:$0xff]  ;;  %v4229_v3 = vcombine.low %v47_v49, %v55_v51  ;;  %v4231_v5 = vcombine.low %v48_v52, %v56_v53  ;;  %v5531_v37 = vld [vmem:[%s7566_s1 + $0x1d0] sm:$0xff]  }
  0x14   :  { %4590 = vmatpush3.bf16.msra.mxu0 %v5495_v18  ;;  %v71_v63 = vld [vmem:[%s7567_s0 + $0x1c0] sm:$0xff]  ;;  %v72_v1 = vld [vmem:[%s7567_s0 + $0x1c8] sm:$0xff]  ;;  %v5532_v39 = vld [vmem:[%s7566_s1 + $0x190] sm:$0xff]  }
  0x15   :  { %4702 = vmatpush3.bf16.msra.mxu1 %v5496_v19  ;;  %4591 = vmatprep.subr.bf16.mxu0 %v5497_v20  ;;  %v5517_v2 = vld [vmem:[%s7566_s1 + $0x168] sm:$0xff]   ;;  %v4246_v6 = vcombine.high %v63_v62, %v71_v63  ;;  %v4248_v8 = vcombine.high %v64_v0, %v72_v1  ;;  %v79_v10 = vld [vmem:[%s7567_s0 + $0x200] sm:$0xff]  ;;  %v4245_v16 = vcombine.low %v63_v62, %v71_v63 }
  0x16   :  { %4703 = vmatprep.subr.bf16.mxu1 %v5498_v21  ;;  %v5518_v4 = vld [vmem:[%s7566_s1 + $0x128] sm:$0xff]   ;;  %v87_v11 = vld [vmem:[%s7567_s0 + $0x240] sm:$0xff]  ;;  %v4247_v18 = vcombine.low %v64_v0, %v72_v1 }
  0x17   :  { %v5519_v7 = vld [vmem:[%s7566_s1 + $0x1e8] sm:$0xff]   ;;  %v5521_v14 = vld [vmem:[%s7566_s1 + $0x160] sm:$0xff]   ;;  %v4262_v19 = vcombine.high %v79_v10, %v87_v11 }
  0x18   :  { %4592 = vmatpush3.bf16.msra.mxu0 %v5499_v22  ;;  %v5520_v9 = vld [vmem:[%s7566_s1 + $0x1a8] sm:$0xff]   ;;  %v5522_v15 = vld [vmem:[%s7566_s1 + $0x120] sm:$0xff]  }
  0x19   :  { %4704 = vmatpush3.bf16.msra.mxu1 %v5500_v23  ;;  %4593 = vmatprep.subr.bf16.mxu0 %v5501_v24  ;;  %v80_v12 = vld [vmem:[%s7567_s0 + $0x208] sm:$0xff]  ;;  %v5523_v17 = vld [vmem:[%s7566_s1 + $0x1e0] sm:$0xff]   ;;  %v5525_v24 = vld [vmem:[%s7566_s1 + $0x158] sm:$0xff]  }
  0x1a   :  { %4705 = vmatprep.subr.bf16.mxu1 %v5502_v25  ;;  %v88_v13 = vld [vmem:[%s7567_s0 + $0x248] sm:$0xff]  ;;  %v5524_v20 = vld [vmem:[%s7566_s1 + $0x1a0] sm:$0xff]  }
  0x1b   :  { %v4264_v21 = vcombine.high %v80_v12, %v88_v13  ;;  %v95_v22 = vld [vmem:[%s7567_s0 + $0x280] sm:$0xff]  ;;  %v96_v25 = vld [vmem:[%s7567_s0 + $0x288] sm:$0xff] }
  0x1c   :  { %4594 = vmatpush3.bf16.msra.mxu0 %v5503_v26  ;;  %v103_v23 = vld [vmem:[%s7567_s0 + $0x2c0] sm:$0xff]  ;;  %v104_v26 = vld [vmem:[%s7567_s0 + $0x2c8] sm:$0xff] }
  0x1d   :  { %4706 = vmatpush3.bf16.msra.mxu1 %v5504_v27  ;;  %4595 = vmatprep.subr.bf16.mxu0 %v5505_v28  ;;  %v5526_v27 = vld [vmem:[%s7566_s1 + $0x118] sm:$0xff]   ;;  %v4278_v32 = vcombine.high %v95_v22, %v103_v23  ;;  %v4280_v33 = vcombine.high %v96_v25, %v104_v26  ;;  %v5534_v47 = vld [vmem:[%s7566_s1 + $0x108] sm:$0xff]   ;;  %v135_v51 = vld [vmem:[%s7567_s0 + $0x3c0] sm:$0xff] }
  0x1e   :  { %4707 = vmatprep.subr.bf16.mxu1 %v5506_v29  ;;  %v5527_v28 = vld [vmem:[%s7566_s1 + $0x1d8] sm:$0xff]   ;;  %v5535_v48 = vld [vmem:[%s7566_s1 + $0x1c8] sm:$0xff]   ;;  %v143_v62 = vld [vmem:[%s7567_s0 + $0x400] sm:$0xff] }
  0x1f   :  { %v5528_v29 = vld [vmem:[%s7566_s1 + $0x198] sm:$0xff]   ;;  %v5536_v49 = vld [vmem:[%s7566_s1 + $0x188] sm:$0xff]   ;;  %v151_v63 = vld [vmem:[%s7567_s0 + $0x440] sm:$0xff] }
  0x20   :  { %4596 = vmatpush3.bf16.msra.mxu0 %v5507_v30  ;;  %v4261_v30 = vcombine.low %v79_v10, %v87_v11  ;;  %v128_v52 = vld [vmem:[%s7567_s0 + $0x388] sm:$0xff] }
  0x21   :  { %4708 = vmatpush3.bf16.msra.mxu1 %v5508_v31  ;;  %4805 = vmatprep.subr.bf16.mxu0 %v5509_v40  ;;  %v4263_v31 = vcombine.low %v80_v12, %v88_v13  ;;  %v112_v40 = vld [vmem:[%s7567_s0 + $0x308] sm:$0xff]  ;;  %v4325_v12 = vcombine.low %v143_v62, %v151_v63 }
  0x22   :  { %4917 = vmatprep.subr.bf16.mxu1 %v5511_v42  ;;  %v4277_v42 = vcombine.low %v95_v22, %v103_v23  ;;  %v136_v53 = vld [vmem:[%s7567_s0 + $0x3c8] sm:$0xff] }
  0x23   :  { %2608 = vmatmul.mubr.bf16.vlgmr.msra.gmra.mxu0 %v4197_v35  ;;  %v111_v35 = vld [vmem:[%s7567_s0 + $0x300] sm:$0xff]  ;;  %v144_v0 = vld [vmem:[%s7567_s0 + $0x408] sm:$0xff] }
  0x24   :  { %2769 = vmatmul.mubr.bf16.vlgmr.msra.gmra.mxu1 %v4199_v38  ;;  %4806 = vmatpush3.bf16.msra.mxu0 %v5510_v41  ;;  %v119_v38 = vld [vmem:[%s7567_s0 + $0x340] sm:$0xff]  ;;  %v120_v41 = vld [vmem:[%s7567_s0 + $0x348] sm:$0xff] }
  0x25   :  { %4918 = vmatpush3.bf16.msra.mxu1 %v5512_v43  ;;  %2615 = vmatprep.mubr.bf16.mxu0 %v4214_v46  ;;  %v4279_v43 = vcombine.low %v96_v25, %v104_v26  ;;  %v4294_v44 = vcombine.high %v111_v35, %v119_v38  ;;  %v4296_v45 = vcombine.high %v112_v40, %v120_v41  ;;  %v5533_v46 = vld [vmem:[%s7566_s1 + $0x148] sm:$0xff]   ;;  %v199_v25 = vld [vmem:[%s7567_s0 + $0x5c0] sm:$0xff] }
  0x26   :  { %2776 = vmatprep.mubr.bf16.mxu1 %v4216_v50  ;;  %4807 = vmatprep.subr.bf16.mxu0 %v5513_v55  ;;  %v127_v50 = vld [vmem:[%s7567_s0 + $0x380] sm:$0xff]  ;;  %v152_v1 = vld [vmem:[%s7567_s0 + $0x448] sm:$0xff] }
  0x27   :  { %4919 = vmatprep.subr.bf16.mxu1 %v5515_v60  ;;  %v5537_v55 = vld [vmem:[%s7566_s1 + $0x140] sm:$0xff]   ;;  %v160_v10 = vld [vmem:[%s7567_s0 + $0x488] sm:$0xff]  ;;  %v4327_v13 = vcombine.low %v144_v0, %v152_v1 }
  0x28   :  { %4808 = vmatpush3.bf16.msra.mxu0 %v5514_v58  ;;  %v5538_v58 = vld [vmem:[%s7566_s1 + $0x100] sm:$0xff]   ;;  %v168_v11 = vld [vmem:[%s7567_s0 + $0x4c8] sm:$0xff] }
  0x29   :  { %4920 = vmatpush3.bf16.msra.mxu1 %v5516_v61  ;;  %4809 = vmatprep.subr.bf16.mxu0 %v5517_v2  ;;  %v5539_v60 = vld [vmem:[%s7566_s1 + $0x1c0] sm:$0xff]   ;;  %v5541_v2 = vld [vmem:[%s7566_s1 + $0x278] sm:$0xff]   ;;  %v192_v26 = vld [vmem:[%s7567_s0 + $0x588] sm:$0xff] }
  0x2a   :  { %4921 = vmatprep.subr.bf16.mxu1 %v5519_v7  ;;  %v5540_v61 = vld [vmem:[%s7566_s1 + $0x180] sm:$0xff]   ;;  %v4328_v7 = vcombine.high %v144_v0, %v152_v1  ;;  %v17_v0 = vld [vmem:[%s7567_s0 + $0x10] sm:$0xff] }
  0x2b   :  { %2616 = vmatmul.mubr.bf16.gmra.mxu0 %v4213_v54  ;;  %v4293_v54 = vcombine.low %v111_v35, %v119_v38  ;;  %v216_v35 = vld [vmem:[%s7567_s0 + $0x648] sm:$0xff]  ;;  %v25_v1 = vld [vmem:[%s7567_s0 + $0x50] sm:$0xff] }
  0x2c   :  { %2777 = vmatmul.mubr.bf16.gmra.mxu1 %v4215_v56  ;;  %2623 = vmatprep.mubr.bf16.mxu0 %v4230_v57  ;;  %v4295_v56 = vcombine.low %v112_v40, %v120_v41  ;;  %v4310_v57 = vcombine.high %v127_v50, %v135_v51  ;;  %v223_v40 = vld [vmem:[%s7567_s0 + $0x680] sm:$0xff] }
  0x2d   :  { %2784 = vmatprep.mubr.bf16.mxu1 %v4232_v59  ;;  %4810 = vmatpush3.bf16.msra.mxu0 %v5518_v4  ;;  %v4312_v59 = vcombine.high %v128_v52, %v136_v53  ;;  %v4311_v4 = vcombine.low %v128_v52, %v136_v53  ;;  %v231_v41 = vld [vmem:[%s7567_s0 + $0x6c0] sm:$0xff] }
  0x2e   :  { %4922 = vmatpush3.bf16.msra.mxu1 %v5520_v9  ;;  %4811 = vmatprep.subr.bf16.mxu0 %v5521_v14  ;;  %v167_v9 = vld [vmem:[%s7567_s0 + $0x4c0] sm:$0xff]  ;;  %v4405_v52 = vcombine.low %v223_v40, %v231_v41 }
  0x2f   :  { %4923 = vmatprep.subr.bf16.mxu1 %v5523_v17  ;;  %v183_v17 = vld [vmem:[%s7567_s0 + $0x540] sm:$0xff] }
  0x31   :  { %4812 = vmatpush3.bf16.msra.mxu0 %v5522_v15  ;;  %v4344_v15 = vcombine.high %v160_v10, %v168_v11 }
  0x32   :  { %4924 = vmatpush3.bf16.msra.mxu1 %v5524_v20  ;;  %4813 = vmatprep.subr.bf16.mxu0 %v5525_v24  ;;  %v191_v24 = vld [vmem:[%s7567_s0 + $0x580] sm:$0xff] }
  0x33   :  { %2624 = vmatmul.mubr.bf16.gmra.mxu0 %v4229_v3  ;;  %4925 = vmatprep.subr.bf16.mxu1 %v5527_v28  ;;  %v4309_v3 = vcombine.low %v127_v50, %v135_v51  ;;  %v240_v50 = vld [vmem:[%s7567_s0 + $0x708] sm:$0xff] }
  0x34   :  { %2785 = vmatmul.mubr.bf16.gmra.mxu1 %v4231_v5  ;;  %2631 = vmatprep.mubr.bf16.mxu0 %v4246_v6  ;;  %v4326_v5 = vcombine.high %v143_v62, %v151_v63  ;;  %v5543_v6 = vld [vmem:[%s7566_s1 + $0x2f8] sm:$0xff]   ;;  %v248_v51 = vld [vmem:[%s7567_s0 + $0x748] sm:$0xff] }
  0x35   :  { %2792 = vmatprep.mubr.bf16.mxu1 %v4248_v8  ;;  %4814 = vmatpush3.bf16.msra.mxu0 %v5526_v27  ;;  %v159_v8 = vld [vmem:[%s7567_s0 + $0x480] sm:$0xff]  ;;  %v200_v27 = vld [vmem:[%s7567_s0 + $0x5c8] sm:$0xff] }
  0x36   :  { %4926 = vmatpush3.bf16.msra.mxu1 %v5528_v29  ;;  %4815 = vmatprep.subr.bf16.mxu0 %v5529_v34  ;;  %v4342_v14 = vcombine.high %v159_v8, %v167_v9  ;;  %v4341_v20 = vcombine.low %v159_v8, %v167_v9  ;;  %v208_v34 = vld [vmem:[%s7567_s0 + $0x608] sm:$0xff]  ;;  %v33_v8 = vld [vmem:[%s7567_s0 + $0x90] sm:$0xff] }
  0x37   :  { %4927 = vmatprep.subr.bf16.mxu1 %v5531_v37  ;;  %v4375_v37 = vcombine.low %v192_v26, %v200_v27  ;;  %v41_v9 = vld [vmem:[%s7567_s0 + $0xd0] sm:$0xff] }
  0x39   :  { %4816 = vmatpush3.bf16.msra.mxu0 %v5530_v36  ;;  %v4373_v36 = vcombine.low %v191_v24, %v199_v25 }
  0x3a   :  { %4928 = vmatpush3.bf16.msra.mxu1 %v5532_v39  ;;  %4817 = vmatprep.subr.bf16.mxu0 %v5533_v46  ;;  %v4392_v39 = vcombine.high %v208_v34, %v216_v35  ;;  %v4406_v46 = vcombine.high %v223_v40, %v231_v41  ;;  %v74_v40 = vld [vmem:[%s7567_s0 + $0x1d8] sm:$0xff]  ;;  %v5556_v41 = vld [vmem:[%s7566_s1 + $0x2a0] sm:$0xff]  }
  0x3b   :  { %2632 = vmatmul.mubr.bf16.gmra.mxu0 %v4245_v16  ;;  %4929 = vmatprep.subr.bf16.mxu1 %v5535_v48  ;;  %v175_v16 = vld [vmem:[%s7567_s0 + $0x500] sm:$0xff] }
  0x3c   :  { %2793 = vmatmul.mubr.bf16.gmra.mxu1 %v4247_v18  ;;  %2639 = vmatprep.mubr.bf16.mxu0 %v4262_v19  ;;  %v176_v18 = vld [vmem:[%s7567_s0 + $0x508] sm:$0xff]  ;;  %v4358_v22 = vcombine.high %v175_v16, %v183_v17  ;;  %v4357_v28 = vcombine.low %v175_v16, %v183_v17  ;;  %v239_v48 = vld [vmem:[%s7567_s0 + $0x700] sm:$0xff]  ;;  %v4218_v16 = vcombine.high %v33_v8, %v41_v9 }
  0x3d   :  { %2800 = vmatprep.mubr.bf16.mxu1 %v4264_v21  ;;  %4818 = vmatpush3.bf16.msra.mxu0 %v5534_v47  ;;  %v184_v19 = vld [vmem:[%s7567_s0 + $0x548] sm:$0xff]  ;;  %v4343_v21 = vcombine.low %v160_v10, %v168_v11  ;;  %v4201_v10 = vcombine.low %v17_v0, %v25_v1  ;;  %v34_v11 = vld [vmem:[%s7567_s0 + $0x98] sm:$0xff] }
  0x3e   :  { %4930 = vmatpush3.bf16.msra.mxu1 %v5536_v49  ;;  %4819 = vmatprep.subr.bf16.mxu0 %v5537_v55  ;;  %v4360_v23 = vcombine.high %v176_v18, %v184_v19  ;;  %v4359_v29 = vcombine.low %v176_v18, %v184_v19  ;;  %v247_v49 = vld [vmem:[%s7567_s0 + $0x740] sm:$0xff]  ;;  %v4424_v55 = vcombine.high %v240_v50, %v248_v51  ;;  %v5545_v18 = vld [vmem:[%s7566_s1 + $0x270] sm:$0xff]  }
  0x3f   :  { %4931 = vmatprep.subr.bf16.mxu1 %v5539_v60  ;;  %v4421_v60 = vcombine.low %v239_v48, %v247_v49  ;;  %v5547_v19 = vld [vmem:[%s7566_s1 + $0x2f0] sm:$0xff]  }
  0x41   :  { %4820 = vmatpush3.bf16.msra.mxu0 %v5538_v58  ;;  %v256_v58 = vld [vmem:[%s7567_s0 + $0x788] sm:$0xff] }
  0x42   :  { %4932 = vmatpush3.bf16.msra.mxu1 %v5540_v61  ;;  %5029 = vmatprep.subr.bf16.mxu0 %v5541_v2  ;;  %v4423_v61 = vcombine.low %v240_v50, %v248_v51  ;;  %v18_v2 = vld [vmem:[%s7567_s0 + $0x18] sm:$0xff]  ;;  %v5561_v50 = vld [vmem:[%s7566_s1 + $0x250] sm:$0xff]  }
  0x43   :  { %2640 = vmatmul.mubr.bf16.gmra.mxu0 %v4261_v30  ;;  %5141 = vmatprep.subr.bf16.mxu1 %v5543_v6  ;;  %v4374_v30 = vcombine.high %v191_v24, %v199_v25  ;;  %v4202_v6 = vcombine.high %v17_v0, %v25_v1  ;;  %v5549_v24 = vld [vmem:[%s7566_s1 + $0x268] sm:$0xff]   ;;  %v50_v25 = vld [vmem:[%s7567_s0 + $0x118] sm:$0xff]  ;;  %v5563_v51 = vld [vmem:[%s7566_s1 + $0x2d0] sm:$0xff]  }
  0x44   :  { %2801 = vmatmul.mubr.bf16.gmra.mxu1 %v4263_v31  ;;  %2647 = vmatprep.mubr.bf16.mxu0 %v4278_v32  ;;  %v4376_v31 = vcombine.high %v192_v26, %v200_v27  ;;  %v207_v32 = vld [vmem:[%s7567_s0 + $0x600] sm:$0xff]  ;;  %v58_v26 = vld [vmem:[%s7567_s0 + $0x158] sm:$0xff]  ;;  %v5551_v27 = vld [vmem:[%s7566_s1 + $0x2e8] sm:$0xff]  }
  0x45   :  { %2808 = vmatprep.mubr.bf16.mxu1 %v4280_v33  ;;  %v215_v33 = vld [vmem:[%s7567_s0 + $0x640] sm:$0xff]  ;;  %v5566_v0 = vld [vmem:[%s7566_s1 + $0x208] sm:$0xff]  }
  0x46   :  { %v4390_v38 = vcombine.high %v207_v32, %v215_v33  ;;  %v5568_v1 = vld [vmem:[%s7566_s1 + $0x288] sm:$0xff]  }
  0x4b   :  { %2648 = vmatmul.mubr.bf16.gmra.mxu0 %v4277_v42  ;;  %v224_v42 = vld [vmem:[%s7567_s0 + $0x688] sm:$0xff] }
  0x4c   :  { %2809 = vmatmul.mubr.bf16.gmra.mxu1 %v4279_v43  ;;  %2655 = vmatprep.mubr.bf16.mxu0 %v4294_v44  ;;  %v232_v43 = vld [vmem:[%s7567_s0 + $0x6c8] sm:$0xff]  ;;  %v4389_v44 = vcombine.low %v207_v32, %v215_v33 }
  0x4d   :  { %2816 = vmatprep.mubr.bf16.mxu1 %v4296_v45  ;;  %v4391_v45 = vcombine.low %v208_v34, %v216_v35  ;;  %v4408_v47 = vcombine.high %v224_v42, %v232_v43  ;;  %v4407_v53 = vcombine.low %v224_v42, %v232_v43  ;;  %v5550_v32 = vld [vmem:[%s7566_s1 + $0x228] sm:$0xff]   ;;  %v5553_v34 = vld [vmem:[%s7566_s1 + $0x260] sm:$0xff]   ;;  %v5557_v42 = vld [vmem:[%s7566_s1 + $0x258] sm:$0xff]  }
  0x4e   :  { %v5552_v33 = vld [vmem:[%s7566_s1 + $0x2a8] sm:$0xff]   ;;  %v5555_v35 = vld [vmem:[%s7566_s1 + $0x2e0] sm:$0xff]  }
  0x53   :  { %2656 = vmatmul.mubr.bf16.gmra.mxu0 %v4293_v54  ;;  %v4422_v54 = vcombine.high %v239_v48, %v247_v49  ;;  %v5558_v48 = vld [vmem:[%s7566_s1 + $0x218] sm:$0xff]  }
  0x54   :  { %2817 = vmatmul.mubr.bf16.gmra.mxu1 %v4295_v56  ;;  %2663 = vmatprep.mubr.bf16.mxu0 %v4310_v57  ;;  %v255_v56 = vld [vmem:[%s7567_s0 + $0x780] sm:$0xff]  ;;  %v5560_v49 = vld [vmem:[%s7566_s1 + $0x298] sm:$0xff]  }
  0x55   :  { %2824 = vmatprep.mubr.bf16.mxu1 %v4312_v59  ;;  %v263_v57 = vld [vmem:[%s7567_s0 + $0x7c0] sm:$0xff]  ;;  %v264_v59 = vld [vmem:[%s7567_s0 + $0x7c8] sm:$0xff] }
  0x56   :  { %v4438_v62 = vcombine.high %v255_v56, %v263_v57  ;;  %v4440_v63 = vcombine.high %v256_v58, %v264_v59 }
  0x5b   :  { %2664 = vmatmul.mubr.bf16.gmra.mxu0 %v4309_v3  ;;  %v26_v3 = vld [vmem:[%s7567_s0 + $0x58] sm:$0xff] }
  0x5c   :  { %2825 = vmatmul.mubr.bf16.gmra.mxu1 %v4311_v4  ;;  %2671 = vmatprep.mubr.bf16.mxu0 %v4326_v5  ;;  %v4437_v4 = vcombine.low %v255_v56, %v263_v57  ;;  %v4439_v5 = vcombine.low %v256_v58, %v264_v59  ;;  %v90_v56 = vld [vmem:[%s7567_s0 + $0x258] sm:$0xff]  ;;  %v5564_v57 = vld [vmem:[%s7566_s1 + $0x290] sm:$0xff]   ;;  %v5565_v58 = vld [vmem:[%s7566_s1 + $0x248] sm:$0xff]  }
  0x5d   :  { %2832 = vmatprep.mubr.bf16.mxu1 %v4328_v7  ;;  %v4204_v7 = vcombine.high %v18_v2, %v26_v3 }
  0x63   :  { %2672 = vmatmul.mubr.bf16.gmra.mxu0 %v4325_v12  ;;  %v42_v12 = vld [vmem:[%s7567_s0 + $0xd8] sm:$0xff] }
  0x64   :  { %2833 = vmatmul.mubr.bf16.gmra.mxu1 %v4327_v13  ;;  %2679 = vmatprep.mubr.bf16.mxu0 %v4342_v14  ;;  %v4203_v13 = vcombine.low %v18_v2, %v26_v3  ;;  %v5542_v14 = vld [vmem:[%s7566_s1 + $0x238] sm:$0xff]   ;;  %v4220_v17 = vcombine.high %v34_v11, %v42_v12  ;;  %v5569_v2 = vld [vmem:[%s7566_s1 + $0x240] sm:$0xff]  }
  0x65   :  { %2840 = vmatprep.mubr.bf16.mxu1 %v4344_v15  ;;  %v5544_v15 = vld [vmem:[%s7566_s1 + $0x2b8] sm:$0xff]   ;;  %v5571_v3 = vld [vmem:[%s7566_s1 + $0x2c0] sm:$0xff]  }
  0x6b   :  { %2680 = vmatmul.mubr.bf16.gmra.mxu0 %v4341_v20  ;;  %v49_v20 = vld [vmem:[%s7567_s0 + $0x110] sm:$0xff] }
  0x6c   :  { %2841 = vmatmul.mubr.bf16.gmra.mxu1 %v4343_v21  ;;  %2687 = vmatprep.mubr.bf16.mxu0 %v4358_v22  ;;  %v5546_v21 = vld [vmem:[%s7566_s1 + $0x230] sm:$0xff]  }
  0x6d   :  { %2848 = vmatprep.mubr.bf16.mxu1 %v4360_v23  ;;  %v57_v22 = vld [vmem:[%s7567_s0 + $0x150] sm:$0xff] }
  0x6e   :  { %v5548_v23 = vld [vmem:[%s7566_s1 + $0x2b0] sm:$0xff]   ;;  %v4233_v43 = vcombine.low %v49_v20, %v57_v22 }
  0x73   :  { %2688 = vmatmul.mubr.bf16.gmra.mxu0 %v4357_v28  ;;  %v4217_v28 = vcombine.low %v33_v8, %v41_v9  ;;  %v106_v8 = vld [vmem:[%s7567_s0 + $0x2d8] sm:$0xff]  ;;  %v5572_v9 = vld [vmem:[%s7566_s1 + $0x280] sm:$0xff]  }
  0x74   :  { %2849 = vmatmul.mubr.bf16.gmra.mxu1 %v4359_v29  ;;  %2695 = vmatprep.mubr.bf16.mxu0 %v4374_v30  ;;  %v4219_v29 = vcombine.low %v34_v11, %v42_v12  ;;  %v4234_v30 = vcombine.high %v49_v20, %v57_v22  ;;  %v5575_v12 = vld [vmem:[%s7566_s1 + $0x3f8] sm:$0xff]  }
  0x75   :  { %2856 = vmatprep.mubr.bf16.mxu1 %v4376_v31  ;;  %v4236_v31 = vcombine.high %v50_v25, %v58_v26 }
  0x7b   :  { %2696 = vmatmul.mubr.bf16.gmra.mxu0 %v4373_v36  ;;  %v65_v36 = vld [vmem:[%s7567_s0 + $0x190] sm:$0xff] }
  0x7c   :  { %2857 = vmatmul.mubr.bf16.gmra.mxu1 %v4375_v37  ;;  %2703 = vmatprep.mubr.bf16.mxu0 %v4390_v38  ;;  %v73_v37 = vld [vmem:[%s7567_s0 + $0x1d0] sm:$0xff]  ;;  %v66_v38 = vld [vmem:[%s7567_s0 + $0x198] sm:$0xff] }
  0x7d   :  { %2864 = vmatprep.mubr.bf16.mxu1 %v4392_v39  ;;  %v5554_v39 = vld [vmem:[%s7566_s1 + $0x220] sm:$0xff]   ;;  %v4249_v59 = vcombine.low %v65_v36, %v73_v37 }
  0x83   :  { %2704 = vmatmul.mubr.bf16.gmra.mxu0 %v4389_v44  ;;  %v5559_v44 = vld [vmem:[%s7566_s1 + $0x2d8] sm:$0xff]  }
  0x84   :  { %2865 = vmatmul.mubr.bf16.gmra.mxu1 %v4391_v45  ;;  %2711 = vmatprep.mubr.bf16.mxu0 %v4406_v46  ;;  %v4235_v45 = vcombine.low %v50_v25, %v58_v26  ;;  %v4250_v46 = vcombine.high %v65_v36, %v73_v37  ;;  %v137_v25 = vld [vmem:[%s7567_s0 + $0x3d0] sm:$0xff]  ;;  %v130_v26 = vld [vmem:[%s7567_s0 + $0x398] sm:$0xff] }
  0x85   :  { %2872 = vmatprep.mubr.bf16.mxu1 %v4408_v47  ;;  %v4252_v47 = vcombine.high %v66_v38, %v74_v40 }
  0x8b   :  { %2712 = vmatmul.mubr.bf16.gmra.mxu0 %v4405_v52  ;;  %v81_v52 = vld [vmem:[%s7567_s0 + $0x210] sm:$0xff] }
  0x8c   :  { %2873 = vmatmul.mubr.bf16.gmra.mxu1 %v4407_v53  ;;  %2719 = vmatprep.mubr.bf16.mxu0 %v4422_v54  ;;  %v89_v53 = vld [vmem:[%s7567_s0 + $0x250] sm:$0xff]  ;;  %v82_v54 = vld [vmem:[%s7567_s0 + $0x218] sm:$0xff] }
  0x8d   :  { %2880 = vmatprep.mubr.bf16.mxu1 %v4424_v55  ;;  %v5562_v55 = vld [vmem:[%s7566_s1 + $0x210] sm:$0xff]   ;;  %v4265_v11 = vcombine.low %v81_v52, %v89_v53 }
  0x93   :  { %2720 = vmatmul.mubr.bf16.gmra.mxu0 %v4421_v60  ;;  %v5567_v60 = vld [vmem:[%s7566_s1 + $0x2c8] sm:$0xff]  }
  0x94   :  { %2881 = vmatmul.mubr.bf16.gmra.mxu1 %v4423_v61  ;;  %2727 = vmatprep.mubr.bf16.mxu0 %v4438_v62  ;;  %v4251_v61 = vcombine.low %v66_v38, %v74_v40  ;;  %v4266_v62 = vcombine.high %v81_v52, %v89_v53  ;;  %v161_v40 = vld [vmem:[%s7567_s0 + $0x490] sm:$0xff] }
  0x95   :  { %2888 = vmatprep.mubr.bf16.mxu1 %v4440_v63  ;;  %v4268_v63 = vcombine.high %v82_v54, %v90_v56  ;;  %v185_v52 = vld [vmem:[%s7567_s0 + $0x550] sm:$0xff] }
  0x9b   :  { %2728 = vmatmul.mubr.bf16.gmra.mxu0 %v4437_v4  ;;  %v97_v4 = vld [vmem:[%s7567_s0 + $0x290] sm:$0xff] }
  0x9c   :  { %2889 = vmatmul.mubr.bf16.gmra.mxu1 %v4439_v5  ;;  %2929 = vmatprep.mubr.bf16.mxu0 %v4202_v6  ;;  %v105_v5 = vld [vmem:[%s7567_s0 + $0x2d0] sm:$0xff]  ;;  %v98_v6 = vld [vmem:[%s7567_s0 + $0x298] sm:$0xff] }
  0x9d   :  { %3090 = vmatprep.mubr.bf16.mxu1 %v4204_v7  ;;  %v5570_v7 = vld [vmem:[%s7566_s1 + $0x200] sm:$0xff]   ;;  %v4281_v20 = vcombine.low %v97_v4, %v105_v5 }
  0xa3   :  { %2930 = vmatmul.mubr.bf16.vlgmr.msra.gmra.mxu0 %v4201_v10  ;;  %v5573_v10 = vld [vmem:[%s7566_s1 + $0x378] sm:$0xff]  }
  0xa4   :  { %3091 = vmatmul.mubr.bf16.vlgmr.msra.gmra.mxu1 %v4203_v13  ;;  %5030 = vmatpush3.bf16.msra.mxu0 %v5542_v14  ;;  %v4267_v13 = vcombine.low %v82_v54, %v90_v56  ;;  %v4282_v14 = vcombine.high %v97_v4, %v105_v5  ;;  %v186_v56 = vld [vmem:[%s7567_s0 + $0x558] sm:$0xff] }
  0xa5   :  { %5142 = vmatpush3.bf16.msra.mxu1 %v5544_v15  ;;  %2937 = vmatprep.mubr.bf16.mxu0 %v4218_v16  ;;  %v4284_v15 = vcombine.high %v98_v6, %v106_v8  ;;  %v113_v16 = vld [vmem:[%s7567_s0 + $0x310] sm:$0xff] }
  0xa6   :  { %3098 = vmatprep.mubr.bf16.mxu1 %v4220_v17  ;;  %5031 = vmatprep.subr.bf16.mxu0 %v5545_v18  ;;  %v121_v17 = vld [vmem:[%s7567_s0 + $0x350] sm:$0xff]  ;;  %v114_v18 = vld [vmem:[%s7567_s0 + $0x318] sm:$0xff] }
  0xa7   :  { %5143 = vmatprep.subr.bf16.mxu1 %v5547_v19  ;;  %v122_v19 = vld [vmem:[%s7567_s0 + $0x358] sm:$0xff]  ;;  %v4298_v22 = vcombine.high %v113_v16, %v121_v17 }
  0xa8   :  { %5032 = vmatpush3.bf16.msra.mxu0 %v5546_v21  ;;  %v4283_v21 = vcombine.low %v98_v6, %v106_v8 }
  0xa9   :  { %5144 = vmatpush3.bf16.msra.mxu1 %v5548_v23  ;;  %5033 = vmatprep.subr.bf16.mxu0 %v5549_v24  ;;  %v4300_v23 = vcombine.high %v114_v18, %v122_v19  ;;  %v129_v24 = vld [vmem:[%s7567_s0 + $0x390] sm:$0xff] }
  0xaa   :  { %5145 = vmatprep.subr.bf16.mxu1 %v5551_v27  ;;  %v138_v27 = vld [vmem:[%s7567_s0 + $0x3d8] sm:$0xff]  ;;  %v4313_v36 = vcombine.low %v129_v24, %v137_v25 }
  0xab   :  { %2938 = vmatmul.mubr.bf16.gmra.mxu0 %v4217_v28  ;;  %v4297_v28 = vcombine.low %v113_v16, %v121_v17  ;;  %v4315_v37 = vcombine.low %v130_v26, %v138_v27 }
  0xac   :  { %3099 = vmatmul.mubr.bf16.gmra.mxu1 %v4219_v29  ;;  %2945 = vmatprep.mubr.bf16.mxu0 %v4234_v30  ;;  %v4299_v29 = vcombine.low %v114_v18, %v122_v19  ;;  %v4314_v30 = vcombine.high %v129_v24, %v137_v25 }
  0xad   :  { %3106 = vmatprep.mubr.bf16.mxu1 %v4236_v31  ;;  %5034 = vmatpush3.bf16.msra.mxu0 %v5550_v32  ;;  %v4316_v31 = vcombine.high %v130_v26, %v138_v27  ;;  %v145_v32 = vld [vmem:[%s7567_s0 + $0x410] sm:$0xff] }
  0xae   :  { %5146 = vmatpush3.bf16.msra.mxu1 %v5552_v33  ;;  %5035 = vmatprep.subr.bf16.mxu0 %v5553_v34  ;;  %v153_v33 = vld [vmem:[%s7567_s0 + $0x450] sm:$0xff]  ;;  %v146_v34 = vld [vmem:[%s7567_s0 + $0x418] sm:$0xff] }
  0xaf   :  { %5147 = vmatprep.subr.bf16.mxu1 %v5555_v35  ;;  %v154_v35 = vld [vmem:[%s7567_s0 + $0x458] sm:$0xff]  ;;  %v4330_v38 = vcombine.high %v145_v32, %v153_v33 }
  0xb1   :  { %5036 = vmatpush3.bf16.msra.mxu0 %v5554_v39  ;;  %v4332_v39 = vcombine.high %v146_v34, %v154_v35 }
  0xb2   :  { %5148 = vmatpush3.bf16.msra.mxu1 %v5556_v41  ;;  %5037 = vmatprep.subr.bf16.mxu0 %v5557_v42  ;;  %v169_v41 = vld [vmem:[%s7567_s0 + $0x4d0] sm:$0xff]  ;;  %v162_v42 = vld [vmem:[%s7567_s0 + $0x498] sm:$0xff] }
  0xb3   :  { %2946 = vmatmul.mubr.bf16.gmra.mxu0 %v4233_v43  ;;  %5149 = vmatprep.subr.bf16.mxu1 %v5559_v44  ;;  %v170_v43 = vld [vmem:[%s7567_s0 + $0x4d8] sm:$0xff]  ;;  %v4329_v44 = vcombine.low %v145_v32, %v153_v33  ;;  %v217_v32 = vld [vmem:[%s7567_s0 + $0x650] sm:$0xff] }
  0xb4   :  { %3107 = vmatmul.mubr.bf16.gmra.mxu1 %v4235_v45  ;;  %2953 = vmatprep.mubr.bf16.mxu0 %v4250_v46  ;;  %v4331_v45 = vcombine.low %v146_v34, %v154_v35  ;;  %v4346_v46 = vcombine.high %v161_v40, %v169_v41  ;;  %v210_v35 = vld [vmem:[%s7567_s0 + $0x618] sm:$0xff] }
  0xb5   :  { %3114 = vmatprep.mubr.bf16.mxu1 %v4252_v47  ;;  %5038 = vmatpush3.bf16.msra.mxu0 %v5558_v48  ;;  %v4348_v47 = vcombine.high %v162_v42, %v170_v43 }
  0xb6   :  { %5150 = vmatpush3.bf16.msra.mxu1 %v5560_v49  ;;  %5039 = vmatprep.subr.bf16.mxu0 %v5561_v50 }
  0xb7   :  { %5151 = vmatprep.subr.bf16.mxu1 %v5563_v51  ;;  %v177_v51 = vld [vmem:[%s7567_s0 + $0x510] sm:$0xff] }
  0xb8   :  { %v4361_v17 = vcombine.low %v177_v51, %v185_v52 }
  0xb9   :  { %5040 = vmatpush3.bf16.msra.mxu0 %v5562_v55  ;;  %v178_v55 = vld [vmem:[%s7567_s0 + $0x518] sm:$0xff] }
  0xba   :  { %5152 = vmatpush3.bf16.msra.mxu1 %v5564_v57  ;;  %5041 = vmatprep.subr.bf16.mxu0 %v5565_v58  ;;  %v4363_v19 = vcombine.low %v178_v55, %v186_v56 }
  0xbb   :  { %2954 = vmatmul.mubr.bf16.gmra.mxu0 %v4249_v59  ;;  %5153 = vmatprep.subr.bf16.mxu1 %v5567_v60  ;;  %v4345_v59 = vcombine.low %v161_v40, %v169_v41 }
  0xbc   :  { %3115 = vmatmul.mubr.bf16.gmra.mxu1 %v4251_v61  ;;  %2961 = vmatprep.mubr.bf16.mxu0 %v4266_v62  ;;  %v4347_v61 = vcombine.low %v162_v42, %v170_v43  ;;  %v4362_v62 = vcombine.high %v177_v51, %v185_v52 }
  0xbd   :  { %3122 = vmatprep.mubr.bf16.mxu1 %v4268_v63  ;;  %5042 = vmatpush3.bf16.msra.mxu0 %v5566_v0 }
  0xbe   :  { %5154 = vmatpush3.bf16.msra.mxu1 %v5568_v1  ;;  %5043 = vmatprep.subr.bf16.mxu0 %v5569_v2  ;;  %v4364_v1 = vcombine.high %v178_v55, %v186_v56 }
  0xbf   :  { %5155 = vmatprep.subr.bf16.mxu1 %v5571_v3 }
  0xc1   :  { %5044 = vmatpush3.bf16.msra.mxu0 %v5570_v7 }
  0xc2   :  { %5156 = vmatpush3.bf16.msra.mxu1 %v5572_v9  ;;  %5253 = vmatprep.subr.bf16.mxu0 %v5573_v10  ;;  %v193_v9 = vld [vmem:[%s7567_s0 + $0x590] sm:$0xff] }
  0xc3   :  { %2962 = vmatmul.mubr.bf16.gmra.mxu0 %v4265_v11  ;;  %5365 = vmatprep.subr.bf16.mxu1 %v5575_v12  ;;  %v201_v10 = vld [vmem:[%s7567_s0 + $0x5d0] sm:$0xff] }
  0xc4   :  { %3123 = vmatmul.mubr.bf16.gmra.mxu1 %v4267_v13  ;;  %2969 = vmatprep.mubr.bf16.mxu0 %v4282_v14  ;;  %v194_v13 = vld [vmem:[%s7567_s0 + $0x598] sm:$0xff] }
  0xc5   :  { %3130 = vmatprep.mubr.bf16.mxu1 %v4284_v15  ;;  %v202_v14 = vld [vmem:[%s7567_s0 + $0x5d8] sm:$0xff] }
  0xc6   :  { %v4379_v41 = vcombine.low %v194_v13, %v202_v14 }
  0xcb   :  { %2970 = vmatmul.mubr.bf16.gmra.mxu0 %v4281_v20  ;;  %v4378_v20 = vcombine.high %v193_v9, %v201_v10 }
  0xcc   :  { %3131 = vmatmul.mubr.bf16.gmra.mxu1 %v4283_v21  ;;  %2977 = vmatprep.mubr.bf16.mxu0 %v4298_v22 }
  0xcd   :  { %3138 = vmatprep.mubr.bf16.mxu1 %v4300_v23  ;;  %v4380_v23 = vcombine.high %v194_v13, %v202_v14  ;;  %v241_v13 = vld [vmem:[%s7567_s0 + $0x710] sm:$0xff] }
  0xce   :  { %v249_v14 = vld [vmem:[%s7567_s0 + $0x750] sm:$0xff] }
  0xd3   :  { %2978 = vmatmul.mubr.bf16.gmra.mxu0 %v4297_v28 }
  0xd4   :  { %3139 = vmatmul.mubr.bf16.gmra.mxu1 %v4299_v29  ;;  %2985 = vmatprep.mubr.bf16.mxu0 %v4314_v30 }
  0xd5   :  { %3146 = vmatprep.mubr.bf16.mxu1 %v4316_v31  ;;  %v209_v31 = vld [vmem:[%s7567_s0 + $0x610] sm:$0xff] }
  0xd6   :  { %v4394_v42 = vcombine.high %v209_v31, %v217_v32 }
  0xdb   :  { %2986 = vmatmul.mubr.bf16.gmra.mxu0 %v4313_v36  ;;  %v218_v36 = vld [vmem:[%s7567_s0 + $0x658] sm:$0xff] }
  0xdc   :  { %3147 = vmatmul.mubr.bf16.gmra.mxu1 %v4315_v37  ;;  %2993 = vmatprep.mubr.bf16.mxu0 %v4330_v38 }
  0xdd   :  { %3154 = vmatprep.mubr.bf16.mxu1 %v4332_v39  ;;  %v4377_v39 = vcombine.low %v193_v9, %v201_v10 }
  0xe3   :  { %v4597_v48 = vpop.f32.mrf.mxu0  ;;  %2994 = vmatmul.mubr.bf16.gmra.mxu0 %v4329_v44 }
  0xe4   :  { %v4709_v49 = vpop.f32.mrf.mxu1  ;;  %3155 = vmatmul.mubr.bf16.gmra.mxu1 %v4331_v45  ;;  %3001 = vmatprep.mubr.bf16.mxu0 %v4346_v46  ;;  %v4396_v45 = vcombine.high %v210_v35, %v218_v36 }
  0xe5   :  { %v4598_v50 = vpop.f32.mrf.mxu0  ;;  %3162 = vmatprep.mubr.bf16.mxu1 %v4348_v47 }
  0xe6   :  { %v4599_v53 = vadd.f32 %v4598_v50, %v4597_v48  ;;  %v4710_v54 = vpop.f32.mrf.mxu1 }
  0xe7   :  { %v4711_v57 = vadd.f32 %v4710_v54, %v4709_v49  ;;  %v4600_v58 = vpop.f32.mrf.mxu0  ;;  %v233_v54 = vld [vmem:[%s7567_s0 + $0x6d0] sm:$0xff] }
  0xe8   :  { %v4712_v60 = vpop.f32.mrf.mxu1 }
  0xe9   :  { %v6248_v63 = vadd.f32 %v4711_v57, %v4599_v53  ;;  %v4601_v0 = vpop.f32.mrf.mxu0  ;;  %v225_v53 = vld [vmem:[%s7567_s0 + $0x690] sm:$0xff]  ;;  %v226_v57 = vld [vmem:[%s7567_s0 + $0x698] sm:$0xff] }
  0xea   :  { %v4602_v2 = vadd.f32 %v4601_v0, %v4600_v58  ;;  %v4713_v3 = vpop.f32.mrf.mxu1  ;;  %v234_v58 = vld [vmem:[%s7567_s0 + $0x6d8] sm:$0xff]  ;;  %v4395_v0 = vcombine.low %v210_v35, %v218_v36 }
  0xeb   :  { %v4714_v4 = vadd.f32 %v4713_v3, %v4712_v60  ;;  %v4603_v5 = vpop.f32.mrf.mxu0  ;;  %3002 = vmatmul.mubr.bf16.gmra.mxu0 %v4345_v59 }
  0xec   :  { %v4715_v6 = vpop.f32.mrf.mxu1  ;;  %3163 = vmatmul.mubr.bf16.gmra.mxu1 %v4347_v61  ;;  %3009 = vmatprep.mubr.bf16.mxu0 %v4362_v62  ;;  %v4393_v61 = vcombine.low %v209_v31, %v217_v32 }
  0xed   :  { %v6250_v7 = vadd.f32 %v4714_v4, %v4602_v2  ;;  %v4604_v8 = vpop.f32.mrf.mxu0  ;;  %3170 = vmatprep.mubr.bf16.mxu1 %v4364_v1  ;;  %v4410_v1 = vcombine.high %v225_v53, %v233_v54  ;;  %v4412_v4 = vcombine.high %v226_v57, %v234_v58 }
  0xee   :  { %v4605_v11 = vadd.f32 %v4604_v8, %v4603_v5  ;;  %v4716_v12 = vpop.f32.mrf.mxu1 }
  0xef   :  { %v4717_v15 = vadd.f32 %v4716_v12, %v4715_v6  ;;  %v4606_v16 = vpop.f32.mrf.mxu0 }
  0xf0   :  { %v4718_v18 = vpop.f32.mrf.mxu1 }
  0xf1   :  { %v6264_v21 = vadd.f32 %v4717_v15, %v4605_v11  ;;  %v4607_v22 = vpop.f32.mrf.mxu0 }
  0xf2   :  { %v4608_v24 = vadd.f32 %v4607_v22, %v4606_v16  ;;  %v4719_v25 = vpop.f32.mrf.mxu1  ;;  %v4409_v22 = vcombine.low %v225_v53, %v233_v54 }
  0xf3   :  { %v4720_v26 = vadd.f32 %v4719_v25, %v4718_v18  ;;  %v4609_v27 = vpop.f32.mrf.mxu0  ;;  %3010 = vmatmul.mubr.bf16.gmra.mxu0 %v4361_v17  ;;  %v242_v17 = vld [vmem:[%s7567_s0 + $0x718] sm:$0xff]  ;;  %v4426_v25 = vcombine.high %v241_v13, %v249_v14 }
  0xf4   :  { %v4721_v28 = vpop.f32.mrf.mxu1  ;;  %3171 = vmatmul.mubr.bf16.gmra.mxu1 %v4363_v19  ;;  %3017 = vmatprep.mubr.bf16.mxu0 %v4378_v20  ;;  %v250_v18 = vld [vmem:[%s7567_s0 + $0x758] sm:$0xff] }
  0xf5   :  { %v6266_v29 = vadd.f32 %v4720_v26, %v4608_v24  ;;  %v4610_v30 = vpop.f32.mrf.mxu0  ;;  %3178 = vmatprep.mubr.bf16.mxu1 %v4380_v23  ;;  %v4411_v24 = vcombine.low %v226_v57, %v234_v58 }
  0xf6   :  { %v4611_v33 = vadd.f32 %v4610_v30, %v4609_v27  ;;  %v4722_v34 = vpop.f32.mrf.mxu1 }
  0xf7   :  { %v4723_v37 = vadd.f32 %v4722_v34, %v4721_v28  ;;  %v4612_v38 = vpop.f32.mrf.mxu0  ;;  %v4428_v28 = vcombine.high %v242_v17, %v250_v18 }
  0xf8   :  { %v4724_v40 = vpop.f32.mrf.mxu1 }
  0xf9   :  { %v6280_v43 = vadd.f32 %v4723_v37, %v4611_v33  ;;  %v4613_v44 = vpop.f32.mrf.mxu0  ;;  %v257_v37 = vld [vmem:[%s7567_s0 + $0x790] sm:$0xff] }
  0xfa   :  { %v4614_v46 = vadd.f32 %v4613_v44, %v4612_v38  ;;  %v4725_v47 = vpop.f32.mrf.mxu1  ;;  %v265_v38 = vld [vmem:[%s7567_s0 + $0x7d0] sm:$0xff] }
  0xfb   :  { %v4726_v48 = vadd.f32 %v4725_v47, %v4724_v40  ;;  %v4615_v49 = vpop.f32.mrf.mxu0  ;;  %3018 = vmatmul.mubr.bf16.gmra.mxu0 %v4377_v39 }
  0xfc   :  { %v4727_v50 = vpop.f32.mrf.mxu1  ;;  %3179 = vmatmul.mubr.bf16.gmra.mxu1 %v4379_v41  ;;  %3025 = vmatprep.mubr.bf16.mxu0 %v4394_v42  ;;  %v258_v41 = vld [vmem:[%s7567_s0 + $0x798] sm:$0xff] }
  0xfd   :  { %v6282_v51 = vadd.f32 %v4726_v48, %v4614_v46  ;;  %v4616_v52 = vpop.f32.mrf.mxu0  ;;  %3186 = vmatprep.mubr.bf16.mxu1 %v4396_v45  ;;  %v266_v42 = vld [vmem:[%s7567_s0 + $0x7d8] sm:$0xff]  ;;  %v4425_v46 = vcombine.low %v241_v13, %v249_v14  ;;  %v4427_v48 = vcombine.low %v242_v17, %v250_v18 }
  0xfe   :  { %v4617_v55 = vadd.f32 %v4616_v52, %v4615_v49  ;;  %v4728_v56 = vpop.f32.mrf.mxu1  ;;  %v4442_v49 = vcombine.high %v257_v37, %v265_v38  ;;  %v4444_v53 = vcombine.high %v258_v41, %v266_v42 }
  0xff   :  { %v4729_v59 = vadd.f32 %v4728_v56, %v4727_v50  ;;  %v4618_v60 = vpop.f32.mrf.mxu0 }
 0x100   :  { %v4730_v62 = vpop.f32.mrf.mxu1 }
 0x101   :  { %v6296_v2 = vadd.f32 %v4729_v59, %v4617_v55  ;;  %v4619_v3 = vpop.f32.mrf.mxu0 }
 0x102   :  { %v4620_v5 = vadd.f32 %v4619_v3, %v4618_v60  ;;  %v4731_v6 = vpop.f32.mrf.mxu1  ;;  %v20_v3 = vld [vmem:[%s7567_s0 + $0x28] sm:$0xff] }
 0x103   :  { %v4732_v8 = vadd.f32 %v4731_v6, %v4730_v62  ;;  %v4621_v9 = vpop.f32.mrf.mxu0  ;;  %3026 = vmatmul.mubr.bf16.gmra.mxu0 %v4393_v61  ;;  %v19_v61 = vld [vmem:[%s7567_s0 + $0x20] sm:$0xff] }
 0x104   :  { %v4733_v10 = vpop.f32.mrf.mxu1  ;;  %3187 = vmatmul.mubr.bf16.gmra.mxu1 %v4395_v0  ;;  %3033 = vmatprep.mubr.bf16.mxu0 %v4410_v1  ;;  %v27_v62 = vld [vmem:[%s7567_s0 + $0x60] sm:$0xff] }
 0x105   :  { %v6298_v11 = vadd.f32 %v4732_v8, %v4620_v5  ;;  %v4622_v12 = vpop.f32.mrf.mxu0  ;;  %3194 = vmatprep.mubr.bf16.mxu1 %v4412_v4  ;;  %v28_v4 = vld [vmem:[%s7567_s0 + $0x68] sm:$0xff]  ;;  %v4441_v8 = vcombine.low %v257_v37, %v265_v38  ;;  %v5574_v38 = vld [vmem:[%s7566_s1 + $0x338] sm:$0xff]  }
 0x106   :  { %v4623_v15 = vadd.f32 %v4622_v12, %v4621_v9  ;;  %v4734_v16 = vpop.f32.mrf.mxu1  ;;  %v4206_v12 = vcombine.high %v19_v61, %v27_v62  ;;  %v4207_v37 = vcombine.low %v20_v3, %v28_v4 }
 0x107   :  { %v4735_v19 = vadd.f32 %v4734_v16, %v4733_v10  ;;  %v4624_v20 = vpop.f32.mrf.mxu0  ;;  %v4443_v10 = vcombine.low %v258_v41, %v266_v42  ;;  %v5576_v41 = vld [vmem:[%s7566_s1 + $0x3b8] sm:$0xff]  }
 0x108   :  { %v4736_v23 = vpop.f32.mrf.mxu1 }
 0x109   :  { %v6312_v26 = vadd.f32 %v4735_v19, %v4623_v15  ;;  %v4625_v27 = vpop.f32.mrf.mxu0  ;;  %v4208_v15 = vcombine.high %v20_v3, %v28_v4  ;;  %v6403_v3 = vld [vmem:[%s7567_s0 + $0x168] sm:$0xff] }
 0x10a   :  { %v4626_v30 = vadd.f32 %v4625_v27, %v4624_v20  ;;  %v4737_v31 = vpop.f32.mrf.mxu1  ;;  %v35_v27 = vld [vmem:[%s7567_s0 + $0xa0] sm:$0xff]  ;;  %v5583_v4 = vld [vmem:[%s7566_s1 + $0x3e8] sm:$0xff]  }
 0x10b   :  { %v4738_v32 = vadd.f32 %v4737_v31, %v4736_v23  ;;  %v4627_v33 = vpop.f32.mrf.mxu0  ;;  %3034 = vmatmul.mubr.bf16.gmra.mxu0 %v4409_v22 }
 0x10c   :  { %v4739_v34 = vpop.f32.mrf.mxu1  ;;  %3195 = vmatmul.mubr.bf16.gmra.mxu1 %v4411_v24  ;;  %3041 = vmatprep.mubr.bf16.mxu0 %v4426_v25 }
 0x10d   :  { %v6314_v35 = vadd.f32 %v4738_v32, %v4626_v30  ;;  %v4628_v36 = vpop.f32.mrf.mxu0  ;;  %3202 = vmatprep.mubr.bf16.mxu1 %v4428_v28  ;;  %v43_v28 = vld [vmem:[%s7567_s0 + $0xe0] sm:$0xff]  ;;  %v4205_v32 = vcombine.low %v19_v61, %v27_v62  ;;  %v5581_v61 = vld [vmem:[%s7566_s1 + $0x368] sm:$0xff]  }
 0x10e   :  { %v4629_v39 = vadd.f32 %v4628_v36, %v4627_v33  ;;  %v4740_v40 = vpop.f32.mrf.mxu1  ;;  %v36_v33 = vld [vmem:[%s7567_s0 + $0xa8] sm:$0xff]  ;;  %v4222_v42 = vcombine.high %v35_v27, %v43_v28 }
 0x10f   :  { %v4741_v44 = vadd.f32 %v4740_v40, %v4739_v34  ;;  %v4630_v45 = vpop.f32.mrf.mxu0  ;;  %v44_v34 = vld [vmem:[%s7567_s0 + $0xe8] sm:$0xff] }
 0x110   :  { %v4742_v47 = vpop.f32.mrf.mxu1 }
 0x111   :  { %v6328_v50 = vadd.f32 %v4741_v44, %v4629_v39  ;;  %v4631_v52 = vpop.f32.mrf.mxu0 }
 0x112   :  { %v4632_v54 = vadd.f32 %v4631_v52, %v4630_v45  ;;  %v4743_v55 = vpop.f32.mrf.mxu1  ;;  %v5579_v52 = vld [vmem:[%s7566_s1 + $0x3f0] sm:$0xff]  }
 0x113   :  { %v4744_v56 = vadd.f32 %v4743_v55, %v4742_v47  ;;  %v4633_v57 = vpop.f32.mrf.mxu0  ;;  %3042 = vmatmul.mubr.bf16.gmra.mxu0 %v4425_v46  ;;  %v4224_v46 = vcombine.high %v36_v33, %v44_v34  ;;  %v5577_v47 = vld [vmem:[%s7566_s1 + $0x370] sm:$0xff]  }
 0x114   :  { %v4745_v58 = vpop.f32.mrf.mxu1  ;;  %3203 = vmatmul.mubr.bf16.gmra.mxu1 %v4427_v48  ;;  %3049 = vmatprep.mubr.bf16.mxu0 %v4442_v49  ;;  %v5578_v55 = vld [vmem:[%s7566_s1 + $0x330] sm:$0xff]  }
 0x115   :  { %v6330_v59 = vadd.f32 %v4744_v56, %v4632_v54  ;;  %v4634_v60 = vpop.f32.mrf.mxu0  ;;  %3210 = vmatprep.mubr.bf16.mxu1 %v4444_v53  ;;  %v6377_v54 = vld [vmem:[%s7567_s0 + $0x120] sm:$0xff] }
 0x116   :  { %v4635_v0 = vadd.f32 %v4634_v60, %v4633_v57  ;;  %v4746_v1 = vpop.f32.mrf.mxu1  ;;  %v5580_v60 = vld [vmem:[%s7566_s1 + $0x3b0] sm:$0xff]  }
 0x117   :  { %v4747_v5 = vadd.f32 %v4746_v1, %v4745_v58  ;;  %v4636_v6 = vpop.f32.mrf.mxu0  ;;  %v6387_v58 = vld [vmem:[%s7567_s0 + $0x160] sm:$0xff]  ;;  %v6398_v1 = vld [vmem:[%s7567_s0 + $0x128] sm:$0xff] }
 0x118   :  { %v4748_v9 = vpop.f32.mrf.mxu1 }
 0x119   :  { %v6344_v13 = vadd.f32 %v4747_v5, %v4635_v0  ;;  %v4637_v14 = vpop.f32.mrf.mxu0 }
 0x11a   :  { %v4638_v16 = vadd.f32 %v4637_v14, %v4636_v6  ;;  %v4749_v17 = vpop.f32.mrf.mxu1 }
 0x11b   :  { %v4750_v18 = vadd.f32 %v4749_v17, %v4748_v9  ;;  %v4639_v19 = vpop.f32.mrf.mxu0  ;;  %3050 = vmatmul.mubr.bf16.gmra.mxu0 %v4441_v8  ;;  %v4221_v8 = vcombine.low %v35_v27, %v43_v28  ;;  %v5582_v17 = vld [vmem:[%s7566_s1 + $0x328] sm:$0xff]   ;;  %v5587_v27 = vld [vmem:[%s7566_s1 + $0x3e0] sm:$0xff]  }
 0x11c   :  { %v4751_v20 = vpop.f32.mrf.mxu1  ;;  %3211 = vmatmul.mubr.bf16.gmra.mxu1 %v4443_v10  ;;  %3251 = vmatprep.mubr.bf16.mxu0 %v4206_v12  ;;  %v4223_v10 = vcombine.low %v36_v33, %v44_v34  ;;  %v4238_v12 = vcombine.high %v6377_v54, %v6387_v58  ;;  %v6436_v33 = vld [vmem:[%s7567_s0 + $0x1e0] sm:$0xff]  ;;  %v6441_v34 = vld [vmem:[%s7567_s0 + $0x1a8] sm:$0xff] }
 0x11d   :  { %v6346_v22 = vadd.f32 %v4750_v18, %v4638_v16  ;;  %v4640_v23 = vpop.f32.mrf.mxu0  ;;  %3412 = vmatprep.mubr.bf16.mxu1 %v4208_v15  ;;  %v4240_v16 = vcombine.high %v6398_v1, %v6403_v3 }
 0x11e   :  { %v4641_v24 = vadd.f32 %v4640_v23, %v4639_v19  ;;  %v4752_v25 = vpop.f32.mrf.mxu1  ;;  %v5585_v23 = vld [vmem:[%s7566_s1 + $0x360] sm:$0xff]  }
 0x11f   :  { %v4753_v30 = vadd.f32 %v4752_v25, %v4751_v20  ;;  %v4642_v31 = vpop.f32.mrf.mxu0  ;;  %v5584_v20 = vld [vmem:[%s7566_s1 + $0x3a8] sm:$0xff]  }
 0x120   :  { %v4754_v36 = vpop.f32.mrf.mxu1 }
 0x121   :  { %v6363_v39 = vadd.f32 %v4753_v30, %v4641_v24  ;;  %v4643_v40 = vpop.f32.mrf.mxu0  ;;  %v6429_v30 = vld [vmem:[%s7567_s0 + $0x1a0] sm:$0xff] }
 0x122   :  { %v4644_v44 = vadd.f32 %v4643_v40, %v4642_v31  ;;  %v4755_v45 = vpop.f32.mrf.mxu1  ;;  %v6449_v40 = vld [vmem:[%s7567_s0 + $0x1e8] sm:$0xff] }
 0x123   :  { %v4756_v48 = vadd.f32 %v4755_v45, %v4754_v36  ;;  %v4645_v49 = vpop.f32.mrf.mxu0  ;;  %3252 = vmatmul.mubr.bf16.vlgmr.msra.gmra.mxu0 %v4205_v32  ;;  %v5586_v36 = vld [vmem:[%s7566_s1 + $0x320] sm:$0xff]  }
 0x124   :  { %v4757_v53 = vpop.f32.mrf.mxu1  ;;  %3413 = vmatmul.mubr.bf16.vlgmr.msra.gmra.mxu1 %v4207_v37  ;;  %5254 = vmatpush3.bf16.msra.mxu0 %v5574_v38 }
 0x125   :  { %v6382_v56 = vadd.f32 %v4756_v48, %v4644_v44  ;;  %v4646_v57 = vpop.f32.mrf.mxu0  ;;  %5366 = vmatpush3.bf16.msra.mxu1 %v5576_v41  ;;  %3259 = vmatprep.mubr.bf16.mxu0 %v4222_v42  ;;  %v5588_v41 = vld [vmem:[%s7566_s1 + $0x3a0] sm:$0xff]   ;;  %v5589_v42 = vld [vmem:[%s7566_s1 + $0x358] sm:$0xff]  }
 0x126   :  { %v4647_v62 = vadd.f32 %v4646_v57, %v4645_v49  ;;  %v4758_v0 = vpop.f32.mrf.mxu1  ;;  %3420 = vmatprep.mubr.bf16.mxu1 %v4224_v46  ;;  %5255 = vmatprep.subr.bf16.mxu0 %v5577_v47  ;;  %v4237_v46 = vcombine.low %v6377_v54, %v6387_v58  ;;  %v5591_v47 = vld [vmem:[%s7566_s1 + $0x3d8] sm:$0xff]   ;;  %v4239_v49 = vcombine.low %v6398_v1, %v6403_v3  ;;  %v5595_v3 = vld [vmem:[%s7566_s1 + $0x3d0] sm:$0xff]  }
 0x127   :  { %v4759_v5 = vadd.f32 %v4758_v0, %v4757_v53  ;;  %v4648_v6 = vpop.f32.mrf.mxu0  ;;  %5367 = vmatprep.subr.bf16.mxu1 %v5579_v52  ;;  %v4254_v52 = vcombine.high %v6429_v30, %v6436_v33  ;;  %v4256_v57 = vcombine.high %v6441_v34, %v6449_v40  ;;  %v5590_v54 = vld [vmem:[%s7566_s1 + $0x318] sm:$0xff]  }
 0x128   :  { %v4760_v9 = vpop.f32.mrf.mxu1  ;;  %5256 = vmatpush3.bf16.msra.mxu0 %v5578_v55 }
 0x129   :  { %v6410_v14 = vadd.f32 %v4759_v5, %v4647_v62  ;;  %v4649_v15 = vpop.f32.mrf.mxu0  ;;  %5368 = vmatpush3.bf16.msra.mxu1 %v5580_v60  ;;  %5257 = vmatprep.subr.bf16.mxu0 %v5581_v61  ;;  %v5592_v61 = vld [vmem:[%s7566_s1 + $0x398] sm:$0xff]   ;;  %v5593_v62 = vld [vmem:[%s7566_s1 + $0x350] sm:$0xff]   ;;  %v6485_v5 = vld [vmem:[%s7567_s0 + $0x220] sm:$0xff] }
 0x12a   :  { %v4650_v18 = vadd.f32 %v4649_v15, %v4648_v6  ;;  %v4761_v19 = vpop.f32.mrf.mxu1  ;;  %5369 = vmatprep.subr.bf16.mxu1 %v5583_v4 }
 0x12b   :  { %v4762_v24 = vadd.f32 %v4761_v19, %v4760_v9  ;;  %v4651_v25 = vpop.f32.mrf.mxu0  ;;  %3260 = vmatmul.mubr.bf16.gmra.mxu0 %v4221_v8  ;;  %v6492_v9 = vld [vmem:[%s7567_s0 + $0x260] sm:$0xff]  ;;  %v5597_v19 = vld [vmem:[%s7566_s1 + $0x348] sm:$0xff]  }
 0x12c   :  { %v4763_v28 = vpop.f32.mrf.mxu1  ;;  %3421 = vmatmul.mubr.bf16.gmra.mxu1 %v4223_v10  ;;  %3267 = vmatprep.mubr.bf16.mxu0 %v4238_v12  ;;  %v6497_v10 = vld [vmem:[%s7567_s0 + $0x228] sm:$0xff]  ;;  %v5594_v12 = vld [vmem:[%s7566_s1 + $0x310] sm:$0xff]  }
 0x12d   :  { %v6431_v31 = vadd.f32 %v4762_v24, %v4650_v18  ;;  %v4652_v32 = vpop.f32.mrf.mxu0  ;;  %3428 = vmatprep.mubr.bf16.mxu1 %v4240_v16  ;;  %5258 = vmatpush3.bf16.msra.mxu0 %v5582_v17  ;;  %v6505_v17 = vld [vmem:[%s7567_s0 + $0x268] sm:$0xff]  ;;  %v5596_v18 = vld [vmem:[%s7566_s1 + $0x390] sm:$0xff]   ;;  %v4253_v24 = vcombine.low %v6429_v30, %v6436_v33 }
 0x12e   :  { %v4653_v37 = vadd.f32 %v4652_v32, %v4651_v25  ;;  %v4764_v38 = vpop.f32.mrf.mxu1  ;;  %5370 = vmatpush3.bf16.msra.mxu1 %v5584_v20  ;;  %5259 = vmatprep.subr.bf16.mxu0 %v5585_v23  ;;  %v5599_v25 = vld [vmem:[%s7566_s1 + $0x3c8] sm:$0xff]   ;;  %v4270_v32 = vcombine.high %v6485_v5, %v6492_v9 }
 0x12f   :  { %v4765_v44 = vadd.f32 %v4764_v38, %v4763_v28  ;;  %v4654_v45 = vpop.f32.mrf.mxu0  ;;  %5371 = vmatprep.subr.bf16.mxu1 %v5587_v27  ;;  %v4255_v28 = vcombine.low %v6441_v34, %v6449_v40  ;;  %v4272_v38 = vcombine.high %v6497_v10, %v6505_v17  ;;  %v5598_v30 = vld [vmem:[%s7566_s1 + $0x308] sm:$0xff]   ;;  %v5601_v40 = vld [vmem:[%s7566_s1 + $0x340] sm:$0xff]  }
 0x130   :  { %v4766_v48 = vpop.f32.mrf.mxu1  ;;  %v5600_v34 = vld [vmem:[%s7566_s1 + $0x388] sm:$0xff]  }
 0x131   :  { %v6466_v53 = vadd.f32 %v4765_v44, %v4653_v37  ;;  %v4655_v55 = vpop.f32.mrf.mxu0  ;;  %5260 = vmatpush3.bf16.msra.mxu0 %v5586_v36 }
 0x132   :  { %v4656_v58 = vadd.f32 %v4655_v55, %v4654_v45  ;;  %v4767_v60 = vpop.f32.mrf.mxu1  ;;  %5372 = vmatpush3.bf16.msra.mxu1 %v5588_v41  ;;  %5261 = vmatprep.subr.bf16.mxu0 %v5589_v42  ;;  %v5603_v45 = vld [vmem:[%s7566_s1 + $0x3c0] sm:$0xff]  }
 0x133   :  { %v4768_v0 = vadd.f32 %v4767_v60, %v4766_v48  ;;  %v4657_v1 = vpop.f32.mrf.mxu0  ;;  %3268 = vmatmul.mubr.bf16.gmra.mxu0 %v4237_v46  ;;  %5373 = vmatprep.subr.bf16.mxu1 %v5591_v47  ;;  %v5602_v55 = vld [vmem:[%s7566_s1 + $0x300] sm:$0xff]   ;;  %v108_v60 = vld [vmem:[%s7567_s0 + $0x2e8] sm:$0xff] }
 0x134   :  { %v4769_v4 = vpop.f32.mrf.mxu1  ;;  %3429 = vmatmul.mubr.bf16.gmra.mxu1 %v4239_v49  ;;  %3275 = vmatprep.mubr.bf16.mxu0 %v4254_v52  ;;  %v99_v49 = vld [vmem:[%s7567_s0 + $0x2a0] sm:$0xff] }
 0x135   :  { %v6487_v6 = vadd.f32 %v4768_v0, %v4656_v58  ;;  %v4658_v8 = vpop.f32.mrf.mxu0  ;;  %3436 = vmatprep.mubr.bf16.mxu1 %v4256_v57  ;;  %5262 = vmatpush3.bf16.msra.mxu0 %v5590_v54  ;;  %v107_v52 = vld [vmem:[%s7567_s0 + $0x2e0] sm:$0xff]  ;;  %v100_v58 = vld [vmem:[%s7567_s0 + $0x2a8] sm:$0xff] }
 0x136   :  { %v4659_v15 = vadd.f32 %v4658_v8, %v4657_v1  ;;  %v4770_v16 = vpop.f32.mrf.mxu1  ;;  %5374 = vmatpush3.bf16.msra.mxu1 %v5592_v61  ;;  %5263 = vmatprep.subr.bf16.mxu0 %v5593_v62  ;;  %v5604_v61 = vld [vmem:[%s7566_s1 + $0x380] sm:$0xff]   ;;  %v4269_v1 = vcombine.low %v6485_v5, %v6492_v9  ;;  %v4286_v8 = vcombine.high %v99_v49, %v107_v52 }
 0x137   :  { %v4771_v20 = vadd.f32 %v4770_v16, %v4769_v4  ;;  %v4660_v23 = vpop.f32.mrf.mxu0  ;;  %5375 = vmatprep.subr.bf16.mxu1 %v5595_v3  ;;  %v4271_v4 = vcombine.low %v6497_v10, %v6505_v17  ;;  %v4288_v16 = vcombine.high %v100_v58, %v108_v60  ;;  %v115_v10 = vld [vmem:[%s7567_s0 + $0x320] sm:$0xff] }
 0x138   :  { %v4772_v27 = vpop.f32.mrf.mxu1  ;;  %v123_v17 = vld [vmem:[%s7567_s0 + $0x360] sm:$0xff] }
 0x139   :  { %v6522_v36 = vadd.f32 %v4771_v20, %v4659_v15  ;;  %v4661_v37 = vpop.f32.mrf.mxu0  ;;  %5264 = vmatpush3.bf16.msra.mxu0 %v5594_v12 }
 0x13a   :  { %v4662_v33 = vadd.f32 %v4661_v37, %v4660_v23  ;;  %v4773_v41 = vpop.f32.mrf.mxu1  ;;  %5376 = vmatpush3.bf16.msra.mxu1 %v5596_v18  ;;  %5265 = vmatprep.subr.bf16.mxu0 %v5597_v19 }
 0x13b   :  { %v4774_v42 = vadd.f32 %v4773_v41, %v4772_v27  ;;  %v4663_v44 = vpop.f32.mrf.mxu0  ;;  %3276 = vmatmul.mubr.bf16.gmra.mxu0 %v4253_v24  ;;  %5377 = vmatprep.subr.bf16.mxu1 %v5599_v25  ;;  %v4287_v41 = vcombine.low %v100_v58, %v108_v60 }
 0x13c   :  { %v4775_v46 = vpop.f32.mrf.mxu1  ;;  %3437 = vmatmul.mubr.bf16.gmra.mxu1 %v4255_v28  ;;  %3283 = vmatprep.mubr.bf16.mxu0 %v4270_v32  ;;  %v116_v28 = vld [vmem:[%s7567_s0 + $0x328] sm:$0xff] }
 0x13d   :  { %v6538_v47 = vadd.f32 %v4774_v42, %v4662_v33  ;;  %v4664_v48 = vpop.f32.mrf.mxu0  ;;  %3444 = vmatprep.mubr.bf16.mxu1 %v4272_v38  ;;  %5266 = vmatpush3.bf16.msra.mxu0 %v5598_v30  ;;  %v124_v32 = vld [vmem:[%s7567_s0 + $0x368] sm:$0xff]  ;;  %v4285_v30 = vcombine.low %v99_v49, %v107_v52  ;;  %v131_v49 = vld [vmem:[%s7567_s0 + $0x3a0] sm:$0xff] }
 0x13e   :  { %v4665_v57 = vadd.f32 %v4664_v48, %v4663_v44  ;;  %v4776_v54 = vpop.f32.mrf.mxu1  ;;  %5378 = vmatpush3.bf16.msra.mxu1 %v5600_v34  ;;  %5267 = vmatprep.subr.bf16.mxu0 %v5601_v40  ;;  %v4302_v34 = vcombine.high %v115_v10, %v123_v17  ;;  %v4304_v44 = vcombine.high %v116_v28, %v124_v32  ;;  %v139_v52 = vld [vmem:[%s7567_s0 + $0x3e0] sm:$0xff] }
 0x13f   :  { %v4777_v62 = vadd.f32 %v4776_v54, %v4775_v46  ;;  %v4666_v0 = vpop.f32.mrf.mxu0  ;;  %5379 = vmatprep.subr.bf16.mxu1 %v5603_v45 }
 0x140   :  { %v4778_v3 = vpop.f32.mrf.mxu1 }
 0x141   :  { %v6562_v12 = vadd.f32 %v4777_v62, %v4665_v57  ;;  %v4667_v15 = vpop.f32.mrf.mxu0  ;;  %5268 = vmatpush3.bf16.msra.mxu0 %v5602_v55  ;;  %v132_v62 = vld [vmem:[%s7567_s0 + $0x3a8] sm:$0xff] }
 0x142   :  { %v4668_v18 = vadd.f32 %v4667_v15, %v4666_v0  ;;  %v4779_v19 = vpop.f32.mrf.mxu1  ;;  %5380 = vmatpush3.bf16.msra.mxu1 %v5604_v61  ;;  %v140_v0 = vld [vmem:[%s7567_s0 + $0x3e8] sm:$0xff]  ;;  %v4303_v15 = vcombine.low %v116_v28, %v124_v32 }
 0x143   :  { %v4780_v20 = vadd.f32 %v4779_v19, %v4778_v3  ;;  %v4669_v23 = vpop.f32.mrf.mxu0  ;;  %3284 = vmatmul.mubr.bf16.gmra.mxu0 %v4269_v1 }
 0x144   :  { %v4781_v24 = vpop.f32.mrf.mxu1  ;;  %3445 = vmatmul.mubr.bf16.gmra.mxu1 %v4271_v4  ;;  %3291 = vmatprep.mubr.bf16.mxu0 %v4286_v8  ;;  %v4301_v4 = vcombine.low %v115_v10, %v123_v17  ;;  %v147_v10 = vld [vmem:[%s7567_s0 + $0x420] sm:$0xff] }
 0x145   :  { %v6564_v5 = vadd.f32 %v4780_v20, %v4668_v18  ;;  %v4670_v9 = vpop.f32.mrf.mxu0  ;;  %3452 = vmatprep.mubr.bf16.mxu1 %v4288_v16  ;;  %v4318_v16 = vcombine.high %v131_v49, %v139_v52  ;;  %v4320_v20 = vcombine.high %v132_v62, %v140_v0  ;;  %v155_v17 = vld [vmem:[%s7567_s0 + $0x460] sm:$0xff] }
 0x146   :  { %v4671_v25 = vadd.f32 %v4670_v9, %v4669_v23  ;;  %v4782_v27 = vpop.f32.mrf.mxu1 }
 0x147   :  { %v4783_v37 = vadd.f32 %v4782_v27, %v4781_v24  ;;  %v4672_v38 = vpop.f32.mrf.mxu0 }
 0x148   :  { %v4784_v33 = vpop.f32.mrf.mxu1 }
 0x149   :  { %v6578_v40 = vadd.f32 %v4783_v37, %v4671_v25  ;;  %v4673_v42 = vpop.f32.mrf.mxu0 }
 0x14a   :  { %v4674_v45 = vadd.f32 %v4673_v42, %v4672_v38  ;;  %v4785_v46 = vpop.f32.mrf.mxu1  ;;  %v4317_v42 = vcombine.low %v131_v49, %v139_v52  ;;  %v163_v49 = vld [vmem:[%s7567_s0 + $0x4a0] sm:$0xff] }
 0x14b   :  { %v4786_v48 = vadd.f32 %v4785_v46, %v4784_v33  ;;  %v4675_v55 = vpop.f32.mrf.mxu0  ;;  %3292 = vmatmul.mubr.bf16.gmra.mxu0 %v4285_v30  ;;  %v148_v30 = vld [vmem:[%s7567_s0 + $0x428] sm:$0xff]  ;;  %v4334_v46 = vcombine.high %v147_v10, %v155_v17  ;;  %v171_v52 = vld [vmem:[%s7567_s0 + $0x4e0] sm:$0xff] }
 0x14c   :  { %v4787_v57 = vpop.f32.mrf.mxu1  ;;  %3453 = vmatmul.mubr.bf16.gmra.mxu1 %v4287_v41  ;;  %3299 = vmatprep.mubr.bf16.mxu0 %v4302_v34  ;;  %v156_v33 = vld [vmem:[%s7567_s0 + $0x468] sm:$0xff] }
 0x14d   :  { %v6580_v54 = vadd.f32 %v4786_v48, %v4674_v45  ;;  %v4676_v61 = vpop.f32.mrf.mxu0  ;;  %3460 = vmatprep.mubr.bf16.mxu1 %v4304_v44  ;;  %v4319_v45 = vcombine.low %v132_v62, %v140_v0 }
 0x14e   :  { %v4677_v58 = vadd.f32 %v4676_v61, %v4675_v55  ;;  %v4788_v60 = vpop.f32.mrf.mxu1 }
 0x14f   :  { %v4789_v1 = vadd.f32 %v4788_v60, %v4787_v57  ;;  %v4678_v3 = vpop.f32.mrf.mxu0  ;;  %v4336_v57 = vcombine.high %v148_v30, %v156_v33 }
 0x150   :  { %v4790_v8 = vpop.f32.mrf.mxu1 }
 0x151   :  { %v6594_v18 = vadd.f32 %v4789_v1, %v4677_v58  ;;  %v4679_v19 = vpop.f32.mrf.mxu0 }
 0x152   :  { %v4680_v23 = vadd.f32 %v4679_v19, %v4678_v3  ;;  %v4791_v24 = vpop.f32.mrf.mxu1 }
 0x153   :  { %v4792_v9 = vadd.f32 %v4791_v24, %v4790_v8  ;;  %v4681_v25 = vpop.f32.mrf.mxu0  ;;  %3300 = vmatmul.mubr.bf16.gmra.mxu0 %v4301_v4 }
 0x154   :  { %v4793_v27 = vpop.f32.mrf.mxu1  ;;  %3461 = vmatmul.mubr.bf16.gmra.mxu1 %v4303_v15  ;;  %3307 = vmatprep.mubr.bf16.mxu0 %v4318_v16  ;;  %v164_v15 = vld [vmem:[%s7567_s0 + $0x4a8] sm:$0xff] }
 0x155   :  { %v6596_v37 = vadd.f32 %v4792_v9, %v4680_v23  ;;  %v4682_v38 = vpop.f32.mrf.mxu0  ;;  %3468 = vmatprep.mubr.bf16.mxu1 %v4320_v20  ;;  %v172_v16 = vld [vmem:[%s7567_s0 + $0x4e8] sm:$0xff]  ;;  %v4333_v23 = vcombine.low %v147_v10, %v155_v17  ;;  %v4335_v9 = vcombine.low %v148_v30, %v156_v33  ;;  %v179_v10 = vld [vmem:[%s7567_s0 + $0x520] sm:$0xff] }
 0x156   :  { %v4683_v28 = vadd.f32 %v4682_v38, %v4681_v25  ;;  %v4794_v32 = vpop.f32.mrf.mxu1  ;;  %v4350_v25 = vcombine.high %v163_v49, %v171_v52  ;;  %v187_v17 = vld [vmem:[%s7567_s0 + $0x560] sm:$0xff] }
 0x157   :  { %v4795_v41 = vadd.f32 %v4794_v32, %v4793_v27  ;;  %v4684_v34 = vpop.f32.mrf.mxu0 }
 0x158   :  { %v4796_v44 = vpop.f32.mrf.mxu1 }
 0x159   :  { %v6610_v48 = vadd.f32 %v4795_v41, %v4683_v28  ;;  %v4685_v55 = vpop.f32.mrf.mxu0  ;;  %v4352_v28 = vcombine.high %v164_v15, %v172_v16 }
 0x15a   :  { %v4686_v61 = vadd.f32 %v4685_v55, %v4684_v34  ;;  %v4797_v58 = vpop.f32.mrf.mxu1  ;;  %v180_v55 = vld [vmem:[%s7567_s0 + $0x528] sm:$0xff] }
 0x15b   :  { %v4798_v60 = vadd.f32 %v4797_v58, %v4796_v44  ;;  %v4687_v1 = vpop.f32.mrf.mxu0  ;;  %3308 = vmatmul.mubr.bf16.gmra.mxu0 %v4317_v42 }
 0x15c   :  { %v4799_v3 = vpop.f32.mrf.mxu1  ;;  %3469 = vmatmul.mubr.bf16.gmra.mxu1 %v4319_v45  ;;  %3315 = vmatprep.mubr.bf16.mxu0 %v4334_v46 }
 0x15d   :  { %v6612_v4 = vadd.f32 %v4798_v60, %v4686_v61  ;;  %v4688_v8 = vpop.f32.mrf.mxu0  ;;  %3476 = vmatprep.mubr.bf16.mxu1 %v4336_v57  ;;  %v188_v57 = vld [vmem:[%s7567_s0 + $0x568] sm:$0xff]  ;;  %v4349_v60 = vcombine.low %v163_v49, %v171_v52  ;;  %v203_v52 = vld [vmem:[%s7567_s0 + $0x5e0] sm:$0xff] }
 0x15e   :  { %v4689_v62 = vadd.f32 %v4688_v8, %v4687_v1  ;;  %v4800_v0 = vpop.f32.mrf.mxu1  ;;  %v4351_v8 = vcombine.low %v164_v15, %v172_v16 }
 0x15f   :  { %v4801_v19 = vadd.f32 %v4800_v0, %v4799_v3  ;;  %v4690_v20 = vpop.f32.mrf.mxu0 }
 0x160   :  { %v4802_v24 = vpop.f32.mrf.mxu1 }
 0x161   :  { %v6626_v27 = vadd.f32 %v4801_v19, %v4689_v62  ;;  %v4691_v38 = vpop.f32.mrf.mxu0  ;;  %v4366_v62 = vcombine.high %v179_v10, %v187_v17  ;;  %v4368_v19 = vcombine.high %v180_v55, %v188_v57 }
 0x162   :  { %v4692_v32 = vadd.f32 %v4691_v38, %v4690_v20  ;;  %v4803_v41 = vpop.f32.mrf.mxu1 }
 0x163   :  { %v4804_v34 = vadd.f32 %v4803_v41, %v4802_v24  ;;  %v4821_v42 = vpop.f32.mrf.mxu0  ;;  %3316 = vmatmul.mubr.bf16.gmra.mxu0 %v4333_v23  ;;  %v204_v41 = vld [vmem:[%s7567_s0 + $0x5e8] sm:$0xff] }
 0x164   :  { %v4933_v44 = vpop.f32.mrf.mxu1  ;;  %3477 = vmatmul.mubr.bf16.gmra.mxu1 %v4335_v9  ;;  %3323 = vmatprep.mubr.bf16.mxu0 %v4350_v25 }
 0x165   :  { %v6628_v45 = vadd.f32 %v4804_v34, %v4692_v32  ;;  %v4822_v46 = vpop.f32.mrf.mxu0  ;;  %3484 = vmatprep.mubr.bf16.mxu1 %v4352_v28 }
 0x166   :  { %v4823_v30 = vadd.f32 %v4822_v46, %v4821_v42  ;;  %v4934_v33 = vpop.f32.mrf.mxu1 }
 0x167   :  { %v4935_v61 = vadd.f32 %v4934_v33, %v4933_v44  ;;  %v4824_v58 = vpop.f32.mrf.mxu0  ;;  %v4365_v44 = vcombine.low %v179_v10, %v187_v17  ;;  %v4367_v33 = vcombine.low %v180_v55, %v188_v57  ;;  %v219_v17 = vld [vmem:[%s7567_s0 + $0x660] sm:$0xff] }
 0x168   :  { %v2932_v1 = vadd.f32 %v4823_v30, %v6248_v63  ;;  %v4936_v3 = vpop.f32.mrf.mxu1  ;;  %v195_v63 = vld [vmem:[%s7567_s0 + $0x5a0] sm:$0xff] }
 0x169   :  { %v4825_v0 = vpop.f32.mrf.mxu0 }
 0x16a   :  { %v6643_v20 = vadd.f32 %v4935_v61, %v2932_v1  ;;  %v4826_v23 = vadd.f32 %v4825_v0, %v4824_v58  ;;  %v4937_v24 = vpop.f32.mrf.mxu1  ;;  %v4382_v61 = vcombine.high %v195_v63, %v203_v52 }
 0x16b   :  { %v4938_v9 = vadd.f32 %v4937_v24, %v4936_v3  ;;  %v4827_v25 = vpop.f32.mrf.mxu0  ;;  %3324 = vmatmul.mubr.bf16.gmra.mxu0 %v4349_v60 }
 0x16c   :  { %v2935_v38 = vadd.f32 %v4826_v23, %v6250_v7  ;;  %v4939_v28 = vpop.f32.mrf.mxu1  ;;  %3485 = vmatmul.mubr.bf16.gmra.mxu1 %v4351_v8  ;;  %3331 = vmatprep.mubr.bf16.mxu0 %v4366_v62  ;;  %v196_v7 = vld [vmem:[%s7567_s0 + $0x5a8] sm:$0xff] }
 0x16d   :  { %v4828_v49 = vpop.f32.mrf.mxu0  ;;  %3492 = vmatprep.mubr.bf16.mxu1 %v4368_v19  ;;  %v4384_v60 = vcombine.high %v196_v7, %v204_v41 }
 0x16e   :  { %v6652_v15 = vadd.f32 %v4938_v9, %v2935_v38  ;;  %v4829_v16 = vadd.f32 %v4828_v49, %v4827_v25  ;;  %v4940_v32 = vpop.f32.mrf.mxu1  ;;  %v220_v9 = vld [vmem:[%s7567_s0 + $0x668] sm:$0xff] }
 0x16f   :  { %v4941_v34 = vadd.f32 %v4940_v32, %v4939_v28  ;;  %v4830_v42 = vpop.f32.mrf.mxu0  ;;  %v4381_v28 = vcombine.low %v195_v63, %v203_v52  ;;  %v4383_v32 = vcombine.low %v196_v7, %v204_v41  ;;  %v235_v52 = vld [vmem:[%s7567_s0 + $0x6e0] sm:$0xff] }
 0x170   :  { %v2940_v46 = vadd.f32 %v4829_v16, %v6264_v21  ;;  %v4942_v30 = vpop.f32.mrf.mxu1  ;;  %v211_v21 = vld [vmem:[%s7567_s0 + $0x620] sm:$0xff] }
 0x171   :  { %v4831_v58 = vpop.f32.mrf.mxu0 }
 0x172   :  { %v6661_v1 = vadd.f32 %v4941_v34, %v2940_v46  ;;  %v4832_v3 = vadd.f32 %v4831_v58, %v4830_v42  ;;  %v4943_v8 = vpop.f32.mrf.mxu1  ;;  %v4398_v34 = vcombine.high %v211_v21, %v219_v17 }
 0x173   :  { %v4944_v62 = vadd.f32 %v4943_v8, %v4942_v30  ;;  %v4833_v0 = vpop.f32.mrf.mxu0  ;;  %3332 = vmatmul.mubr.bf16.gmra.mxu0 %v4365_v44 }
 0x174   :  { %v2943_v19 = vadd.f32 %v4832_v3, %v6266_v29  ;;  %v4945_v23 = vpop.f32.mrf.mxu1  ;;  %3493 = vmatmul.mubr.bf16.gmra.mxu1 %v4367_v33  ;;  %3339 = vmatprep.mubr.bf16.mxu0 %v4382_v61  ;;  %v212_v29 = vld [vmem:[%s7567_s0 + $0x628] sm:$0xff] }
 0x175   :  { %v4834_v10 = vpop.f32.mrf.mxu0  ;;  %3500 = vmatprep.mubr.bf16.mxu1 %v4384_v60  ;;  %v4400_v44 = vcombine.high %v212_v29, %v220_v9 }
 0x176   :  { %v6670_v55 = vadd.f32 %v4944_v62, %v2943_v19  ;;  %v4835_v57 = vadd.f32 %v4834_v10, %v4833_v0  ;;  %v4946_v24 = vpop.f32.mrf.mxu1  ;;  %v236_v62 = vld [vmem:[%s7567_s0 + $0x6e8] sm:$0xff] }
 0x177   :  { %v4947_v25 = vadd.f32 %v4946_v24, %v4945_v23  ;;  %v4836_v38 = vpop.f32.mrf.mxu0  ;;  %v4397_v23 = vcombine.low %v211_v21, %v219_v17  ;;  %v4399_v24 = vcombine.low %v212_v29, %v220_v9  ;;  %v251_v17 = vld [vmem:[%s7567_s0 + $0x760] sm:$0xff] }
 0x178   :  { %v2948_v49 = vadd.f32 %v4835_v57, %v6280_v43  ;;  %v4948_v16 = vpop.f32.mrf.mxu1  ;;  %v227_v43 = vld [vmem:[%s7567_s0 + $0x6a0] sm:$0xff] }
 0x179   :  { %v4837_v42 = vpop.f32.mrf.mxu0 }
 0x17a   :  { %v6679_v46 = vadd.f32 %v4947_v25, %v2948_v49  ;;  %v4838_v30 = vadd.f32 %v4837_v42, %v4836_v38  ;;  %v4949_v33 = vpop.f32.mrf.mxu1  ;;  %v4414_v25 = vcombine.high %v227_v43, %v235_v52 }
 0x17b   :  { %v4950_v61 = vadd.f32 %v4949_v33, %v4948_v16  ;;  %v4839_v58 = vpop.f32.mrf.mxu0  ;;  %3340 = vmatmul.mubr.bf16.gmra.mxu0 %v4381_v28 }
 0x17c   :  { %v2951_v60 = vadd.f32 %v4838_v30, %v6282_v51  ;;  %v4951_v3 = vpop.f32.mrf.mxu1  ;;  %3501 = vmatmul.mubr.bf16.gmra.mxu1 %v4383_v32  ;;  %3347 = vmatprep.mubr.bf16.mxu0 %v4398_v34  ;;  %v228_v51 = vld [vmem:[%s7567_s0 + $0x6a8] sm:$0xff] }
 0x17d   :  { %v4840_v63 = vpop.f32.mrf.mxu0  ;;  %3508 = vmatprep.mubr.bf16.mxu1 %v4400_v44  ;;  %v4416_v28 = vcombine.high %v228_v51, %v236_v62 }
 0x17e   :  { %v6688_v7 = vadd.f32 %v4950_v61, %v2951_v60  ;;  %v4841_v41 = vadd.f32 %v4840_v63, %v4839_v58  ;;  %v4952_v8 = vpop.f32.mrf.mxu1  ;;  %v252_v61 = vld [vmem:[%s7567_s0 + $0x768] sm:$0xff] }
 0x17f   :  { %v4953_v0 = vadd.f32 %v4952_v8, %v4951_v3  ;;  %v4842_v19 = vpop.f32.mrf.mxu0  ;;  %v4413_v3 = vcombine.low %v227_v43, %v235_v52  ;;  %v4415_v8 = vcombine.low %v228_v51, %v236_v62  ;;  %v267_v52 = vld [vmem:[%s7567_s0 + $0x7e0] sm:$0xff] }
 0x180   :  { %v2956_v10 = vadd.f32 %v4841_v41, %v6296_v2  ;;  %v4954_v57 = vpop.f32.mrf.mxu1  ;;  %v243_v2 = vld [vmem:[%s7567_s0 + $0x720] sm:$0xff] }
 0x181   :  { %v4843_v38 = vpop.f32.mrf.mxu0 }
 0x182   :  { %v6697_v49 = vadd.f32 %v4953_v0, %v2956_v10  ;;  %v4844_v16 = vadd.f32 %v4843_v38, %v4842_v19  ;;  %v4955_v32 = vpop.f32.mrf.mxu1  ;;  %v4430_v0 = vcombine.high %v243_v2, %v251_v17 }
 0x183   :  { %v4956_v34 = vadd.f32 %v4955_v32, %v4954_v57  ;;  %v4845_v42 = vpop.f32.mrf.mxu0  ;;  %3348 = vmatmul.mubr.bf16.gmra.mxu0 %v4397_v23 }
 0x184   :  { %v2959_v44 = vadd.f32 %v4844_v16, %v6298_v11  ;;  %v4957_v30 = vpop.f32.mrf.mxu1  ;;  %3509 = vmatmul.mubr.bf16.gmra.mxu1 %v4399_v24  ;;  %3355 = vmatprep.mubr.bf16.mxu0 %v4414_v25  ;;  %v244_v11 = vld [vmem:[%s7567_s0 + $0x728] sm:$0xff] }
 0x185   :  { %v4846_v21 = vpop.f32.mrf.mxu0  ;;  %3516 = vmatprep.mubr.bf16.mxu1 %v4416_v28  ;;  %v4432_v23 = vcombine.high %v244_v11, %v252_v61 }
 0x186   :  { %v6706_v29 = vadd.f32 %v4956_v34, %v2959_v44  ;;  %v4847_v9 = vadd.f32 %v4846_v21, %v4845_v42  ;;  %v4958_v33 = vpop.f32.mrf.mxu1  ;;  %v268_v34 = vld [vmem:[%s7567_s0 + $0x7e8] sm:$0xff] }
 0x187   :  { %v4959_v58 = vadd.f32 %v4958_v33, %v4957_v30  ;;  %v4848_v60 = vpop.f32.mrf.mxu0  ;;  %v4429_v30 = vcombine.low %v243_v2, %v251_v17  ;;  %v4431_v33 = vcombine.low %v244_v11, %v252_v61  ;;  %v29_v17 = vld [vmem:[%s7567_s0 + $0x70] sm:$0xff] }
 0x188   :  { %v2964_v63 = vadd.f32 %v4847_v9, %v6312_v26  ;;  %v4960_v41 = vpop.f32.mrf.mxu1  ;;  %v259_v26 = vld [vmem:[%s7567_s0 + $0x7a0] sm:$0xff] }
 0x189   :  { %v4849_v19 = vpop.f32.mrf.mxu0 }
 0x18a   :  { %v6715_v10 = vadd.f32 %v4959_v58, %v2964_v63  ;;  %v4850_v57 = vadd.f32 %v4849_v19, %v4848_v60  ;;  %v4961_v24 = vpop.f32.mrf.mxu1  ;;  %v4446_v58 = vcombine.high %v259_v26, %v267_v52 }
 0x18b   :  { %v4962_v25 = vadd.f32 %v4961_v24, %v4960_v41  ;;  %v4851_v38 = vpop.f32.mrf.mxu0  ;;  %3356 = vmatmul.mubr.bf16.gmra.mxu0 %v4413_v3 }
 0x18c   :  { %v2967_v28 = vadd.f32 %v4850_v57, %v6314_v35  ;;  %v4963_v16 = vpop.f32.mrf.mxu1  ;;  %3517 = vmatmul.mubr.bf16.gmra.mxu1 %v4415_v8  ;;  %3363 = vmatprep.mubr.bf16.mxu0 %v4430_v0  ;;  %v260_v35 = vld [vmem:[%s7567_s0 + $0x7a8] sm:$0xff] }
 0x18d   :  { %v4852_v43 = vpop.f32.mrf.mxu0  ;;  %3524 = vmatprep.mubr.bf16.mxu1 %v4432_v23  ;;  %v4448_v3 = vcombine.high %v260_v35, %v268_v34 }
 0x18e   :  { %v6724_v51 = vadd.f32 %v4962_v25, %v2967_v28  ;;  %v4853_v62 = vadd.f32 %v4852_v43, %v4851_v38  ;;  %v4964_v32 = vpop.f32.mrf.mxu1  ;;  %v30_v25 = vld [vmem:[%s7567_s0 + $0x78] sm:$0xff] }
 0x18f   :  { %v4965_v42 = vadd.f32 %v4964_v32, %v4963_v16  ;;  %v4854_v44 = vpop.f32.mrf.mxu0  ;;  %v4445_v16 = vcombine.low %v259_v26, %v267_v52  ;;  %v4447_v32 = vcombine.low %v260_v35, %v268_v34  ;;  %v45_v52 = vld [vmem:[%s7567_s0 + $0xf0] sm:$0xff] }
 0x190   :  { %v2972_v21 = vadd.f32 %v4853_v62, %v6328_v50  ;;  %v4966_v9 = vpop.f32.mrf.mxu1  ;;  %v21_v50 = vld [vmem:[%s7567_s0 + $0x30] sm:$0xff] }
 0x191   :  { %v4855_v60 = vpop.f32.mrf.mxu0 }
 0x192   :  { %v6733_v63 = vadd.f32 %v4965_v42, %v2972_v21  ;;  %v4856_v41 = vadd.f32 %v4855_v60, %v4854_v44  ;;  %v4967_v8 = vpop.f32.mrf.mxu1  ;;  %v4210_v42 = vcombine.high %v21_v50, %v29_v17 }
 0x193   :  { %v4968_v0 = vadd.f32 %v4967_v8, %v4966_v9  ;;  %v4857_v19 = vpop.f32.mrf.mxu0  ;;  %3364 = vmatmul.mubr.bf16.gmra.mxu0 %v4429_v30 }
 0x194   :  { %v2975_v23 = vadd.f32 %v4856_v41, %v6330_v59  ;;  %v4969_v57 = vpop.f32.mrf.mxu1  ;;  %3525 = vmatmul.mubr.bf16.gmra.mxu1 %v4431_v33  ;;  %3371 = vmatprep.mubr.bf16.mxu0 %v4446_v58  ;;  %v22_v59 = vld [vmem:[%s7567_s0 + $0x38] sm:$0xff] }
 0x195   :  { %v4858_v2 = vpop.f32.mrf.mxu0  ;;  %3532 = vmatprep.mubr.bf16.mxu1 %v4448_v3  ;;  %v4212_v30 = vcombine.high %v22_v59, %v30_v25 }
 0x196   :  { %v6742_v11 = vadd.f32 %v4968_v0, %v2975_v23  ;;  %v4859_v61 = vadd.f32 %v4858_v2, %v4857_v19  ;;  %v4970_v24 = vpop.f32.mrf.mxu1  ;;  %v46_v0 = vld [vmem:[%s7567_s0 + $0xf8] sm:$0xff] }
 0x197   :  { %v4971_v38 = vadd.f32 %v4970_v24, %v4969_v57  ;;  %v4860_v28 = vpop.f32.mrf.mxu0  ;;  %v4209_v57 = vcombine.low %v21_v50, %v29_v17  ;;  %v4211_v24 = vcombine.low %v22_v59, %v30_v25  ;;  %v61_v17 = vld [vmem:[%s7567_s0 + $0x170] sm:$0xff] }
 0x198   :  { %v2980_v43 = vadd.f32 %v4859_v61, %v6344_v13  ;;  %v4972_v62 = vpop.f32.mrf.mxu1  ;;  %v37_v13 = vld [vmem:[%s7567_s0 + $0xb0] sm:$0xff] }
 0x199   :  { %v4861_v44 = vpop.f32.mrf.mxu0 }
 0x19a   :  { %v6751_v21 = vadd.f32 %v4971_v38, %v2980_v43  ;;  %v4862_v9 = vadd.f32 %v4861_v44, %v4860_v28  ;;  %v4973_v33 = vpop.f32.mrf.mxu1  ;;  %v4226_v38 = vcombine.high %v37_v13, %v45_v52 }
 0x19b   :  { %v4974_v58 = vadd.f32 %v4973_v33, %v4972_v62  ;;  %v4863_v60 = vpop.f32.mrf.mxu0  ;;  %3372 = vmatmul.mubr.bf16.gmra.mxu0 %v4445_v16 }
 0x19c   :  { %v2983_v3 = vadd.f32 %v4862_v9, %v6346_v22  ;;  %v4975_v41 = vpop.f32.mrf.mxu1  ;;  %3533 = vmatmul.mubr.bf16.gmra.mxu1 %v4447_v32  ;;  %3573 = vmatprep.mubr.bf16.mxu0 %v4210_v42  ;;  %v38_v22 = vld [vmem:[%s7567_s0 + $0xb8] sm:$0xff] }
 0x19d   :  { %v4864_v26 = vpop.f32.mrf.mxu0  ;;  %3734 = vmatprep.mubr.bf16.mxu1 %v4212_v30  ;;  %v4228_v16 = vcombine.high %v38_v22, %v46_v0 }
 0x19e   :  { %v6760_v35 = vadd.f32 %v4974_v58, %v2983_v3  ;;  %v4865_v34 = vadd.f32 %v4864_v26, %v4863_v60  ;;  %v4976_v8 = vpop.f32.mrf.mxu1  ;;  %v62_v58 = vld [vmem:[%s7567_s0 + $0x178] sm:$0xff] }
 0x19f   :  { %v4977_v19 = vadd.f32 %v4976_v8, %v4975_v41  ;;  %v4866_v23 = vpop.f32.mrf.mxu0  ;;  %v4225_v41 = vcombine.low %v37_v13, %v45_v52  ;;  %v4227_v8 = vcombine.low %v38_v22, %v46_v0  ;;  %v77_v52 = vld [vmem:[%s7567_s0 + $0x1f0] sm:$0xff] }
 0x1a0   :  { %v2988_v2 = vadd.f32 %v4865_v34, %v6363_v39  ;;  %v4978_v61 = vpop.f32.mrf.mxu1  ;;  %v53_v39 = vld [vmem:[%s7567_s0 + $0x130] sm:$0xff] }
 0x1a1   :  { %v4867_v28 = vpop.f32.mrf.mxu0 }
 0x1a2   :  { %v6769_v43 = vadd.f32 %v4977_v19, %v2988_v2  ;;  %v4868_v62 = vadd.f32 %v4867_v28, %v4866_v23  ;;  %v4979_v32 = vpop.f32.mrf.mxu1  ;;  %v4242_v19 = vcombine.high %v53_v39, %v61_v17 }
 0x1a3   :  { %v4980_v42 = vadd.f32 %v4979_v32, %v4978_v61  ;;  %v4869_v44 = vpop.f32.mrf.mxu0  ;;  %3574 = vmatmul.mubr.bf16.vlgmr.msra.gmra.mxu0 %v4209_v57 }
 0x1a4   :  { %v2991_v30 = vadd.f32 %v4868_v62, %v6382_v56  ;;  %v4981_v9 = vpop.f32.mrf.mxu1  ;;  %3735 = vmatmul.mubr.bf16.vlgmr.msra.gmra.mxu1 %v4211_v24  ;;  %3581 = vmatprep.mubr.bf16.mxu0 %v4226_v38  ;;  %v54_v56 = vld [vmem:[%s7567_s0 + $0x138] sm:$0xff] }
 0x1a5   :  { %v4870_v50 = vpop.f32.mrf.mxu0  ;;  %3742 = vmatprep.mubr.bf16.mxu1 %v4228_v16  ;;  %v4244_v57 = vcombine.high %v54_v56, %v62_v58 }
 0x1a6   :  { %v6778_v59 = vadd.f32 %v4980_v42, %v2991_v30  ;;  %v4871_v25 = vadd.f32 %v4870_v50, %v4869_v44  ;;  %v4982_v33 = vpop.f32.mrf.mxu1  ;;  %v78_v42 = vld [vmem:[%s7567_s0 + $0x1f8] sm:$0xff] }
 0x1a7   :  { %v4983_v60 = vadd.f32 %v4982_v33, %v4981_v9  ;;  %v4872_v3 = vpop.f32.mrf.mxu0  ;;  %v4241_v9 = vcombine.low %v53_v39, %v61_v17  ;;  %v4243_v33 = vcombine.low %v54_v56, %v62_v58  ;;  %v93_v17 = vld [vmem:[%s7567_s0 + $0x270] sm:$0xff] }
 0x1a8   :  { %v2996_v26 = vadd.f32 %v4871_v25, %v6410_v14  ;;  %v4984_v34 = vpop.f32.mrf.mxu1  ;;  %v69_v14 = vld [vmem:[%s7567_s0 + $0x1b0] sm:$0xff] }
 0x1a9   :  { %v4873_v23 = vpop.f32.mrf.mxu0 }
 0x1aa   :  { %v6787_v2 = vadd.f32 %v4983_v60, %v2996_v26  ;;  %v4874_v61 = vadd.f32 %v4873_v23, %v4872_v3  ;;  %v4985_v24 = vpop.f32.mrf.mxu1  ;;  %v4258_v60 = vcombine.high %v69_v14, %v77_v52 }
 0x1ab   :  { %v4986_v38 = vadd.f32 %v4985_v24, %v4984_v34  ;;  %v4875_v28 = vpop.f32.mrf.mxu0  ;;  %3582 = vmatmul.mubr.bf16.gmra.mxu0 %v4225_v41 }
 0x1ac   :  { %v2999_v16 = vadd.f32 %v4874_v61, %v6431_v31  ;;  %v4987_v62 = vpop.f32.mrf.mxu1  ;;  %3743 = vmatmul.mubr.bf16.gmra.mxu1 %v4227_v8  ;;  %3589 = vmatprep.mubr.bf16.mxu0 %v4242_v19  ;;  %v70_v31 = vld [vmem:[%s7567_s0 + $0x1b8] sm:$0xff] }
 0x1ad   :  { %v4876_v13 = vpop.f32.mrf.mxu0  ;;  %3750 = vmatprep.mubr.bf16.mxu1 %v4244_v57  ;;  %v4260_v41 = vcombine.high %v70_v31, %v78_v42 }
 0x1ae   :  { %v6796_v22 = vadd.f32 %v4986_v38, %v2999_v16  ;;  %v4877_v0 = vadd.f32 %v4876_v13, %v4875_v28  ;;  %v4988_v32 = vpop.f32.mrf.mxu1  ;;  %v94_v38 = vld [vmem:[%s7567_s0 + $0x278] sm:$0xff] }
 0x1af   :  { %v4989_v44 = vadd.f32 %v4988_v32, %v4987_v62  ;;  %v4878_v30 = vpop.f32.mrf.mxu0  ;;  %v4257_v62 = vcombine.low %v69_v14, %v77_v52  ;;  %v4259_v32 = vcombine.low %v70_v31, %v78_v42  ;;  %v109_v52 = vld [vmem:[%s7567_s0 + $0x2f0] sm:$0xff] }
 0x1b0   :  { %v3004_v50 = vadd.f32 %v4877_v0, %v6466_v53  ;;  %v4990_v25 = vpop.f32.mrf.mxu1  ;;  %v85_v53 = vld [vmem:[%s7567_s0 + $0x230] sm:$0xff] }
 0x1b1   :  { %v4879_v3 = vpop.f32.mrf.mxu0 }
 0x1b2   :  { %v6805_v26 = vadd.f32 %v4989_v44, %v3004_v50  ;;  %v4880_v34 = vadd.f32 %v4879_v3, %v4878_v30  ;;  %v4991_v8 = vpop.f32.mrf.mxu1  ;;  %v4274_v44 = vcombine.high %v85_v53, %v93_v17 }
 0x1b3   :  { %v4992_v19 = vadd.f32 %v4991_v8, %v4990_v25  ;;  %v4881_v23 = vpop.f32.mrf.mxu0  ;;  %3590 = vmatmul.mubr.bf16.gmra.mxu0 %v4241_v9 }
 0x1b4   :  { %v3007_v57 = vadd.f32 %v4880_v34, %v6487_v6  ;;  %v4993_v61 = vpop.f32.mrf.mxu1  ;;  %3751 = vmatmul.mubr.bf16.gmra.mxu1 %v4243_v33  ;;  %3597 = vmatprep.mubr.bf16.mxu0 %v4258_v60  ;;  %v86_v6 = vld [vmem:[%s7567_s0 + $0x238] sm:$0xff] }
 0x1b5   :  { %v4882_v39 = vpop.f32.mrf.mxu0  ;;  %3758 = vmatprep.mubr.bf16.mxu1 %v4260_v41  ;;  %v4276_v9 = vcombine.high %v86_v6, %v94_v38 }
 0x1b6   :  { %v6814_v56 = vadd.f32 %v4992_v19, %v3007_v57  ;;  %v4883_v58 = vadd.f32 %v4882_v39, %v4881_v23  ;;  %v4994_v24 = vpop.f32.mrf.mxu1  ;;  %v110_v19 = vld [vmem:[%s7567_s0 + $0x2f8] sm:$0xff] }
 0x1b7   :  { %v4995_v28 = vadd.f32 %v4994_v24, %v4993_v61  ;;  %v4884_v16 = vpop.f32.mrf.mxu0  ;;  %v4273_v61 = vcombine.low %v85_v53, %v93_v17  ;;  %v4275_v24 = vcombine.low %v86_v6, %v94_v38  ;;  %v125_v17 = vld [vmem:[%s7567_s0 + $0x370] sm:$0xff] }
 0x1b8   :  { %v3012_v13 = vadd.f32 %v4883_v58, %v6522_v36  ;;  %v4996_v0 = vpop.f32.mrf.mxu1  ;;  %v101_v36 = vld [vmem:[%s7567_s0 + $0x2b0] sm:$0xff] }
 0x1b9   :  { %v4885_v30 = vpop.f32.mrf.mxu0 }
 0x1ba   :  { %v6823_v50 = vadd.f32 %v4995_v28, %v3012_v13  ;;  %v4886_v25 = vadd.f32 %v4885_v30, %v4884_v16  ;;  %v4997_v33 = vpop.f32.mrf.mxu1  ;;  %v4290_v28 = vcombine.high %v101_v36, %v109_v52 }
 0x1bb   :  { %v4998_v60 = vadd.f32 %v4997_v33, %v4996_v0  ;;  %v4887_v3 = vpop.f32.mrf.mxu0  ;;  %3598 = vmatmul.mubr.bf16.gmra.mxu0 %v4257_v62 }
 0x1bc   :  { %v3015_v41 = vadd.f32 %v4886_v25, %v6538_v47  ;;  %v4999_v34 = vpop.f32.mrf.mxu1  ;;  %3759 = vmatmul.mubr.bf16.gmra.mxu1 %v4259_v32  ;;  %3605 = vmatprep.mubr.bf16.mxu0 %v4274_v44  ;;  %v102_v47 = vld [vmem:[%s7567_s0 + $0x2b8] sm:$0xff] }
 0x1bd   :  { %v4888_v14 = vpop.f32.mrf.mxu0  ;;  %3766 = vmatprep.mubr.bf16.mxu1 %v4276_v9  ;;  %v4292_v62 = vcombine.high %v102_v47, %v110_v19 }
 0x1be   :  { %v6832_v31 = vadd.f32 %v4998_v60, %v3015_v41  ;;  %v4889_v42 = vadd.f32 %v4888_v14, %v4887_v3  ;;  %v5000_v8 = vpop.f32.mrf.mxu1  ;;  %v126_v60 = vld [vmem:[%s7567_s0 + $0x378] sm:$0xff] }
 0x1bf   :  { %v5001_v23 = vadd.f32 %v5000_v8, %v4999_v34  ;;  %v4890_v57 = vpop.f32.mrf.mxu0  ;;  %v4289_v34 = vcombine.low %v101_v36, %v109_v52  ;;  %v4291_v8 = vcombine.low %v102_v47, %v110_v19  ;;  %v141_v52 = vld [vmem:[%s7567_s0 + $0x3f0] sm:$0xff] }
 0x1c0   :  { %v3020_v39 = vadd.f32 %v4889_v42, %v6562_v12  ;;  %v5002_v58 = vpop.f32.mrf.mxu1  ;;  %v117_v12 = vld [vmem:[%s7567_s0 + $0x330] sm:$0xff] }
 0x1c1   :  { %v4891_v16 = vpop.f32.mrf.mxu0 }
 0x1c2   :  { %v6841_v13 = vadd.f32 %v5001_v23, %v3020_v39  ;;  %v4892_v0 = vadd.f32 %v4891_v16, %v4890_v57  ;;  %v5003_v32 = vpop.f32.mrf.mxu1  ;;  %v4306_v23 = vcombine.high %v117_v12, %v125_v17 }
 0x1c3   :  { %v5004_v44 = vadd.f32 %v5003_v32, %v5002_v58  ;;  %v4893_v30 = vpop.f32.mrf.mxu0  ;;  %3606 = vmatmul.mubr.bf16.gmra.mxu0 %v4273_v61 }
 0x1c4   :  { %v3023_v9 = vadd.f32 %v4892_v0, %v6564_v5  ;;  %v5005_v25 = vpop.f32.mrf.mxu1  ;;  %3767 = vmatmul.mubr.bf16.gmra.mxu1 %v4275_v24  ;;  %3613 = vmatprep.mubr.bf16.mxu0 %v4290_v28  ;;  %v118_v5 = vld [vmem:[%s7567_s0 + $0x338] sm:$0xff] }
 0x1c5   :  { %v4894_v53 = vpop.f32.mrf.mxu0  ;;  %3774 = vmatprep.mubr.bf16.mxu1 %v4292_v62  ;;  %v4308_v61 = vcombine.high %v118_v5, %v126_v60 }
 0x1c6   :  { %v6850_v6 = vadd.f32 %v5004_v44, %v3023_v9  ;;  %v4895_v38 = vadd.f32 %v4894_v53, %v4893_v30  ;;  %v5006_v33 = vpop.f32.mrf.mxu1  ;;  %v142_v44 = vld [vmem:[%s7567_s0 + $0x3f8] sm:$0xff] }
 0x1c7   :  { %v5007_v3 = vadd.f32 %v5006_v33, %v5005_v25  ;;  %v4896_v41 = vpop.f32.mrf.mxu0  ;;  %v4305_v25 = vcombine.low %v117_v12, %v125_v17  ;;  %v4307_v33 = vcombine.low %v118_v5, %v126_v60  ;;  %v157_v17 = vld [vmem:[%s7567_s0 + $0x470] sm:$0xff] }
 0x1c8   :  { %v3028_v14 = vadd.f32 %v4895_v38, %v6578_v40  ;;  %v5008_v42 = vpop.f32.mrf.mxu1  ;;  %v133_v40 = vld [vmem:[%s7567_s0 + $0x3b0] sm:$0xff] }
 0x1c9   :  { %v4897_v57 = vpop.f32.mrf.mxu0 }
 0x1ca   :  { %v6859_v39 = vadd.f32 %v5007_v3, %v3028_v14  ;;  %v4898_v58 = vadd.f32 %v4897_v57, %v4896_v41  ;;  %v5009_v24 = vpop.f32.mrf.mxu1  ;;  %v4322_v3 = vcombine.high %v133_v40, %v141_v52 }
 0x1cb   :  { %v5010_v28 = vadd.f32 %v5009_v24, %v5008_v42  ;;  %v4899_v16 = vpop.f32.mrf.mxu0  ;;  %3614 = vmatmul.mubr.bf16.gmra.mxu0 %v4289_v34 }
 0x1cc   :  { %v3031_v62 = vadd.f32 %v4898_v58, %v6580_v54  ;;  %v5011_v0 = vpop.f32.mrf.mxu1  ;;  %3775 = vmatmul.mubr.bf16.gmra.mxu1 %v4291_v8  ;;  %3621 = vmatprep.mubr.bf16.mxu0 %v4306_v23  ;;  %v134_v54 = vld [vmem:[%s7567_s0 + $0x3b8] sm:$0xff] }
 0x1cd   :  { %v4900_v36 = vpop.f32.mrf.mxu0  ;;  %3782 = vmatprep.mubr.bf16.mxu1 %v4308_v61  ;;  %v4324_v34 = vcombine.high %v134_v54, %v142_v44 }
 0x1ce   :  { %v6868_v47 = vadd.f32 %v5010_v28, %v3031_v62  ;;  %v4901_v19 = vadd.f32 %v4900_v36, %v4899_v16  ;;  %v5012_v32 = vpop.f32.mrf.mxu1  ;;  %v158_v28 = vld [vmem:[%s7567_s0 + $0x478] sm:$0xff] }
 0x1cf   :  { %v5013_v30 = vadd.f32 %v5012_v32, %v5011_v0  ;;  %v4902_v9 = vpop.f32.mrf.mxu0  ;;  %v4321_v0 = vcombine.low %v133_v40, %v141_v52  ;;  %v4323_v32 = vcombine.low %v134_v54, %v142_v44  ;;  %v173_v52 = vld [vmem:[%s7567_s0 + $0x4f0] sm:$0xff] }
 0x1d0   :  { %v3036_v53 = vadd.f32 %v4901_v19, %v6594_v18  ;;  %v5014_v38 = vpop.f32.mrf.mxu1  ;;  %v149_v18 = vld [vmem:[%s7567_s0 + $0x430] sm:$0xff] }
 0x1d1   :  { %v4903_v41 = vpop.f32.mrf.mxu0 }
 0x1d2   :  { %v6877_v14 = vadd.f32 %v5013_v30, %v3036_v53  ;;  %v4904_v42 = vadd.f32 %v4903_v41, %v4902_v9  ;;  %v5015_v8 = vpop.f32.mrf.mxu1  ;;  %v4338_v30 = vcombine.high %v149_v18, %v157_v17 }
 0x1d3   :  { %v5016_v23 = vadd.f32 %v5015_v8, %v5014_v38  ;;  %v4905_v57 = vpop.f32.mrf.mxu0  ;;  %3622 = vmatmul.mubr.bf16.gmra.mxu0 %v4305_v25 }
 0x1d4   :  { %v3039_v61 = vadd.f32 %v4904_v42, %v6596_v37  ;;  %v5017_v58 = vpop.f32.mrf.mxu1  ;;  %3783 = vmatmul.mubr.bf16.gmra.mxu1 %v4307_v33  ;;  %3629 = vmatprep.mubr.bf16.mxu0 %v4322_v3  ;;  %v150_v37 = vld [vmem:[%s7567_s0 + $0x438] sm:$0xff] }
 0x1d5   :  { %v4906_v12 = vpop.f32.mrf.mxu0  ;;  %3790 = vmatprep.mubr.bf16.mxu1 %v4324_v34  ;;  %v4340_v25 = vcombine.high %v150_v37, %v158_v28 }
 0x1d6   :  { %v6886_v5 = vadd.f32 %v5016_v23, %v3039_v61  ;;  %v4907_v60 = vadd.f32 %v4906_v12, %v4905_v57  ;;  %v5018_v24 = vpop.f32.mrf.mxu1  ;;  %v174_v23 = vld [vmem:[%s7567_s0 + $0x4f8] sm:$0xff] }
 0x1d7   :  { %v5019_v16 = vadd.f32 %v5018_v24, %v5017_v58  ;;  %v4908_v62 = vpop.f32.mrf.mxu0  ;;  %v4337_v58 = vcombine.low %v149_v18, %v157_v17  ;;  %v4339_v24 = vcombine.low %v150_v37, %v158_v28  ;;  %v189_v17 = vld [vmem:[%s7567_s0 + $0x570] sm:$0xff] }
 0x1d8   :  { %v3044_v36 = vadd.f32 %v4907_v60, %v6610_v48  ;;  %v5020_v19 = vpop.f32.mrf.mxu1  ;;  %v165_v48 = vld [vmem:[%s7567_s0 + $0x4b0] sm:$0xff] }
 0x1d9   :  { %v4909_v9 = vpop.f32.mrf.mxu0 }
 0x1da   :  { %v6895_v53 = vadd.f32 %v5019_v16, %v3044_v36  ;;  %v4910_v38 = vadd.f32 %v4909_v9, %v4908_v62  ;;  %v5021_v33 = vpop.f32.mrf.mxu1  ;;  %v4354_v16 = vcombine.high %v165_v48, %v173_v52 }
 0x1db   :  { %v5022_v3 = vadd.f32 %v5021_v33, %v5020_v19  ;;  %v4911_v41 = vpop.f32.mrf.mxu0  ;;  %3630 = vmatmul.mubr.bf16.gmra.mxu0 %v4321_v0 }
 0x1dc   :  { %v3047_v34 = vadd.f32 %v4910_v38, %v6612_v4  ;;  %v5023_v42 = vpop.f32.mrf.mxu1  ;;  %3791 = vmatmul.mubr.bf16.gmra.mxu1 %v4323_v32  ;;  %3637 = vmatprep.mubr.bf16.mxu0 %v4338_v30  ;;  %v166_v4 = vld [vmem:[%s7567_s0 + $0x4b8] sm:$0xff] }
 0x1dd   :  { %v4912_v40 = vpop.f32.mrf.mxu0  ;;  %3798 = vmatprep.mubr.bf16.mxu1 %v4340_v25  ;;  %v4356_v0 = vcombine.high %v166_v4, %v174_v23 }
 0x1de   :  { %v6904_v54 = vadd.f32 %v5022_v3, %v3047_v34  ;;  %v4913_v44 = vadd.f32 %v4912_v40, %v4911_v41  ;;  %v5024_v8 = vpop.f32.mrf.mxu1  ;;  %v190_v3 = vld [vmem:[%s7567_s0 + $0x578] sm:$0xff] }
 0x1df   :  { %v5025_v57 = vadd.f32 %v5024_v8, %v5023_v42  ;;  %v4914_v61 = vpop.f32.mrf.mxu0  ;;  %v4353_v42 = vcombine.low %v165_v48, %v173_v52  ;;  %v4355_v8 = vcombine.low %v166_v4, %v174_v23  ;;  %v205_v52 = vld [vmem:[%s7567_s0 + $0x5f0] sm:$0xff] }
 0x1e0   :  { %v3052_v12 = vadd.f32 %v4913_v44, %v6626_v27  ;;  %v5026_v60 = vpop.f32.mrf.mxu1  ;;  %v181_v27 = vld [vmem:[%s7567_s0 + $0x530] sm:$0xff] }
 0x1e1   :  { %v4915_v62 = vpop.f32.mrf.mxu0 }
 0x1e2   :  { %v6913_v36 = vadd.f32 %v5025_v57, %v3052_v12  ;;  %v4916_v19 = vadd.f32 %v4915_v62, %v4914_v61  ;;  %v5027_v32 = vpop.f32.mrf.mxu1  ;;  %v4370_v57 = vcombine.high %v181_v27, %v189_v17 }
 0x1e3   :  { %v5028_v30 = vadd.f32 %v5027_v32, %v5026_v60  ;;  %v5045_v9 = vpop.f32.mrf.mxu0  ;;  %3638 = vmatmul.mubr.bf16.gmra.mxu0 %v4337_v58 }
 0x1e4   :  { %v3055_v25 = vadd.f32 %v4916_v19, %v6628_v45  ;;  %v5157_v38 = vpop.f32.mrf.mxu1  ;;  %3799 = vmatmul.mubr.bf16.gmra.mxu1 %v4339_v24  ;;  %3645 = vmatprep.mubr.bf16.mxu0 %v4354_v16  ;;  %v182_v45 = vld [vmem:[%s7567_s0 + $0x538] sm:$0xff] }
 0x1e5   :  { %v5046_v18 = vpop.f32.mrf.mxu0  ;;  %3806 = vmatprep.mubr.bf16.mxu1 %v4356_v0  ;;  %v4372_v58 = vcombine.high %v182_v45, %v190_v3 }
 0x1e6   :  { %v6922_v37 = vadd.f32 %v5028_v30, %v3055_v25  ;;  %v5047_v28 = vadd.f32 %v5046_v18, %v5045_v9  ;;  %v5158_v33 = vpop.f32.mrf.mxu1  ;;  %v206_v30 = vld [vmem:[%s7567_s0 + $0x5f8] sm:$0xff] }
 0x1e7   :  { %v5159_v41 = vadd.f32 %v5158_v33, %v5157_v38  ;;  %v5048_v34 = vpop.f32.mrf.mxu0  ;;  %v4369_v38 = vcombine.low %v181_v27, %v189_v17  ;;  %v4371_v33 = vcombine.low %v182_v45, %v190_v3  ;;  %v221_v17 = vld [vmem:[%s7567_s0 + $0x670] sm:$0xff] }
 0x1e8   :  { %v3254_v40 = vadd.f32 %v5047_v28, %v6643_v20  ;;  %v5160_v44 = vpop.f32.mrf.mxu1  ;;  %v197_v20 = vld [vmem:[%s7567_s0 + $0x5b0] sm:$0xff] }
 0x1e9   :  { %v5049_v61 = vpop.f32.mrf.mxu0 }
 0x1ea   :  { %v6931_v12 = vadd.f32 %v5159_v41, %v3254_v40  ;;  %v5050_v60 = vadd.f32 %v5049_v61, %v5048_v34  ;;  %v5161_v24 = vpop.f32.mrf.mxu1  ;;  %v4386_v41 = vcombine.high %v197_v20, %v205_v52 }
 0x1eb   :  { %v5162_v16 = vadd.f32 %v5161_v24, %v5160_v44  ;;  %v5051_v62 = vpop.f32.mrf.mxu0  ;;  %3646 = vmatmul.mubr.bf16.gmra.mxu0 %v4353_v42 }
 0x1ec   :  { %v3257_v0 = vadd.f32 %v5050_v60, %v6652_v15  ;;  %v5163_v19 = vpop.f32.mrf.mxu1  ;;  %3807 = vmatmul.mubr.bf16.gmra.mxu1 %v4355_v8  ;;  %3653 = vmatprep.mubr.bf16.mxu0 %v4370_v57  ;;  %v198_v15 = vld [vmem:[%s7567_s0 + $0x5b8] sm:$0xff] }
 0x1ed   :  { %v5052_v48 = vpop.f32.mrf.mxu0  ;;  %3814 = vmatprep.mubr.bf16.mxu1 %v4372_v58  ;;  %v4388_v42 = vcombine.high %v198_v15, %v206_v30 }
 0x1ee   :  { %v6940_v4 = vadd.f32 %v5162_v16, %v3257_v0  ;;  %v5053_v23 = vadd.f32 %v5052_v48, %v5051_v62  ;;  %v5164_v32 = vpop.f32.mrf.mxu1  ;;  %v222_v16 = vld [vmem:[%s7567_s0 + $0x678] sm:$0xff] }
 0x1ef   :  { %v5165_v9 = vadd.f32 %v5164_v32, %v5163_v19  ;;  %v5054_v25 = vpop.f32.mrf.mxu0  ;;  %v4385_v19 = vcombine.low %v197_v20, %v205_v52  ;;  %v4387_v32 = vcombine.low %v198_v15, %v206_v30  ;;  %v237_v52 = vld [vmem:[%s7567_s0 + $0x6f0] sm:$0xff] }
 0x1f0   :  { %v3262_v18 = vadd.f32 %v5053_v23, %v6661_v1  ;;  %v5166_v28 = vpop.f32.mrf.mxu1  ;;  %v213_v1 = vld [vmem:[%s7567_s0 + $0x630] sm:$0xff] }
 0x1f1   :  { %v5055_v34 = vpop.f32.mrf.mxu0 }
 0x1f2   :  { %v6949_v40 = vadd.f32 %v5165_v9, %v3262_v18  ;;  %v5056_v44 = vadd.f32 %v5055_v34, %v5054_v25  ;;  %v5167_v8 = vpop.f32.mrf.mxu1  ;;  %v4402_v9 = vcombine.high %v213_v1, %v221_v17 }
 0x1f3   :  { %v5168_v57 = vadd.f32 %v5167_v8, %v5166_v28  ;;  %v5057_v61 = vpop.f32.mrf.mxu0  ;;  %3654 = vmatmul.mubr.bf16.gmra.mxu0 %v4369_v38 }
 0x1f4   :  { %v3265_v58 = vadd.f32 %v5056_v44, %v6670_v55  ;;  %v5169_v60 = vpop.f32.mrf.mxu1  ;;  %3815 = vmatmul.mubr.bf16.gmra.mxu1 %v4371_v33  ;;  %3661 = vmatprep.mubr.bf16.mxu0 %v4386_v41  ;;  %v214_v55 = vld [vmem:[%s7567_s0 + $0x638] sm:$0xff] }
 0x1f5   :  { %v5058_v27 = vpop.f32.mrf.mxu0  ;;  %3822 = vmatprep.mubr.bf16.mxu1 %v4388_v42  ;;  %v4404_v38 = vcombine.high %v214_v55, %v222_v16 }
 0x1f6   :  { %v6958_v45 = vadd.f32 %v5168_v57, %v3265_v58  ;;  %v5059_v3 = vadd.f32 %v5058_v27, %v5057_v61  ;;  %v5170_v24 = vpop.f32.mrf.mxu1  ;;  %v238_v57 = vld [vmem:[%s7567_s0 + $0x6f8] sm:$0xff] }
 0x1f7   :  { %v5171_v62 = vadd.f32 %v5170_v24, %v5169_v60  ;;  %v5060_v0 = vpop.f32.mrf.mxu0  ;;  %v4401_v60 = vcombine.low %v213_v1, %v221_v17  ;;  %v4403_v24 = vcombine.low %v214_v55, %v222_v16  ;;  %v253_v17 = vld [vmem:[%s7567_s0 + $0x770] sm:$0xff] }
 0x1f8   :  { %v3270_v48 = vadd.f32 %v5059_v3, %v6679_v46  ;;  %v5172_v23 = vpop.f32.mrf.mxu1  ;;  %v229_v46 = vld [vmem:[%s7567_s0 + $0x6b0] sm:$0xff] }
 0x1f9   :  { %v5061_v25 = vpop.f32.mrf.mxu0 }
 0x1fa   :  { %v6967_v18 = vadd.f32 %v5171_v62, %v3270_v48  ;;  %v5062_v28 = vadd.f32 %v5061_v25, %v5060_v0  ;;  %v5173_v33 = vpop.f32.mrf.mxu1  ;;  %v4418_v62 = vcombine.high %v229_v46, %v237_v52 }
 0x1fb   :  { %v5174_v41 = vadd.f32 %v5173_v33, %v5172_v23  ;;  %v5063_v34 = vpop.f32.mrf.mxu0  ;;  %3662 = vmatmul.mubr.bf16.gmra.mxu0 %v4385_v19 }
 0x1fc   :  { %v3273_v42 = vadd.f32 %v5062_v28, %v6688_v7  ;;  %v5175_v44 = vpop.f32.mrf.mxu1  ;;  %3823 = vmatmul.mubr.bf16.gmra.mxu1 %v4387_v32  ;;  %3669 = vmatprep.mubr.bf16.mxu0 %v4402_v9  ;;  %v230_v7 = vld [vmem:[%s7567_s0 + $0x6b8] sm:$0xff] }
 0x1fd   :  { %v5064_v20 = vpop.f32.mrf.mxu0  ;;  %3830 = vmatprep.mubr.bf16.mxu1 %v4404_v38  ;;  %v4420_v19 = vcombine.high %v230_v7, %v238_v57 }
 0x1fe   :  { %v6976_v15 = vadd.f32 %v5174_v41, %v3273_v42  ;;  %v5065_v30 = vadd.f32 %v5064_v20, %v5063_v34  ;;  %v5176_v8 = vpop.f32.mrf.mxu1  ;;  %v254_v41 = vld [vmem:[%s7567_s0 + $0x778] sm:$0xff] }
 0x1ff   :  { %v5177_v61 = vadd.f32 %v5176_v8, %v5175_v44  ;;  %v5066_v58 = vpop.f32.mrf.mxu0  ;;  %v4417_v44 = vcombine.low %v229_v46, %v237_v52  ;;  %v4419_v8 = vcombine.low %v230_v7, %v238_v57  ;;  %v269_v52 = vld [vmem:[%s7567_s0 + $0x7f0] sm:$0xff] }
 0x200   :  { %v3278_v27 = vadd.f32 %v5065_v30, %v6697_v49  ;;  %v5178_v3 = vpop.f32.mrf.mxu1  ;;  %v245_v49 = vld [vmem:[%s7567_s0 + $0x730] sm:$0xff] }
 0x201   :  { %v5067_v0 = vpop.f32.mrf.mxu0 }
 0x202   :  { %v6985_v48 = vadd.f32 %v5177_v61, %v3278_v27  ;;  %v5068_v23 = vadd.f32 %v5067_v0, %v5066_v58  ;;  %v5179_v32 = vpop.f32.mrf.mxu1  ;;  %v4434_v61 = vcombine.high %v245_v49, %v253_v17 }
 0x203   :  { %v5180_v9 = vadd.f32 %v5179_v32, %v5178_v3  ;;  %v5069_v25 = vpop.f32.mrf.mxu0  ;;  %3670 = vmatmul.mubr.bf16.gmra.mxu0 %v4401_v60 }
 0x204   :  { %v3281_v38 = vadd.f32 %v5068_v23, %v6706_v29  ;;  %v5181_v28 = vpop.f32.mrf.mxu1  ;;  %3831 = vmatmul.mubr.bf16.gmra.mxu1 %v4403_v24  ;;  %3677 = vmatprep.mubr.bf16.mxu0 %v4418_v62  ;;  %v246_v29 = vld [vmem:[%s7567_s0 + $0x738] sm:$0xff] }
 0x205   :  { %v5070_v1 = vpop.f32.mrf.mxu0  ;;  %3838 = vmatprep.mubr.bf16.mxu1 %v4420_v19  ;;  %v4436_v60 = vcombine.high %v246_v29, %v254_v41 }
 0x206   :  { %v6994_v55 = vadd.f32 %v5180_v9, %v3281_v38  ;;  %v5071_v16 = vadd.f32 %v5070_v1, %v5069_v25  ;;  %v5182_v33 = vpop.f32.mrf.mxu1  ;;  %v270_v9 = vld [vmem:[%s7567_s0 + $0x7f8] sm:$0xff] }
 0x207   :  { %v5183_v34 = vadd.f32 %v5182_v33, %v5181_v28  ;;  %v5072_v42 = vpop.f32.mrf.mxu0  ;;  %v4433_v28 = vcombine.low %v245_v49, %v253_v17  ;;  %v4435_v33 = vcombine.low %v246_v29, %v254_v41 }
 0x208   :  { %v3286_v20 = vadd.f32 %v5071_v16, %v6715_v10  ;;  %v5184_v30 = vpop.f32.mrf.mxu1  ;;  %v261_v10 = vld [vmem:[%s7567_s0 + $0x7b0] sm:$0xff] }
 0x209   :  { %v5073_v58 = vpop.f32.mrf.mxu0 }
 0x20a   :  { %v7003_v27 = vadd.f32 %v5183_v34, %v3286_v20  ;;  %v5074_v3 = vadd.f32 %v5073_v58, %v5072_v42  ;;  %v5185_v24 = vpop.f32.mrf.mxu1  ;;  %v4450_v34 = vcombine.high %v261_v10, %v269_v52 }
 0x20b   :  { %v5186_v62 = vadd.f32 %v5185_v24, %v5184_v30  ;;  %v5075_v0 = vpop.f32.mrf.mxu0  ;;  %3678 = vmatmul.mubr.bf16.gmra.mxu0 %v4417_v44 }
 0x20c   :  { %v3289_v19 = vadd.f32 %v5074_v3, %v6724_v51  ;;  %v5187_v23 = vpop.f32.mrf.mxu1  ;;  %3839 = vmatmul.mubr.bf16.gmra.mxu1 %v4419_v8  ;;  %3685 = vmatprep.mubr.bf16.mxu0 %v4434_v61  ;;  %v262_v51 = vld [vmem:[%s7567_s0 + $0x7b8] sm:$0xff] }
 0x20d   :  { %v5076_v46 = vpop.f32.mrf.mxu0  ;;  %3846 = vmatprep.mubr.bf16.mxu1 %v4436_v60  ;;  %v4452_v44 = vcombine.high %v262_v51, %v270_v9 }
 0x20e   :  { %v7012_v7 = vadd.f32 %v5186_v62, %v3289_v19  ;;  %v5077_v57 = vadd.f32 %v5076_v46, %v5075_v0  ;;  %v5188_v32 = vpop.f32.mrf.mxu1  ;;  %v4449_v62 = vcombine.low %v261_v10, %v269_v52 }
 0x20f   :  { %v5189_v25 = vadd.f32 %v5188_v32, %v5187_v23  ;;  %v5078_v38 = vpop.f32.mrf.mxu0  ;;  %v4451_v23 = vcombine.low %v262_v51, %v270_v9 }
 0x210   :  { %v3294_v1 = vadd.f32 %v5077_v57, %v6733_v63  ;;  %v5190_v16 = vpop.f32.mrf.mxu1 }
 0x211   :  { %v5079_v42 = vpop.f32.mrf.mxu0 }
 0x212   :  { %v7021_v20 = vadd.f32 %v5189_v25, %v3294_v1  ;;  %v5080_v30 = vadd.f32 %v5079_v42, %v5078_v38  ;;  %v5191_v8 = vpop.f32.mrf.mxu1 }
 0x213   :  { %v5192_v61 = vadd.f32 %v5191_v8, %v5190_v16  ;;  %v5081_v58 = vpop.f32.mrf.mxu0  ;;  %3686 = vmatmul.mubr.bf16.gmra.mxu0 %v4433_v28 }
 0x214   :  { %v3297_v60 = vadd.f32 %v5080_v30, %v6742_v11  ;;  %v5193_v3 = vpop.f32.mrf.mxu1  ;;  %3847 = vmatmul.mubr.bf16.gmra.mxu1 %v4435_v33  ;;  %3693 = vmatprep.mubr.bf16.mxu0 %v4450_v34 }
 0x215   :  { %v5082_v49 = vpop.f32.mrf.mxu0  ;;  %3854 = vmatprep.mubr.bf16.mxu1 %v4452_v44 }
 0x216   :  { %v7024_v63 = vadd.f32 %v5192_v61, %v3297_v60  ;;  %v5083_v17 = vadd.f32 %v5082_v49, %v5081_v58  ;;  %v5194_v29 = vpop.f32.mrf.mxu1 }
 0x217   :  { %v5195_v41 = vadd.f32 %v5194_v29, %v5193_v3  ;;  %v5084_v24 = vpop.f32.mrf.mxu0 }
 0x218   :  { %v3302_v0 = vadd.f32 %v5083_v17, %v6751_v21  ;;  %v5196_v19 = vpop.f32.mrf.mxu1 }
 0x219   :  { %v5085_v46 = vpop.f32.mrf.mxu0 }
 0x21a   :  { %v7027_v57 = vadd.f32 %v5195_v41, %v3302_v0  ;;  %v5086_v11 = vadd.f32 %v5085_v46, %v5084_v24  ;;  %v5197_v32 = vpop.f32.mrf.mxu1 }
 0x21b   :  { %v5198_v25 = vadd.f32 %v5197_v32, %v5196_v19  ;;  %v5087_v38 = vpop.f32.mrf.mxu0  ;;  %3694 = vmatmul.mubr.bf16.gmra.mxu0 %v4449_v62 }
 0x21c   :  { %v3305_v28 = vadd.f32 %v5086_v11, %v6760_v35  ;;  %v5199_v1 = vpop.f32.mrf.mxu1  ;;  %3855 = vmatmul.mubr.bf16.gmra.mxu1 %v4451_v23 }
 0x21d   :  { %v5088_v16 = vpop.f32.mrf.mxu0 }
 0x21e   :  { %v7030_v33 = vadd.f32 %v5198_v25, %v3305_v28  ;;  %v5089_v10 = vadd.f32 %v5088_v16, %v5087_v38  ;;  %v5200_v52 = vpop.f32.mrf.mxu1 }
 0x21f   :  { %v5201_v21 = vadd.f32 %v5200_v52, %v5199_v1  ;;  %v5090_v34 = vpop.f32.mrf.mxu0 }
 0x220   :  { %v3310_v51 = vadd.f32 %v5089_v10, %v6769_v43  ;;  %v5202_v9 = vpop.f32.mrf.mxu1 }
 0x221   :  { %v5091_v42 = vpop.f32.mrf.mxu0 }
 0x222   :  { %v7033_v44 = vadd.f32 %v5201_v21, %v3310_v51  ;;  %v5092_v30 = vadd.f32 %v5091_v42, %v5090_v34  ;;  %v5203_v8 = vpop.f32.mrf.mxu1 }
 0x223   :  { %v5204_v61 = vadd.f32 %v5203_v8, %v5202_v9  ;;  %v5093_v58 = vpop.f32.mrf.mxu0 }
 0x224   :  { %v3313_v35 = vadd.f32 %v5092_v30, %v6778_v59  ;;  %v5205_v60 = vpop.f32.mrf.mxu1 }
 0x225   :  { %v5094_v3 = vpop.f32.mrf.mxu0 }
 0x226   :  { %v7036_v49 = vadd.f32 %v5204_v61, %v3313_v35  ;;  %v5095_v17 = vadd.f32 %v5094_v3, %v5093_v58  ;;  %v5206_v29 = vpop.f32.mrf.mxu1 }
 0x227   :  { %v5207_v41 = vadd.f32 %v5206_v29, %v5205_v60  ;;  %v5096_v24 = vpop.f32.mrf.mxu0 }
 0x228   :  { %v3318_v43 = vadd.f32 %v5095_v17, %v6787_v2  ;;  %v5208_v62 = vpop.f32.mrf.mxu1 }
 0x229   :  { %v5097_v0 = vpop.f32.mrf.mxu0 }
 0x22a   :  { %v7039_v19 = vadd.f32 %v5207_v41, %v3318_v43  ;;  %v5098_v23 = vadd.f32 %v5097_v0, %v5096_v24  ;;  %v5209_v46 = vpop.f32.mrf.mxu1 }
 0x22b   :  { %v5210_v11 = vadd.f32 %v5209_v46, %v5208_v62  ;;  %v5099_v32 = vpop.f32.mrf.mxu0 }
 0x22c   :  { %v3321_v59 = vadd.f32 %v5098_v23, %v6796_v22  ;;  %v5211_v25 = vpop.f32.mrf.mxu1 }
 0x22d   :  { %v5100_v38 = vpop.f32.mrf.mxu0 }
 0x22e   :  { %v7042_v28 = vadd.f32 %v5210_v11, %v3321_v59  ;;  %v5101_v1 = vadd.f32 %v5100_v38, %v5099_v32  ;;  %v5212_v16 = vpop.f32.mrf.mxu1 }
 0x22f   :  { %v5213_v10 = vadd.f32 %v5212_v16, %v5211_v25  ;;  %v5102_v52 = vpop.f32.mrf.mxu0 }
 0x230   :  { %v3326_v2 = vadd.f32 %v5101_v1, %v6805_v26  ;;  %v5214_v21 = vpop.f32.mrf.mxu1 }
 0x231   :  { %v5103_v34 = vpop.f32.mrf.mxu0 }
 0x232   :  { %v7045_v51 = vadd.f32 %v5213_v10, %v3326_v2  ;;  %v5104_v9 = vadd.f32 %v5103_v34, %v5102_v52  ;;  %v5215_v42 = vpop.f32.mrf.mxu1 }
 0x233   :  { %v5216_v30 = vadd.f32 %v5215_v42, %v5214_v21  ;;  %v5105_v8 = vpop.f32.mrf.mxu0 }
 0x234   :  { %v3329_v22 = vadd.f32 %v5104_v9, %v6814_v56  ;;  %v5217_v61 = vpop.f32.mrf.mxu1 }
 0x235   :  { %v5106_v58 = vpop.f32.mrf.mxu0 }
 0x236   :  { %v7048_v35 = vadd.f32 %v5216_v30, %v3329_v22  ;;  %v5107_v60 = vadd.f32 %v5106_v58, %v5105_v8  ;;  %v5218_v3 = vpop.f32.mrf.mxu1 }
 0x237   :  { %v5219_v17 = vadd.f32 %v5218_v3, %v5217_v61  ;;  %v5108_v29 = vpop.f32.mrf.mxu0 }
 0x238   :  { %v3334_v26 = vadd.f32 %v5107_v60, %v6823_v50  ;;  %v5220_v41 = vpop.f32.mrf.mxu1 }
 0x239   :  { %v5109_v24 = vpop.f32.mrf.mxu0 }
 0x23a   :  { %v7051_v43 = vadd.f32 %v5219_v17, %v3334_v26  ;;  %v5110_v62 = vadd.f32 %v5109_v24, %v5108_v29  ;;  %v5221_v0 = vpop.f32.mrf.mxu1 }
 0x23b   :  { %v5222_v23 = vadd.f32 %v5221_v0, %v5220_v41  ;;  %v5111_v46 = vpop.f32.mrf.mxu0 }
 0x23c   :  { %v3337_v56 = vadd.f32 %v5110_v62, %v6832_v31  ;;  %v5223_v11 = vpop.f32.mrf.mxu1 }
 0x23d   :  { %v5112_v32 = vpop.f32.mrf.mxu0 }
 0x23e   :  { %v7054_v59 = vadd.f32 %v5222_v23, %v3337_v56  ;;  %v5113_v25 = vadd.f32 %v5112_v32, %v5111_v46  ;;  %v5224_v38 = vpop.f32.mrf.mxu1 }
 0x23f   :  { %v5225_v1 = vadd.f32 %v5224_v38, %v5223_v11  ;;  %v5114_v16 = vpop.f32.mrf.mxu0 }
 0x240   :  { %v3342_v50 = vadd.f32 %v5113_v25, %v6841_v13  ;;  %v5226_v10 = vpop.f32.mrf.mxu1 }
 0x241   :  { %v5115_v52 = vpop.f32.mrf.mxu0 }
 0x242   :  { %v7057_v2 = vadd.f32 %v5225_v1, %v3342_v50  ;;  %v5116_v21 = vadd.f32 %v5115_v52, %v5114_v16  ;;  %v5227_v34 = vpop.f32.mrf.mxu1 }
 0x243   :  { %v5228_v9 = vadd.f32 %v5227_v34, %v5226_v10  ;;  %v5117_v42 = vpop.f32.mrf.mxu0 }
 0x244   :  { %v3345_v31 = vadd.f32 %v5116_v21, %v6850_v6  ;;  %v5229_v30 = vpop.f32.mrf.mxu1 }
 0x245   :  { %v5118_v8 = vpop.f32.mrf.mxu0 }
 0x246   :  { %v7060_v22 = vadd.f32 %v5228_v9, %v3345_v31  ;;  %v5119_v61 = vadd.f32 %v5118_v8, %v5117_v42  ;;  %v5230_v58 = vpop.f32.mrf.mxu1 }
 0x247   :  { %v5231_v60 = vadd.f32 %v5230_v58, %v5229_v30  ;;  %v5120_v3 = vpop.f32.mrf.mxu0 }
 0x248   :  { %v3350_v13 = vadd.f32 %v5119_v61, %v6859_v39  ;;  %v5232_v17 = vpop.f32.mrf.mxu1 }
 0x249   :  { %v5121_v29 = vpop.f32.mrf.mxu0 }
 0x24a   :  { %v7063_v26 = vadd.f32 %v5231_v60, %v3350_v13  ;;  %v5122_v41 = vadd.f32 %v5121_v29, %v5120_v3  ;;  %v5233_v24 = vpop.f32.mrf.mxu1 }
 0x24b   :  { %v5234_v62 = vadd.f32 %v5233_v24, %v5232_v17  ;;  %v5123_v0 = vpop.f32.mrf.mxu0 }
 0x24c   :  { %v3353_v6 = vadd.f32 %v5122_v41, %v6868_v47  ;;  %v5235_v23 = vpop.f32.mrf.mxu1 }
 0x24d   :  { %v5124_v46 = vpop.f32.mrf.mxu0 }
 0x24e   :  { %v7066_v56 = vadd.f32 %v5234_v62, %v3353_v6  ;;  %v5125_v11 = vadd.f32 %v5124_v46, %v5123_v0  ;;  %v5236_v32 = vpop.f32.mrf.mxu1 }
 0x24f   :  { %v5237_v25 = vadd.f32 %v5236_v32, %v5235_v23  ;;  %v5126_v38 = vpop.f32.mrf.mxu0 }
 0x250   :  { %v3358_v39 = vadd.f32 %v5125_v11, %v6877_v14  ;;  %v5238_v1 = vpop.f32.mrf.mxu1 }
 0x251   :  { %v5127_v16 = vpop.f32.mrf.mxu0 }
 0x252   :  { %v7069_v50 = vadd.f32 %v5237_v25, %v3358_v39  ;;  %v5128_v10 = vadd.f32 %v5127_v16, %v5126_v38  ;;  %v5239_v52 = vpop.f32.mrf.mxu1 }
 0x253   :  { %v5240_v21 = vadd.f32 %v5239_v52, %v5238_v1  ;;  %v5129_v34 = vpop.f32.mrf.mxu0 }
 0x254   :  { %v3361_v47 = vadd.f32 %v5128_v10, %v6886_v5  ;;  %v5241_v9 = vpop.f32.mrf.mxu1 }
 0x255   :  { %v5130_v42 = vpop.f32.mrf.mxu0 }
 0x256   :  { %v7072_v31 = vadd.f32 %v5240_v21, %v3361_v47  ;;  %v5131_v30 = vadd.f32 %v5130_v42, %v5129_v34  ;;  %v5242_v8 = vpop.f32.mrf.mxu1 }
 0x257   :  { %v5243_v61 = vadd.f32 %v5242_v8, %v5241_v9  ;;  %v5132_v58 = vpop.f32.mrf.mxu0 }
 0x258   :  { %v3366_v14 = vadd.f32 %v5131_v30, %v6895_v53  ;;  %v5244_v60 = vpop.f32.mrf.mxu1 }
 0x259   :  { %v5133_v3 = vpop.f32.mrf.mxu0 }
 0x25a   :  { %v7075_v13 = vadd.f32 %v5243_v61, %v3366_v14  ;;  %v5134_v17 = vadd.f32 %v5133_v3, %v5132_v58  ;;  %v5245_v29 = vpop.f32.mrf.mxu1 }
 0x25b   :  { %v5246_v41 = vadd.f32 %v5245_v29, %v5244_v60  ;;  %v5135_v24 = vpop.f32.mrf.mxu0 }
 0x25c   :  { %v3369_v5 = vadd.f32 %v5134_v17, %v6904_v54  ;;  %v5247_v62 = vpop.f32.mrf.mxu1 }
 0x25d   :  { %v5136_v0 = vpop.f32.mrf.mxu0 }
 0x25e   :  { %v7078_v6 = vadd.f32 %v5246_v41, %v3369_v5  ;;  %v5137_v23 = vadd.f32 %v5136_v0, %v5135_v24  ;;  %v5248_v46 = vpop.f32.mrf.mxu1 }
 0x25f   :  { %v5249_v11 = vadd.f32 %v5248_v46, %v5247_v62  ;;  %v5138_v32 = vpop.f32.mrf.mxu0 }
 0x260   :  { %v3374_v53 = vadd.f32 %v5137_v23, %v6913_v36  ;;  %v5250_v25 = vpop.f32.mrf.mxu1 }
 0x261   :  { %v5139_v38 = vpop.f32.mrf.mxu0 }
 0x262   :  { %v7081_v39 = vadd.f32 %v5249_v11, %v3374_v53  ;;  %v5140_v1 = vadd.f32 %v5139_v38, %v5138_v32  ;;  %v5251_v16 = vpop.f32.mrf.mxu1 }
 0x263   :  { %v5252_v10 = vadd.f32 %v5251_v16, %v5250_v25  ;;  %v5269_v52 = vpop.f32.mrf.mxu0 }
 0x264   :  { %v3377_v54 = vadd.f32 %v5140_v1, %v6922_v37  ;;  %v5381_v21 = vpop.f32.mrf.mxu1 }
 0x265   :  { %v5270_v34 = vpop.f32.mrf.mxu0 }
 0x266   :  { %v7084_v47 = vadd.f32 %v5252_v10, %v3377_v54  ;;  %v5271_v9 = vadd.f32 %v5270_v34, %v5269_v52  ;;  %v5382_v42 = vpop.f32.mrf.mxu1 }
 0x267   :  { %v5272_v30 = vpop.f32.mrf.mxu0  ;;  %v5383_v36 = vadd.f32 %v5382_v42, %v5381_v21 }
 0x268   :  { %v3576_v8 = vadd.f32 %v5271_v9, %v6931_v12  ;;  %v5384_v61 = vpop.f32.mrf.mxu1 }
 0x269   :  { %v5273_v58 = vpop.f32.mrf.mxu0 }
 0x26a   :  { %v3737_v14 = vadd.f32 %v5383_v36, %v3576_v8  ;;  %v5274_v60 = vadd.f32 %v5273_v58, %v5272_v30  ;;  %v5385_v3 = vpop.f32.mrf.mxu1 }
 0x26b   :  { %v5275_v17 = vpop.f32.mrf.mxu0  ;;  %v5386_v29 = vadd.f32 %v5385_v3, %v5384_v61 }
 0x26c   :  { %3864 = vst.msk [vmem:[%s7568_s2] sm:$0xff] %vm3863_vm0, %v3737_v14  ;;  %v3579_v37 = vadd.f32 %v5274_v60, %v6940_v4  ;;  %v5387_v41 = vpop.f32.mrf.mxu1  ;;  %v3896_v24 = vsel %vm3863_vm0, %v3737_v14, 0.0  ;;  %v4025_v12 = vmul.f32 %v3737_v14, %v3737_v14 }
 0x26d   :  { %v5276_v5 = vpop.f32.mrf.mxu0  ;;  %3897 = vadd.xlane.f32.xlu0 %v3896_v24 }
 0x26e   :  { %v3740_v62 = vadd.f32 %v5386_v29, %v3579_v37  ;;  %v5277_v0 = vadd.f32 %v5276_v5, %v5275_v17  ;;  %v5388_v23 = vpop.f32.mrf.mxu1  ;;  %v4057_v53 = vsel %vm3863_vm0, %v4025_v12, 0.0 }
 0x26f   :  { %v5389_v46 = vadd.f32 %v5388_v23, %v5387_v41  ;;  %v5278_v11 = vpop.f32.mrf.mxu0 }
 0x270   :  { %3865 = vst.msk [vmem:[%s7568_s2 + $0x8] sm:$0xff] %vm3863_vm0, %v3740_v62  ;;  %v3584_v32 = vadd.f32 %v5277_v0, %v6949_v40  ;;  %v5390_v4 = vpop.f32.mrf.mxu1  ;;  %v4026_v25 = vmul.f32 %v3740_v62, %v3740_v62  ;;  %v3899_v9 = vsel %vm3863_vm0, %v3740_v62, 0.0 }
 0x271   :  { %v5279_v38 = vpop.f32.mrf.mxu0  ;;  %4058 = vadd.xlane.f32.xlu0 %v4057_v53 }
 0x272   :  { %v3745_v1 = vadd.f32 %v5389_v46, %v3584_v32  ;;  %v5280_v16 = vadd.f32 %v5279_v38, %v5278_v11  ;;  %v5391_v10 = vpop.f32.mrf.mxu1  ;;  %v4060_v52 = vsel %vm3863_vm0, %v4026_v25, 0.0 }
 0x273   :  { %v5281_v54 = vpop.f32.mrf.mxu0  ;;  %4061 = vadd.xlane.f32.xlu1 %v4060_v52  ;;  %v5392_v21 = vadd.f32 %v5391_v10, %v5390_v4 }
 0x274   :  { %3866 = vst.msk [vmem:[%s7568_s2 + $0x10] sm:$0xff] %vm3863_vm0, %v3745_v1  ;;  %v3587_v40 = vadd.f32 %v5280_v16, %v6958_v45  ;;  %v5393_v34 = vpop.f32.mrf.mxu1  ;;  %v4027_v42 = vmul.f32 %v3745_v1, %v3745_v1  ;;  %v3902_v58 = vsel %vm3863_vm0, %v3745_v1, 0.0 }
 0x275   :  { %v5282_v30 = vpop.f32.mrf.mxu0  ;;  %3900 = vadd.xlane.f32.xlu0 %v3899_v9 }
 0x276   :  { %v3748_v8 = vadd.f32 %v5392_v21, %v3587_v40  ;;  %v5283_v36 = vadd.f32 %v5282_v30, %v5281_v54  ;;  %v5394_v61 = vpop.f32.mrf.mxu1  ;;  %v4063_v17 = vsel %vm3863_vm0, %v4027_v42, 0.0 }
 0x277   :  { %v5395_v14 = vadd.f32 %v5394_v61, %v5393_v34  ;;  %v5284_v60 = vpop.f32.mrf.mxu0  ;;  %3903 = vadd.xlane.f32.xlu1 %v3902_v58 }
 0x278   :  { %3867 = vst.msk [vmem:[%s7568_s2 + $0x18] sm:$0xff] %vm3863_vm0, %v3748_v8  ;;  %v3592_v45 = vadd.f32 %v5283_v36, %v6967_v18  ;;  %v5396_v3 = vpop.f32.mrf.mxu1  ;;  %v3905_v12 = vsel %vm3863_vm0, %v3748_v8, 0.0  ;;  %v4028_v5 = vmul.f32 %v3748_v8, %v3748_v8 }
 0x279   :  { %v5285_v37 = vpop.f32.mrf.mxu0  ;;  %4064 = vadd.xlane.f32.xlu0 %v4063_v17 }
 0x27a   :  { %v3753_v29 = vadd.f32 %v5395_v14, %v3592_v45  ;;  %v5286_v41 = vadd.f32 %v5285_v37, %v5284_v60  ;;  %v5397_v24 = vpop.f32.mrf.mxu1  ;;  %v4066_v38 = vsel %vm3863_vm0, %v4028_v5, 0.0 }
 0x27b   :  { %v5287_v62 = vpop.f32.mrf.mxu0  ;;  %3906 = vadd.xlane.f32.xlu1 %v3905_v12  ;;  %v5398_v0 = vadd.f32 %v5397_v24, %v5396_v3 }
 0x27c   :  { %3868 = vst.msk [vmem:[%s7568_s2 + $0x20] sm:$0xff] %vm3863_vm0, %v3753_v29  ;;  %v3595_v18 = vadd.f32 %v5286_v41, %v6976_v15  ;;  %v5399_v23 = vpop.f32.mrf.mxu1  ;;  %v3908_v46 = vsel %vm3863_vm0, %v3753_v29, 0.0  ;;  %v4029_v11 = vmul.f32 %v3753_v29, %v3753_v29 }
 0x27d   :  { %v5288_v32 = vpop.f32.mrf.mxu0  ;;  %3909 = vadd.xlane.f32.xlu0 %v3908_v46 }
 0x27e   :  { %v3756_v4 = vadd.f32 %v5398_v0, %v3595_v18  ;;  %v5289_v53 = vadd.f32 %v5288_v32, %v5287_v62  ;;  %v5400_v25 = vpop.f32.mrf.mxu1  ;;  %v4069_v52 = vsel %vm3863_vm0, %v4029_v11, 0.0 }
 0x27f   :  { %v5401_v1 = vadd.f32 %v5400_v25, %v5399_v23  ;;  %v5290_v16 = vpop.f32.mrf.mxu0  ;;  %4067 = vadd.xlane.f32.xlu1 %v4066_v38 }
 0x280   :  { %3869 = vst.msk [vmem:[%s7568_s2 + $0x28] sm:$0xff] %vm3863_vm0, %v3756_v4  ;;  %v3600_v15 = vadd.f32 %v5289_v53, %v6985_v48  ;;  %v5402_v10 = vpop.f32.mrf.mxu1  ;;  %v3911_v9 = vsel %vm3863_vm0, %v3756_v4, 0.0  ;;  %v4030_v42 = vmul.f32 %v3756_v4, %v3756_v4 }
 0x281   :  { %v5291_v54 = vpop.f32.mrf.mxu0  ;;  %4070 = vadd.xlane.f32.xlu0 %v4069_v52 }
 0x282   :  { %v3761_v40 = vadd.f32 %v5401_v1, %v3600_v15  ;;  %v5292_v21 = vadd.f32 %v5291_v54, %v5290_v16  ;;  %v5403_v34 = vpop.f32.mrf.mxu1  ;;  %v4072_v17 = vsel %vm3863_vm0, %v4030_v42, 0.0 }
 0x283   :  { %v5293_v30 = vpop.f32.mrf.mxu0  ;;  %3912 = vadd.xlane.f32.xlu1 %v3911_v9  ;;  %v5404_v8 = vadd.f32 %v5403_v34, %v5402_v10 }
 0x284   :  { %3870 = vst.msk [vmem:[%s7568_s2 + $0x30] sm:$0xff] %vm3863_vm0, %v3761_v40  ;;  %v3603_v48 = vadd.f32 %v5292_v21, %v6994_v55  ;;  %v5405_v36 = vpop.f32.mrf.mxu1  ;;  %v3914_v61 = vsel %vm3863_vm0, %v3761_v40, 0.0  ;;  %v4031_v58 = vmul.f32 %v3761_v40, %v3761_v40 }
 0x285   :  { %v5294_v14 = vpop.f32.mrf.mxu0  ;;  %3915 = vadd.xlane.f32.xlu0 %v3914_v61 }
 0x286   :  { %v3764_v60 = vadd.f32 %v5404_v8, %v3603_v48  ;;  %v5295_v45 = vadd.f32 %v5294_v14, %v5293_v30  ;;  %v5406_v3 = vpop.f32.mrf.mxu1  ;;  %v4075_v24 = vsel %vm3863_vm0, %v4031_v58, 0.0 }
 0x287   :  { %v5407_v37 = vadd.f32 %v5406_v3, %v5405_v36  ;;  %v5296_v29 = vpop.f32.mrf.mxu0  ;;  %4073 = vadd.xlane.f32.xlu1 %v4072_v17 }
 0x288   :  { %3871 = vst.msk [vmem:[%s7568_s2 + $0x38] sm:$0xff] %vm3863_vm0, %v3764_v60  ;;  %v3608_v55 = vadd.f32 %v5295_v45, %v7003_v27  ;;  %v5408_v41 = vpop.f32.mrf.mxu1  ;;  %v3917_v0 = vsel %vm3863_vm0, %v3764_v60, 0.0  ;;  %v4032_v23 = vmul.f32 %v3764_v60, %v3764_v60 }
 0x289   :  { %v5297_v12 = vpop.f32.mrf.mxu0  ;;  %4076 = vadd.xlane.f32.xlu0 %v4075_v24 }
 0x28a   :  { %v3769_v5 = vadd.f32 %v5407_v37, %v3608_v55  ;;  %v5298_v62 = vadd.f32 %v5297_v12, %v5296_v29  ;;  %v5409_v18 = vpop.f32.mrf.mxu1  ;;  %v4078_v15 = vsel %vm3863_vm0, %v4032_v23, 0.0 }
 0x28b   :  { %v5299_v46 = vpop.f32.mrf.mxu0  ;;  %3918 = vadd.xlane.f32.xlu1 %v3917_v0  ;;  %v5410_v11 = vadd.f32 %v5409_v18, %v5408_v41 }
 0x28c   :  { %3872 = vst.msk [vmem:[%s7568_s2 + $0x40] sm:$0xff] %vm3863_vm0, %v3769_v5  ;;  %v3611_v27 = vadd.f32 %v5298_v62, %v7012_v7  ;;  %v5411_v32 = vpop.f32.mrf.mxu1  ;;  %v3920_v4 = vsel %vm3863_vm0, %v3769_v5, 0.0  ;;  %v4033_v53 = vmul.f32 %v3769_v5, %v3769_v5 }
 0x28d   :  { %v5300_v25 = vpop.f32.mrf.mxu0  ;;  %3921 = vadd.xlane.f32.xlu0 %v3920_v4 }
 0x28e   :  { %v3772_v38 = vadd.f32 %v5410_v11, %v3611_v27  ;;  %v5301_v1 = vadd.f32 %v5300_v25, %v5299_v46  ;;  %v5412_v16 = vpop.f32.mrf.mxu1  ;;  %v4081_v40 = vsel %vm3863_vm0, %v4033_v53, 0.0 }
 0x28f   :  { %v5413_v10 = vadd.f32 %v5412_v16, %v5411_v32  ;;  %v5302_v52 = vpop.f32.mrf.mxu0  ;;  %4079 = vadd.xlane.f32.xlu1 %v4078_v15 }
 0x290   :  { %3873 = vst.msk [vmem:[%s7568_s2 + $0x48] sm:$0xff] %vm3863_vm0, %v3772_v38  ;;  %v3616_v7 = vadd.f32 %v5301_v1, %v7021_v20  ;;  %v5414_v54 = vpop.f32.mrf.mxu1  ;;  %v3923_v30 = vsel %vm3863_vm0, %v3772_v38, 0.0  ;;  %v4034_v48 = vmul.f32 %v3772_v38, %v3772_v38 }
 0x291   :  { %v5303_v21 = vpop.f32.mrf.mxu0  ;;  %4082 = vadd.xlane.f32.xlu0 %v4081_v40 }
 0x292   :  { %v3777_v34 = vadd.f32 %v5413_v10, %v3616_v7  ;;  %v5304_v9 = vadd.f32 %v5303_v21, %v5302_v52  ;;  %v5415_v42 = vpop.f32.mrf.mxu1  ;;  %v4084_v37 = vsel %vm3863_vm0, %v4034_v48, 0.0 }
 0x293   :  { %v5305_v8 = vpop.f32.mrf.mxu0  ;;  %3924 = vadd.xlane.f32.xlu1 %v3923_v30  ;;  %v5416_v36 = vadd.f32 %v5415_v42, %v5414_v54 }
 0x294   :  { %3874 = vst.msk [vmem:[%s7568_s2 + $0x50] sm:$0xff] %vm3863_vm0, %v3777_v34  ;;  %v3619_v20 = vadd.f32 %v5304_v9, %v7024_v63  ;;  %v5417_v61 = vpop.f32.mrf.mxu1  ;;  %v3926_v58 = vsel %vm3863_vm0, %v3777_v34, 0.0  ;;  %v4035_v14 = vmul.f32 %v3777_v34, %v3777_v34 }
 0x295   :  { %v5306_v60 = vpop.f32.mrf.mxu0  ;;  %3927 = vadd.xlane.f32.xlu0 %v3926_v58 }
 0x296   :  { %v3780_v45 = vadd.f32 %v5416_v36, %v3619_v20  ;;  %v5307_v3 = vadd.f32 %v5306_v60, %v5305_v8  ;;  %v5418_v17 = vpop.f32.mrf.mxu1  ;;  %v4087_v24 = vsel %vm3863_vm0, %v4035_v14, 0.0 }
 0x297   :  { %v5419_v29 = vadd.f32 %v5418_v17, %v5417_v61  ;;  %v5308_v55 = vpop.f32.mrf.mxu0  ;;  %4085 = vadd.xlane.f32.xlu1 %v4084_v37 }
 0x298   :  { %3875 = vst.msk [vmem:[%s7568_s2 + $0x58] sm:$0xff] %vm3863_vm0, %v3780_v45  ;;  %v3624_v63 = vadd.f32 %v5307_v3, %v7027_v57  ;;  %v5420_v41 = vpop.f32.mrf.mxu1  ;;  %v3929_v0 = vsel %vm3863_vm0, %v3780_v45, 0.0  ;;  %v4036_v23 = vmul.f32 %v3780_v45, %v3780_v45 }
 0x299   :  { %v5309_v12 = vpop.f32.mrf.mxu0  ;;  %4088 = vadd.xlane.f32.xlu0 %v4087_v24 }
 0x29a   :  { %v3785_v5 = vadd.f32 %v5419_v29, %v3624_v63  ;;  %v5310_v62 = vadd.f32 %v5309_v12, %v5308_v55  ;;  %v5421_v18 = vpop.f32.mrf.mxu1  ;;  %v4090_v16 = vsel %vm3863_vm0, %v4036_v23, 0.0 }
 0x29b   :  { %v5311_v46 = vpop.f32.mrf.mxu0  ;;  %3930 = vadd.xlane.f32.xlu1 %v3929_v0  ;;  %v5422_v27 = vadd.f32 %v5421_v18, %v5420_v41 }
 0x29c   :  { %3876 = vst.msk [vmem:[%s7568_s2 + $0x60] sm:$0xff] %vm3863_vm0, %v3785_v5  ;;  %v3627_v57 = vadd.f32 %v5310_v62, %v7030_v33  ;;  %v5423_v11 = vpop.f32.mrf.mxu1  ;;  %v3932_v32 = vsel %vm3863_vm0, %v3785_v5, 0.0  ;;  %v4037_v4 = vmul.f32 %v3785_v5, %v3785_v5 }
 0x29d   :  { %v5312_v53 = vpop.f32.mrf.mxu0  ;;  %3933 = vadd.xlane.f32.xlu0 %v3932_v32 }
 0x29e   :  { %v3788_v25 = vadd.f32 %v5422_v27, %v3627_v57  ;;  %v5313_v38 = vadd.f32 %v5312_v53, %v5311_v46  ;;  %v5424_v1 = vpop.f32.mrf.mxu1  ;;  %v4093_v7 = vsel %vm3863_vm0, %v4037_v4, 0.0 }
 0x29f   :  { %v5425_v15 = vadd.f32 %v5424_v1, %v5423_v11  ;;  %v5314_v10 = vpop.f32.mrf.mxu0  ;;  %4091 = vadd.xlane.f32.xlu1 %v4090_v16 }
 0x2a0   :  { %3877 = vst.msk [vmem:[%s7568_s2 + $0x68] sm:$0xff] %vm3863_vm0, %v3788_v25  ;;  %v3632_v33 = vadd.f32 %v5313_v38, %v7033_v44  ;;  %v5426_v52 = vpop.f32.mrf.mxu1  ;;  %v3935_v9 = vsel %vm3863_vm0, %v3788_v25, 0.0  ;;  %v4038_v42 = vmul.f32 %v3788_v25, %v3788_v25 }
 0x2a1   :  { %v5315_v54 = vpop.f32.mrf.mxu0  ;;  %4094 = vadd.xlane.f32.xlu0 %v4093_v7 }
 0x2a2   :  { %v3793_v40 = vadd.f32 %v5425_v15, %v3632_v33  ;;  %v5316_v21 = vadd.f32 %v5315_v54, %v5314_v10  ;;  %v5427_v34 = vpop.f32.mrf.mxu1  ;;  %v4096_v45 = vsel %vm3863_vm0, %v4038_v42, 0.0 }
 0x2a3   :  { %v5317_v30 = vpop.f32.mrf.mxu0  ;;  %3936 = vadd.xlane.f32.xlu1 %v3935_v9  ;;  %v5428_v48 = vadd.f32 %v5427_v34, %v5426_v52 }
 0x2a4   :  { %3878 = vst.msk [vmem:[%s7568_s2 + $0x70] sm:$0xff] %vm3863_vm0, %v3793_v40  ;;  %v3635_v44 = vadd.f32 %v5316_v21, %v7036_v49  ;;  %v5429_v8 = vpop.f32.mrf.mxu1  ;;  %v3938_v20 = vsel %vm3863_vm0, %v3793_v40, 0.0  ;;  %v4039_v36 = vmul.f32 %v3793_v40, %v3793_v40 }
 0x2a5   :  { %v5318_v61 = vpop.f32.mrf.mxu0  ;;  %3939 = vadd.xlane.f32.xlu0 %v3938_v20 }
 0x2a6   :  { %v3796_v58 = vadd.f32 %v5428_v48, %v3635_v44  ;;  %v5319_v14 = vadd.f32 %v5318_v61, %v5317_v30  ;;  %v5430_v60 = vpop.f32.mrf.mxu1  ;;  %v4099_v29 = vsel %vm3863_vm0, %v4039_v36, 0.0 }
 0x2a7   :  { %v5431_v3 = vadd.f32 %v5430_v60, %v5429_v8  ;;  %v5320_v17 = vpop.f32.mrf.mxu0  ;;  %4097 = vadd.xlane.f32.xlu1 %v4096_v45 }
 0x2a8   :  { %3879 = vst.msk [vmem:[%s7568_s2 + $0x78] sm:$0xff] %vm3863_vm0, %v3796_v58  ;;  %v3640_v49 = vadd.f32 %v5319_v14, %v7039_v19  ;;  %v5432_v37 = vpop.f32.mrf.mxu1  ;;  %v3941_v12 = vsel %vm3863_vm0, %v3796_v58, 0.0  ;;  %v4040_v5 = vmul.f32 %v3796_v58, %v3796_v58 }
 0x2a9   :  { %v5321_v55 = vpop.f32.mrf.mxu0  ;;  %4100 = vadd.xlane.f32.xlu0 %v4099_v29 }
 0x2aa   :  { %v3801_v63 = vadd.f32 %v5431_v3, %v3640_v49  ;;  %v5322_v41 = vadd.f32 %v5321_v55, %v5320_v17  ;;  %v5433_v24 = vpop.f32.mrf.mxu1  ;;  %v4102_v4 = vsel %vm3863_vm0, %v4040_v5, 0.0 }
 0x2ab   :  { %v5323_v62 = vpop.f32.mrf.mxu0  ;;  %3942 = vadd.xlane.f32.xlu1 %v3941_v12  ;;  %v5434_v18 = vadd.f32 %v5433_v24, %v5432_v37 }
 0x2ac   :  { %3880 = vst.msk [vmem:[%s7568_s2 + $0x80] sm:$0xff] %vm3863_vm0, %v3801_v63  ;;  %v3643_v19 = vadd.f32 %v5322_v41, %v7042_v28  ;;  %v5435_v0 = vpop.f32.mrf.mxu1  ;;  %v3944_v23 = vsel %vm3863_vm0, %v3801_v63, 0.0  ;;  %v4041_v46 = vmul.f32 %v3801_v63, %v3801_v63 }
 0x2ad   :  { %v5324_v57 = vpop.f32.mrf.mxu0  ;;  %3945 = vadd.xlane.f32.xlu0 %v3944_v23 }
 0x2ae   :  { %v3804_v27 = vadd.f32 %v5434_v18, %v3643_v19  ;;  %v5325_v11 = vadd.f32 %v5324_v57, %v5323_v62  ;;  %v5436_v32 = vpop.f32.mrf.mxu1  ;;  %v4105_v1 = vsel %vm3863_vm0, %v4041_v46, 0.0 }
 0x2af   :  { %v5437_v53 = vadd.f32 %v5436_v32, %v5435_v0  ;;  %v5326_v25 = vpop.f32.mrf.mxu0  ;;  %4103 = vadd.xlane.f32.xlu1 %v4102_v4 }
 0x2b0   :  { %3881 = vst.msk [vmem:[%s7568_s2 + $0x88] sm:$0xff] %vm3863_vm0, %v3804_v27  ;;  %v3648_v28 = vadd.f32 %v5325_v11, %v7045_v51  ;;  %v5438_v38 = vpop.f32.mrf.mxu1  ;;  %v3947_v52 = vsel %vm3863_vm0, %v3804_v27, 0.0  ;;  %v4042_v7 = vmul.f32 %v3804_v27, %v3804_v27 }
 0x2b1   :  { %v5327_v16 = vpop.f32.mrf.mxu0  ;;  %4106 = vadd.xlane.f32.xlu0 %v4105_v1 }
 0x2b2   :  { %v3809_v15 = vadd.f32 %v5437_v53, %v3648_v28  ;;  %v5328_v10 = vadd.f32 %v5327_v16, %v5326_v25  ;;  %v5439_v33 = vpop.f32.mrf.mxu1  ;;  %v4108_v8 = vsel %vm3863_vm0, %v4042_v7, 0.0 }
 0x2b3   :  { %v5329_v54 = vpop.f32.mrf.mxu0  ;;  %3948 = vadd.xlane.f32.xlu1 %v3947_v52  ;;  %v5440_v40 = vadd.f32 %v5439_v33, %v5438_v38 }
 0x2b4   :  { %3882 = vst.msk [vmem:[%s7568_s2 + $0x90] sm:$0xff] %vm3863_vm0, %v3809_v15  ;;  %v3651_v51 = vadd.f32 %v5328_v10, %v7048_v35  ;;  %v5441_v21 = vpop.f32.mrf.mxu1  ;;  %v3950_v34 = vsel %vm3863_vm0, %v3809_v15, 0.0  ;;  %v4043_v9 = vmul.f32 %v3809_v15, %v3809_v15 }
 0x2b5   :  { %v5330_v42 = vpop.f32.mrf.mxu0  ;;  %3951 = vadd.xlane.f32.xlu0 %v3950_v34 }
 0x2b6   :  { %v3812_v30 = vadd.f32 %v5440_v40, %v3651_v51  ;;  %v5331_v44 = vadd.f32 %v5330_v42, %v5329_v54  ;;  %v5442_v48 = vpop.f32.mrf.mxu1  ;;  %v4111_v58 = vsel %vm3863_vm0, %v4043_v9, 0.0 }
 0x2b7   :  { %v5443_v20 = vadd.f32 %v5442_v48, %v5441_v21  ;;  %v5332_v36 = vpop.f32.mrf.mxu0  ;;  %4109 = vadd.xlane.f32.xlu1 %v4108_v8 }
 0x2b8   :  { %3883 = vst.msk [vmem:[%s7568_s2 + $0x98] sm:$0xff] %vm3863_vm0, %v3812_v30  ;;  %v3656_v35 = vadd.f32 %v5331_v44, %v7051_v43  ;;  %v5444_v61 = vpop.f32.mrf.mxu1  ;;  %v3953_v17 = vsel %vm3863_vm0, %v3812_v30, 0.0  ;;  %v4044_v49 = vmul.f32 %v3812_v30, %v3812_v30 }
 0x2b9   :  { %v5333_v14 = vpop.f32.mrf.mxu0  ;;  %4112 = vadd.xlane.f32.xlu0 %v4111_v58 }
 0x2ba   :  { %v3817_v60 = vadd.f32 %v5443_v20, %v3656_v35  ;;  %v5334_v45 = vadd.f32 %v5333_v14, %v5332_v36  ;;  %v5445_v3 = vpop.f32.mrf.mxu1  ;;  %v4114_v19 = vsel %vm3863_vm0, %v4044_v49, 0.0 }
 0x2bb   :  { %v5335_v37 = vpop.f32.mrf.mxu0  ;;  %3954 = vadd.xlane.f32.xlu1 %v3953_v17  ;;  %v5446_v29 = vadd.f32 %v5445_v3, %v5444_v61 }
 0x2bc   :  { %3884 = vst.msk [vmem:[%s7568_s2 + $0xa0] sm:$0xff] %vm3863_vm0, %v3817_v60  ;;  %v3659_v43 = vadd.f32 %v5334_v45, %v7054_v59  ;;  %v5447_v55 = vpop.f32.mrf.mxu1  ;;  %v3956_v63 = vsel %vm3863_vm0, %v3817_v60, 0.0  ;;  %v4045_v41 = vmul.f32 %v3817_v60, %v3817_v60 }
 0x2bd   :  { %v5336_v24 = vpop.f32.mrf.mxu0  ;;  %3957 = vadd.xlane.f32.xlu0 %v3956_v63 }
 0x2be   :  { %v3820_v12 = vadd.f32 %v5446_v29, %v3659_v43  ;;  %v5337_v5 = vadd.f32 %v5336_v24, %v5335_v37  ;;  %v5448_v62 = vpop.f32.mrf.mxu1  ;;  %v4117_v46 = vsel %vm3863_vm0, %v4045_v41, 0.0 }
 0x2bf   :  { %v5449_v18 = vadd.f32 %v5448_v62, %v5447_v55  ;;  %v5338_v0 = vpop.f32.mrf.mxu0  ;;  %4115 = vadd.xlane.f32.xlu1 %v4114_v19 }
 0x2c0   :  { %3885 = vst.msk [vmem:[%s7568_s2 + $0xa8] sm:$0xff] %vm3863_vm0, %v3820_v12  ;;  %v3664_v59 = vadd.f32 %v5337_v5, %v7057_v2  ;;  %v5450_v23 = vpop.f32.mrf.mxu1  ;;  %v3959_v4 = vsel %vm3863_vm0, %v3820_v12, 0.0  ;;  %v4046_v53 = vmul.f32 %v3820_v12, %v3820_v12 }
 0x2c1   :  { %v5339_v57 = vpop.f32.mrf.mxu0  ;;  %4118 = vadd.xlane.f32.xlu0 %v4117_v46 }
 0x2c2   :  { %v3825_v27 = vadd.f32 %v5449_v18, %v3664_v59  ;;  %v5340_v11 = vadd.f32 %v5339_v57, %v5338_v0  ;;  %v5451_v32 = vpop.f32.mrf.mxu1  ;;  %v4120_v7 = vsel %vm3863_vm0, %v4046_v53, 0.0 }
 0x2c3   :  { %v5341_v25 = vpop.f32.mrf.mxu0  ;;  %3960 = vadd.xlane.f32.xlu1 %v3959_v4  ;;  %v5452_v28 = vadd.f32 %v5451_v32, %v5450_v23 }
 0x2c4   :  { %3886 = vst.msk [vmem:[%s7568_s2 + $0xb0] sm:$0xff] %vm3863_vm0, %v3825_v27  ;;  %v3667_v2 = vadd.f32 %v5340_v11, %v7060_v22  ;;  %v5453_v38 = vpop.f32.mrf.mxu1  ;;  %v3962_v1 = vsel %vm3863_vm0, %v3825_v27, 0.0  ;;  %v4047_v16 = vmul.f32 %v3825_v27, %v3825_v27 }
 0x2c5   :  { %v5342_v15 = vpop.f32.mrf.mxu0  ;;  %3963 = vadd.xlane.f32.xlu0 %v3962_v1 }
 0x2c6   :  { %v3828_v10 = vadd.f32 %v5452_v28, %v3667_v2  ;;  %v5343_v33 = vadd.f32 %v5342_v15, %v5341_v25  ;;  %v5454_v52 = vpop.f32.mrf.mxu1  ;;  %v4123_v21 = vsel %vm3863_vm0, %v4047_v16, 0.0 }
 0x2c7   :  { %v5455_v54 = vadd.f32 %v5454_v52, %v5453_v38  ;;  %v5344_v51 = vpop.f32.mrf.mxu0  ;;  %4121 = vadd.xlane.f32.xlu1 %v4120_v7 }
 0x2c8   :  { %3887 = vst.msk [vmem:[%s7568_s2 + $0xb8] sm:$0xff] %vm3863_vm0, %v3828_v10  ;;  %v3672_v22 = vadd.f32 %v5343_v33, %v7063_v26  ;;  %v5456_v40 = vpop.f32.mrf.mxu1  ;;  %v3965_v44 = vsel %vm3863_vm0, %v3828_v10, 0.0  ;;  %v4048_v48 = vmul.f32 %v3828_v10, %v3828_v10 }
 0x2c9   :  { %v5345_v34 = vpop.f32.mrf.mxu0  ;;  %4124 = vadd.xlane.f32.xlu0 %v4123_v21 }
 0x2ca   :  { %v3833_v9 = vadd.f32 %v5455_v54, %v3672_v22  ;;  %v5346_v42 = vadd.f32 %v5345_v34, %v5344_v51  ;;  %v5457_v30 = vpop.f32.mrf.mxu1  ;;  %v4126_v3 = vsel %vm3863_vm0, %v4048_v48, 0.0 }
 0x2cb   :  { %v5347_v8 = vpop.f32.mrf.mxu0  ;;  %3966 = vadd.xlane.f32.xlu1 %v3965_v44  ;;  %v5458_v20 = vadd.f32 %v5457_v30, %v5456_v40 }
 0x2cc   :  { %3888 = vst.msk [vmem:[%s7568_s2 + $0xc0] sm:$0xff] %vm3863_vm0, %v3833_v9  ;;  %v3675_v26 = vadd.f32 %v5346_v42, %v7066_v56  ;;  %v5459_v36 = vpop.f32.mrf.mxu1  ;;  %v3968_v35 = vsel %vm3863_vm0, %v3833_v9, 0.0  ;;  %v4049_v61 = vmul.f32 %v3833_v9, %v3833_v9 }
 0x2cd   :  { %v5348_v58 = vpop.f32.mrf.mxu0  ;;  %3969 = vadd.xlane.f32.xlu0 %v3968_v35 }
 0x2ce   :  { %v3836_v14 = vadd.f32 %v5458_v20, %v3675_v26  ;;  %v5349_v60 = vadd.f32 %v5348_v58, %v5347_v8  ;;  %v5460_v45 = vpop.f32.mrf.mxu1  ;;  %v4129_v43 = vsel %vm3863_vm0, %v4049_v61, 0.0 }
 0x2cf   :  { %v5461_v17 = vadd.f32 %v5460_v45, %v5459_v36  ;;  %v5350_v49 = vpop.f32.mrf.mxu0  ;;  %4127 = vadd.xlane.f32.xlu1 %v4126_v3 }
 0x2d0   :  { %3889 = vst.msk [vmem:[%s7568_s2 + $0xc8] sm:$0xff] %vm3863_vm0, %v3836_v14  ;;  %v3680_v56 = vadd.f32 %v5349_v60, %v7069_v50  ;;  %v5462_v37 = vpop.f32.mrf.mxu1  ;;  %v3971_v24 = vsel %vm3863_vm0, %v3836_v14, 0.0  ;;  %v4050_v12 = vmul.f32 %v3836_v14, %v3836_v14 }
 0x2d1   :  { %v5351_v29 = vpop.f32.mrf.mxu0  ;;  %4130 = vadd.xlane.f32.xlu0 %v4129_v43 }
 0x2d2   :  { %v3841_v55 = vadd.f32 %v5461_v17, %v3680_v56  ;;  %v5352_v63 = vadd.f32 %v5351_v29, %v5350_v49  ;;  %v5463_v41 = vpop.f32.mrf.mxu1  ;;  %v4132_v27 = vsel %vm3863_vm0, %v4050_v12, 0.0 }
 0x2d3   :  { %v5353_v5 = vpop.f32.mrf.mxu0  ;;  %3972 = vadd.xlane.f32.xlu1 %v3971_v24  ;;  %v5464_v62 = vadd.f32 %v5463_v41, %v5462_v37 }
 0x2d4   :  { %3890 = vst.msk [vmem:[%s7568_s2 + $0xd0] sm:$0xff] %vm3863_vm0, %v3841_v55  ;;  %v3683_v50 = vadd.f32 %v5352_v63, %v7072_v31  ;;  %v5465_v19 = vpop.f32.mrf.mxu1  ;;  %v3974_v18 = vsel %vm3863_vm0, %v3841_v55, 0.0  ;;  %v4051_v0 = vmul.f32 %v3841_v55, %v3841_v55 }
 0x2d5   :  { %v5354_v59 = vpop.f32.mrf.mxu0  ;;  %3975 = vadd.xlane.f32.xlu0 %v3974_v18 }
 0x2d6   :  { %v3844_v23 = vadd.f32 %v5464_v62, %v3683_v50  ;;  %v5355_v46 = vadd.f32 %v5354_v59, %v5353_v5  ;;  %v5466_v57 = vpop.f32.mrf.mxu1  ;;  %v4135_v53 = vsel %vm3863_vm0, %v4051_v0, 0.0 }
 0x2d7   :  { %v5467_v11 = vadd.f32 %v5466_v57, %v5465_v19  ;;  %v5356_v32 = vpop.f32.mrf.mxu0  ;;  %4133 = vadd.xlane.f32.xlu1 %v4132_v27 }
 0x2d8   :  { %3891 = vst.msk [vmem:[%s7568_s2 + $0xd8] sm:$0xff] %vm3863_vm0, %v3844_v23  ;;  %v3688_v31 = vadd.f32 %v5355_v46, %v7075_v13  ;;  %v5468_v4 = vpop.f32.mrf.mxu1  ;;  %v3977_v1 = vsel %vm3863_vm0, %v3844_v23, 0.0  ;;  %v4052_v16 = vmul.f32 %v3844_v23, %v3844_v23 }
 0x2d9   :  { %v5357_v25 = vpop.f32.mrf.mxu0  ;;  %4136 = vadd.xlane.f32.xlu0 %v4135_v53 }
 0x2da   :  { %v3849_v2 = vadd.f32 %v5467_v11, %v3688_v31  ;;  %v5358_v28 = vadd.f32 %v5357_v25, %v5356_v32  ;;  %v5469_v38 = vpop.f32.mrf.mxu1  ;;  %v4138_v21 = vsel %vm3863_vm0, %v4052_v16, 0.0 }
 0x2db   :  { %v5359_v15 = vpop.f32.mrf.mxu0  ;;  %3978 = vadd.xlane.f32.xlu1 %v3977_v1  ;;  %v5470_v10 = vadd.f32 %v5469_v38, %v5468_v4 }
 0x2dc   :  { %3892 = vst.msk [vmem:[%s7568_s2 + $0xe0] sm:$0xff] %vm3863_vm0, %v3849_v2  ;;  %v3691_v13 = vadd.f32 %v5358_v28, %v7078_v6  ;;  %v5471_v33 = vpop.f32.mrf.mxu1  ;;  %v3980_v52 = vsel %vm3863_vm0, %v3849_v2, 0.0  ;;  %v4053_v7 = vmul.f32 %v3849_v2, %v3849_v2 }
 0x2dd   :  { %v5360_v54 = vpop.f32.mrf.mxu0  ;;  %3981 = vadd.xlane.f32.xlu0 %v3980_v52 }
 0x2de   :  { %v3852_v51 = vadd.f32 %v5470_v10, %v3691_v13  ;;  %v5361_v22 = vadd.f32 %v5360_v54, %v5359_v15  ;;  %v5472_v40 = vpop.f32.mrf.mxu1  ;;  %v4141_v30 = vsel %vm3863_vm0, %v4053_v7, 0.0 }
 0x2df   :  { %v5473_v34 = vadd.f32 %v5472_v40, %v5471_v33  ;;  %v5362_v9 = vpop.f32.mrf.mxu0  ;;  %4139 = vadd.xlane.f32.xlu1 %v4138_v21 }
 0x2e0   :  { %3893 = vst.msk [vmem:[%s7568_s2 + $0xe8] sm:$0xff] %vm3863_vm0, %v3852_v51  ;;  %v3696_v6 = vadd.f32 %v5361_v22, %v7081_v39  ;;  %v5474_v42 = vpop.f32.mrf.mxu1  ;;  %v3983_v20 = vsel %vm3863_vm0, %v3852_v51, 0.0  ;;  %v4054_v36 = vmul.f32 %v3852_v51, %v3852_v51 }
 0x2e1   :  { %v5363_v44 = vpop.f32.mrf.mxu0  ;;  %4142 = vadd.xlane.f32.xlu0 %v4141_v30 }
 0x2e2   :  { %v3857_v48 = vadd.f32 %v5473_v34, %v3696_v6  ;;  %v5364_v8 = vadd.f32 %v5363_v44, %v5362_v9  ;;  %v5475_v26 = vpop.f32.mrf.mxu1  ;;  %v4144_v60 = vsel %vm3863_vm0, %v4054_v36, 0.0 }
 0x2e3   :  { %3984 = vadd.xlane.f32.xlu1 %v3983_v20  ;;  %v5476_v39 = vadd.f32 %v5475_v26, %v5474_v42 }
 0x2e4   :  { %3894 = vst.msk [vmem:[%s7568_s2 + $0xf0] sm:$0xff] %vm3863_vm0, %v3857_v48  ;;  %v3699_v35 = vadd.f32 %v5364_v8, %v7084_v47  ;;  %v3986_v61 = vsel %vm3863_vm0, %v3857_v48, 0.0  ;;  %v4055_v58 = vmul.f32 %v3857_v48, %v3857_v48 }
 0x2e5   :  { %3987 = vadd.xlane.f32.xlu0 %v3986_v61 }
 0x2e6   :  { %v3860_v14 = vadd.f32 %v5476_v39, %v3699_v35  ;;  %v4147_v45 = vsel %vm3863_vm0, %v4055_v58, 0.0 }
 0x2e7   :  { %4145 = vadd.xlane.f32.xlu1 %v4144_v60 }
 0x2e8   :  { %3895 = vst.msk [vmem:[%s7568_s2 + $0xf8] sm:$0xff] %vm3863_vm0, %v3860_v14  ;;  %v3989_v3 = vsel %vm3863_vm0, %v3860_v14, 0.0  ;;  %v4056_v47 = vmul.f32 %v3860_v14, %v3860_v14 }
 0x2e9   :  { %4148 = vadd.xlane.f32.xlu0 %v4147_v45 }
 0x2ea   :  { %v4150_v17 = vsel %vm3863_vm0, %v4056_v47, 0.0 }
 0x2eb   :  { %3990 = vadd.xlane.f32.xlu1 %v3989_v3 }
 0x2ef   :  { %4151 = vadd.xlane.f32.xlu1 %v4150_v17 }
 0x2f6   :  { %v3898_v49 = vpop.xlane.xlu0 %3897 }
 0x2f7   :  { %3993 = vst.msk [vmem:[%s7569_s3] sm:$0xff] %vm3992_vm1, %v3898_v49 }
 0x2fa   :  { %v4059_v56 = vpop.xlane.xlu0 %4058 }
 0x2fb   :  { %4153 = vst.msk [vmem:[%s7570_s4] sm:$0xff] %vm3992_vm1, %v4059_v56 }
 0x2fc   :  { %v4062_v37 = vpop.xlane.xlu1 %4061 }
 0x2fd   :  { %4154 = vst.msk [vmem:[%s7570_s4 + $0x8] sm:$0xff] %vm3992_vm1, %v4062_v37 }
 0x2fe   :  { %v3901_v43 = vpop.xlane.xlu0 %3900 }
 0x2ff   :  { %3994 = vst.msk [vmem:[%s7569_s3 + $0x8] sm:$0xff] %vm3992_vm1, %v3901_v43 }
 0x300   :  { %v3904_v29 = vpop.xlane.xlu1 %3903 }
 0x301   :  { %3995 = vst.msk [vmem:[%s7569_s3 + $0x10] sm:$0xff] %vm3992_vm1, %v3904_v29 }
 0x302   :  { %v4065_v55 = vpop.xlane.xlu0 %4064 }
 0x303   :  { %4155 = vst.msk [vmem:[%s7570_s4 + $0x10] sm:$0xff] %vm3992_vm1, %v4065_v55 }
 0x304   :  { %v3907_v63 = vpop.xlane.xlu1 %3906 }
 0x305   :  { %3996 = vst.msk [vmem:[%s7569_s3 + $0x18] sm:$0xff] %vm3992_vm1, %v3907_v63 }
 0x306   :  { %v3910_v41 = vpop.xlane.xlu0 %3909 }
 0x307   :  { %3997 = vst.msk [vmem:[%s7569_s3 + $0x20] sm:$0xff] %vm3992_vm1, %v3910_v41 }
 0x308   :  { %v4068_v24 = vpop.xlane.xlu1 %4067 }
 0x309   :  { %4156 = vst.msk [vmem:[%s7570_s4 + $0x18] sm:$0xff] %vm3992_vm1, %v4068_v24 }
 0x30a   :  { %v4071_v12 = vpop.xlane.xlu0 %4070 }
 0x30b   :  { %4157 = vst.msk [vmem:[%s7570_s4 + $0x20] sm:$0xff] %vm3992_vm1, %v4071_v12 }
 0x30c   :  { %v3913_v5 = vpop.xlane.xlu1 %3912 }
 0x30d   :  { %3998 = vst.msk [vmem:[%s7569_s3 + $0x28] sm:$0xff] %vm3992_vm1, %v3913_v5 }
 0x30e   :  { %v3916_v50 = vpop.xlane.xlu0 %3915 }
 0x30f   :  { %3999 = vst.msk [vmem:[%s7569_s3 + $0x30] sm:$0xff] %vm3992_vm1, %v3916_v50 }
 0x310   :  { %v4074_v62 = vpop.xlane.xlu1 %4073 }
 0x311   :  { %4158 = vst.msk [vmem:[%s7570_s4 + $0x28] sm:$0xff] %vm3992_vm1, %v4074_v62 }
 0x312   :  { %v4077_v19 = vpop.xlane.xlu0 %4076 }
 0x313   :  { %4159 = vst.msk [vmem:[%s7570_s4 + $0x30] sm:$0xff] %vm3992_vm1, %v4077_v19 }
 0x314   :  { %v3919_v18 = vpop.xlane.xlu1 %3918 }
 0x315   :  { %4000 = vst.msk [vmem:[%s7569_s3 + $0x38] sm:$0xff] %vm3992_vm1, %v3919_v18 }
 0x316   :  { %v3922_v0 = vpop.xlane.xlu0 %3921 }
 0x317   :  { %4001 = vst.msk [vmem:[%s7569_s3 + $0x40] sm:$0xff] %vm3992_vm1, %v3922_v0 }
 0x318   :  { %v4080_v59 = vpop.xlane.xlu1 %4079 }
 0x319   :  { %4160 = vst.msk [vmem:[%s7570_s4 + $0x38] sm:$0xff] %vm3992_vm1, %v4080_v59 }
 0x31a   :  { %v4083_v23 = vpop.xlane.xlu0 %4082 }
 0x31b   :  { %4161 = vst.msk [vmem:[%s7570_s4 + $0x40] sm:$0xff] %vm3992_vm1, %v4083_v23 }
 0x31c   :  { %v3925_v46 = vpop.xlane.xlu1 %3924 }
 0x31d   :  { %4002 = vst.msk [vmem:[%s7569_s3 + $0x48] sm:$0xff] %vm3992_vm1, %v3925_v46 }
 0x31e   :  { %v3928_v57 = vpop.xlane.xlu0 %3927 }
 0x31f   :  { %4003 = vst.msk [vmem:[%s7569_s3 + $0x50] sm:$0xff] %vm3992_vm1, %v3928_v57 }
 0x320   :  { %v4086_v27 = vpop.xlane.xlu1 %4085 }
 0x321   :  { %4162 = vst.msk [vmem:[%s7570_s4 + $0x48] sm:$0xff] %vm3992_vm1, %v4086_v27 }
 0x322   :  { %v4089_v11 = vpop.xlane.xlu0 %4088 }
 0x323   :  { %4163 = vst.msk [vmem:[%s7570_s4 + $0x50] sm:$0xff] %vm3992_vm1, %v4089_v11 }
 0x324   :  { %v3931_v32 = vpop.xlane.xlu1 %3930 }
 0x325   :  { %4004 = vst.msk [vmem:[%s7569_s3 + $0x58] sm:$0xff] %vm3992_vm1, %v3931_v32 }
 0x326   :  { %v3934_v31 = vpop.xlane.xlu0 %3933 }
 0x327   :  { %4005 = vst.msk [vmem:[%s7569_s3 + $0x60] sm:$0xff] %vm3992_vm1, %v3934_v31 }
 0x328   :  { %v4092_v4 = vpop.xlane.xlu1 %4091 }
 0x329   :  { %4164 = vst.msk [vmem:[%s7570_s4 + $0x58] sm:$0xff] %vm3992_vm1, %v4092_v4 }
 0x32a   :  { %v4095_v53 = vpop.xlane.xlu0 %4094 }
 0x32b   :  { %4165 = vst.msk [vmem:[%s7570_s4 + $0x60] sm:$0xff] %vm3992_vm1, %v4095_v53 }
 0x32c   :  { %v3937_v25 = vpop.xlane.xlu1 %3936 }
 0x32d   :  { %4006 = vst.msk [vmem:[%s7569_s3 + $0x68] sm:$0xff] %vm3992_vm1, %v3937_v25 }
 0x32e   :  { %v3940_v2 = vpop.xlane.xlu0 %3939 }
 0x32f   :  { %4007 = vst.msk [vmem:[%s7569_s3 + $0x70] sm:$0xff] %vm3992_vm1, %v3940_v2 }
 0x330   :  { %v4098_v28 = vpop.xlane.xlu1 %4097 }
 0x331   :  { %4166 = vst.msk [vmem:[%s7570_s4 + $0x68] sm:$0xff] %vm3992_vm1, %v4098_v28 }
 0x332   :  { %v4101_v38 = vpop.xlane.xlu0 %4100 }
 0x333   :  { %4167 = vst.msk [vmem:[%s7570_s4 + $0x70] sm:$0xff] %vm3992_vm1, %v4101_v38 }
 0x334   :  { %v3943_v1 = vpop.xlane.xlu1 %3942 }
 0x335   :  { %4008 = vst.msk [vmem:[%s7569_s3 + $0x78] sm:$0xff] %vm3992_vm1, %v3943_v1 }
 0x336   :  { %v3946_v16 = vpop.xlane.xlu0 %3945 }
 0x337   :  { %4009 = vst.msk [vmem:[%s7569_s3 + $0x80] sm:$0xff] %vm3992_vm1, %v3946_v16 }
 0x338   :  { %v4104_v15 = vpop.xlane.xlu1 %4103 }
 0x339   :  { %4168 = vst.msk [vmem:[%s7570_s4 + $0x78] sm:$0xff] %vm3992_vm1, %v4104_v15 }
 0x33a   :  { %v4107_v13 = vpop.xlane.xlu0 %4106 }
 0x33b   :  { %4169 = vst.msk [vmem:[%s7570_s4 + $0x80] sm:$0xff] %vm3992_vm1, %v4107_v13 }
 0x33c   :  { %v3949_v10 = vpop.xlane.xlu1 %3948 }
 0x33d   :  { %4010 = vst.msk [vmem:[%s7569_s3 + $0x88] sm:$0xff] %vm3992_vm1, %v3949_v10 }
 0x33e   :  { %v3952_v33 = vpop.xlane.xlu0 %3951 }
 0x33f   :  { %4011 = vst.msk [vmem:[%s7569_s3 + $0x90] sm:$0xff] %vm3992_vm1, %v3952_v33 }
 0x340   :  { %v4110_v52 = vpop.xlane.xlu1 %4109 }
 0x341   :  { %4170 = vst.msk [vmem:[%s7570_s4 + $0x88] sm:$0xff] %vm3992_vm1, %v4110_v52 }
 0x342   :  { %v4113_v7 = vpop.xlane.xlu0 %4112 }
 0x343   :  { %4171 = vst.msk [vmem:[%s7570_s4 + $0x90] sm:$0xff] %vm3992_vm1, %v4113_v7 }
 0x344   :  { %v3955_v54 = vpop.xlane.xlu1 %3954 }
 0x345   :  { %4012 = vst.msk [vmem:[%s7569_s3 + $0x98] sm:$0xff] %vm3992_vm1, %v3955_v54 }
 0x346   :  { %v3958_v51 = vpop.xlane.xlu0 %3957 }
 0x347   :  { %4013 = vst.msk [vmem:[%s7569_s3 + $0xa0] sm:$0xff] %vm3992_vm1, %v3958_v51 }
 0x348   :  { %v4116_v22 = vpop.xlane.xlu1 %4115 }
 0x349   :  { %4172 = vst.msk [vmem:[%s7570_s4 + $0x98] sm:$0xff] %vm3992_vm1, %v4116_v22 }
 0x34a   :  { %v4119_v40 = vpop.xlane.xlu0 %4118 }
 0x34b   :  { %4173 = vst.msk [vmem:[%s7570_s4 + $0xa0] sm:$0xff] %vm3992_vm1, %v4119_v40 }
 0x34c   :  { %v3961_v21 = vpop.xlane.xlu1 %3960 }
 0x34d   :  { %4014 = vst.msk [vmem:[%s7569_s3 + $0xa8] sm:$0xff] %vm3992_vm1, %v3961_v21 }
 0x34e   :  { %v3964_v34 = vpop.xlane.xlu0 %3963 }
 0x34f   :  { %4015 = vst.msk [vmem:[%s7569_s3 + $0xb0] sm:$0xff] %vm3992_vm1, %v3964_v34 }
 0x350   :  { %v4122_v9 = vpop.xlane.xlu1 %4121 }
 0x351   :  { %4174 = vst.msk [vmem:[%s7570_s4 + $0xa8] sm:$0xff] %vm3992_vm1, %v4122_v9 }
 0x352   :  { %v4125_v6 = vpop.xlane.xlu0 %4124 }
 0x353   :  { %4175 = vst.msk [vmem:[%s7570_s4 + $0xb0] sm:$0xff] %vm3992_vm1, %v4125_v6 }
 0x354   :  { %v3967_v42 = vpop.xlane.xlu1 %3966 }
 0x355   :  { %4016 = vst.msk [vmem:[%s7569_s3 + $0xb8] sm:$0xff] %vm3992_vm1, %v3967_v42 }
 0x356   :  { %v3970_v30 = vpop.xlane.xlu0 %3969 }
 0x357   :  { %4017 = vst.msk [vmem:[%s7569_s3 + $0xc0] sm:$0xff] %vm3992_vm1, %v3970_v30 }
 0x358   :  { %v4128_v44 = vpop.xlane.xlu1 %4127 }
 0x359   :  { %4176 = vst.msk [vmem:[%s7570_s4 + $0xb8] sm:$0xff] %vm3992_vm1, %v4128_v44 }
 0x35a   :  { %v4131_v48 = vpop.xlane.xlu0 %4130 }
 0x35b   :  { %4177 = vst.msk [vmem:[%s7570_s4 + $0xc0] sm:$0xff] %vm3992_vm1, %v4131_v48 }
 0x35c   :  { %v3973_v8 = vpop.xlane.xlu1 %3972 }
 0x35d   :  { %4018 = vst.msk [vmem:[%s7569_s3 + $0xc8] sm:$0xff] %vm3992_vm1, %v3973_v8 }
 0x35e   :  { %v3976_v26 = vpop.xlane.xlu0 %3975 }
 0x35f   :  { %4019 = vst.msk [vmem:[%s7569_s3 + $0xd0] sm:$0xff] %vm3992_vm1, %v3976_v26 }
 0x360   :  { %v4134_v20 = vpop.xlane.xlu1 %4133 }
 0x361   :  { %4178 = vst.msk [vmem:[%s7570_s4 + $0xc8] sm:$0xff] %vm3992_vm1, %v4134_v20 }
 0x362   :  { %v4137_v36 = vpop.xlane.xlu0 %4136 }
 0x363   :  { %4179 = vst.msk [vmem:[%s7570_s4 + $0xd0] sm:$0xff] %vm3992_vm1, %v4137_v36 }
 0x364   :  { %v3979_v35 = vpop.xlane.xlu1 %3978 }
 0x365   :  { %4020 = vst.msk [vmem:[%s7569_s3 + $0xd8] sm:$0xff] %vm3992_vm1, %v3979_v35 }
 0x366   :  { %v3982_v39 = vpop.xlane.xlu0 %3981 }
 0x367   :  { %4021 = vst.msk [vmem:[%s7569_s3 + $0xe0] sm:$0xff] %vm3992_vm1, %v3982_v39 }
 0x368   :  { %v4140_v61 = vpop.xlane.xlu1 %4139 }
 0x369   :  { %4180 = vst.msk [vmem:[%s7570_s4 + $0xd8] sm:$0xff] %vm3992_vm1, %v4140_v61 }
 0x36a   :  { %v4143_v58 = vpop.xlane.xlu0 %4142 }
 0x36b   :  { %4181 = vst.msk [vmem:[%s7570_s4 + $0xe0] sm:$0xff] %vm3992_vm1, %v4143_v58 }
 0x36c   :  { %v3985_v14 = vpop.xlane.xlu1 %3984 }
 0x36d   :  { %4022 = vst.msk [vmem:[%s7569_s3 + $0xe8] sm:$0xff] %vm3992_vm1, %v3985_v14 }
 0x36e   :  { %v3988_v60 = vpop.xlane.xlu0 %3987 }
 0x36f   :  { %4023 = vst.msk [vmem:[%s7569_s3 + $0xf0] sm:$0xff] %vm3992_vm1, %v3988_v60 }
 0x370   :  { %v4146_v45 = vpop.xlane.xlu1 %4145 }
 0x371   :  { %4182 = vst.msk [vmem:[%s7570_s4 + $0xe8] sm:$0xff] %vm3992_vm1, %v4146_v45 }
 0x372   :  { %v4149_v3 = vpop.xlane.xlu0 %4148 }
 0x373   :  { %4183 = vst.msk [vmem:[%s7570_s4 + $0xf0] sm:$0xff] %vm3992_vm1, %v4149_v3 }
 0x374   :  { %v3991_v47 = vpop.xlane.xlu1 %3990 }
 0x375   :  { %4024 = vst.msk [vmem:[%s7569_s3 + $0xf8] sm:$0xff] %vm3992_vm1, %v3991_v47 }
 0x378   :  { %v4152_v17 = vpop.xlane.xlu1 %4151 }
 0x379   :  { %4184 = vst.msk [vmem:[%s7570_s4 + $0xf8] sm:$0xff] %vm3992_vm1, %v4152_v17 }

// kernel: discriminator_forward.15
= control target key start
LH: loop header
LB: loop body
LE: loop exit
PB: predicated region body
PF: predicated region fallthrough
CT: control target
= control target key end

     0   :  { %v537_v28 = vlaneseq  ;;  %v3855_v36 = vmov 1966171168   ;;  %s4701_s0 = inlined_call_operand.vmem [shape: bf16[1,4096], index: 0, kind: input, shape index: {}]   ;;  %s4702_s1 = inlined_call_operand.vmem [shape: bf16[4096,2], index: 1, kind: input, shape index: {}]   ;;  %s4703_s2 = inlined_call_operand.hbm [shape: f32[1,2], index: 2, kind: output, shape index: {}]  }
   0x1   :  { %v3569_v0 = vld [vmem:[%s4702_s1 + $0x78] sm:$0xff]   ;;  %v3573_v4 = vld [vmem:[%s4702_s1 + $0x70] sm:$0xff]   ;;  %v3577_v8 = vld [vmem:[%s4702_s1 + $0x68] sm:$0xff]   ;;  %v535_v37 = vunpack.c.l.s4 %v3855_v36 }
   0x2   :  { %v3570_v1 = vld [vmem:[%s4702_s1 + $0xf8] sm:$0xff]   ;;  %3215 = vmatprep.subr.bf16.mxu0 %v3569_v0  ;;  %v3574_v5 = vld [vmem:[%s4702_s1 + $0xf0] sm:$0xff]   ;;  %v3578_v9 = vld [vmem:[%s4702_s1 + $0xe8] sm:$0xff]   ;;  %v538_v33 = vshrl.u32 %v537_v28, 7 }
   0x3   :  { %v3571_v2 = vld [vmem:[%s4702_s1 + $0x38] sm:$0xff]   ;;  %3237 = vmatprep.subr.bf16.mxu1 %v3570_v1  ;;  %v3575_v6 = vld [vmem:[%s4702_s1 + $0x30] sm:$0xff]   ;;  %v3579_v10 = vld [vmem:[%s4702_s1 + $0x28] sm:$0xff]   ;;  %v536_v40 = vunpack.c.0.s8 %v535_v37 }
   0x4   :  { %v3572_v3 = vld [vmem:[%s4702_s1 + $0xb8] sm:$0xff]   ;;  %3216 = vmatpush3.bf16.msra.mxu0 %v3571_v2  ;;  %v3576_v7 = vld [vmem:[%s4702_s1 + $0xb0] sm:$0xff]   ;;  %v3580_v11 = vld [vmem:[%s4702_s1 + $0xa8] sm:$0xff]  }
   0x5   :  { %3238 = vmatpush3.bf16.msra.mxu1 %v3572_v3  ;;  %3217 = vmatprep.subr.bf16.mxu0 %v3573_v4  ;;  %v3581_v12 = vld [vmem:[%s4702_s1 + $0x60] sm:$0xff]   ;;  %v3585_v16 = vld [vmem:[%s4702_s1 + $0x58] sm:$0xff]   ;;  %v3589_v20 = vld [vmem:[%s4702_s1 + $0x50] sm:$0xff]   ;;  %v3977_v41 = vsub.s32 %v536_v40, %v538_v33 }
   0x6   :  { %3239 = vmatprep.subr.bf16.mxu1 %v3574_v5  ;;  %v3582_v13 = vld [vmem:[%s4702_s1 + $0xe0] sm:$0xff]   ;;  %v3586_v17 = vld [vmem:[%s4702_s1 + $0xd8] sm:$0xff]   ;;  %v3590_v21 = vld [vmem:[%s4702_s1 + $0xd0] sm:$0xff]  }
   0x7   :  { %v3583_v14 = vld [vmem:[%s4702_s1 + $0x20] sm:$0xff]   ;;  %v3587_v18 = vld [vmem:[%s4702_s1 + $0x18] sm:$0xff]   ;;  %v3591_v22 = vld [vmem:[%s4702_s1 + $0x10] sm:$0xff]  }
   0x8   :  { %3218 = vmatpush3.bf16.msra.mxu0 %v3575_v6  ;;  %v3584_v15 = vld [vmem:[%s4702_s1 + $0xa0] sm:$0xff]   ;;  %v3588_v19 = vld [vmem:[%s4702_s1 + $0x98] sm:$0xff]   ;;  %v3592_v23 = vld [vmem:[%s4702_s1 + $0x90] sm:$0xff]  }
   0x9   :  { %3240 = vmatpush3.bf16.msra.mxu1 %v3576_v7  ;;  %3219 = vmatprep.subr.bf16.mxu0 %v3577_v8  ;;  %v3593_v24 = vld [vmem:[%s4702_s1 + $0x48] sm:$0xff]   ;;  %v3597_v29 = vld [vmem:[%s4702_s1 + $0x40] sm:$0xff]   ;;  %v3602_v35 = vld [vmem:[%s4702_s1 + $0x178] sm:$0xff]  }
   0xa   :  { %3241 = vmatprep.subr.bf16.mxu1 %v3578_v9  ;;  %v3594_v25 = vld [vmem:[%s4702_s1 + $0xc8] sm:$0xff]   ;;  %v3598_v30 = vld [vmem:[%s4702_s1 + $0xc0] sm:$0xff]   ;;  %v3603_v38 = vld [vmem:[%s4702_s1 + $0x1f8] sm:$0xff]  }
   0xb   :  { %v3595_v26 = vld [vmem:[%s4702_s1 + $0x8] sm:$0xff]   ;;  %v3599_v31 = vld [vmem:[%s4702_s1] sm:$0xff]   ;;  %v3604_v47 = vld [vmem:[%s4702_s1 + $0x138] sm:$0xff]  }
   0xc   :  { %3220 = vmatpush3.bf16.msra.mxu0 %v3579_v10  ;;  %v3596_v27 = vld [vmem:[%s4702_s1 + $0x88] sm:$0xff]   ;;  %v3600_v32 = vld [vmem:[%s4702_s1 + $0x80] sm:$0xff]   ;;  %v3605_v49 = vld [vmem:[%s4702_s1 + $0x1b8] sm:$0xff]  }
   0xd   :  { %3242 = vmatpush3.bf16.msra.mxu1 %v3580_v11  ;;  %3221 = vmatprep.subr.bf16.mxu0 %v3581_v12  ;;  %v13_v34 = vld [vmem:[%s4701_s0] sm:$0xff]  ;;  %v3606_v52 = vld [vmem:[%s4702_s1 + $0x170] sm:$0xff]   ;;  %v3610_v58 = vld [vmem:[%s4702_s1 + $0x168] sm:$0xff]  }
   0xe   :  { %3243 = vmatprep.subr.bf16.mxu1 %v3582_v13  ;;  %v533_v39 = vcombine.high %v13_v34, %v13_v34  ;;  %v540_v42 = vrot.slane %v13_v34, %v3977_v41  ;;  %v3607_v54 = vld [vmem:[%s4702_s1 + $0x1f0] sm:$0xff]   ;;  %v3611_v59 = vld [vmem:[%s4702_s1 + $0x1e8] sm:$0xff]   ;;  %v3614_v62 = vld [vmem:[%s4702_s1 + $0x160] sm:$0xff]  }
   0xf   :  { %v3608_v55 = vld [vmem:[%s4702_s1 + $0x130] sm:$0xff]   ;;  %v3612_v60 = vld [vmem:[%s4702_s1 + $0x128] sm:$0xff]   ;;  %v3615_v63 = vld [vmem:[%s4702_s1 + $0x1e0] sm:$0xff]  }
  0x10   :  { %3222 = vmatpush3.bf16.msra.mxu0 %v3583_v14  ;;  %v3981_v43 = vrot.slane %v533_v39, %v3977_v41  ;;  %v548_v44 = vcombine.high %v540_v42, %v540_v42  ;;  %v556_v45 = vrot.slane %v540_v42, %v3977_v41  ;;  %v3609_v57 = vld [vmem:[%s4702_s1 + $0x1b0] sm:$0xff]   ;;  %v3613_v61 = vld [vmem:[%s4702_s1 + $0x1a8] sm:$0xff]   ;;  %v3616_v0 = vld [vmem:[%s4702_s1 + $0x120] sm:$0xff]  }
  0x11   :  { %3244 = vmatpush3.bf16.msra.mxu1 %v3584_v15  ;;  %3223 = vmatprep.subr.bf16.mxu0 %v3585_v16  ;;  %v3617_v1 = vld [vmem:[%s4702_s1 + $0x1a0] sm:$0xff]   ;;  %v3618_v2 = vld [vmem:[%s4702_s1 + $0x158] sm:$0xff]   ;;  %v3622_v6 = vld [vmem:[%s4702_s1 + $0x150] sm:$0xff]  }
  0x12   :  { %3245 = vmatprep.subr.bf16.mxu1 %v3586_v17  ;;  %v549_v46 = vcombine.high %v3981_v43, %v3981_v43  ;;  %v570_v48 = vrot.slane %v548_v44, %v3977_v41  ;;  %v578_v51 = vcombine.high %v556_v45, %v556_v45  ;;  %v3619_v3 = vld [vmem:[%s4702_s1 + $0x1d8] sm:$0xff]   ;;  %v3623_v7 = vld [vmem:[%s4702_s1 + $0x1d0] sm:$0xff]   ;;  %v3626_v10 = vld [vmem:[%s4702_s1 + $0x148] sm:$0xff]  }
  0x13   :  { %v3620_v4 = vld [vmem:[%s4702_s1 + $0x118] sm:$0xff]   ;;  %v3624_v8 = vld [vmem:[%s4702_s1 + $0x110] sm:$0xff]   ;;  %v3627_v11 = vld [vmem:[%s4702_s1 + $0x1c8] sm:$0xff]  }
  0x14   :  { %3224 = vmatpush3.bf16.msra.mxu0 %v3587_v18  ;;  %v577_v50 = vrot.slane %v549_v46, %v3977_v41  ;;  %2329 = vmatprep.mubr.bf16.mxu0 %v570_v48  ;;  %v580_v53 = vcombine.high %v570_v48, %v570_v48  ;;  %v3621_v5 = vld [vmem:[%s4702_s1 + $0x198] sm:$0xff]   ;;  %v3625_v9 = vld [vmem:[%s4702_s1 + $0x190] sm:$0xff]   ;;  %v3628_v12 = vld [vmem:[%s4702_s1 + $0x108] sm:$0xff]   ;;  %v563_v18 = vrot.slane %v3981_v43, %v3977_v41 }
  0x15   :  { %3246 = vmatpush3.bf16.msra.mxu1 %v3588_v19  ;;  %3225 = vmatprep.subr.bf16.mxu0 %v3589_v20  ;;  %v3629_v13 = vld [vmem:[%s4702_s1 + $0x188] sm:$0xff]   ;;  %v3630_v14 = vld [vmem:[%s4702_s1 + $0x140] sm:$0xff]   ;;  %v3634_v19 = vld [vmem:[%s4702_s1 + $0x278] sm:$0xff]  }
  0x16   :  { %3247 = vmatprep.subr.bf16.mxu1 %v3590_v21  ;;  %v581_v56 = vcombine.high %v577_v50, %v577_v50  ;;  %2369 = vmatprep.mubr.bf16.mxu1 %v580_v53  ;;  %v3631_v15 = vld [vmem:[%s4702_s1 + $0x1c0] sm:$0xff]   ;;  %v3635_v20 = vld [vmem:[%s4702_s1 + $0x2f8] sm:$0xff]   ;;  %v3642_v28 = vld [vmem:[%s4702_s1 + $0x268] sm:$0xff]  }
  0x17   :  { %v3632_v16 = vld [vmem:[%s4702_s1 + $0x100] sm:$0xff]   ;;  %v3636_v21 = vld [vmem:[%s4702_s1 + $0x238] sm:$0xff]   ;;  %v3654_v40 = vld [vmem:[%s4702_s1 + $0x250] sm:$0xff]  }
  0x18   :  { %3226 = vmatpush3.bf16.msra.mxu0 %v3591_v22  ;;  %v3633_v17 = vld [vmem:[%s4702_s1 + $0x180] sm:$0xff]   ;;  %v3637_v22 = vld [vmem:[%s4702_s1 + $0x2b8] sm:$0xff]   ;;  %v3655_v42 = vld [vmem:[%s4702_s1 + $0x2d0] sm:$0xff]  }
  0x19   :  { %3248 = vmatpush3.bf16.msra.mxu1 %v3592_v23  ;;  %3227 = vmatprep.subr.bf16.mxu0 %v3593_v24  ;;  %v579_v23 = vcombine.high %v563_v18, %v563_v18  ;;  %v3638_v24 = vld [vmem:[%s4702_s1 + $0x270] sm:$0xff]   ;;  %v3647_v33 = vld [vmem:[%s4702_s1 + $0x2e0] sm:$0xff]   ;;  %v3650_v36 = vld [vmem:[%s4702_s1 + $0x258] sm:$0xff]  }
  0x1a   :  { %3249 = vmatprep.subr.bf16.mxu1 %v3594_v25  ;;  %v3639_v25 = vld [vmem:[%s4702_s1 + $0x2f0] sm:$0xff]   ;;  %v3648_v34 = vld [vmem:[%s4702_s1 + $0x220] sm:$0xff]   ;;  %v3651_v37 = vld [vmem:[%s4702_s1 + $0x2d8] sm:$0xff]  }
  0x1b   :  { %v3653_v39 = vld [vmem:[%s4702_s1 + $0x298] sm:$0xff]   ;;  %v3656_v43 = vld [vmem:[%s4702_s1 + $0x210] sm:$0xff]   ;;  %v14_v46 = vld [vmem:[%s4701_s0 + $0x8] sm:$0xff] }
  0x1c   :  { %3228 = vmatpush3.bf16.msra.mxu0 %v3595_v26  ;;  %v3640_v26 = vld [vmem:[%s4702_s1 + $0x230] sm:$0xff]   ;;  %v589_v48 = vrot.slane %v14_v46, %v3977_v41 }
  0x1d   :  { %3250 = vmatpush3.bf16.msra.mxu1 %v3596_v27  ;;  %3229 = vmatprep.subr.bf16.mxu0 %v3597_v29  ;;  %v3641_v27 = vld [vmem:[%s4702_s1 + $0x2b0] sm:$0xff]   ;;  %v3643_v29 = vld [vmem:[%s4702_s1 + $0x2e8] sm:$0xff]  }
  0x1e   :  { %3251 = vmatprep.subr.bf16.mxu1 %v3598_v30  ;;  %v3644_v30 = vld [vmem:[%s4702_s1 + $0x228] sm:$0xff]   ;;  %v3657_v44 = vld [vmem:[%s4702_s1 + $0x290] sm:$0xff]  }
  0x20   :  { %3230 = vmatpush3.bf16.msra.mxu0 %v3599_v31  ;;  %v3645_v31 = vld [vmem:[%s4702_s1 + $0x2a8] sm:$0xff]  }
  0x21   :  { %3252 = vmatpush3.bf16.msra.mxu1 %v3600_v32  ;;  %3259 = vmatprep.subr.bf16.mxu0 %v3602_v35  ;;  %v3646_v32 = vld [vmem:[%s4702_s1 + $0x260] sm:$0xff]  }
  0x22   :  { %3281 = vmatprep.subr.bf16.mxu1 %v3603_v38  ;;  %v3649_v35 = vld [vmem:[%s4702_s1 + $0x2a0] sm:$0xff]   ;;  %v3652_v38 = vld [vmem:[%s4702_s1 + $0x218] sm:$0xff]  }
  0x23   :  { %2330 = vmatmul.mubr.bf16.vlgmr.msra.gmra.mxu0 %v556_v45  ;;  %v3658_v45 = vld [vmem:[%s4702_s1 + $0x248] sm:$0xff]  }
  0x24   :  { %3260 = vmatpush3.bf16.msra.mxu0 %v3604_v47  ;;  %2370 = vmatmul.mubr.bf16.vlgmr.msra.gmra.mxu1 %v578_v51  ;;  %v3659_v47 = vld [vmem:[%s4702_s1 + $0x2c8] sm:$0xff]  }
  0x25   :  { %3261 = vmatprep.subr.bf16.mxu0 %v3606_v52  ;;  %3282 = vmatpush3.bf16.msra.mxu1 %v3605_v49  ;;  %v582_v49 = vcombine.high %v14_v46, %v14_v46  ;;  %v3661_v51 = vld [vmem:[%s4702_s1 + $0x288] sm:$0xff]   ;;  %v597_v52 = vcombine.high %v589_v48, %v589_v48 }
  0x26   :  { %2409 = vmatprep.mubr.bf16.mxu0 %v577_v50  ;;  %3283 = vmatprep.subr.bf16.mxu1 %v3607_v54  ;;  %v3660_v50 = vld [vmem:[%s4702_s1 + $0x208] sm:$0xff]   ;;  %v3662_v54 = vld [vmem:[%s4702_s1 + $0x240] sm:$0xff]  }
  0x27   :  { %2449 = vmatprep.mubr.bf16.mxu1 %v581_v56  ;;  %v4169_v53 = vrot.slane %v582_v49, %v3977_v41  ;;  %v619_v56 = vrot.slane %v597_v52, %v3977_v41  ;;  %v3709_v46 = vld [vmem:[%s4702_s1 + $0x428] sm:$0xff]   ;;  %v3712_v49 = vld [vmem:[%s4702_s1 + $0x4e0] sm:$0xff]   ;;  %v3715_v52 = vld [vmem:[%s4702_s1 + $0x458] sm:$0xff]  }
  0x28   :  { %3262 = vmatpush3.bf16.msra.mxu0 %v3608_v55  ;;  %v3663_v55 = vld [vmem:[%s4702_s1 + $0x2c0] sm:$0xff]  }
  0x29   :  { %3263 = vmatprep.subr.bf16.mxu0 %v3610_v58  ;;  %3284 = vmatpush3.bf16.msra.mxu1 %v3609_v57  ;;  %v598_v57 = vcombine.high %v4169_v53, %v4169_v53  ;;  %v3664_v58 = vld [vmem:[%s4702_s1 + $0x200] sm:$0xff]  }
  0x2a   :  { %3285 = vmatprep.subr.bf16.mxu1 %v3611_v59  ;;  %v3665_v59 = vld [vmem:[%s4702_s1 + $0x280] sm:$0xff]  }
  0x2c   :  { %3264 = vmatpush3.bf16.msra.mxu0 %v3612_v60  ;;  %v629_v60 = vcombine.high %v619_v56, %v619_v56 }
  0x2d   :  { %3265 = vmatprep.subr.bf16.mxu0 %v3614_v62  ;;  %3286 = vmatpush3.bf16.msra.mxu1 %v3613_v61  ;;  %v605_v61 = vrot.slane %v589_v48, %v3977_v41  ;;  %v3666_v62 = vld [vmem:[%s4702_s1 + $0x378] sm:$0xff]   ;;  %v3711_v48 = vld [vmem:[%s4702_s1 + $0x460] sm:$0xff]  }
  0x2e   :  { %3287 = vmatprep.subr.bf16.mxu1 %v3615_v63  ;;  %v3667_v63 = vld [vmem:[%s4702_s1 + $0x3f8] sm:$0xff]  }
  0x30   :  { %3266 = vmatpush3.bf16.msra.mxu0 %v3616_v0  ;;  %v626_v0 = vrot.slane %v598_v57, %v3977_v41  ;;  %v3720_v57 = vld [vmem:[%s4702_s1 + $0x4d0] sm:$0xff]  }
  0x31   :  { %3267 = vmatprep.subr.bf16.mxu0 %v3618_v2  ;;  %3288 = vmatpush3.bf16.msra.mxu1 %v3617_v1  ;;  %v3668_v1 = vld [vmem:[%s4702_s1 + $0x338] sm:$0xff]  }
  0x32   :  { %3289 = vmatprep.subr.bf16.mxu1 %v3619_v3  ;;  %v3669_v2 = vld [vmem:[%s4702_s1 + $0x3b8] sm:$0xff]   ;;  %v627_v3 = vcombine.high %v605_v61, %v605_v61 }
  0x34   :  { %3268 = vmatpush3.bf16.msra.mxu0 %v3620_v4  ;;  %v3670_v4 = vld [vmem:[%s4702_s1 + $0x370] sm:$0xff]  }
  0x35   :  { %3269 = vmatprep.subr.bf16.mxu0 %v3622_v6  ;;  %3290 = vmatpush3.bf16.msra.mxu1 %v3621_v5  ;;  %v3671_v5 = vld [vmem:[%s4702_s1 + $0x3f0] sm:$0xff]   ;;  %v630_v6 = vcombine.high %v626_v0, %v626_v0 }
  0x36   :  { %3291 = vmatprep.subr.bf16.mxu1 %v3623_v7  ;;  %v3672_v7 = vld [vmem:[%s4702_s1 + $0x330] sm:$0xff]  }
  0x38   :  { %3270 = vmatpush3.bf16.msra.mxu0 %v3624_v8  ;;  %v3673_v8 = vld [vmem:[%s4702_s1 + $0x3b0] sm:$0xff]  }
  0x39   :  { %3271 = vmatprep.subr.bf16.mxu0 %v3626_v10  ;;  %3292 = vmatpush3.bf16.msra.mxu1 %v3625_v9  ;;  %v3674_v9 = vld [vmem:[%s4702_s1 + $0x368] sm:$0xff]  }
  0x3a   :  { %3293 = vmatprep.subr.bf16.mxu1 %v3627_v11  ;;  %v3675_v10 = vld [vmem:[%s4702_s1 + $0x3e8] sm:$0xff]  }
  0x3b   :  { %v3676_v11 = vld [vmem:[%s4702_s1 + $0x328] sm:$0xff]  }
  0x3c   :  { %3272 = vmatpush3.bf16.msra.mxu0 %v3628_v12  ;;  %v3677_v12 = vld [vmem:[%s4702_s1 + $0x3a8] sm:$0xff]  }
  0x3d   :  { %3273 = vmatprep.subr.bf16.mxu0 %v3630_v14  ;;  %3294 = vmatpush3.bf16.msra.mxu1 %v3629_v13  ;;  %v3678_v13 = vld [vmem:[%s4702_s1 + $0x360] sm:$0xff]  }
  0x3e   :  { %3295 = vmatprep.subr.bf16.mxu1 %v3631_v15  ;;  %v3679_v14 = vld [vmem:[%s4702_s1 + $0x3e0] sm:$0xff]  }
  0x3f   :  { %v3680_v15 = vld [vmem:[%s4702_s1 + $0x320] sm:$0xff]  }
  0x40   :  { %3274 = vmatpush3.bf16.msra.mxu0 %v3632_v16  ;;  %v3681_v16 = vld [vmem:[%s4702_s1 + $0x3a0] sm:$0xff]  }
  0x41   :  { %3303 = vmatprep.subr.bf16.mxu0 %v3634_v19  ;;  %3296 = vmatpush3.bf16.msra.mxu1 %v3633_v17  ;;  %v3682_v17 = vld [vmem:[%s4702_s1 + $0x358] sm:$0xff]  }
  0x42   :  { %3325 = vmatprep.subr.bf16.mxu1 %v3635_v20  ;;  %v3684_v19 = vld [vmem:[%s4702_s1 + $0x318] sm:$0xff]  }
  0x43   :  { %2410 = vmatmul.mubr.bf16.vlgmr.msra.gmra.mxu0 %v563_v18  ;;  %v3683_v18 = vld [vmem:[%s4702_s1 + $0x3d8] sm:$0xff]  }
  0x44   :  { %3304 = vmatpush3.bf16.msra.mxu0 %v3636_v21  ;;  %2450 = vmatmul.mubr.bf16.vlgmr.msra.gmra.mxu1 %v579_v23  ;;  %v3685_v20 = vld [vmem:[%s4702_s1 + $0x398] sm:$0xff]   ;;  %v3686_v21 = vld [vmem:[%s4702_s1 + $0x350] sm:$0xff]  }
  0x45   :  { %3305 = vmatprep.subr.bf16.mxu0 %v3638_v24  ;;  %3326 = vmatpush3.bf16.msra.mxu1 %v3637_v22  ;;  %v3687_v22 = vld [vmem:[%s4702_s1 + $0x3d0] sm:$0xff]  }
  0x46   :  { %3327 = vmatprep.subr.bf16.mxu1 %v3639_v25  ;;  %2489 = vmatprep.mubr.bf16.mxu0 %v619_v56  ;;  %v3688_v23 = vld [vmem:[%s4702_s1 + $0x310] sm:$0xff]   ;;  %v3690_v25 = vld [vmem:[%s4702_s1 + $0x348] sm:$0xff]  }
  0x47   :  { %2529 = vmatprep.mubr.bf16.mxu1 %v629_v60  ;;  %v3689_v24 = vld [vmem:[%s4702_s1 + $0x390] sm:$0xff]   ;;  %v3723_v60 = vld [vmem:[%s4702_s1 + $0x448] sm:$0xff]  }
  0x48   :  { %3306 = vmatpush3.bf16.msra.mxu0 %v3640_v26  ;;  %v3691_v26 = vld [vmem:[%s4702_s1 + $0x3c8] sm:$0xff]   ;;  %v3719_v56 = vld [vmem:[%s4702_s1 + $0x450] sm:$0xff]  }
  0x49   :  { %3307 = vmatprep.subr.bf16.mxu0 %v3642_v28  ;;  %3328 = vmatpush3.bf16.msra.mxu1 %v3641_v27  ;;  %v3692_v27 = vld [vmem:[%s4702_s1 + $0x308] sm:$0xff]  }
  0x4a   :  { %3329 = vmatprep.subr.bf16.mxu1 %v3643_v29  ;;  %v3693_v28 = vld [vmem:[%s4702_s1 + $0x388] sm:$0xff]   ;;  %v3694_v29 = vld [vmem:[%s4702_s1 + $0x340] sm:$0xff]  }
  0x4c   :  { %3308 = vmatpush3.bf16.msra.mxu0 %v3644_v30  ;;  %v3695_v30 = vld [vmem:[%s4702_s1 + $0x3c0] sm:$0xff]  }
  0x4d   :  { %3309 = vmatprep.subr.bf16.mxu0 %v3646_v32  ;;  %3330 = vmatpush3.bf16.msra.mxu1 %v3645_v31  ;;  %v3696_v31 = vld [vmem:[%s4702_s1 + $0x300] sm:$0xff]  }
  0x4e   :  { %3331 = vmatprep.subr.bf16.mxu1 %v3647_v33  ;;  %v3697_v32 = vld [vmem:[%s4702_s1 + $0x380] sm:$0xff]   ;;  %v612_v33 = vrot.slane %v4169_v53, %v3977_v41  ;;  %v3716_v53 = vld [vmem:[%s4702_s1 + $0x4d8] sm:$0xff]  }
  0x50   :  { %3310 = vmatpush3.bf16.msra.mxu0 %v3648_v34  ;;  %v3699_v34 = vld [vmem:[%s4702_s1 + $0x478] sm:$0xff]  }
  0x51   :  { %3311 = vmatprep.subr.bf16.mxu0 %v3650_v36  ;;  %3332 = vmatpush3.bf16.msra.mxu1 %v3649_v35  ;;  %v3700_v35 = vld [vmem:[%s4702_s1 + $0x4f8] sm:$0xff]  }
  0x52   :  { %3333 = vmatprep.subr.bf16.mxu1 %v3651_v37  ;;  %v3701_v36 = vld [vmem:[%s4702_s1 + $0x438] sm:$0xff]  }
  0x53   :  { %v3702_v37 = vld [vmem:[%s4702_s1 + $0x4b8] sm:$0xff]  }
  0x54   :  { %3312 = vmatpush3.bf16.msra.mxu0 %v3652_v38  ;;  %v628_v38 = vcombine.high %v612_v33, %v612_v33 }
  0x55   :  { %3313 = vmatprep.subr.bf16.mxu0 %v3654_v40  ;;  %3334 = vmatpush3.bf16.msra.mxu1 %v3653_v39  ;;  %v3703_v39 = vld [vmem:[%s4702_s1 + $0x470] sm:$0xff]  }
  0x56   :  { %3335 = vmatprep.subr.bf16.mxu1 %v3655_v42  ;;  %v3704_v40 = vld [vmem:[%s4702_s1 + $0x4f0] sm:$0xff]  }
  0x57   :  { %v3705_v42 = vld [vmem:[%s4702_s1 + $0x430] sm:$0xff]  }
  0x58   :  { %3314 = vmatpush3.bf16.msra.mxu0 %v3656_v43  ;;  %v3706_v43 = vld [vmem:[%s4702_s1 + $0x4b0] sm:$0xff]  }
  0x59   :  { %3315 = vmatprep.subr.bf16.mxu0 %v3658_v45  ;;  %3336 = vmatpush3.bf16.msra.mxu1 %v3657_v44  ;;  %v3707_v44 = vld [vmem:[%s4702_s1 + $0x468] sm:$0xff]  }
  0x5a   :  { %3337 = vmatprep.subr.bf16.mxu1 %v3659_v47  ;;  %v3708_v45 = vld [vmem:[%s4702_s1 + $0x4e8] sm:$0xff]  }
  0x5b   :  { %v3710_v47 = vld [vmem:[%s4702_s1 + $0x4a8] sm:$0xff]  }
  0x5c   :  { %3316 = vmatpush3.bf16.msra.mxu0 %v3660_v50  ;;  %v3713_v50 = vld [vmem:[%s4702_s1 + $0x420] sm:$0xff]  }
  0x5d   :  { %3317 = vmatprep.subr.bf16.mxu0 %v3662_v54  ;;  %3338 = vmatpush3.bf16.msra.mxu1 %v3661_v51  ;;  %v3714_v51 = vld [vmem:[%s4702_s1 + $0x4a0] sm:$0xff]   ;;  %v3717_v54 = vld [vmem:[%s4702_s1 + $0x418] sm:$0xff]  }
  0x5e   :  { %3339 = vmatprep.subr.bf16.mxu1 %v3663_v55  ;;  %v3718_v55 = vld [vmem:[%s4702_s1 + $0x498] sm:$0xff]  }
  0x60   :  { %3318 = vmatpush3.bf16.msra.mxu0 %v3664_v58  ;;  %v3721_v58 = vld [vmem:[%s4702_s1 + $0x410] sm:$0xff]  }
  0x61   :  { %3347 = vmatprep.subr.bf16.mxu0 %v3666_v62  ;;  %3340 = vmatpush3.bf16.msra.mxu1 %v3665_v59  ;;  %v3722_v59 = vld [vmem:[%s4702_s1 + $0x490] sm:$0xff]   ;;  %v3724_v62 = vld [vmem:[%s4702_s1 + $0x4c8] sm:$0xff]  }
  0x62   :  { %3369 = vmatprep.subr.bf16.mxu1 %v3667_v63 }
  0x63   :  { %2490 = vmatmul.mubr.bf16.vlgmr.msra.gmra.mxu0 %v605_v61  ;;  %v15_v61 = vld [vmem:[%s4701_s0 + $0x10] sm:$0xff] }
  0x64   :  { %3348 = vmatpush3.bf16.msra.mxu0 %v3668_v1  ;;  %2569 = vmatprep.mubr.bf16.mxu0 %v626_v0  ;;  %v638_v63 = vrot.slane %v15_v61, %v3977_v41  ;;  %v631_v0 = vcombine.high %v15_v61, %v15_v61  ;;  %v3725_v1 = vld [vmem:[%s4702_s1 + $0x408] sm:$0xff]  }
  0x65   :  { %2530 = vmatmul.mubr.bf16.vlgmr.msra.gmra.mxu1 %v627_v3  ;;  %3349 = vmatprep.subr.bf16.mxu0 %v3670_v4  ;;  %v3774_v61 = vld [vmem:[%s4702_s1 + $0x628] sm:$0xff]  }
  0x66   :  { %3370 = vmatpush3.bf16.msra.mxu1 %v3669_v2  ;;  %2609 = vmatprep.mubr.bf16.mxu1 %v630_v6  ;;  %v3726_v2 = vld [vmem:[%s4702_s1 + $0x488] sm:$0xff]   ;;  %v646_v3 = vcombine.high %v638_v63, %v638_v63  ;;  %v4375_v4 = vrot.slane %v631_v0, %v3977_v41  ;;  %v3728_v6 = vld [vmem:[%s4702_s1 + $0x4c0] sm:$0xff]  }
  0x67   :  { %3371 = vmatprep.subr.bf16.mxu1 %v3671_v5  ;;  %v3727_v5 = vld [vmem:[%s4702_s1 + $0x440] sm:$0xff]  }
  0x68   :  { %3350 = vmatpush3.bf16.msra.mxu0 %v3672_v7  ;;  %v668_v7 = vrot.slane %v646_v3, %v3977_v41  ;;  %v3777_v0 = vld [vmem:[%s4702_s1 + $0x6e0] sm:$0xff]   ;;  %v3780_v3 = vld [vmem:[%s4702_s1 + $0x658] sm:$0xff]  }
  0x69   :  { %3351 = vmatprep.subr.bf16.mxu0 %v3674_v9  ;;  %v3729_v9 = vld [vmem:[%s4702_s1 + $0x400] sm:$0xff]  }
  0x6a   :  { %3372 = vmatpush3.bf16.msra.mxu1 %v3673_v8  ;;  %v647_v8 = vcombine.high %v4375_v4, %v4375_v4 }
  0x6b   :  { %3373 = vmatprep.subr.bf16.mxu1 %v3675_v10  ;;  %v3730_v10 = vld [vmem:[%s4702_s1 + $0x480] sm:$0xff]  }
  0x6c   :  { %3352 = vmatpush3.bf16.msra.mxu0 %v3676_v11  ;;  %v678_v11 = vcombine.high %v668_v7, %v668_v7 }
  0x6d   :  { %3353 = vmatprep.subr.bf16.mxu0 %v3678_v13  ;;  %v3731_v13 = vld [vmem:[%s4702_s1 + $0x578] sm:$0xff]  }
  0x6e   :  { %3374 = vmatpush3.bf16.msra.mxu1 %v3677_v12  ;;  %v654_v12 = vrot.slane %v638_v63, %v3977_v41  ;;  %v3776_v63 = vld [vmem:[%s4702_s1 + $0x660] sm:$0xff]  }
  0x6f   :  { %3375 = vmatprep.subr.bf16.mxu1 %v3679_v14  ;;  %v3732_v14 = vld [vmem:[%s4702_s1 + $0x5f8] sm:$0xff]  }
  0x70   :  { %3354 = vmatpush3.bf16.msra.mxu0 %v3680_v15  ;;  %v675_v15 = vrot.slane %v647_v8, %v3977_v41  ;;  %v3785_v8 = vld [vmem:[%s4702_s1 + $0x6d0] sm:$0xff]  }
  0x71   :  { %3355 = vmatprep.subr.bf16.mxu0 %v3682_v17  ;;  %v3734_v17 = vld [vmem:[%s4702_s1 + $0x5b8] sm:$0xff]  }
  0x72   :  { %3376 = vmatpush3.bf16.msra.mxu1 %v3681_v16  ;;  %v3733_v16 = vld [vmem:[%s4702_s1 + $0x538] sm:$0xff]  }
  0x73   :  { %3377 = vmatprep.subr.bf16.mxu1 %v3683_v18  ;;  %v676_v18 = vcombine.high %v654_v12, %v654_v12 }
  0x74   :  { %3356 = vmatpush3.bf16.msra.mxu0 %v3684_v19  ;;  %v3735_v19 = vld [vmem:[%s4702_s1 + $0x570] sm:$0xff]  }
  0x75   :  { %3357 = vmatprep.subr.bf16.mxu0 %v3686_v21  ;;  %v679_v21 = vcombine.high %v675_v15, %v675_v15 }
  0x76   :  { %3378 = vmatpush3.bf16.msra.mxu1 %v3685_v20  ;;  %v3736_v20 = vld [vmem:[%s4702_s1 + $0x5f0] sm:$0xff]  }
  0x77   :  { %3379 = vmatprep.subr.bf16.mxu1 %v3687_v22  ;;  %v3737_v22 = vld [vmem:[%s4702_s1 + $0x530] sm:$0xff]  }
  0x78   :  { %3358 = vmatpush3.bf16.msra.mxu0 %v3688_v23  ;;  %v3738_v23 = vld [vmem:[%s4702_s1 + $0x5b0] sm:$0xff]  }
  0x79   :  { %3359 = vmatprep.subr.bf16.mxu0 %v3690_v25  ;;  %v3740_v25 = vld [vmem:[%s4702_s1 + $0x5e8] sm:$0xff]  }
  0x7a   :  { %3380 = vmatpush3.bf16.msra.mxu1 %v3689_v24  ;;  %v3739_v24 = vld [vmem:[%s4702_s1 + $0x568] sm:$0xff]  }
  0x7b   :  { %3381 = vmatprep.subr.bf16.mxu1 %v3691_v26  ;;  %v3741_v26 = vld [vmem:[%s4702_s1 + $0x528] sm:$0xff]  }
  0x7c   :  { %3360 = vmatpush3.bf16.msra.mxu0 %v3692_v27  ;;  %v3742_v27 = vld [vmem:[%s4702_s1 + $0x5a8] sm:$0xff]  }
  0x7d   :  { %3361 = vmatprep.subr.bf16.mxu0 %v3694_v29  ;;  %v3744_v29 = vld [vmem:[%s4702_s1 + $0x5e0] sm:$0xff]  }
  0x7e   :  { %3382 = vmatpush3.bf16.msra.mxu1 %v3693_v28  ;;  %v3743_v28 = vld [vmem:[%s4702_s1 + $0x560] sm:$0xff]  }
  0x7f   :  { %3383 = vmatprep.subr.bf16.mxu1 %v3695_v30  ;;  %v3745_v30 = vld [vmem:[%s4702_s1 + $0x520] sm:$0xff]  }
  0x80   :  { %3362 = vmatpush3.bf16.msra.mxu0 %v3696_v31  ;;  %v3746_v31 = vld [vmem:[%s4702_s1 + $0x5a0] sm:$0xff]  }
  0x81   :  { %3391 = vmatprep.subr.bf16.mxu0 %v3699_v34  ;;  %v3749_v34 = vld [vmem:[%s4702_s1 + $0x518] sm:$0xff]  }
  0x82   :  { %3384 = vmatpush3.bf16.msra.mxu1 %v3697_v32  ;;  %v3747_v32 = vld [vmem:[%s4702_s1 + $0x558] sm:$0xff]  }
  0x83   :  { %2570 = vmatmul.mubr.bf16.vlgmr.msra.gmra.mxu0 %v612_v33  ;;  %3413 = vmatprep.subr.bf16.mxu1 %v3700_v35  ;;  %v3748_v33 = vld [vmem:[%s4702_s1 + $0x5d8] sm:$0xff]  }
  0x84   :  { %3392 = vmatpush3.bf16.msra.mxu0 %v3701_v36  ;;  %2649 = vmatprep.mubr.bf16.mxu0 %v668_v7  ;;  %v3750_v35 = vld [vmem:[%s4702_s1 + $0x598] sm:$0xff]   ;;  %v3751_v36 = vld [vmem:[%s4702_s1 + $0x550] sm:$0xff]  }
  0x85   :  { %2610 = vmatmul.mubr.bf16.vlgmr.msra.gmra.mxu1 %v628_v38  ;;  %3393 = vmatprep.subr.bf16.mxu0 %v3703_v39  ;;  %v3753_v38 = vld [vmem:[%s4702_s1 + $0x510] sm:$0xff]  }
  0x86   :  { %3414 = vmatpush3.bf16.msra.mxu1 %v3702_v37  ;;  %2689 = vmatprep.mubr.bf16.mxu1 %v678_v11  ;;  %v3752_v37 = vld [vmem:[%s4702_s1 + $0x5d0] sm:$0xff]   ;;  %v3788_v11 = vld [vmem:[%s4702_s1 + $0x648] sm:$0xff]  }
  0x87   :  { %3415 = vmatprep.subr.bf16.mxu1 %v3704_v40  ;;  %v3754_v39 = vld [vmem:[%s4702_s1 + $0x590] sm:$0xff]   ;;  %v3755_v40 = vld [vmem:[%s4702_s1 + $0x548] sm:$0xff]  }
  0x88   :  { %3394 = vmatpush3.bf16.msra.mxu0 %v3705_v42  ;;  %v3756_v42 = vld [vmem:[%s4702_s1 + $0x5c8] sm:$0xff]   ;;  %v3784_v7 = vld [vmem:[%s4702_s1 + $0x650] sm:$0xff]  }
  0x89   :  { %3395 = vmatprep.subr.bf16.mxu0 %v3707_v44  ;;  %v3758_v44 = vld [vmem:[%s4702_s1 + $0x588] sm:$0xff]  }
  0x8a   :  { %3416 = vmatpush3.bf16.msra.mxu1 %v3706_v43  ;;  %v3757_v43 = vld [vmem:[%s4702_s1 + $0x508] sm:$0xff]  }
  0x8b   :  { %3417 = vmatprep.subr.bf16.mxu1 %v3708_v45  ;;  %v3759_v45 = vld [vmem:[%s4702_s1 + $0x540] sm:$0xff]  }
  0x8c   :  { %3396 = vmatpush3.bf16.msra.mxu0 %v3709_v46  ;;  %v3760_v46 = vld [vmem:[%s4702_s1 + $0x5c0] sm:$0xff]  }
  0x8d   :  { %3397 = vmatprep.subr.bf16.mxu0 %v3711_v48  ;;  %v3762_v48 = vld [vmem:[%s4702_s1 + $0x580] sm:$0xff]  }
  0x8e   :  { %3418 = vmatpush3.bf16.msra.mxu1 %v3710_v47  ;;  %v3761_v47 = vld [vmem:[%s4702_s1 + $0x500] sm:$0xff]  }
  0x8f   :  { %3419 = vmatprep.subr.bf16.mxu1 %v3712_v49  ;;  %v661_v49 = vrot.slane %v4375_v4, %v3977_v41  ;;  %v3781_v4 = vld [vmem:[%s4702_s1 + $0x6d8] sm:$0xff]  }
  0x90   :  { %3398 = vmatpush3.bf16.msra.mxu0 %v3713_v50  ;;  %v3764_v50 = vld [vmem:[%s4702_s1 + $0x678] sm:$0xff]  }
  0x91   :  { %3399 = vmatprep.subr.bf16.mxu0 %v3715_v52  ;;  %v3766_v52 = vld [vmem:[%s4702_s1 + $0x638] sm:$0xff]  }
  0x92   :  { %3420 = vmatpush3.bf16.msra.mxu1 %v3714_v51  ;;  %v3765_v51 = vld [vmem:[%s4702_s1 + $0x6f8] sm:$0xff]  }
  0x93   :  { %3421 = vmatprep.subr.bf16.mxu1 %v3716_v53  ;;  %v3767_v53 = vld [vmem:[%s4702_s1 + $0x6b8] sm:$0xff]  }
  0x94   :  { %3400 = vmatpush3.bf16.msra.mxu0 %v3717_v54  ;;  %v677_v54 = vcombine.high %v661_v49, %v661_v49 }
  0x95   :  { %3401 = vmatprep.subr.bf16.mxu0 %v3719_v56  ;;  %v3769_v56 = vld [vmem:[%s4702_s1 + $0x6f0] sm:$0xff]  }
  0x96   :  { %3422 = vmatpush3.bf16.msra.mxu1 %v3718_v55  ;;  %v3768_v55 = vld [vmem:[%s4702_s1 + $0x670] sm:$0xff]  }
  0x97   :  { %3423 = vmatprep.subr.bf16.mxu1 %v3720_v57  ;;  %v3770_v57 = vld [vmem:[%s4702_s1 + $0x630] sm:$0xff]  }
  0x98   :  { %3402 = vmatpush3.bf16.msra.mxu0 %v3721_v58  ;;  %v3771_v58 = vld [vmem:[%s4702_s1 + $0x6b0] sm:$0xff]  }
  0x99   :  { %3403 = vmatprep.subr.bf16.mxu0 %v3723_v60  ;;  %v3773_v60 = vld [vmem:[%s4702_s1 + $0x6e8] sm:$0xff]  }
  0x9a   :  { %3424 = vmatpush3.bf16.msra.mxu1 %v3722_v59  ;;  %v3772_v59 = vld [vmem:[%s4702_s1 + $0x668] sm:$0xff]  }
  0x9b   :  { %3425 = vmatprep.subr.bf16.mxu1 %v3724_v62  ;;  %v3775_v62 = vld [vmem:[%s4702_s1 + $0x6a8] sm:$0xff]  }
  0x9c   :  { %3404 = vmatpush3.bf16.msra.mxu0 %v3725_v1  ;;  %v3778_v1 = vld [vmem:[%s4702_s1 + $0x620] sm:$0xff]  }
  0x9d   :  { %3405 = vmatprep.subr.bf16.mxu0 %v3727_v5  ;;  %v3782_v5 = vld [vmem:[%s4702_s1 + $0x618] sm:$0xff]  }
  0x9e   :  { %3426 = vmatpush3.bf16.msra.mxu1 %v3726_v2  ;;  %v3779_v2 = vld [vmem:[%s4702_s1 + $0x6a0] sm:$0xff]  }
  0x9f   :  { %3427 = vmatprep.subr.bf16.mxu1 %v3728_v6  ;;  %v3783_v6 = vld [vmem:[%s4702_s1 + $0x698] sm:$0xff]  }
  0xa0   :  { %3406 = vmatpush3.bf16.msra.mxu0 %v3729_v9  ;;  %v3786_v9 = vld [vmem:[%s4702_s1 + $0x610] sm:$0xff]  }
  0xa1   :  { %3435 = vmatprep.subr.bf16.mxu0 %v3731_v13  ;;  %v3789_v13 = vld [vmem:[%s4702_s1 + $0x6c8] sm:$0xff]  }
  0xa2   :  { %3428 = vmatpush3.bf16.msra.mxu1 %v3730_v10  ;;  %v3787_v10 = vld [vmem:[%s4702_s1 + $0x690] sm:$0xff]  }
  0xa3   :  { %2650 = vmatmul.mubr.bf16.vlgmr.msra.gmra.mxu0 %v654_v12  ;;  %3457 = vmatprep.subr.bf16.mxu1 %v3732_v14  ;;  %v16_v12 = vld [vmem:[%s4701_s0 + $0x18] sm:$0xff] }
  0xa4   :  { %3436 = vmatpush3.bf16.msra.mxu0 %v3733_v16  ;;  %2729 = vmatprep.mubr.bf16.mxu0 %v675_v15  ;;  %v687_v14 = vrot.slane %v16_v12, %v3977_v41  ;;  %v680_v15 = vcombine.high %v16_v12, %v16_v12  ;;  %v3790_v16 = vld [vmem:[%s4702_s1 + $0x608] sm:$0xff]  }
  0xa5   :  { %2690 = vmatmul.mubr.bf16.vlgmr.msra.gmra.mxu1 %v676_v18  ;;  %3437 = vmatprep.subr.bf16.mxu0 %v3735_v19 }
  0xa6   :  { %3458 = vmatpush3.bf16.msra.mxu1 %v3734_v17  ;;  %2769 = vmatprep.mubr.bf16.mxu1 %v679_v21  ;;  %v3792_v17 = vld [vmem:[%s4702_s1 + $0x640] sm:$0xff]   ;;  %v695_v18 = vcombine.high %v687_v14, %v687_v14  ;;  %v4581_v19 = vrot.slane %v680_v15, %v3977_v41 }
  0xa7   :  { %3459 = vmatprep.subr.bf16.mxu1 %v3736_v20  ;;  %v3791_v20 = vld [vmem:[%s4702_s1 + $0x688] sm:$0xff]   ;;  %v3793_v21 = vld [vmem:[%s4702_s1 + $0x6c0] sm:$0xff]  }
  0xa8   :  { %3438 = vmatpush3.bf16.msra.mxu0 %v3737_v22  ;;  %v717_v22 = vrot.slane %v695_v18, %v3977_v41 }
  0xa9   :  { %3439 = vmatprep.subr.bf16.mxu0 %v3739_v24  ;;  %v3794_v24 = vld [vmem:[%s4702_s1 + $0x600] sm:$0xff]  }
  0xaa   :  { %3460 = vmatpush3.bf16.msra.mxu1 %v3738_v23  ;;  %v696_v23 = vcombine.high %v4581_v19, %v4581_v19 }
  0xab   :  { %3461 = vmatprep.subr.bf16.mxu1 %v3740_v25  ;;  %v727_v25 = vcombine.high %v717_v22, %v717_v22 }
  0xac   :  { %3440 = vmatpush3.bf16.msra.mxu0 %v3741_v26  ;;  %v703_v26 = vrot.slane %v687_v14, %v3977_v41 }
  0xad   :  { %3441 = vmatprep.subr.bf16.mxu0 %v3743_v28  ;;  %v3795_v28 = vld [vmem:[%s4702_s1 + $0x680] sm:$0xff]  }
  0xae   :  { %3462 = vmatpush3.bf16.msra.mxu1 %v3742_v27  ;;  %v3796_v27 = vld [vmem:[%s4702_s1 + $0x778] sm:$0xff]  }
  0xaf   :  { %3463 = vmatprep.subr.bf16.mxu1 %v3744_v29  ;;  %v724_v29 = vrot.slane %v696_v23, %v3977_v41 }
  0xb0   :  { %3442 = vmatpush3.bf16.msra.mxu0 %v3745_v30  ;;  %v3797_v30 = vld [vmem:[%s4702_s1 + $0x7f8] sm:$0xff]  }
  0xb1   :  { %3443 = vmatprep.subr.bf16.mxu0 %v3747_v32  ;;  %v725_v32 = vcombine.high %v703_v26, %v703_v26 }
  0xb2   :  { %3464 = vmatpush3.bf16.msra.mxu1 %v3746_v31  ;;  %v3798_v31 = vld [vmem:[%s4702_s1 + $0x738] sm:$0xff]  }
  0xb3   :  { %3465 = vmatprep.subr.bf16.mxu1 %v3748_v33  ;;  %v3800_v33 = vld [vmem:[%s4702_s1 + $0x770] sm:$0xff]  }
  0xb4   :  { %3444 = vmatpush3.bf16.msra.mxu0 %v3749_v34  ;;  %v3799_v34 = vld [vmem:[%s4702_s1 + $0x7b8] sm:$0xff]  }
  0xb5   :  { %3445 = vmatprep.subr.bf16.mxu0 %v3751_v36 }
  0xb6   :  { %3466 = vmatpush3.bf16.msra.mxu1 %v3750_v35  ;;  %v728_v35 = vcombine.high %v724_v29, %v724_v29 }
  0xb7   :  { %3467 = vmatprep.subr.bf16.mxu1 %v3752_v37  ;;  %v3801_v37 = vld [vmem:[%s4702_s1 + $0x7f0] sm:$0xff]  }
  0xb8   :  { %3446 = vmatpush3.bf16.msra.mxu0 %v3753_v38  ;;  %v3802_v38 = vld [vmem:[%s4702_s1 + $0x730] sm:$0xff]  }
  0xb9   :  { %3447 = vmatprep.subr.bf16.mxu0 %v3755_v40 }
  0xba   :  { %3468 = vmatpush3.bf16.msra.mxu1 %v3754_v39 }
  0xbb   :  { %3469 = vmatprep.subr.bf16.mxu1 %v3756_v42  ;;  %v3804_v42 = vld [vmem:[%s4702_s1 + $0x768] sm:$0xff]  }
  0xbc   :  { %3448 = vmatpush3.bf16.msra.mxu0 %v3757_v43 }
  0xbd   :  { %3449 = vmatprep.subr.bf16.mxu0 %v3759_v45 }
  0xbe   :  { %3470 = vmatpush3.bf16.msra.mxu1 %v3758_v44  ;;  %v3803_v44 = vld [vmem:[%s4702_s1 + $0x7b0] sm:$0xff]  }
  0xbf   :  { %3471 = vmatprep.subr.bf16.mxu1 %v3760_v46 }
  0xc0   :  { %3450 = vmatpush3.bf16.msra.mxu0 %v3761_v47  ;;  %v3805_v47 = vld [vmem:[%s4702_s1 + $0x7e8] sm:$0xff]  }
  0xc1   :  { %3479 = vmatprep.subr.bf16.mxu0 %v3764_v50 }
  0xc2   :  { %3472 = vmatpush3.bf16.msra.mxu1 %v3762_v48 }
  0xc3   :  { %2730 = vmatmul.mubr.bf16.vlgmr.msra.gmra.mxu0 %v661_v49  ;;  %3501 = vmatprep.subr.bf16.mxu1 %v3765_v51  ;;  %v3806_v49 = vld [vmem:[%s4702_s1 + $0x728] sm:$0xff]  }
  0xc4   :  { %3480 = vmatpush3.bf16.msra.mxu0 %v3766_v52  ;;  %2809 = vmatprep.mubr.bf16.mxu0 %v717_v22  ;;  %v3808_v52 = vld [vmem:[%s4702_s1 + $0x760] sm:$0xff]  }
  0xc5   :  { %2770 = vmatmul.mubr.bf16.vlgmr.msra.gmra.mxu1 %v677_v54  ;;  %3481 = vmatprep.subr.bf16.mxu0 %v3768_v55  ;;  %v3807_v54 = vld [vmem:[%s4702_s1 + $0x7a8] sm:$0xff]  }
  0xc6   :  { %3502 = vmatpush3.bf16.msra.mxu1 %v3767_v53  ;;  %2849 = vmatprep.mubr.bf16.mxu1 %v727_v25 }
  0xc7   :  { %3503 = vmatprep.subr.bf16.mxu1 %v3769_v56  ;;  %v3809_v56 = vld [vmem:[%s4702_s1 + $0x7e0] sm:$0xff]  }
  0xc8   :  { %3482 = vmatpush3.bf16.msra.mxu0 %v3770_v57  ;;  %v3810_v57 = vld [vmem:[%s4702_s1 + $0x720] sm:$0xff]  }
  0xc9   :  { %3483 = vmatprep.subr.bf16.mxu0 %v3772_v59  ;;  %v3811_v59 = vld [vmem:[%s4702_s1 + $0x7a0] sm:$0xff]  }
  0xca   :  { %3504 = vmatpush3.bf16.msra.mxu1 %v3771_v58  ;;  %v3812_v58 = vld [vmem:[%s4702_s1 + $0x758] sm:$0xff]  }
  0xcb   :  { %3505 = vmatprep.subr.bf16.mxu1 %v3773_v60  ;;  %v3813_v60 = vld [vmem:[%s4702_s1 + $0x7d8] sm:$0xff]  }
  0xcc   :  { %3484 = vmatpush3.bf16.msra.mxu0 %v3774_v61  ;;  %v3814_v61 = vld [vmem:[%s4702_s1 + $0x718] sm:$0xff]  }
  0xcd   :  { %3485 = vmatprep.subr.bf16.mxu0 %v3776_v63  ;;  %v3815_v63 = vld [vmem:[%s4702_s1 + $0x798] sm:$0xff]  }
  0xce   :  { %3506 = vmatpush3.bf16.msra.mxu1 %v3775_v62  ;;  %v3816_v62 = vld [vmem:[%s4702_s1 + $0x750] sm:$0xff]  }
  0xcf   :  { %3507 = vmatprep.subr.bf16.mxu1 %v3777_v0  ;;  %v3817_v0 = vld [vmem:[%s4702_s1 + $0x7d0] sm:$0xff]  }
  0xd0   :  { %3486 = vmatpush3.bf16.msra.mxu0 %v3778_v1  ;;  %v3818_v1 = vld [vmem:[%s4702_s1 + $0x710] sm:$0xff]  }
  0xd1   :  { %3487 = vmatprep.subr.bf16.mxu0 %v3780_v3  ;;  %v3819_v3 = vld [vmem:[%s4702_s1 + $0x790] sm:$0xff]  }
  0xd2   :  { %3508 = vmatpush3.bf16.msra.mxu1 %v3779_v2  ;;  %v3820_v2 = vld [vmem:[%s4702_s1 + $0x748] sm:$0xff]  }
  0xd3   :  { %3509 = vmatprep.subr.bf16.mxu1 %v3781_v4 }
  0xd4   :  { %3488 = vmatpush3.bf16.msra.mxu0 %v3782_v5 }
  0xd5   :  { %3489 = vmatprep.subr.bf16.mxu0 %v3784_v7 }
  0xd6   :  { %3510 = vmatpush3.bf16.msra.mxu1 %v3783_v6 }
  0xd7   :  { %3511 = vmatprep.subr.bf16.mxu1 %v3785_v8 }
  0xd8   :  { %3490 = vmatpush3.bf16.msra.mxu0 %v3786_v9 }
  0xd9   :  { %3491 = vmatprep.subr.bf16.mxu0 %v3788_v11 }
  0xda   :  { %3512 = vmatpush3.bf16.msra.mxu1 %v3787_v10 }
  0xdb   :  { %3513 = vmatprep.subr.bf16.mxu1 %v3789_v13 }
  0xdc   :  { %3492 = vmatpush3.bf16.msra.mxu0 %v3790_v16 }
  0xdd   :  { %3493 = vmatprep.subr.bf16.mxu0 %v3792_v17 }
  0xde   :  { %3514 = vmatpush3.bf16.msra.mxu1 %v3791_v20 }
  0xdf   :  { %3515 = vmatprep.subr.bf16.mxu1 %v3793_v21 }
  0xe0   :  { %3494 = vmatpush3.bf16.msra.mxu0 %v3794_v24 }
  0xe1   :  { %3523 = vmatprep.subr.bf16.mxu0 %v3796_v27 }
  0xe2   :  { %3516 = vmatpush3.bf16.msra.mxu1 %v3795_v28 }
  0xe3   :  { %v3231_v36 = vpop.f32.mrf.mxu0  ;;  %2810 = vmatmul.mubr.bf16.vlgmr.msra.gmra.mxu0 %v703_v26  ;;  %3545 = vmatprep.subr.bf16.mxu1 %v3797_v30 }
  0xe4   :  { %3524 = vmatpush3.bf16.msra.mxu0 %v3798_v31  ;;  %2889 = vmatprep.mubr.bf16.mxu0 %v724_v29  ;;  %v3253_v39 = vpop.f32.mrf.mxu1 }
  0xe5   :  { %2850 = vmatmul.mubr.bf16.vlgmr.msra.gmra.mxu1 %v725_v32  ;;  %v3232_v40 = vpop.f32.mrf.mxu0  ;;  %3525 = vmatprep.subr.bf16.mxu0 %v3800_v33 }
  0xe6   :  { %3546 = vmatpush3.bf16.msra.mxu1 %v3799_v34  ;;  %v3233_v43 = vadd.f32 %v3232_v40, %v3231_v36  ;;  %2929 = vmatprep.mubr.bf16.mxu1 %v728_v35  ;;  %v3254_v45 = vpop.f32.mrf.mxu1 }
  0xe7   :  { %v3234_v46 = vpop.f32.mrf.mxu0  ;;  %3547 = vmatprep.subr.bf16.mxu1 %v3801_v37  ;;  %v3255_v48 = vadd.f32 %v3254_v45, %v3253_v39 }
  0xe8   :  { %3526 = vmatpush3.bf16.msra.mxu0 %v3802_v38  ;;  %v3256_v50 = vpop.f32.mrf.mxu1 }
  0xe9   :  { %v3235_v51 = vpop.f32.mrf.mxu0  ;;  %3527 = vmatprep.subr.bf16.mxu0 %v3804_v42  ;;  %v2372_v53 = vadd.f32 %v3255_v48, %v3233_v43 }
  0xea   :  { %3548 = vmatpush3.bf16.msra.mxu1 %v3803_v44  ;;  %v3257_v55 = vpop.f32.mrf.mxu1 }
  0xeb   :  { %3549 = vmatprep.subr.bf16.mxu1 %v3805_v47 }
  0xec   :  { %3528 = vmatpush3.bf16.msra.mxu0 %v3806_v49 }
  0xed   :  { %3529 = vmatprep.subr.bf16.mxu0 %v3808_v52 }
  0xee   :  { %3550 = vmatpush3.bf16.msra.mxu1 %v3807_v54 }
  0xef   :  { %3551 = vmatprep.subr.bf16.mxu1 %v3809_v56 }
  0xf0   :  { %3530 = vmatpush3.bf16.msra.mxu0 %v3810_v57 }
  0xf1   :  { %3531 = vmatprep.subr.bf16.mxu0 %v3812_v58 }
  0xf2   :  { %3552 = vmatpush3.bf16.msra.mxu1 %v3811_v59 }
  0xf3   :  { %3553 = vmatprep.subr.bf16.mxu1 %v3813_v60 }
  0xf4   :  { %3532 = vmatpush3.bf16.msra.mxu0 %v3814_v61 }
  0xf5   :  { %3533 = vmatprep.subr.bf16.mxu0 %v3816_v62 }
  0xf6   :  { %3554 = vmatpush3.bf16.msra.mxu1 %v3815_v63 }
  0xf7   :  { %7 = vsyncpa [#allocation3], 0  ;;  %3555 = vmatprep.subr.bf16.mxu1 %v3817_v0  ;;  %v3821_v4 = vld [vmem:[%s4702_s1 + $0x7c8] sm:$0xff]   ;;  %v3824_v6 = vld [vmem:[%s4702_s1 + $0x740] sm:$0xff]   ;;  %v710_v10 = vrot.slane %v4581_v19, %v3977_v41  ;;  %vm2943_vm0 = vcmask 8192  }
  0xf8   :  { %3534 = vmatpush3.bf16.msra.mxu0 %v3818_v1  ;;  %v3822_v5 = vld [vmem:[%s4702_s1 + $0x708] sm:$0xff]   ;;  %v3825_v8 = vld [vmem:[%s4702_s1 + $0x7c0] sm:$0xff]  }
  0xf9   :  { %3535 = vmatprep.subr.bf16.mxu0 %v3820_v2  ;;  %v3823_v7 = vld [vmem:[%s4702_s1 + $0x788] sm:$0xff]   ;;  %v3826_v9 = vld [vmem:[%s4702_s1 + $0x700] sm:$0xff]   ;;  %v726_v12 = vcombine.high %v710_v10, %v710_v10 }
  0xfa   :  { %3556 = vmatpush3.bf16.msra.mxu1 %v3819_v3  ;;  %v3827_v11 = vld [vmem:[%s4702_s1 + $0x780] sm:$0xff]   ;;  %s3856_s1 = smov [#allocation2]  }
  0xfb   :  { %3557 = vmatprep.subr.bf16.mxu1 %v3821_v4  ;;  %s2951_s22 = sshll.u32 %s3856_s1, 4  ;;  %s2952_s22 = int_to_ptr.vmem [resolvable:$true] %s2951_s22 }
  0xfc   :  { %3536 = vmatpush3.bf16.msra.mxu0 %v3822_v5  ;;  %s3833_s23 = scalar_lea.vmem %s2952_s22, 16  ;;  %s3837_s24 = scalar_lea.vmem %s2952_s22, 32 }
  0xfd   :  { %3537 = vmatprep.subr.bf16.mxu0 %v3824_v6  ;;  %p3834_p0 = scmp.ne.s32.totalorder %s2952_s22, %s3833_s23  ;;  %p3838_p1 = scmp.lt.s32.totalorder %s2952_s22, %s2952_s22 }
  0xfe   :  { %3558 = vmatpush3.bf16.msra.mxu1 %v3823_v7  ;;  %p3839_p2 = scmp.lt.s32.totalorder %s3837_s24, %s3833_s23 }
  0xff   :  { %3559 = vmatprep.subr.bf16.mxu1 %v3825_v8 }
 0x100   :  { %3538 = vmatpush3.bf16.msra.mxu0 %v3826_v9  ;;  %p3840_p3 = por %p3839_p2, %p3838_p1 }
 0x102   :  { %3560 = vmatpush3.bf16.msra.mxu1 %v3827_v11  ;;  %p3841_p4 = pnand %p3840_p3, %p3834_p0 }
 0x103   :  { %v3275_v13 = vpop.f32.mrf.mxu0  ;;  %2890 = vmatmul.mubr.bf16.vlgmr.msra.gmra.mxu0 %v710_v10 }
 0x104   :  { %v3297_v14 = vpop.f32.mrf.mxu1 }
 0x105   :  { %2930 = vmatmul.mubr.bf16.vlgmr.msra.gmra.mxu1 %v726_v12  ;;  %v3276_v15 = vpop.f32.mrf.mxu0 }
 0x106   :  { %v3277_v16 = vadd.f32 %v3276_v15, %v3275_v13  ;;  %v3298_v17 = vpop.f32.mrf.mxu1 }
 0x107   :  { %v3278_v18 = vpop.f32.mrf.mxu0  ;;  %v3299_v21 = vadd.f32 %v3298_v17, %v3297_v14 }
 0x108   :  { %v2412_v20 = vadd.f32 %v3277_v16, %v2372_v53  ;;  %v3300_v41 = vpop.f32.mrf.mxu1 }
 0x109   :  { %v3279_v19 = vpop.f32.mrf.mxu0 }
 0x10a   :  { %v2452_v22 = vadd.f32 %v3299_v21, %v2412_v20  ;;  %v3301_v23 = vpop.f32.mrf.mxu1 }
 0x123   :  { %v3319_v24 = vpop.f32.mrf.mxu0 }
 0x125   :  { %v3341_v25 = vpop.f32.mrf.mxu1  ;;  %v3320_v26 = vpop.f32.mrf.mxu0 }
 0x126   :  { %v3321_v27 = vadd.f32 %v3320_v26, %v3319_v24 }
 0x127   :  { %v3342_v28 = vpop.f32.mrf.mxu1  ;;  %v3322_v29 = vpop.f32.mrf.mxu0 }
 0x128   :  { %v2492_v30 = vadd.f32 %v3321_v27, %v2452_v22  ;;  %v3343_v31 = vadd.f32 %v3342_v28, %v3341_v25 }
 0x129   :  { %v3344_v32 = vpop.f32.mrf.mxu1  ;;  %v3323_v33 = vpop.f32.mrf.mxu0 }
 0x12a   :  { %v2532_v34 = vadd.f32 %v3343_v31, %v2492_v30 }
 0x12b   :  { %v3345_v35 = vpop.f32.mrf.mxu1 }
 0x143   :  { %v3363_v36 = vpop.f32.mrf.mxu0 }
 0x145   :  { %v3385_v37 = vpop.f32.mrf.mxu1  ;;  %v3364_v38 = vpop.f32.mrf.mxu0 }
 0x146   :  { %v3365_v39 = vadd.f32 %v3364_v38, %v3363_v36 }
 0x147   :  { %v3386_v40 = vpop.f32.mrf.mxu1  ;;  %v3366_v42 = vpop.f32.mrf.mxu0 }
 0x148   :  { %v2572_v43 = vadd.f32 %v3365_v39, %v2532_v34  ;;  %v3387_v44 = vadd.f32 %v3386_v40, %v3385_v37 }
 0x149   :  { %v3388_v45 = vpop.f32.mrf.mxu1  ;;  %v3367_v46 = vpop.f32.mrf.mxu0 }
 0x14a   :  { %v2612_v47 = vadd.f32 %v3387_v44, %v2572_v43 }
 0x14b   :  { %v3389_v48 = vpop.f32.mrf.mxu1 }
 0x163   :  { %v3407_v49 = vpop.f32.mrf.mxu0 }
 0x165   :  { %v3429_v50 = vpop.f32.mrf.mxu1  ;;  %v3408_v51 = vpop.f32.mrf.mxu0 }
 0x166   :  { %v3409_v52 = vadd.f32 %v3408_v51, %v3407_v49 }
 0x167   :  { %v3430_v53 = vpop.f32.mrf.mxu1  ;;  %v3410_v54 = vpop.f32.mrf.mxu0 }
 0x168   :  { %v2652_v55 = vadd.f32 %v3409_v52, %v2612_v47  ;;  %v3431_v56 = vadd.f32 %v3430_v53, %v3429_v50 }
 0x169   :  { %v3432_v57 = vpop.f32.mrf.mxu1  ;;  %v3411_v58 = vpop.f32.mrf.mxu0 }
 0x16a   :  { %v2692_v59 = vadd.f32 %v3431_v56, %v2652_v55 }
 0x16b   :  { %v3433_v60 = vpop.f32.mrf.mxu1 }
 0x183   :  { %v3451_v61 = vpop.f32.mrf.mxu0 }
 0x185   :  { %v3473_v62 = vpop.f32.mrf.mxu1  ;;  %v3452_v63 = vpop.f32.mrf.mxu0 }
 0x186   :  { %v3453_v13 = vadd.f32 %v3452_v63, %v3451_v61 }
 0x187   :  { %v3474_v0 = vpop.f32.mrf.mxu1  ;;  %v3454_v1 = vpop.f32.mrf.mxu0 }
 0x188   :  { %v2732_v14 = vadd.f32 %v3453_v13, %v2692_v59  ;;  %v3475_v15 = vadd.f32 %v3474_v0, %v3473_v62 }
 0x189   :  { %v3476_v2 = vpop.f32.mrf.mxu1  ;;  %v3455_v3 = vpop.f32.mrf.mxu0 }
 0x18a   :  { %v2772_v17 = vadd.f32 %v3475_v15, %v2732_v14 }
 0x18b   :  { %v3477_v4 = vpop.f32.mrf.mxu1 }
 0x1a3   :  { %v3495_v5 = vpop.f32.mrf.mxu0 }
 0x1a5   :  { %v3517_v6 = vpop.f32.mrf.mxu1  ;;  %v3496_v7 = vpop.f32.mrf.mxu0 }
 0x1a6   :  { %v3497_v16 = vadd.f32 %v3496_v7, %v3495_v5 }
 0x1a7   :  { %v3518_v8 = vpop.f32.mrf.mxu1  ;;  %v3498_v9 = vpop.f32.mrf.mxu0 }
 0x1a8   :  { %v2812_v18 = vadd.f32 %v3497_v16, %v2772_v17  ;;  %v3519_v20 = vadd.f32 %v3518_v8, %v3517_v6 }
 0x1a9   :  { %v3520_v10 = vpop.f32.mrf.mxu1  ;;  %v3499_v11 = vpop.f32.mrf.mxu0 }
 0x1aa   :  { %v2852_v22 = vadd.f32 %v3519_v20, %v2812_v18 }
 0x1ab   :  { %v3521_v12 = vpop.f32.mrf.mxu1 }
 0x1c3   :  { %v3539_v21 = vpop.f32.mrf.mxu0 }
 0x1c5   :  { %v3561_v41 = vpop.f32.mrf.mxu1  ;;  %v3540_v19 = vpop.f32.mrf.mxu0 }
 0x1c6   :  { %v3541_v23 = vadd.f32 %v3540_v19, %v3539_v21 }
 0x1c7   :  { %v3562_v24 = vpop.f32.mrf.mxu1  ;;  %v3542_v25 = vpop.f32.mrf.mxu0 }
 0x1c8   :  { %v2892_v26 = vadd.f32 %v3541_v23, %v2852_v22  ;;  %v3563_v27 = vadd.f32 %v3562_v24, %v3561_v41 }
 0x1c9   :  { %v3564_v28 = vpop.f32.mrf.mxu1  ;;  %v3543_v29 = vpop.f32.mrf.mxu0 }
 0x1ca   :  { %v2932_v30 = vadd.f32 %v3563_v27, %v2892_v26 }
 0x1cb   :  { %v3565_v31 = vpop.f32.mrf.mxu1 }
 0x1cc   :  { %v2937_v32 = vsub.f32 0.0, %v2932_v30 }
 0x1ce   :  { %v2938_v33 = vmul.f32 1.442695, %v2937_v32 }
 0x1d0   :  { %3829 = vpow2.f32 %v2938_v33 }
 0x1dd   :  { %v3830_v34 = vpop.eup %3829 }
 0x1de   :  { %v2940_v35 = vadd.f32 1.0, %v3830_v34 }
 0x1e0   :  { %3831 = vrcp.f32 %v2940_v35 }
 0x1ed   :  { %v3832_v36 = vpop.eup %3831 }
 0x1ee   :  { %2944 = vst.msk [vmem:[#allocation2] sm:$0x1] %vm2943_vm0, %v3832_v36 }
 0x1ef   :  { %3844 = shalt.err (!%p3841_p4)
}
 0x1f0   :  { %2954 = dma.vmem_to_hbm [thread:$0]  %s2952_s22, 16, %s4703_s2, [#allocation3]  }
 0x1f1   :  { %3853 = dma.done.wait [#allocation3], 16  }
 0x1f2   :  { %3854 = vsyncadd [#allocation3], 4294967280 }
 0x1f3   :  { %2958 = vsyncpa [#allocation3], 1 }

</bundles_post_ra>
